<compile_context>
chip_gen: v7x
topology: tpu7x:2x2x1
jax: 0.10.0
libtpu: 0.0.40
codegen_flags: <defaults>
</compile_context>

<pallas_src>
import functools

import jax
import jax.numpy as jnp
from jax.experimental import pallas as pl
from jax.experimental.pallas import tpu as pltpu


# ----------------------------------------------------------------------------
# Shared flash-style masked GAT attention step (one (q_tile, k_tile) grid step)
# ----------------------------------------------------------------------------
def _flash_gat_step(xq_ref, xk_ref, adj_ref, w_ref, att_ref,
                    m_sc, l_sc, ad_sc, acc_sc, *, heads, dh, neg_slope):
    """Online-softmax update for dense-masked multi-head GAT attention.

    att_ref rows: [0:H]  = att_src packed block-diagonally ([H, Dp]),
                  [H:2H] = att_dst packed the same way,
                  [2H]   = bias (consumed by the caller at finalize).
    Scratch (per head, leading axis): m (running max), l (running denom),
    ad (alpha_dst, constant over k), acc (running numerator).
    """
    k_idx = pl.program_id(1)

    @pl.when(k_idx == 0)
    def _init():
        m_sc[...] = jnp.full_like(m_sc, -jnp.inf)
        l_sc[...] = jnp.zeros_like(l_sc)
        acc_sc[...] = jnp.zeros_like(acc_sc)
        # alpha_dst only depends on the q tile -> compute once per q tile.
        h_q = jnp.dot(xq_ref[...], w_ref[...],
                      preferred_element_type=jnp.float32)            # [tq, Dp]
        a_dst_t = att_ref[heads:2 * heads, :]                        # [H, Dp]
        a_dst = jax.lax.dot_general(h_q, a_dst_t, (((1,), (1,)), ((), ())),
                                    preferred_element_type=jnp.float32)  # [tq, H]
        for hh in range(heads):
            ad_sc[hh, :, :] = a_dst[:, hh:hh + 1]

    # Source-block projection (depends on the k tile).
    h_k = jnp.dot(xk_ref[...], w_ref[...],
                  preferred_element_type=jnp.float32)                # [tk, Dp]
    a_src_t = att_ref[0:heads, :]                                    # [H, Dp]
    alpha_src = jax.lax.dot_general(a_src_t, h_k, (((1,), (1,)), ((), ())),
                                    preferred_element_type=jnp.float32)  # [H, tk]

    # Additive mask, recomputed per int8 tile; shared by all heads this step.
    mask_bias = (adj_ref[...].astype(jnp.float32) - 1.0) * jnp.float32(1e30)
    h_k_bf = h_k.astype(jnp.bfloat16)

    for hh in range(heads):                                          # static unroll
        e = ad_sc[hh, :, :] + alpha_src[hh:hh + 1, :]                # [tq, tk]
        e = jnp.where(e > 0, e, neg_slope * e)                       # LeakyReLU(0.2)
        e = e + mask_bias
        m_old = m_sc[hh, :, :]
        m_new = jnp.maximum(m_old, jnp.max(e, axis=-1, keepdims=True))
        scale = jnp.exp(m_old - m_new)
        p = jnp.exp(e - m_new)
        l_sc[hh, :, :] = scale * l_sc[hh, :, :] + jnp.sum(p, axis=-1, keepdims=True)
        acc_sc[hh, :, :] = scale * acc_sc[hh, :, :] + jnp.dot(
            p.astype(jnp.bfloat16), h_k_bf[:, hh * dh:(hh + 1) * dh],
            preferred_element_type=jnp.float32)
        m_sc[hh, :, :] = m_new


# ----------------------------------------------------------------------------
# Layer 1: GATConv(in_dim, hidden, heads=H) -> concat -> bias -> ELU
# ----------------------------------------------------------------------------
def _gat_layer1_kernel(xq_ref, xk_ref, adj_ref, w_ref, att_ref, o_ref,
                       m_sc, l_sc, ad_sc, acc_sc, *, heads, dh, neg_slope):
    _flash_gat_step(xq_ref, xk_ref, adj_ref, w_ref, att_ref,
                    m_sc, l_sc, ad_sc, acc_sc,
                    heads=heads, dh=dh, neg_slope=neg_slope)

    @pl.when(pl.program_id(1) == pl.num_programs(1) - 1)
    def _finalize():
        parts = []
        for hh in range(heads):
            inv_l = pl.reciprocal(l_sc[hh, :, :], approx=True)
            parts.append(acc_sc[hh, :, :] * inv_l)
        pad = o_ref.shape[-1] - heads * dh
        if pad > 0:
            parts.append(jnp.zeros((o_ref.shape[0], pad), jnp.float32))
        h1 = jnp.concatenate(parts, axis=-1) + att_ref[2 * heads:2 * heads + 1, :]
        # F.elu ; F.dropout(training=False) == identity.
        o_ref[...] = jnp.where(h1 > 0, h1, jnp.exp(h1) - 1.0).astype(o_ref.dtype)


# ----------------------------------------------------------------------------
# Layer 2: GATConv(H*hidden, out, heads=1, concat=False) + residual Linear
# ----------------------------------------------------------------------------
def _gat_layer2_kernel(hq_ref, hk_ref, adj_ref, w_ref, att_ref, xq_ref, wr_ref,
                       o_ref, m_sc, l_sc, ad_sc, acc_sc, *, neg_slope):
    dh = acc_sc.shape[-1]
    _flash_gat_step(hq_ref, hk_ref, adj_ref, w_ref, att_ref,
                    m_sc, l_sc, ad_sc, acc_sc,
                    heads=1, dh=dh, neg_slope=neg_slope)

    @pl.when(pl.program_id(1) == pl.num_programs(1) - 1)
    def _finalize():
        agg = acc_sc[0, :, :] * pl.reciprocal(l_sc[0, :, :], approx=True)
        res = jnp.dot(xq_ref[...], wr_ref[...],
                      preferred_element_type=jnp.float32)            # residual Linear
        out = agg + res + att_ref[2:3, :]                            # b2 + br folded
        o_ref[...] = out.astype(o_ref.dtype)


# ----------------------------------------------------------------------------
# Wrapper: full GNNModelPYG forward (name='gat', residual Linear, eval mode)
# ----------------------------------------------------------------------------
def _round_up(v, m):
    return (v + m - 1) // m * m


def gnn_gat_forward(params, features, adj, *, heads, hidden_dim, out_dim,
                    negative_slope=0.2, max_tile=128):
    n, in_dim = features.shape
    dh = hidden_dim
    d_cat = heads * dh
    dh_p = max(128, _round_up(d_cat, 128))      # lane-dense hidden (concat) dim
    out_p = max(128, _round_up(out_dim, 128))   # lane-dense output dim

    tile = min(max_tile, _round_up(n, 8))
    n_p = _round_up(n, tile)

    x = features.astype(jnp.float32)
    adj_i8 = adj.astype(jnp.int8)
    if n_p != n:
        x = jnp.pad(x, ((0, n_p - n), (0, 0)))
        adj_i8 = jnp.pad(adj_i8, ((0, n_p - n), (0, n_p - n)))
    x_bf = x.astype(jnp.bfloat16)

    # ---- pack / pad parameters (lane-dense, few DMA descriptors) ----
    w1_p = jnp.zeros((in_dim, dh_p), jnp.float32).at[:, :d_cat].set(
        params["w1"]).astype(jnp.bfloat16)
    att1 = jnp.zeros((2 * heads + 1, dh_p), jnp.float32)
    for hh in range(heads):
        sl = slice(hh * dh, (hh + 1) * dh)
        att1 = att1.at[hh, sl].set(params["att_src1"][hh])
        att1 = att1.at[heads + hh, sl].set(params["att_dst1"][hh])
    att1 = att1.at[2 * heads, :d_cat].set(params["b1"].reshape(-1))

    w2_p = jnp.zeros((dh_p, out_p), jnp.float32).at[:d_cat, :out_dim].set(
        params["w2"]).astype(jnp.bfloat16)
    att2 = jnp.zeros((3, out_p), jnp.float32)
    att2 = att2.at[0, :out_dim].set(params["att_src2"].reshape(-1))
    att2 = att2.at[1, :out_dim].set(params["att_dst2"].reshape(-1))
    att2 = att2.at[2, :out_dim].set((params["b2"] + params["br"]).reshape(-1))
    wr_p = jnp.zeros((in_dim, out_p), jnp.float32).at[:, :out_dim].set(
        params["wr"]).astype(jnp.bfloat16)

    grid = (n_p // tile, n_p // tile)
    cparams = pltpu.CompilerParams(
        dimension_semantics=("parallel", "arbitrary"),
        vmem_limit_bytes=64 * 1024 * 1024)

    # ---- layer 1: GATConv(in_dim, hidden, heads=H) + ELU ----
    h1 = pl.pallas_call(
        functools.partial(_gat_layer1_kernel, heads=heads, dh=dh,
                          neg_slope=negative_slope),
        out_shape=jax.ShapeDtypeStruct((n_p, dh_p), jnp.bfloat16),
        grid=grid,
        in_specs=[
            pl.BlockSpec((tile, in_dim), lambda q, k: (q, 0)),        # x (dst rows)
            pl.BlockSpec((tile, in_dim), lambda q, k: (k, 0)),        # x (src rows)
            pl.BlockSpec((tile, tile), lambda q, k: (q, k)),          # adj tile (int8)
            pl.BlockSpec((in_dim, dh_p), lambda q, k: (0, 0)),        # W1 (bf16)
            pl.BlockSpec((2 * heads + 1, dh_p), lambda q, k: (0, 0)),  # att/bias pack
        ],
        out_specs=pl.BlockSpec((tile, dh_p), lambda q, k: (q, 0)),
        scratch_shapes=[
            pltpu.VMEM((heads, tile, 1), jnp.float32),    # running max
            pltpu.VMEM((heads, tile, 1), jnp.float32),    # running denom
            pltpu.VMEM((heads, tile, 1), jnp.float32),    # alpha_dst cache
            pltpu.VMEM((heads, tile, dh), jnp.float32),   # running numerator
        ],
        compiler_params=cparams,
    )(x_bf, x_bf, adj_i8, w1_p, att1)

    # ---- layer 2: GATConv(H*hidden, out, heads=1, concat=False) + residual ----
    out = pl.pallas_call(
        functools.partial(_gat_layer2_kernel, neg_slope=negative_slope),
        out_shape=jax.ShapeDtypeStruct((n_p, out_p), jnp.float32),
        grid=grid,
        in_specs=[
            pl.BlockSpec((tile, dh_p), lambda q, k: (q, 0)),          # h1 (dst rows)
            pl.BlockSpec((tile, dh_p), lambda q, k: (k, 0)),          # h1 (src rows)
            pl.BlockSpec((tile, tile), lambda q, k: (q, k)),          # adj tile (int8)
            pl.BlockSpec((dh_p, out_p), lambda q, k: (0, 0)),         # W2 (bf16)
            pl.BlockSpec((3, out_p), lambda q, k: (0, 0)),            # att/bias pack
            pl.BlockSpec((tile, in_dim), lambda q, k: (q, 0)),        # x (residual)
            pl.BlockSpec((in_dim, out_p), lambda q, k: (0, 0)),       # Wr (bf16)
        ],
        out_specs=pl.BlockSpec((tile, out_p), lambda q, k: (q, 0)),
        scratch_shapes=[
            pltpu.VMEM((1, tile, 1), jnp.float32),
            pltpu.VMEM((1, tile, 1), jnp.float32),
            pltpu.VMEM((1, tile, 1), jnp.float32),
            pltpu.VMEM((1, tile, out_p), jnp.float32),
        ],
        compiler_params=cparams,
    )(h1, h1, adj_i8, w2_p, att2, x_bf, wr_p)

    return out[:n, :out_dim]


# ----------------------------------------------------------------------------
# Pure-JAX f32 reference (mirrors the PyTorch module in eval mode)
# ----------------------------------------------------------------------------
def gnn_reference(params, x, adj, *, heads, hidden_dim, out_dim):
    adj_f = adj.astype(jnp.float32)
    neg = 0.2

    def gat(hin, w, a_src, a_dst, bias_flat, nheads, d):
        h = hin @ w
        outs = []
        for hh in range(nheads):
            hs = h[:, hh * d:(hh + 1) * d]
            al_src = hs @ a_src[hh]
            al_dst = hs @ a_dst[hh]
            e = al_dst[:, None] + al_src[None, :]
            e = jnp.where(e > 0, e, neg * e)
            e = jnp.where(adj_f > 0, e, -1e30)
            e = e - jnp.max(e, axis=-1, keepdims=True)
            p = jnp.exp(e)
            attn = p / jnp.sum(p, axis=-1, keepdims=True)
            outs.append(attn @ hs)
        return jnp.concatenate(outs, axis=-1) + bias_flat[None, :]

    h1 = gat(x, params["w1"], params["att_src1"], params["att_dst1"],
             params["b1"].reshape(-1), heads, hidden_dim)
    h1 = jnp.where(h1 > 0, h1, jnp.exp(h1) - 1.0)
    h2 = gat(h1, params["w2"], params["att_src2"], params["att_dst2"],
             params["b2"].reshape(-1), 1, out_dim)
    return h2 + x @ params["wr"] + params["br"]


if __name__ == "__main__":
    N, IN_DIM, HIDDEN, HEADS, OUT_DIM = 256, 16, 16, 4, 32

    key = jax.random.PRNGKey(0)
    keys = jax.random.split(key, 12)

    features = jax.random.normal(keys[0], (N, IN_DIM), jnp.float32)

    # Deterministic edge_index (ring + chord), as a dense mask:
    # adj[i, j] = 1 iff edge j -> i; self-loops added (GATConv default).
    idx = jnp.arange(N)
    src = jnp.concatenate([idx, idx])
    dst = jnp.concatenate([(idx + 1) % N, (idx + 7) % N])
    adj = jnp.zeros((N, N), jnp.int8).at[dst, src].set(1)
    adj = adj.at[idx, idx].set(1)

    def glorot(k, shape):
        lim = (6.0 / (shape[0] + shape[-1])) ** 0.5
        return jax.random.uniform(k, shape, jnp.float32, -lim, lim)

    params = dict(
        # GATConv(in_dim, hidden, heads=HEADS)
        w1=glorot(keys[1], (IN_DIM, HEADS * HIDDEN)),
        att_src1=glorot(keys[2], (HEADS, HIDDEN)),
        att_dst1=glorot(keys[3], (HEADS, HIDDEN)),
        b1=0.1 * jax.random.normal(keys[4], (HEADS, HIDDEN), jnp.float32),
        # GATConv(hidden*heads, out_dim, heads=1, concat=False)
        w2=glorot(keys[5], (HEADS * HIDDEN, OUT_DIM)),
        att_src2=glorot(keys[6], (1, OUT_DIM)),
        att_dst2=glorot(keys[7], (1, OUT_DIM)),
        b2=0.1 * jax.random.normal(keys[8], (1, OUT_DIM), jnp.float32),
        # residual Linear(in_dim, out_dim)  (in_dim != out_dim)
        wr=glorot(keys[9], (IN_DIM, OUT_DIM)),
        br=0.1 * jax.random.normal(keys[10], (1, OUT_DIM), jnp.float32),
    )

    out = gnn_gat_forward(params, features, adj,
                          heads=HEADS, hidden_dim=HIDDEN, out_dim=OUT_DIM)
    out = jax.block_until_ready(out)

    ref = gnn_reference(params, features, adj,
                        heads=HEADS, hidden_dim=HIDDEN, out_dim=OUT_DIM)
    err = float(jnp.max(jnp.abs(out - ref)))

    assert out.shape == (N, OUT_DIM), out.shape
    assert bool(jnp.all(jnp.isfinite(out)))
    assert err < 0.2, f"max abs err vs f32 reference: {err}"
    print("KERNEL_OK")
</pallas_src>

<mosaic_0001>
module attributes {stable_mosaic.version = 11 : i64} {
  func.func @_gat_layer1_kernel(%arg0: i32, %arg1: i32, %arg2: memref<128x16xbf16, #tpu.memory_space<vmem>>, %arg3: memref<128x16xbf16, #tpu.memory_space<vmem>>, %arg4: memref<128x128xi8, #tpu.memory_space<vmem>>, %arg5: memref<16x128xbf16, #tpu.memory_space<vmem>>, %arg6: memref<9x128xf32, #tpu.memory_space<vmem>>, %arg7: memref<128x128xbf16, #tpu.memory_space<vmem>>, %arg8: memref<4x128x1xf32, #tpu.memory_space<vmem>>, %arg9: memref<4x128x1xf32, #tpu.memory_space<vmem>>, %arg10: memref<4x128x1xf32, #tpu.memory_space<vmem>>, %arg11: memref<4x128x16xf32, #tpu.memory_space<vmem>>) attributes {dimension_semantics = [#tpu.dimension_semantics<parallel>, #tpu.dimension_semantics<arbitrary>], iteration_bounds = array<i64: 2, 2>, scalar_prefetch = 0 : i64, scratch_operands = 4 : i64, tpu.core_type = #tpu.core_type<tc>, window_params = [{transform_indices = @transform_0, window_bounds = array<i64: 128, 16>}, {transform_indices = @transform_1, window_bounds = array<i64: 128, 16>}, {transform_indices = @transform_2, window_bounds = array<i64: 128, 128>}, {pipeline_mode = #tpu.pipeline_mode<synchronous>, transform_indices = @transform_3, window_bounds = array<i64: 16, 128>}, {pipeline_mode = #tpu.pipeline_mode<synchronous>, transform_indices = @transform_4, window_bounds = array<i64: 9, 128>}, {transform_indices = @transform_5, window_bounds = array<i64: 128, 128>}]} {
    %c0_i32 = arith.constant 0 : i32
    %0 = arith.cmpi eq, %arg1, %c0_i32 : i32
    %1 = arith.extui %0 : i1 to i32
    %c0_i32_0 = arith.constant 0 : i32
    %2 = arith.cmpi ne, %1, %c0_i32_0 : i32
    scf.if %2 {
      %cst_113 = arith.constant 0xFF800000 : f32
      %198 = vector.broadcast %cst_113 : f32 to vector<4x128x1xf32>
      %c0_114 = arith.constant 0 : index
      %c0_115 = arith.constant 0 : index
      %c0_116 = arith.constant 0 : index
      %199 = vector.load %arg8[%c0_114, %c0_115, %c0_116] : memref<4x128x1xf32, #tpu.memory_space<vmem>>, vector<4x128x1xf32>
      tpu.vector_store %arg8[%c0_114, %c0_115, %c0_116], %198 {strides = array<i32>} : memref<4x128x1xf32, #tpu.memory_space<vmem>>, vector<4x128x1xf32>,
      %cst_117 = arith.constant 0.000000e+00 : f32
      %200 = vector.broadcast %cst_117 : f32 to vector<4x128x1xf32>
      %c0_118 = arith.constant 0 : index
      %c0_119 = arith.constant 0 : index
      %c0_120 = arith.constant 0 : index
      %201 = vector.load %arg9[%c0_118, %c0_119, %c0_120] : memref<4x128x1xf32, #tpu.memory_space<vmem>>, vector<4x128x1xf32>
      tpu.vector_store %arg9[%c0_118, %c0_119, %c0_120], %200 {strides = array<i32>} : memref<4x128x1xf32, #tpu.memory_space<vmem>>, vector<4x128x1xf32>,
      %cst_121 = arith.constant 0.000000e+00 : f32
      %202 = vector.broadcast %cst_121 : f32 to vector<4x128x16xf32>
      %c0_122 = arith.constant 0 : index
      %c0_123 = arith.constant 0 : index
      %c0_124 = arith.constant 0 : index
      %203 = vector.load %arg11[%c0_122, %c0_123, %c0_124] : memref<4x128x16xf32, #tpu.memory_space<vmem>>, vector<4x128x16xf32>
      tpu.vector_store %arg11[%c0_122, %c0_123, %c0_124], %202 {strides = array<i32>} : memref<4x128x16xf32, #tpu.memory_space<vmem>>, vector<4x128x16xf32>,
      %c0_125 = arith.constant 0 : index
      %c0_126 = arith.constant 0 : index
      %204 = vector.load %arg2[%c0_125, %c0_126] : memref<128x16xbf16, #tpu.memory_space<vmem>>, vector<128x16xbf16>
      %c0_127 = arith.constant 0 : index
      %c0_128 = arith.constant 0 : index
      %205 = vector.load %arg5[%c0_127, %c0_128] : memref<16x128xbf16, #tpu.memory_space<vmem>>, vector<16x128xbf16>
      %cst_129 = arith.constant dense<0.000000e+00> : vector<128x128xf32>
      %206 = tpu.matmul %204, %205, %cst_129 {dimension_numbers = #tpu.dot_dimension_numbers<[1], [0], [0], [1], [0, 0, 1, 1], [], []>} : vector<128x16xbf16>, vector<16x128xbf16>, vector<128x128xf32> -> vector<128x128xf32>
      %c4 = arith.constant 4 : index
      %c0_130 = arith.constant 0 : index
      %207 = vector.load %arg6[%c4, %c0_130] : memref<9x128xf32, #tpu.memory_space<vmem>>, vector<4x128xf32>
      %cst_131 = arith.constant dense<0.000000e+00> : vector<128x4xf32>
      %208 = tpu.matmul %206, %207, %cst_131 {dimension_numbers = #tpu.dot_dimension_numbers<[1], [1], [0], [0], [0, 0, 1, 0], [], []>} : vector<128x128xf32>, vector<4x128xf32>, vector<128x4xf32> -> vector<128x4xf32>
      %209 = vector.extract_strided_slice %208 {offsets = [0, 0], sizes = [128, 1], strides = [1, 1]} : vector<128x4xf32> to vector<128x1xf32>
      %c0_132 = arith.constant 0 : index
      %c0_133 = arith.constant 0 : index
      %c0_134 = arith.constant 0 : index
      %210 = vector.load %arg10[%c0_132, %c0_133, %c0_134] : memref<4x128x1xf32, #tpu.memory_space<vmem>>, vector<1x128x1xf32>
      %211 = vector.shape_cast %210 : vector<1x128x1xf32> to vector<128x1xf32>
      %212 = vector.shape_cast %209 : vector<128x1xf32> to vector<1x128x1xf32>
      tpu.vector_store %arg10[%c0_132, %c0_133, %c0_134], %212 {strides = array<i32>} : memref<4x128x1xf32, #tpu.memory_space<vmem>>, vector<1x128x1xf32>,
      %213 = vector.extract_strided_slice %208 {offsets = [0, 1], sizes = [128, 1], strides = [1, 1]} : vector<128x4xf32> to vector<128x1xf32>
      %c1_135 = arith.constant 1 : index
      %c0_136 = arith.constant 0 : index
      %c0_137 = arith.constant 0 : index
      %214 = vector.load %arg10[%c1_135, %c0_136, %c0_137] : memref<4x128x1xf32, #tpu.memory_space<vmem>>, vector<1x128x1xf32>
      %215 = vector.shape_cast %214 : vector<1x128x1xf32> to vector<128x1xf32>
      %216 = vector.shape_cast %213 : vector<128x1xf32> to vector<1x128x1xf32>
      tpu.vector_store %arg10[%c1_135, %c0_136, %c0_137], %216 {strides = array<i32>} : memref<4x128x1xf32, #tpu.memory_space<vmem>>, vector<1x128x1xf32>,
      %217 = vector.extract_strided_slice %208 {offsets = [0, 2], sizes = [128, 1], strides = [1, 1]} : vector<128x4xf32> to vector<128x1xf32>
      %c2_138 = arith.constant 2 : index
      %c0_139 = arith.constant 0 : index
      %c0_140 = arith.constant 0 : index
      %218 = vector.load %arg10[%c2_138, %c0_139, %c0_140] : memref<4x128x1xf32, #tpu.memory_space<vmem>>, vector<1x128x1xf32>
      %219 = vector.shape_cast %218 : vector<1x128x1xf32> to vector<128x1xf32>
      %220 = vector.shape_cast %217 : vector<128x1xf32> to vector<1x128x1xf32>
      tpu.vector_store %arg10[%c2_138, %c0_139, %c0_140], %220 {strides = array<i32>} : memref<4x128x1xf32, #tpu.memory_space<vmem>>, vector<1x128x1xf32>,
      %221 = vector.extract_strided_slice %208 {offsets = [0, 3], sizes = [128, 1], strides = [1, 1]} : vector<128x4xf32> to vector<128x1xf32>
      %c3_141 = arith.constant 3 : index
      %c0_142 = arith.constant 0 : index
      %c0_143 = arith.constant 0 : index
      %222 = vector.load %arg10[%c3_141, %c0_142, %c0_143] : memref<4x128x1xf32, #tpu.memory_space<vmem>>, vector<1x128x1xf32>
      %223 = vector.shape_cast %222 : vector<1x128x1xf32> to vector<128x1xf32>
      %224 = vector.shape_cast %221 : vector<128x1xf32> to vector<1x128x1xf32>
      tpu.vector_store %arg10[%c3_141, %c0_142, %c0_143], %224 {strides = array<i32>} : memref<4x128x1xf32, #tpu.memory_space<vmem>>, vector<1x128x1xf32>,
    } else {
    }
    %c0 = arith.constant 0 : index
    %c0_1 = arith.constant 0 : index
    %3 = vector.load %arg3[%c0, %c0_1] : memref<128x16xbf16, #tpu.memory_space<vmem>>, vector<128x16xbf16>
    %c0_2 = arith.constant 0 : index
    %c0_3 = arith.constant 0 : index
    %4 = vector.load %arg5[%c0_2, %c0_3] : memref<16x128xbf16, #tpu.memory_space<vmem>>, vector<16x128xbf16>
    %cst = arith.constant dense<0.000000e+00> : vector<128x128xf32>
    %5 = tpu.matmul %3, %4, %cst {dimension_numbers = #tpu.dot_dimension_numbers<[1], [0], [0], [1], [0, 0, 1, 1], [], []>} : vector<128x16xbf16>, vector<16x128xbf16>, vector<128x128xf32> -> vector<128x128xf32>
    %c0_4 = arith.constant 0 : index
    %c0_5 = arith.constant 0 : index
    %6 = vector.load %arg6[%c0_4, %c0_5] : memref<9x128xf32, #tpu.memory_space<vmem>>, vector<4x128xf32>
    %cst_6 = arith.constant dense<0.000000e+00> : vector<4x128xf32>
    %7 = tpu.matmul %6, %5, %cst_6 {dimension_numbers = #tpu.dot_dimension_numbers<[1], [1], [0], [0], [0, 0, 1, 0], [], []>} : vector<4x128xf32>, vector<128x128xf32>, vector<4x128xf32> -> vector<4x128xf32>
    %c0_7 = arith.constant 0 : index
    %c0_8 = arith.constant 0 : index
    %8 = vector.load %arg4[%c0_7, %c0_8] : memref<128x128xi8, #tpu.memory_space<vmem>>, vector<128x128xi8>
    %9 = arith.sitofp %8 : vector<128x128xi8> to vector<128x128xf32>
    %cst_9 = arith.constant 1.000000e+00 : f32
    %10 = vector.broadcast %cst_9 : f32 to vector<128x128xf32>
    %11 = arith.subf %9, %10 : vector<128x128xf32>
    %cst_10 = arith.constant 1.000000e+30 : f32
    %12 = vector.broadcast %cst_10 : f32 to vector<128x128xf32>
    %13 = arith.mulf %11, %12 : vector<128x128xf32>
    %14 = arith.truncf %5 : vector<128x128xf32> to vector<128x128xbf16>
    %c0_11 = arith.constant 0 : index
    %c0_12 = arith.constant 0 : index
    %c0_13 = arith.constant 0 : index
    %15 = vector.load %arg10[%c0_11, %c0_12, %c0_13] : memref<4x128x1xf32, #tpu.memory_space<vmem>>, vector<1x128x1xf32>
    %16 = vector.shape_cast %15 : vector<1x128x1xf32> to vector<128x1xf32>
    %17 = vector.extract_strided_slice %7 {offsets = [0, 0], sizes = [1, 128], strides = [1, 1]} : vector<4x128xf32> to vector<1x128xf32>
    %18 = vector.broadcast %16 : vector<128x1xf32> to vector<128x128xf32>
    %19 = vector.broadcast %17 : vector<1x128xf32> to vector<128x128xf32>
    %20 = arith.addf %18, %19 : vector<128x128xf32>
    %cst_14 = arith.constant 0.000000e+00 : f32
    %21 = vector.broadcast %cst_14 : f32 to vector<128x128xf32>
    %22 = arith.cmpf ogt, %20, %21 : vector<128x128xf32>
    %cst_15 = arith.constant 2.000000e-01 : f32
    %23 = vector.broadcast %cst_15 : f32 to vector<128x128xf32>
    %24 = arith.mulf %23, %20 : vector<128x128xf32>
    %25 = arith.select %22, %20, %24 : vector<128x128xi1>, vector<128x128xf32>
    %26 = arith.addf %25, %13 : vector<128x128xf32>
    %c0_16 = arith.constant 0 : index
    %c0_17 = arith.constant 0 : index
    %c0_18 = arith.constant 0 : index
    %27 = vector.load %arg8[%c0_16, %c0_17, %c0_18] : memref<4x128x1xf32, #tpu.memory_space<vmem>>, vector<1x128x1xf32>
    %28 = vector.shape_cast %27 : vector<1x128x1xf32> to vector<128x1xf32>
    %cst_19 = arith.constant dense<0xFF800000> : vector<128xf32>
    %29 = vector.multi_reduction <maximumf>, %26, %cst_19 [1] : vector<128x128xf32> to vector<128xf32>
    %30 = vector.shape_cast %29 : vector<128xf32> to vector<128x1xf32>
    %31 = arith.maximumf %28, %30 : vector<128x1xf32>
    %32 = arith.subf %28, %31 : vector<128x1xf32>
    %33 = math.exp %32 : vector<128x1xf32>
    %34 = vector.broadcast %31 : vector<128x1xf32> to vector<128x128xf32>
    %35 = arith.subf %26, %34 : vector<128x128xf32>
    %36 = math.exp %35 : vector<128x128xf32>
    %c0_20 = arith.constant 0 : index
    %c0_21 = arith.constant 0 : index
    %c0_22 = arith.constant 0 : index
    %37 = vector.load %arg9[%c0_20, %c0_21, %c0_22] : memref<4x128x1xf32, #tpu.memory_space<vmem>>, vector<1x128x1xf32>
    %38 = vector.shape_cast %37 : vector<1x128x1xf32> to vector<128x1xf32>
    %39 = arith.mulf %33, %38 : vector<128x1xf32>
    %cst_23 = arith.constant dense<0.000000e+00> : vector<128xf32>
    %40 = vector.multi_reduction <add>, %36, %cst_23 [1] : vector<128x128xf32> to vector<128xf32>
    %41 = vector.shape_cast %40 : vector<128xf32> to vector<128x1xf32>
    %42 = arith.addf %39, %41 : vector<128x1xf32>
    %c0_24 = arith.constant 0 : index
    %c0_25 = arith.constant 0 : index
    %c0_26 = arith.constant 0 : index
    %43 = vector.load %arg9[%c0_24, %c0_25, %c0_26] : memref<4x128x1xf32, #tpu.memory_space<vmem>>, vector<1x128x1xf32>
    %44 = vector.shape_cast %43 : vector<1x128x1xf32> to vector<128x1xf32>
    %45 = vector.shape_cast %42 : vector<128x1xf32> to vector<1x128x1xf32>
    tpu.vector_store %arg9[%c0_24, %c0_25, %c0_26], %45 {strides = array<i32>} : memref<4x128x1xf32, #tpu.memory_space<vmem>>, vector<1x128x1xf32>,
    %c0_27 = arith.constant 0 : index
    %c0_28 = arith.constant 0 : index
    %c0_29 = arith.constant 0 : index
    %46 = vector.load %arg11[%c0_27, %c0_28, %c0_29] : memref<4x128x16xf32, #tpu.memory_space<vmem>>, vector<1x128x16xf32>
    %47 = vector.shape_cast %46 : vector<1x128x16xf32> to vector<128x16xf32>
    %48 = vector.broadcast %33 : vector<128x1xf32> to vector<128x16xf32>
    %49 = arith.mulf %48, %47 : vector<128x16xf32>
    %50 = arith.truncf %36 : vector<128x128xf32> to vector<128x128xbf16>
    %51 = vector.extract_strided_slice %14 {offsets = [0, 0], sizes = [128, 16], strides = [1, 1]} : vector<128x128xbf16> to vector<128x16xbf16>
    %cst_30 = arith.constant dense<0.000000e+00> : vector<128x16xf32>
    %52 = tpu.matmul %50, %51, %cst_30 {dimension_numbers = #tpu.dot_dimension_numbers<[1], [0], [0], [1], [0, 0, 1, 1], [], []>} : vector<128x128xbf16>, vector<128x16xbf16>, vector<128x16xf32> -> vector<128x16xf32>
    %53 = arith.addf %49, %52 : vector<128x16xf32>
    %c0_31 = arith.constant 0 : index
    %c0_32 = arith.constant 0 : index
    %c0_33 = arith.constant 0 : index
    %54 = vector.load %arg11[%c0_31, %c0_32, %c0_33] : memref<4x128x16xf32, #tpu.memory_space<vmem>>, vector<1x128x16xf32>
    %55 = vector.shape_cast %54 : vector<1x128x16xf32> to vector<128x16xf32>
    %56 = vector.shape_cast %53 : vector<128x16xf32> to vector<1x128x16xf32>
    tpu.vector_store %arg11[%c0_31, %c0_32, %c0_33], %56 {strides = array<i32>} : memref<4x128x16xf32, #tpu.memory_space<vmem>>, vector<1x128x16xf32>,
    %c0_34 = arith.constant 0 : index
    %c0_35 = arith.constant 0 : index
    %c0_36 = arith.constant 0 : index
    %57 = vector.load %arg8[%c0_34, %c0_35, %c0_36] : memref<4x128x1xf32, #tpu.memory_space<vmem>>, vector<1x128x1xf32>
    %58 = vector.shape_cast %57 : vector<1x128x1xf32> to vector<128x1xf32>
    %59 = vector.shape_cast %31 : vector<128x1xf32> to vector<1x128x1xf32>
    tpu.vector_store %arg8[%c0_34, %c0_35, %c0_36], %59 {strides = array<i32>} : memref<4x128x1xf32, #tpu.memory_space<vmem>>, vector<1x128x1xf32>,
    %c1 = arith.constant 1 : index
    %c0_37 = arith.constant 0 : index
    %c0_38 = arith.constant 0 : index
    %60 = vector.load %arg10[%c1, %c0_37, %c0_38] : memref<4x128x1xf32, #tpu.memory_space<vmem>>, vector<1x128x1xf32>
    %61 = vector.shape_cast %60 : vector<1x128x1xf32> to vector<128x1xf32>
    %62 = vector.extract_strided_slice %7 {offsets = [1, 0], sizes = [1, 128], strides = [1, 1]} : vector<4x128xf32> to vector<1x128xf32>
    %63 = vector.broadcast %61 : vector<128x1xf32> to vector<128x128xf32>
    %64 = vector.broadcast %62 : vector<1x128xf32> to vector<128x128xf32>
    %65 = arith.addf %63, %64 : vector<128x128xf32>
    %cst_39 = arith.constant 0.000000e+00 : f32
    %66 = vector.broadcast %cst_39 : f32 to vector<128x128xf32>
    %67 = arith.cmpf ogt, %65, %66 : vector<128x128xf32>
    %cst_40 = arith.constant 2.000000e-01 : f32
    %68 = vector.broadcast %cst_40 : f32 to vector<128x128xf32>
    %69 = arith.mulf %68, %65 : vector<128x128xf32>
    %70 = arith.select %67, %65, %69 : vector<128x128xi1>, vector<128x128xf32>
    %71 = arith.addf %70, %13 : vector<128x128xf32>
    %c1_41 = arith.constant 1 : index
    %c0_42 = arith.constant 0 : index
    %c0_43 = arith.constant 0 : index
    %72 = vector.load %arg8[%c1_41, %c0_42, %c0_43] : memref<4x128x1xf32, #tpu.memory_space<vmem>>, vector<1x128x1xf32>
    %73 = vector.shape_cast %72 : vector<1x128x1xf32> to vector<128x1xf32>
    %cst_44 = arith.constant dense<0xFF800000> : vector<128xf32>
    %74 = vector.multi_reduction <maximumf>, %71, %cst_44 [1] : vector<128x128xf32> to vector<128xf32>
    %75 = vector.shape_cast %74 : vector<128xf32> to vector<128x1xf32>
    %76 = arith.maximumf %73, %75 : vector<128x1xf32>
    %77 = arith.subf %73, %76 : vector<128x1xf32>
    %78 = math.exp %77 : vector<128x1xf32>
    %79 = vector.broadcast %76 : vector<128x1xf32> to vector<128x128xf32>
    %80 = arith.subf %71, %79 : vector<128x128xf32>
    %81 = math.exp %80 : vector<128x128xf32>
    %c1_45 = arith.constant 1 : index
    %c0_46 = arith.constant 0 : index
    %c0_47 = arith.constant 0 : index
    %82 = vector.load %arg9[%c1_45, %c0_46, %c0_47] : memref<4x128x1xf32, #tpu.memory_space<vmem>>, vector<1x128x1xf32>
    %83 = vector.shape_cast %82 : vector<1x128x1xf32> to vector<128x1xf32>
    %84 = arith.mulf %78, %83 : vector<128x1xf32>
    %cst_48 = arith.constant dense<0.000000e+00> : vector<128xf32>
    %85 = vector.multi_reduction <add>, %81, %cst_48 [1] : vector<128x128xf32> to vector<128xf32>
    %86 = vector.shape_cast %85 : vector<128xf32> to vector<128x1xf32>
    %87 = arith.addf %84, %86 : vector<128x1xf32>
    %c1_49 = arith.constant 1 : index
    %c0_50 = arith.constant 0 : index
    %c0_51 = arith.constant 0 : index
    %88 = vector.load %arg9[%c1_49, %c0_50, %c0_51] : memref<4x128x1xf32, #tpu.memory_space<vmem>>, vector<1x128x1xf32>
    %89 = vector.shape_cast %88 : vector<1x128x1xf32> to vector<128x1xf32>
    %90 = vector.shape_cast %87 : vector<128x1xf32> to vector<1x128x1xf32>
    tpu.vector_store %arg9[%c1_49, %c0_50, %c0_51], %90 {strides = array<i32>} : memref<4x128x1xf32, #tpu.memory_space<vmem>>, vector<1x128x1xf32>,
    %c1_52 = arith.constant 1 : index
    %c0_53 = arith.constant 0 : index
    %c0_54 = arith.constant 0 : index
    %91 = vector.load %arg11[%c1_52, %c0_53, %c0_54] : memref<4x128x16xf32, #tpu.memory_space<vmem>>, vector<1x128x16xf32>
    %92 = vector.shape_cast %91 : vector<1x128x16xf32> to vector<128x16xf32>
    %93 = vector.broadcast %78 : vector<128x1xf32> to vector<128x16xf32>
    %94 = arith.mulf %93, %92 : vector<128x16xf32>
    %95 = arith.truncf %81 : vector<128x128xf32> to vector<128x128xbf16>
    %96 = vector.extract_strided_slice %14 {offsets = [0, 16], sizes = [128, 16], strides = [1, 1]} : vector<128x128xbf16> to vector<128x16xbf16>
    %cst_55 = arith.constant dense<0.000000e+00> : vector<128x16xf32>
    %97 = tpu.matmul %95, %96, %cst_55 {dimension_numbers = #tpu.dot_dimension_numbers<[1], [0], [0], [1], [0, 0, 1, 1], [], []>} : vector<128x128xbf16>, vector<128x16xbf16>, vector<128x16xf32> -> vector<128x16xf32>
    %98 = arith.addf %94, %97 : vector<128x16xf32>
    %c1_56 = arith.constant 1 : index
    %c0_57 = arith.constant 0 : index
    %c0_58 = arith.constant 0 : index
    %99 = vector.load %arg11[%c1_56, %c0_57, %c0_58] : memref<4x128x16xf32, #tpu.memory_space<vmem>>, vector<1x128x16xf32>
    %100 = vector.shape_cast %99 : vector<1x128x16xf32> to vector<128x16xf32>
    %101 = vector.shape_cast %98 : vector<128x16xf32> to vector<1x128x16xf32>
    tpu.vector_store %arg11[%c1_56, %c0_57, %c0_58], %101 {strides = array<i32>} : memref<4x128x16xf32, #tpu.memory_space<vmem>>, vector<1x128x16xf32>,
    %c1_59 = arith.constant 1 : index
    %c0_60 = arith.constant 0 : index
    %c0_61 = arith.constant 0 : index
    %102 = vector.load %arg8[%c1_59, %c0_60, %c0_61] : memref<4x128x1xf32, #tpu.memory_space<vmem>>, vector<1x128x1xf32>
    %103 = vector.shape_cast %102 : vector<1x128x1xf32> to vector<128x1xf32>
    %104 = vector.shape_cast %76 : vector<128x1xf32> to vector<1x128x1xf32>
    tpu.vector_store %arg8[%c1_59, %c0_60, %c0_61], %104 {strides = array<i32>} : memref<4x128x1xf32, #tpu.memory_space<vmem>>, vector<1x128x1xf32>,
    %c2 = arith.constant 2 : index
    %c0_62 = arith.constant 0 : index
    %c0_63 = arith.constant 0 : index
    %105 = vector.load %arg10[%c2, %c0_62, %c0_63] : memref<4x128x1xf32, #tpu.memory_space<vmem>>, vector<1x128x1xf32>
    %106 = vector.shape_cast %105 : vector<1x128x1xf32> to vector<128x1xf32>
    %107 = vector.extract_strided_slice %7 {offsets = [2, 0], sizes = [1, 128], strides = [1, 1]} : vector<4x128xf32> to vector<1x128xf32>
    %108 = vector.broadcast %106 : vector<128x1xf32> to vector<128x128xf32>
    %109 = vector.broadcast %107 : vector<1x128xf32> to vector<128x128xf32>
    %110 = arith.addf %108, %109 : vector<128x128xf32>
    %cst_64 = arith.constant 0.000000e+00 : f32
    %111 = vector.broadcast %cst_64 : f32 to vector<128x128xf32>
    %112 = arith.cmpf ogt, %110, %111 : vector<128x128xf32>
    %cst_65 = arith.constant 2.000000e-01 : f32
    %113 = vector.broadcast %cst_65 : f32 to vector<128x128xf32>
    %114 = arith.mulf %113, %110 : vector<128x128xf32>
    %115 = arith.select %112, %110, %114 : vector<128x128xi1>, vector<128x128xf32>
    %116 = arith.addf %115, %13 : vector<128x128xf32>
    %c2_66 = arith.constant 2 : index
    %c0_67 = arith.constant 0 : index
    %c0_68 = arith.constant 0 : index
    %117 = vector.load %arg8[%c2_66, %c0_67, %c0_68] : memref<4x128x1xf32, #tpu.memory_space<vmem>>, vector<1x128x1xf32>
    %118 = vector.shape_cast %117 : vector<1x128x1xf32> to vector<128x1xf32>
    %cst_69 = arith.constant dense<0xFF800000> : vector<128xf32>
    %119 = vector.multi_reduction <maximumf>, %116, %cst_69 [1] : vector<128x128xf32> to vector<128xf32>
    %120 = vector.shape_cast %119 : vector<128xf32> to vector<128x1xf32>
    %121 = arith.maximumf %118, %120 : vector<128x1xf32>
    %122 = arith.subf %118, %121 : vector<128x1xf32>
    %123 = math.exp %122 : vector<128x1xf32>
    %124 = vector.broadcast %121 : vector<128x1xf32> to vector<128x128xf32>
    %125 = arith.subf %116, %124 : vector<128x128xf32>
    %126 = math.exp %125 : vector<128x128xf32>
    %c2_70 = arith.constant 2 : index
    %c0_71 = arith.constant 0 : index
    %c0_72 = arith.constant 0 : index
    %127 = vector.load %arg9[%c2_70, %c0_71, %c0_72] : memref<4x128x1xf32, #tpu.memory_space<vmem>>, vector<1x128x1xf32>
    %128 = vector.shape_cast %127 : vector<1x128x1xf32> to vector<128x1xf32>
    %129 = arith.mulf %123, %128 : vector<128x1xf32>
    %cst_73 = arith.constant dense<0.000000e+00> : vector<128xf32>
    %130 = vector.multi_reduction <add>, %126, %cst_73 [1] : vector<128x128xf32> to vector<128xf32>
    %131 = vector.shape_cast %130 : vector<128xf32> to vector<128x1xf32>
    %132 = arith.addf %129, %131 : vector<128x1xf32>
    %c2_74 = arith.constant 2 : index
    %c0_75 = arith.constant 0 : index
    %c0_76 = arith.constant 0 : index
    %133 = vector.load %arg9[%c2_74, %c0_75, %c0_76] : memref<4x128x1xf32, #tpu.memory_space<vmem>>, vector<1x128x1xf32>
    %134 = vector.shape_cast %133 : vector<1x128x1xf32> to vector<128x1xf32>
    %135 = vector.shape_cast %132 : vector<128x1xf32> to vector<1x128x1xf32>
    tpu.vector_store %arg9[%c2_74, %c0_75, %c0_76], %135 {strides = array<i32>} : memref<4x128x1xf32, #tpu.memory_space<vmem>>, vector<1x128x1xf32>,
    %c2_77 = arith.constant 2 : index
    %c0_78 = arith.constant 0 : index
    %c0_79 = arith.constant 0 : index
    %136 = vector.load %arg11[%c2_77, %c0_78, %c0_79] : memref<4x128x16xf32, #tpu.memory_space<vmem>>, vector<1x128x16xf32>
    %137 = vector.shape_cast %136 : vector<1x128x16xf32> to vector<128x16xf32>
    %138 = vector.broadcast %123 : vector<128x1xf32> to vector<128x16xf32>
    %139 = arith.mulf %138, %137 : vector<128x16xf32>
    %140 = arith.truncf %126 : vector<128x128xf32> to vector<128x128xbf16>
    %141 = vector.extract_strided_slice %14 {offsets = [0, 32], sizes = [128, 16], strides = [1, 1]} : vector<128x128xbf16> to vector<128x16xbf16>
    %cst_80 = arith.constant dense<0.000000e+00> : vector<128x16xf32>
    %142 = tpu.matmul %140, %141, %cst_80 {dimension_numbers = #tpu.dot_dimension_numbers<[1], [0], [0], [1], [0, 0, 1, 1], [], []>} : vector<128x128xbf16>, vector<128x16xbf16>, vector<128x16xf32> -> vector<128x16xf32>
    %143 = arith.addf %139, %142 : vector<128x16xf32>
    %c2_81 = arith.constant 2 : index
    %c0_82 = arith.constant 0 : index
    %c0_83 = arith.constant 0 : index
    %144 = vector.load %arg11[%c2_81, %c0_82, %c0_83] : memref<4x128x16xf32, #tpu.memory_space<vmem>>, vector<1x128x16xf32>
    %145 = vector.shape_cast %144 : vector<1x128x16xf32> to vector<128x16xf32>
    %146 = vector.shape_cast %143 : vector<128x16xf32> to vector<1x128x16xf32>
    tpu.vector_store %arg11[%c2_81, %c0_82, %c0_83], %146 {strides = array<i32>} : memref<4x128x16xf32, #tpu.memory_space<vmem>>, vector<1x128x16xf32>,
    %c2_84 = arith.constant 2 : index
    %c0_85 = arith.constant 0 : index
    %c0_86 = arith.constant 0 : index
    %147 = vector.load %arg8[%c2_84, %c0_85, %c0_86] : memref<4x128x1xf32, #tpu.memory_space<vmem>>, vector<1x128x1xf32>
    %148 = vector.shape_cast %147 : vector<1x128x1xf32> to vector<128x1xf32>
    %149 = vector.shape_cast %121 : vector<128x1xf32> to vector<1x128x1xf32>
    tpu.vector_store %arg8[%c2_84, %c0_85, %c0_86], %149 {strides = array<i32>} : memref<4x128x1xf32, #tpu.memory_space<vmem>>, vector<1x128x1xf32>,
    %c3 = arith.constant 3 : index
    %c0_87 = arith.constant 0 : index
    %c0_88 = arith.constant 0 : index
    %150 = vector.load %arg10[%c3, %c0_87, %c0_88] : memref<4x128x1xf32, #tpu.memory_space<vmem>>, vector<1x128x1xf32>
    %151 = vector.shape_cast %150 : vector<1x128x1xf32> to vector<128x1xf32>
    %152 = vector.extract_strided_slice %7 {offsets = [3, 0], sizes = [1, 128], strides = [1, 1]} : vector<4x128xf32> to vector<1x128xf32>
    %153 = vector.broadcast %151 : vector<128x1xf32> to vector<128x128xf32>
    %154 = vector.broadcast %152 : vector<1x128xf32> to vector<128x128xf32>
    %155 = arith.addf %153, %154 : vector<128x128xf32>
    %cst_89 = arith.constant 0.000000e+00 : f32
    %156 = vector.broadcast %cst_89 : f32 to vector<128x128xf32>
    %157 = arith.cmpf ogt, %155, %156 : vector<128x128xf32>
    %cst_90 = arith.constant 2.000000e-01 : f32
    %158 = vector.broadcast %cst_90 : f32 to vector<128x128xf32>
    %159 = arith.mulf %158, %155 : vector<128x128xf32>
    %160 = arith.select %157, %155, %159 : vector<128x128xi1>, vector<128x128xf32>
    %161 = arith.addf %160, %13 : vector<128x128xf32>
    %c3_91 = arith.constant 3 : index
    %c0_92 = arith.constant 0 : index
    %c0_93 = arith.constant 0 : index
    %162 = vector.load %arg8[%c3_91, %c0_92, %c0_93] : memref<4x128x1xf32, #tpu.memory_space<vmem>>, vector<1x128x1xf32>
    %163 = vector.shape_cast %162 : vector<1x128x1xf32> to vector<128x1xf32>
    %cst_94 = arith.constant dense<0xFF800000> : vector<128xf32>
    %164 = vector.multi_reduction <maximumf>, %161, %cst_94 [1] : vector<128x128xf32> to vector<128xf32>
    %165 = vector.shape_cast %164 : vector<128xf32> to vector<128x1xf32>
    %166 = arith.maximumf %163, %165 : vector<128x1xf32>
    %167 = arith.subf %163, %166 : vector<128x1xf32>
    %168 = math.exp %167 : vector<128x1xf32>
    %169 = vector.broadcast %166 : vector<128x1xf32> to vector<128x128xf32>
    %170 = arith.subf %161, %169 : vector<128x128xf32>
    %171 = math.exp %170 : vector<128x128xf32>
    %c3_95 = arith.constant 3 : index
    %c0_96 = arith.constant 0 : index
    %c0_97 = arith.constant 0 : index
    %172 = vector.load %arg9[%c3_95, %c0_96, %c0_97] : memref<4x128x1xf32, #tpu.memory_space<vmem>>, vector<1x128x1xf32>
    %173 = vector.shape_cast %172 : vector<1x128x1xf32> to vector<128x1xf32>
    %174 = arith.mulf %168, %173 : vector<128x1xf32>
    %cst_98 = arith.constant dense<0.000000e+00> : vector<128xf32>
    %175 = vector.multi_reduction <add>, %171, %cst_98 [1] : vector<128x128xf32> to vector<128xf32>
    %176 = vector.shape_cast %175 : vector<128xf32> to vector<128x1xf32>
    %177 = arith.addf %174, %176 : vector<128x1xf32>
    %c3_99 = arith.constant 3 : index
    %c0_100 = arith.constant 0 : index
    %c0_101 = arith.constant 0 : index
    %178 = vector.load %arg9[%c3_99, %c0_100, %c0_101] : memref<4x128x1xf32, #tpu.memory_space<vmem>>, vector<1x128x1xf32>
    %179 = vector.shape_cast %178 : vector<1x128x1xf32> to vector<128x1xf32>
    %180 = vector.shape_cast %177 : vector<128x1xf32> to vector<1x128x1xf32>
    tpu.vector_store %arg9[%c3_99, %c0_100, %c0_101], %180 {strides = array<i32>} : memref<4x128x1xf32, #tpu.memory_space<vmem>>, vector<1x128x1xf32>,
    %c3_102 = arith.constant 3 : index
    %c0_103 = arith.constant 0 : index
    %c0_104 = arith.constant 0 : index
    %181 = vector.load %arg11[%c3_102, %c0_103, %c0_104] : memref<4x128x16xf32, #tpu.memory_space<vmem>>, vector<1x128x16xf32>
    %182 = vector.shape_cast %181 : vector<1x128x16xf32> to vector<128x16xf32>
    %183 = vector.broadcast %168 : vector<128x1xf32> to vector<128x16xf32>
    %184 = arith.mulf %183, %182 : vector<128x16xf32>
    %185 = arith.truncf %171 : vector<128x128xf32> to vector<128x128xbf16>
    %186 = vector.extract_strided_slice %14 {offsets = [0, 48], sizes = [128, 16], strides = [1, 1]} : vector<128x128xbf16> to vector<128x16xbf16>
    %cst_105 = arith.constant dense<0.000000e+00> : vector<128x16xf32>
    %187 = tpu.matmul %185, %186, %cst_105 {dimension_numbers = #tpu.dot_dimension_numbers<[1], [0], [0], [1], [0, 0, 1, 1], [], []>} : vector<128x128xbf16>, vector<128x16xbf16>, vector<128x16xf32> -> vector<128x16xf32>
    %188 = arith.addf %184, %187 : vector<128x16xf32>
    %c3_106 = arith.constant 3 : index
    %c0_107 = arith.constant 0 : index
    %c0_108 = arith.constant 0 : index
    %189 = vector.load %arg11[%c3_106, %c0_107, %c0_108] : memref<4x128x16xf32, #tpu.memory_space<vmem>>, vector<1x128x16xf32>
    %190 = vector.shape_cast %189 : vector<1x128x16xf32> to vector<128x16xf32>
    %191 = vector.shape_cast %188 : vector<128x16xf32> to vector<1x128x16xf32>
    tpu.vector_store %arg11[%c3_106, %c0_107, %c0_108], %191 {strides = array<i32>} : memref<4x128x16xf32, #tpu.memory_space<vmem>>, vector<1x128x16xf32>,
    %c3_109 = arith.constant 3 : index
    %c0_110 = arith.constant 0 : index
    %c0_111 = arith.constant 0 : index
    %192 = vector.load %arg8[%c3_109, %c0_110, %c0_111] : memref<4x128x1xf32, #tpu.memory_space<vmem>>, vector<1x128x1xf32>
    %193 = vector.shape_cast %192 : vector<1x128x1xf32> to vector<128x1xf32>
    %194 = vector.shape_cast %166 : vector<128x1xf32> to vector<1x128x1xf32>
    tpu.vector_store %arg8[%c3_109, %c0_110, %c0_111], %194 {strides = array<i32>} : memref<4x128x1xf32, #tpu.memory_space<vmem>>, vector<1x128x1xf32>,
    %c1_i32 = arith.constant 1 : i32
    %195 = arith.cmpi eq, %arg1, %c1_i32 : i32
    %196 = arith.extui %195 : i1 to i32
    %c0_i32_112 = arith.constant 0 : i32
    %197 = arith.cmpi ne, %196, %c0_i32_112 : i32
    scf.if %197 {
      %c0_113 = arith.constant 0 : index
      %c0_114 = arith.constant 0 : index
      %c0_115 = arith.constant 0 : index
      %198 = vector.load %arg9[%c0_113, %c0_114, %c0_115] : memref<4x128x1xf32, #tpu.memory_space<vmem>>, vector<1x128x1xf32>
      %199 = vector.shape_cast %198 : vector<1x128x1xf32> to vector<128x1xf32>
      %200 = tpu.reciprocal %199 {approx = true} : vector<128x1xf32> -> vector<128x1xf32>
      %c0_116 = arith.constant 0 : index
      %c0_117 = arith.constant 0 : index
      %c0_118 = arith.constant 0 : index
      %201 = vector.load %arg11[%c0_116, %c0_117, %c0_118] : memref<4x128x16xf32, #tpu.memory_space<vmem>>, vector<1x128x16xf32>
      %202 = vector.shape_cast %201 : vector<1x128x16xf32> to vector<128x16xf32>
      %203 = vector.broadcast %200 : vector<128x1xf32> to vector<128x16xf32>
      %204 = arith.mulf %202, %203 : vector<128x16xf32>
      %c1_119 = arith.constant 1 : index
      %c0_120 = arith.constant 0 : index
      %c0_121 = arith.constant 0 : index
      %205 = vector.load %arg9[%c1_119, %c0_120, %c0_121] : memref<4x128x1xf32, #tpu.memory_space<vmem>>, vector<1x128x1xf32>
      %206 = vector.shape_cast %205 : vector<1x128x1xf32> to vector<128x1xf32>
      %207 = tpu.reciprocal %206 {approx = true} : vector<128x1xf32> -> vector<128x1xf32>
      %c1_122 = arith.constant 1 : index
      %c0_123 = arith.constant 0 : index
      %c0_124 = arith.constant 0 : index
      %208 = vector.load %arg11[%c1_122, %c0_123, %c0_124] : memref<4x128x16xf32, #tpu.memory_space<vmem>>, vector<1x128x16xf32>
      %209 = vector.shape_cast %208 : vector<1x128x16xf32> to vector<128x16xf32>
      %210 = vector.broadcast %207 : vector<128x1xf32> to vector<128x16xf32>
      %211 = arith.mulf %209, %210 : vector<128x16xf32>
      %c2_125 = arith.constant 2 : index
      %c0_126 = arith.constant 0 : index
      %c0_127 = arith.constant 0 : index
      %212 = vector.load %arg9[%c2_125, %c0_126, %c0_127] : memref<4x128x1xf32, #tpu.memory_space<vmem>>, vector<1x128x1xf32>
      %213 = vector.shape_cast %212 : vector<1x128x1xf32> to vector<128x1xf32>
      %214 = tpu.reciprocal %213 {approx = true} : vector<128x1xf32> -> vector<128x1xf32>
      %c2_128 = arith.constant 2 : index
      %c0_129 = arith.constant 0 : index
      %c0_130 = arith.constant 0 : index
      %215 = vector.load %arg11[%c2_128, %c0_129, %c0_130] : memref<4x128x16xf32, #tpu.memory_space<vmem>>, vector<1x128x16xf32>
      %216 = vector.shape_cast %215 : vector<1x128x16xf32> to vector<128x16xf32>
      %217 = vector.broadcast %214 : vector<128x1xf32> to vector<128x16xf32>
      %218 = arith.mulf %216, %217 : vector<128x16xf32>
      %c3_131 = arith.constant 3 : index
      %c0_132 = arith.constant 0 : index
      %c0_133 = arith.constant 0 : index
      %219 = vector.load %arg9[%c3_131, %c0_132, %c0_133] : memref<4x128x1xf32, #tpu.memory_space<vmem>>, vector<1x128x1xf32>
      %220 = vector.shape_cast %219 : vector<1x128x1xf32> to vector<128x1xf32>
      %221 = tpu.reciprocal %220 {approx = true} : vector<128x1xf32> -> vector<128x1xf32>
      %c3_134 = arith.constant 3 : index
      %c0_135 = arith.constant 0 : index
      %c0_136 = arith.constant 0 : index
      %222 = vector.load %arg11[%c3_134, %c0_135, %c0_136] : memref<4x128x16xf32, #tpu.memory_space<vmem>>, vector<1x128x16xf32>
      %223 = vector.shape_cast %222 : vector<1x128x16xf32> to vector<128x16xf32>
      %224 = vector.broadcast %221 : vector<128x1xf32> to vector<128x16xf32>
      %225 = arith.mulf %223, %224 : vector<128x16xf32>
      %cst_137 = arith.constant 0.000000e+00 : f32
      %226 = vector.broadcast %cst_137 : f32 to vector<128x64xf32>
      %227 = tpu.concatenate %204, %211, %218, %225, %226 in 1 : vector<128x16xf32>, vector<128x16xf32>, vector<128x16xf32>, vector<128x16xf32>, vector<128x64xf32> -> vector<128x128xf32>
      %c8 = arith.constant 8 : index
      %c0_138 = arith.constant 0 : index
      %228 = vector.load %arg6[%c8, %c0_138] : memref<9x128xf32, #tpu.memory_space<vmem>>, vector<1x128xf32>
      %229 = vector.broadcast %228 : vector<1x128xf32> to vector<128x128xf32>
      %230 = arith.addf %227, %229 : vector<128x128xf32>
      %cst_139 = arith.constant 0.000000e+00 : f32
      %231 = vector.broadcast %cst_139 : f32 to vector<128x128xf32>
      %232 = arith.cmpf ogt, %230, %231 : vector<128x128xf32>
      %233 = math.exp %230 : vector<128x128xf32>
      %cst_140 = arith.constant 1.000000e+00 : f32
      %234 = vector.broadcast %cst_140 : f32 to vector<128x128xf32>
      %235 = arith.subf %233, %234 : vector<128x128xf32>
      %236 = arith.select %232, %230, %235 : vector<128x128xi1>, vector<128x128xf32>
      %237 = arith.truncf %236 : vector<128x128xf32> to vector<128x128xbf16>
      %c0_141 = arith.constant 0 : index
      %c0_142 = arith.constant 0 : index
      %238 = vector.load %arg7[%c0_141, %c0_142] : memref<128x128xbf16, #tpu.memory_space<vmem>>, vector<128x128xbf16>
      tpu.vector_store %arg7[%c0_141, %c0_142], %237 {strides = array<i32>} : memref<128x128xbf16, #tpu.memory_space<vmem>>, vector<128x128xbf16>,
    } else {
    }
    return
  }
  func.func @transform_0(%arg0: i32, %arg1: i32) -> (i32, i32) {
    %c0_i32 = arith.constant 0 : i32
    %c0_i32_0 = arith.constant 0 : i32
    return %arg0, %c0_i32 : i32, i32
  }
  func.func @transform_1(%arg0: i32, %arg1: i32) -> (i32, i32) {
    %c0_i32 = arith.constant 0 : i32
    %c0_i32_0 = arith.constant 0 : i32
    return %arg1, %c0_i32 : i32, i32
  }
  func.func @transform_2(%arg0: i32, %arg1: i32) -> (i32, i32) {
    %c0_i32 = arith.constant 0 : i32
    return %arg0, %arg1 : i32, i32
  }
  func.func @transform_3(%arg0: i32, %arg1: i32) -> (i32, i32) {
    %c0_i32 = arith.constant 0 : i32
    %c0_i32_0 = arith.constant 0 : i32
    %c0_i32_1 = arith.constant 0 : i32
    return %c0_i32, %c0_i32_0 : i32, i32
  }
  func.func @transform_4(%arg0: i32, %arg1: i32) -> (i32, i32) {
    %c0_i32 = arith.constant 0 : i32
    %c0_i32_0 = arith.constant 0 : i32
    %c0_i32_1 = arith.constant 0 : i32
    return %c0_i32, %c0_i32_0 : i32, i32
  }
  func.func @transform_5(%arg0: i32, %arg1: i32) -> (i32, i32) {
    %c0_i32 = arith.constant 0 : i32
    %c0_i32_0 = arith.constant 0 : i32
    return %arg0, %c0_i32 : i32, i32
  }
}

</mosaic_0001>

<bundles_post_ra>
// kernel: tpu_custom_call.1
= control target key start
LH: loop header
LB: loop body
LE: loop exit
PB: predicated region body
PF: predicated region fallthrough
CT: control target
= control target key end

     0   :  { %s11013_s0 = inlined_call_operand.hbm [shape: bf16[256,16], index: 0, kind: input, shape index: {}]   ;;  %s11014_s1 = inlined_call_operand.hbm [shape: bf16[256,16], index: 1, kind: input, shape index: {}]   ;;  %s11015_s2 = inlined_call_operand.hbm [shape: s8[256,256], index: 2, kind: input, shape index: {}]   ;;  %s11016_s3 = inlined_call_operand.hbm [shape: bf16[16,128], index: 3, kind: input, shape index: {}]   ;;  %s11017_s4 = inlined_call_operand.hbm [shape: f32[9,128], index: 4, kind: input, shape index: {}]   ;;  %s11018_s5 = inlined_call_operand.hbm [shape: bf16[256,128], index: 5, kind: output, shape index: {}]  }
   0x1   :  { %11237 = sst [smem:[#allocation196_spill]] %s11013_s0 }
   0x2   :  { %11238 = sst [smem:[#allocation197_spill]] %s11014_s1 }
   0x3   :  { %11239 = sst [smem:[#allocation198_spill]] %s11016_s3 }
   0x4   :  { %11240 = sst [smem:[#allocation199_spill]] %s11017_s4 }
   0x5   :  { %11241 = sst [smem:[#allocation200_spill]] %s11018_s5 }
   0x6   :  { %10 = vsyncpa [#allocation7], 0 }
   0x7   :  { %12 = vsyncpa [#allocation7 + $0x1], 0 }
   0x8   :  { %13 = vsyncpa [#allocation10], 0 }
   0x9   :  { %15 = vsyncpa [#allocation10 + $0x1], 0 }
   0xa   :  { %16 = vsyncpa [#allocation13], 0 }
   0xb   :  { %17 = vsyncpa [#allocation8], 0 }
   0xc   :  { %19 = vsyncpa [#allocation8 + $0x1], 0  ;;  %s7386_s18 = smov 0   ;;  %s7388_s19 = smov 0  }
   0xd   :  { %s7390_s20 = smov 0   ;;  %s7392_s21 = smov 0  }
   0xe   :  { %s7394_s22 = smov 0   ;;  %s7396_s23 = smov 0  }
   0xf   :  { %s7398_s24 = smov 0   ;;  %s7400_s25 = smov 0  }
  0x10   :  { %s7402_s26 = smov 0   ;;  %s7404_s27 = smov 0  }
  0x11   :  { %s7406_s28 = smov 0   ;;  %s7408_s29 = smov 0  }
  0x12   :  { %s7410_s30 = smov 0   ;;  %s7412_s6 = smov 0  }
  0x13 LB: > { %11242 = sst [smem:[#allocation21_spill]] %s7289_s22  ;;  %s7455_s7 = sadd.s32 4294967295, %s7325_s6   ;;  %s7325_s6 = sphi %s7412_s6, %s25_s6   ;;  %s7321_s30 = sphi %s7410_s30, %s11795_s30   ;;  %s7317_s29 = sphi %s7408_s29, %s11794_s29   ;;  %s7313_s28 = sphi %s7406_s28, %s11793_s28   ;;  %s7309_s27 = sphi %s7404_s27, %s11792_s27   ;;  %s7305_s26 = sphi %s7402_s26, %s11791_s26   ;;  %s7301_s25 = sphi %s7400_s25, %s11790_s25   ;;  %s7297_s24 = sphi %s7398_s24, %s11789_s24   ;;  %s7293_s23 = sphi %s7396_s23, %s11782_s23   ;;  %s7289_s22 = sphi %s7394_s22, %s11781_s22   ;;  %s7285_s21 = sphi %s7392_s21, %s11780_s21   ;;  %s7281_s20 = sphi %s7390_s20, %s11788_s20   ;;  %s7277_s19 = sphi %s7388_s19, %s11787_s19   ;;  %s7273_s18 = sphi %s7386_s18, %s11786_s18  }
  0x14   : > { %11243 = sst [smem:[#allocation22_spill]] %s7293_s23  ;;  %p111_p0 = scmp.ne.s32.totalorder %s7277_s19, %s7273_s18 }
  0x15   : > { %11244 = sst [smem:[#allocation23_spill]] %s7297_s24  ;;  %p11019_p1 = scmp.eq.s32.totalorder %s7455_s7, 0 }
  0x16   : > { %11245 = sst [smem:[#allocation24_spill]] %s7309_s27  ;;  %p5860_p3 = scmp.ge.s32.totalorder %s7325_s6, 1 }
  0x17   : > { %11246 = sst [smem:[#allocation25_spill]] %s7313_s28  ;;  %p190_p4 = scmp.lt.s32.totalorder %s7325_s6, 5 }
  0x18   : > { %p7464_p5 = por %p111_p0, %p11019_p1  ;;  %s7327_s10 = smov [#allocation12]  }
  0x19   : > { %p7468_p6 = pnand %p5860_p3, %p190_p4  ;;  %s202_s11 = sshll.u32 %s7327_s10, 4  ;;  %s203_s11 = int_to_ptr.vmem [resolvable:$true] %s202_s11 }
  0x1a   : > { %s11247_s8 = scalar_select %p7464_p5, 1, 0 }
  0x1b   : > { %s11249_s9 = scalar_select %p7468_p6, 1, 0 }
  0x1c   : > { %11248 = sst [smem:[#allocation26_spill]] %s11247_s8  ;;  %p6419_p7 = pneg %p7468_p6 }
  0x1d   : > { %s11251_s3 = sld [smem:[#allocation198_spill]] }
  0x1e   : > { %p7476_p8 = pnand %p6419_p7, %p11019_p1 }
  0x20   : > { %p11035_p10 = pneg %p7476_p8 }
  0x23   : > { %s7021_s15 = scalar_lea.hbm %s11251_s3, 128 }
  0x24   : > { %p7022_p9 = scmp.ne.s32.totalorder %s11251_s3, %s7021_s15  ;;  %p7028_p13 = scmp.lt.u32.totalorder %s7021_s15, %s11251_s3 }
  0x26   : > { %p7024_p11 = pnand %p11035_p10, %p7022_p9 }
  0x28   : > { %p7025_p12 = pneg %p7024_p11 }
  0x2a   : > { %p7030_p0 = pnand %p7028_p13, %p7025_p12 }
  0x2c   : > { %7033 = shalt.err (!%p7030_p0)
}
  0x2d   : > { %s7034_s13 = scalar_lea.vmem %s203_s11, 128  ;;  %p7042_p2 = scmp.lt.s32.totalorder %s203_s11, %s203_s11 }
  0x2e   : > { %p7035_p3 = scmp.ne.s32.totalorder %s203_s11, %s7034_s13  ;;  %p7043_p1 = scmp.lt.s32.totalorder %s7034_s13, %s7034_s13 }
  0x30   : > { %p7037_p4 = pnand %p7035_p3, %p11035_p10  ;;  %p7044_p5 = por %p7043_p1, %p7042_p2 }
  0x32   : > { %p7038_p7 = pneg %p7037_p4 }
  0x34   : > { %p7045_p6 = pnand %p7044_p5, %p7038_p7 }
  0x36   : > { %7048 = shalt.err (!%p7045_p6)
}
  0x37   : > { %s11022_s14 = smov 64   ;;  %s11024_s15 = smov 4  }
  0x38   : > { %6422 = dma.hbm_to_vmem [thread:$0]  (!%p7476_p8), %s11251_s3, 128, %s203_s11, [#allocation13], %s11022_s14, %s11022_s14, %s11024_s15  }
  0x39   : > { %s34_s18 = sadd.s32 1, %s7317_s29  ;;  %p11034_p1 = scmp.eq.s32.totalorder %s7325_s6, 0 }
  0x3a   : > { %p7507_p2 = scmp.ge.s32.totalorder %s34_s18, 2  ;;  %s70_s13 = sadd.s32 1, %s7293_s23 }
  0x3b   : > { %p77_p5 = scmp.ne.s32.totalorder %s7293_s23, %s7289_s22  ;;  %p83_p6 = scmp.ne.s32.totalorder %s7289_s22, %s7285_s21 }
  0x3c   : > { %s11252_s10 = scalar_select %p7507_p2, 1, 0 }
  0x3d   : > { %s11797_s18 = smov (%p7507_p2, %s34_s18), 0  ;;  %p7522_p9 = por %p77_p5, %p11034_p1 }
  0x3e   : > { %11253 = sst [smem:[#allocation27_spill]] %s11797_s18  ;;  %p11255_p11 = scmp.eq.s32.totalorder %s7455_s7, 0 }
  0x3f   : > { %s7534_s17 = ssub.s32 %s7317_s29, %s11797_s18  ;;  %p11033_p13 = scmp.lt.s32.totalorder %s7325_s6, 4 }
  0x40   : > { %p7528_p12 = por %p83_p6, %p11255_p11  ;;  %p68_p0 = scmp.eq.s32.totalorder %s7534_s17, 0 }
  0x41   : > { %s250_s21 = sand.u32 1, %s7325_s6   ;;  %s252_s14 = sand.u32 1, %s7293_s23  }
  0x42   : > { %s11256_s11 = scalar_select %p7528_p12, 1, 0 }
  0x43   : > { %s7541_s15 = scalar_select %p68_p0, %s7293_s23, %s70_s13  }
  0x44   : > { %11257 = sst [smem:[#allocation28_spill]] %s11256_s11  ;;  %s5867_s3 = sshll.u32 %s252_s14, 6 }
  0x45   : > { %11258 = sst [smem:[#allocation29_spill]] %s7541_s15  ;;  %s5972_s5 = sshll.u32 %s7317_s29, 10 }
  0x46   : > { %s11259_s1 = sld [smem:[#allocation197_spill]]  ;;  %s254_s11 = scalar_lea.vmem [#allocation9], %s5867_s3 }
  0x47   : > { %s261_s18 = sshll.u32 %s254_s11, 4  ;;  %p7553_p3 = pnand %p11033_p13, %p7522_p9  ;;  %s7557_s18 = int_to_ptr.vmem [resolvable:$true] %s261_s18 }
  0x48   : > { %s7330_s14 = smov [#allocation14]  }
  0x49   : > { %s7559_s27 = sshll.u32 %s7330_s14, 4  ;;  %p7051_p7 = pneg %p7553_p3  ;;  %s216_s27 = int_to_ptr.vmem [resolvable:$true] %s7559_s27 }
  0x4c   : > { %s7547_s8 = scalar_lea.hbm %s11259_s1, %s5972_s5  ;;  %s7561_s5 = scalar_lea.sflag [#allocation10], %s250_s21 }
  0x4d   : > { %s7049_s28 = scalar_lea.hbm %s7547_s8, 1024  ;;  %s7054_s16 = scalar_lea.hbm %s11259_s1, 2048 }
  0x4e   : > { %p7050_p4 = scmp.ne.s32.totalorder %s7547_s8, %s7049_s28  ;;  %p7055_p9 = scmp.lt.u32.totalorder %s7547_s8, %s11259_s1 }
  0x4f   : > { %p7056_p11 = scmp.lt.u32.totalorder %s7054_s16, %s7049_s28  ;;  %p7058_p13 = scmp.lt.u32.totalorder %s7049_s28, %s7547_s8 }
  0x50   : > { %p7052_p5 = pnand %p7051_p7, %p7050_p4 }
  0x51   : > { %p7057_p0 = por %p7056_p11, %p7055_p9 }
  0x52   : > { %p7053_p6 = pneg %p7052_p5 }
  0x53   : > { %p7059_p1 = por %p7058_p13, %p7057_p0 }
  0x55   : > { %p7060_p10 = pnand %p7059_p1, %p7053_p6 }
  0x57   : > { %7063 = shalt.err (!%p7060_p10)
}
  0x58   : > { %s7064_s21 = scalar_lea.vmem %s7557_s18, 1024  ;;  %s7331_s14 = smov [#allocation9]  }
  0x59   : > { %p7065_p4 = scmp.ne.s32.totalorder %s7557_s18, %s7064_s21  ;;  %s7069_s3 = sshll.u32 %s7331_s14, 4  ;;  %s7070_s3 = int_to_ptr.vmem [resolvable:$false] %s7069_s3 }
  0x5a   : > { %s7071_s15 = scalar_lea.vmem %s7070_s3, 2048  ;;  %p7072_p2 = scmp.lt.s32.totalorder %s7557_s18, %s7070_s3 }
  0x5b   : > { %p7067_p5 = pnand %p7065_p4, %p7051_p7  ;;  %p7073_p9 = scmp.lt.s32.totalorder %s7071_s15, %s7064_s21 }
  0x5d   : > { %p7068_p12 = pneg %p7067_p5  ;;  %p7074_p11 = por %p7073_p9, %p7072_p2 }
  0x5f   : > { %p7075_p13 = pnand %p7074_p11, %p7068_p12 }
  0x61   : > { %7078 = shalt.err (!%p7075_p13)
}
  0x62   : > { %s11261_s28 = smov 4   ;;  %s11262_s13 = smov 64  }
  0x63   : > { %6432 = dma.hbm_to_vmem [thread:$0]  (!%p7553_p3), %s7547_s8, 1024, %s7557_s18, %s7561_s5, %s11262_s13, %s11262_s13, %s11261_s28  }
  0x64   : > { %s11263_s4 = sld [smem:[#allocation199_spill]]  ;;  %p11264_p1 = pneg %p7476_p8 }
  0x6a   : > { %s7079_s14 = scalar_lea.hbm %s11263_s4, 256 }
  0x6b   : > { %p7080_p10 = scmp.ne.s32.totalorder %s11263_s4, %s7079_s14  ;;  %p7086_p7 = scmp.lt.u32.totalorder %s7079_s14, %s11263_s4 }
  0x6d   : > { %p7082_p2 = pnand %p7080_p10, %p11264_p1 }
  0x6f   : > { %p7083_p12 = pneg %p7082_p2 }
  0x71   : > { %p7088_p6 = pnand %p7086_p7, %p7083_p12 }
  0x73   : > { %7091 = shalt.err (!%p7088_p6)
}
  0x74   : > { %s7092_s8 = scalar_lea.vmem %s216_s27, 256  ;;  %p11265_p0 = pmov %p11264_p1 }
  0x75   : > { %p7093_p3 = scmp.ne.s32.totalorder %s216_s27, %s7092_s8  ;;  %p7100_p9 = scmp.lt.s32.totalorder %s216_s27, %s216_s27 }
  0x76   : > { %p7101_p11 = scmp.lt.s32.totalorder %s7092_s8, %s7092_s8 }
  0x77   : > { %p7095_p4 = pnand %p7093_p3, %p11265_p0 }
  0x78   : > { %p7102_p13 = por %p7101_p11, %p7100_p9 }
  0x79   : > { %p7096_p5 = pneg %p7095_p4 }
  0x7b   : > { %p7103_p1 = pnand %p7102_p13, %p7096_p5 }
  0x7d   : > { %7106 = shalt.err (!%p7103_p1)
}
  0x7e   : > { %s11038_s18 = smov 128   ;;  %s11039_s16 = smov 8  }
  0x7f   : > { %6425 = dma.hbm_to_vmem [thread:$0]  (!%p7476_p8), %s11263_s4, 256, %s216_s27, [#allocation13], %s11038_s18, %s11038_s18, %s11039_s16  }
  0x80   : > { %s5859_s21 = sadd.s32 4294967294, %s7325_s6   ;;  %s37_s3 = sadd.s32 1, %s7321_s30 }
  0x81   : > { %s44_s22 = sadd.s32 1, %s7305_s26  ;;  %p11266_p10 = scmp.ne.s32.totalorder %s11252_s10, 0 }
  0x82   : > { %p51_p2 = scmp.ne.s32.totalorder %s7305_s26, %s7301_s25  ;;  %p57_p12 = scmp.ne.s32.totalorder %s7301_s25, %s7297_s24 }
  0x83   : > { %s11799_s3 = smov (!%p11266_p10, %s37_s3), %s7321_s30  ;;  %p183_p6 = scmp.eq.s32.totalorder %s5859_s21, 3 }
  0x84   : > { %p39_p7 = scmp.ge.s32.totalorder %s11799_s3, 2  ;;  %p11267_p3 = scmp.eq.s32.totalorder %s7325_s6, 0 }
  0x85   : > { %p11269_p4 = scmp.eq.s32.totalorder %s7455_s7, 0  ;;  %p11272_p5 = scmp.eq.s32.totalorder %s7455_s7, 3 }
  0x86   : > { %p7628_p0 = por %p11267_p3, %p51_p2  ;;  %s11801_s3 = smov (%p39_p7, %s11799_s3), 0 }
  0x87   : > { %p7634_p8 = por %p11269_p4, %p57_p12  ;;  %11271 = sst [smem:[#allocation30_spill]] %s11801_s3 }
  0x88   : > { %p7642_p9 = por %p11272_p5, %p51_p2  ;;  %p7646_p11 = por %p183_p6, %p57_p12 }
  0x89   : > { %s11270_s27 = scalar_select %p7634_p8, 1, 0 }
  0x8a   : > { %s11273_s10 = scalar_select %p7642_p9, 1, 0 }
  0x8b   : > { %s11274_s15 = scalar_select %p7646_p11, 1, 0 }
  0x8c   : > { %s41_s8 = ssub.s32 %s7321_s30, %s11801_s3  ;;  %s229_s11 = sand.u32 1, %s7305_s26  }
  0x8d   : > { %11275 = sst [smem:[#allocation31_spill]] %s11274_s15  ;;  %p42_p13 = scmp.eq.s32.totalorder %s41_s8, 0 }
  0x8e   : > { %s95_s14 = sor.u32 %s7534_s17, %s41_s8  ;;  %s5864_s16 = sshll.u32 %s229_s11, 6 }
  0x8f   : > { %p7654_p1 = scmp.eq.s32.totalorder %s95_s14, 0  ;;  %s5971_s1 = sshll.u32 %s7321_s30, 10 }
  0x90   : > { %s7659_s18 = scalar_select %p42_p13, %s7305_s26, %s44_s22  }
  0x91   : > { %s11278_s0 = sld [smem:[#allocation196_spill]]  ;;  %s233_s3 = scalar_lea.vmem [#allocation6], %s5864_s16 }
  0x92   : > { %11277 = sst [smem:[#allocation32_spill]] %s7659_s18  ;;  %s240_s15 = sshll.u32 %s233_s3, 4  ;;  %s7675_s15 = int_to_ptr.vmem [resolvable:$true] %s240_s15 }
  0x93   : > { %p11279_p10 = scmp.lt.s32.totalorder %s7325_s6, 4  ;;  %s7677_s22 = scalar_lea.sflag [#allocation7], %s229_s11 }
  0x95   : > { %p7671_p2 = pnand %p11279_p10, %p7628_p0 }
  0x97   : > { %s7665_s24 = scalar_lea.hbm %s11278_s0, %s5971_s1  ;;  %p7109_p7 = pneg %p7671_p2 }
  0x98   : > { %s7107_s1 = scalar_lea.hbm %s7665_s24, 1024  ;;  %s7112_s16 = scalar_lea.hbm %s11278_s0, 2048 }
  0x99   : > { %p7108_p12 = scmp.ne.s32.totalorder %s7665_s24, %s7107_s1  ;;  %p7113_p0 = scmp.lt.u32.totalorder %s7665_s24, %s11278_s0 }
  0x9a   : > { %p7114_p4 = scmp.lt.u32.totalorder %s7112_s16, %s7107_s1  ;;  %p7116_p13 = scmp.lt.u32.totalorder %s7107_s1, %s7665_s24 }
  0x9b   : > { %p7110_p6 = pnand %p7109_p7, %p7108_p12 }
  0x9c   : > { %p7115_p5 = por %p7114_p4, %p7113_p0 }
  0x9d   : > { %p7111_p3 = pneg %p7110_p6 }
  0x9e   : > { %p7117_p10 = por %p7116_p13, %p7115_p5 }
  0xa0   : > { %p7118_p11 = pnand %p7117_p10, %p7111_p3 }
  0xa2   : > { %7121 = shalt.err (!%p7118_p11)
}
  0xa3   : > { %s7122_s8 = scalar_lea.vmem %s7675_s15, 1024  ;;  %s7334_s11 = smov [#allocation6]  }
  0xa4   : > { %p7123_p12 = scmp.ne.s32.totalorder %s7675_s15, %s7122_s8  ;;  %s7127_s14 = sshll.u32 %s7334_s11, 4  ;;  %s7128_s14 = int_to_ptr.vmem [resolvable:$false] %s7127_s14 }
  0xa5   : > { %s7129_s4 = scalar_lea.vmem %s7128_s14, 2048  ;;  %p7130_p8 = scmp.lt.s32.totalorder %s7675_s15, %s7128_s14 }
  0xa6   : > { %p7125_p6 = pnand %p7123_p12, %p7109_p7  ;;  %p7131_p0 = scmp.lt.s32.totalorder %s7129_s4, %s7122_s8 }
  0xa8   : > { %p7126_p9 = pneg %p7125_p6  ;;  %p7132_p4 = por %p7131_p0, %p7130_p8 }
  0xaa   : > { %p7133_p5 = pnand %p7132_p4, %p7126_p9 }
  0xac   : > { %7136 = shalt.err (!%p7133_p5)
}
  0xad   : > { %6429 = dma.hbm_to_vmem [thread:$0]  (!%p7671_p2), %s7665_s24, 1024, %s7675_s15, %s7677_s22, %s11262_s13, %s11262_s13, %s11261_s28  }
  0xae   : > { %s98_s1 = sadd.s32 1, %s7281_s20  ;;  %p105_p8 = scmp.ne.s32.totalorder %s7281_s20, %s7277_s19 }
  0xaf   : > { %s7714_s17 = scalar_select %p7654_p1, %s7281_s20, %s98_s1  }
  0xb0   : > { %p11281_p9 = scmp.eq.s32.totalorder %s7325_s6, 0  ;;  %s273_s23 = sand.u32 1, %s7281_s20  }
  0xb1   : > { %s5870_s16 = sshll.u32 %s273_s23, 5  ;;  %s5973_s3 = sshll.u32 %s7321_s30, 3 }
  0xb2   : > { %p107_p11 = por %p105_p8, %p11281_p9  ;;  %s281_s12 = sadd.s32 %s7317_s29, %s5973_s3 }
  0xb3   : > { %s5873_s8 = sshll.u32 %s281_s12, 7  ;;  %s275_s11 = scalar_lea.vmem [#allocation11], %s5870_s16 }
  0xb4   : > { %s284_s14 = sshll.u32 %s275_s11, 4  ;;  %s7724_s18 = scalar_lea.hbm %s11015_s2, %s5873_s8  ;;  %s7726_s14 = int_to_ptr.vmem [resolvable:$true] %s284_s14 }
  0xb5   : > { %p11282_p1 = scmp.lt.s32.totalorder %s7325_s6, 4  ;;  %s7137_s28 = scalar_lea.hbm %s7724_s18, 512 }
  0xb6   : > { %p7138_p7 = scmp.ne.s32.totalorder %s7724_s18, %s7137_s28  ;;  %s7142_s15 = scalar_lea.hbm %s11015_s2, 2048 }
  0xb7   : > { %p7730_p2 = pnand %p11282_p1, %p107_p11  ;;  %p7143_p12 = scmp.lt.u32.totalorder %s7724_s18, %s11015_s2 }
  0xb8   : > { %p7144_p6 = scmp.lt.u32.totalorder %s7142_s15, %s7137_s28  ;;  %p7146_p4 = scmp.lt.u32.totalorder %s7137_s28, %s7724_s18 }
  0xb9   : > { %p7139_p3 = pneg %p7730_p2 }
  0xba   : > { %p7145_p0 = por %p7144_p6, %p7143_p12 }
  0xbb   : > { %p7140_p13 = pnand %p7139_p3, %p7138_p7 }
  0xbc   : > { %p7147_p5 = por %p7146_p4, %p7145_p0 }
  0xbd   : > { %p7141_p10 = pneg %p7140_p13 }
  0xbf   : > { %p7148_p8 = pnand %p7147_p5, %p7141_p10 }
  0xc1   : > { %7151 = shalt.err (!%p7148_p8)
}
  0xc2   : > { %s7152_s1 = scalar_lea.vmem %s7726_s14, 512  ;;  %s7335_s23 = smov [#allocation11]  }
  0xc3   : > { %p7153_p9 = scmp.ne.s32.totalorder %s7726_s14, %s7152_s1  ;;  %s7157_s16 = sshll.u32 %s7335_s23, 4  ;;  %s7158_s16 = int_to_ptr.vmem [resolvable:$false] %s7157_s16 }
  0xc4   : > { %s7159_s3 = scalar_lea.vmem %s7158_s16, 1024  ;;  %p7160_p7 = scmp.lt.s32.totalorder %s7726_s14, %s7158_s16 }
  0xc5   : > { %p7155_p11 = pnand %p7153_p9, %p7139_p3  ;;  %p7161_p13 = scmp.lt.s32.totalorder %s7159_s3, %s7152_s1 }
  0xc7   : > { %p7156_p1 = pneg %p7155_p11  ;;  %p7162_p12 = por %p7161_p13, %p7160_p7 }
  0xc9   : > { %p7163_p6 = pnand %p7162_p12, %p7156_p1 }
  0xcb   : > { %7166 = shalt.err (!%p7163_p6)
}
  0xcc   : > { %s7336_s12 = smov 256   ;;  %s11284_s8 = smov 8  }
  0xcd   : > { %s11285_s11 = smov 128   ;;  %p11286_p3 = scmp.ne.s32.totalorder %s11249_s9, 0 }
  0xce   : > { %6435 = dma.hbm_to_vmem [thread:$0]  (!%p7730_p2), %s7724_s18, 512, %s7726_s14, %s7561_s5, %s7336_s12, %s11285_s11, %s11284_s8  }
  0xcf   : > { %296 = sbr.rel (%p11286_p3) target bundleno = 2707 (0xa93), region = 40 }
  0xd6   : > { %s7765_s4 = sand.u32 1, %s7301_s25   ;;  %p11287_p10 = scmp.ne.s32.totalorder %s11270_s27, 0 }
  0xd7   : > { %s5875_s28 = sshll.u32 %s7765_s4, 6  ;;  %s299_s0 = scalar_lea.sflag [#allocation7], %s7765_s4 }
  0xd8   : > { %s7769_s13 = scalar_lea.vmem [#allocation6], %s5875_s28 }
  0xd9   : > { %7252 = dma.done.wait (%p11287_p10), %s299_s0, 1024  }
  0xda   : > { %7254 = vsyncadd (%p11287_p10), %s299_s0, 4294966272  ;;  %s11288_s5 = sld [smem:[#allocation21_spill]]  ;;  %s11289_s18 = sld [smem:[#allocation28_spill]] }
  0xdb   : > { %s307_s9 = sand.u32 1, %s7455_s7  }
  0xdc   : > { %s308_s15 = scalar_lea.sflag [#allocation10], %s307_s9 }
  0xe0   : > { %s309_s14 = sand.u32 1, %s11288_s5   ;;  %p11290_p2 = scmp.ne.s32.totalorder %s11289_s18, 0 }
  0xe1   : > { %s5876_s24 = sshll.u32 %s309_s14, 6 }
  0xe2   : > { %s7777_s21 = scalar_lea.vmem [#allocation9], %s5876_s24 }
  0xe3   : > { %7256 = dma.done.wait (%p11290_p2), %s308_s15, 1024  }
  0xe4   : > { %7258 = vsyncadd (%p11290_p2), %s308_s15, 4294966272  ;;  %s11291_s22 = sld [smem:[#allocation26_spill]]  ;;  %s318_s1 = sand.u32 1, %s7277_s19  }
  0xe5   : > { %s5877_s23 = sshll.u32 %s318_s1, 5 }
  0xe6   : > { %s7784_s27 = scalar_lea.vmem [#allocation11], %s5877_s23 }
  0xea   : > { %p11292_p0 = scmp.ne.s32.totalorder %s11291_s22, 0 }
  0xec   : > { %7260 = dma.done.wait (%p11292_p0), %s308_s15, 512  }
  0xed   : > { %7262 = vsyncadd (%p11292_p0), %s308_s15, 4294966784  ;;  %p11293_p4 = scmp.eq.s32.totalorder %s7455_s7, 0 }
  0xef   : > { %7264 = dma.done.wait (%p11293_p4), [#allocation13], 384   ;;  %p11294_p5 = pmov %p11293_p4 }
  0xf0   : > { %s7794_s16 = scalar_lea.vmem [#allocation15], %s5875_s28  ;;  %s11295_s3 = sld [smem:[#allocation24_spill]] }
  0xf1   : > { %7266 = vsyncadd (%p11294_p5), [#allocation13], 4294966912 }
  0xf6   : > { %p5881_p8 = scmp.ne.s32.totalorder %s11295_s3, 0 }
  0xf7   : > { %v7797_v0 = vld [vmem:[#allocation12] sm:$0xff] (!%p5881_p8)   ;;  %vm503_vm0 = vcmask (!%p5881_p8), 130048   ;;  %v7337_v1 = vmov (!%p5881_p8), 0.0   ;;  %v6585_v3 = vld [vmem:[%s7769_s13 + $0x8] sm:$0xff] (!%p5881_p8)   ;;  %v6586_v4 = vld [vmem:[%s7769_s13 + $0x10] sm:$0xff] (!%p5881_p8)   ;;  %vm374_vm1 = vcmask (!%p5881_p8), 7168  }
  0xf8   : > { %373 = sbr.rel (%p5881_p8) target bundleno = 887 (0x377), region = 64  ;;  %6154 = vmatprep.subr.bf16.mxu0 (!%p5881_p8), %v7797_v0  ;;  %504 = vst.msk [vmem:[#allocation5] sm:$0xff] (!%p5881_p8), %vm503_vm0, %v7337_v1  ;;  %505 = vst.msk [vmem:[#allocation5 + $0x8] sm:$0xff] (!%p5881_p8), %vm503_vm0, %v7337_v1  ;;  %v6584_v2 = vld [vmem:[%s7769_s13] sm:$0xff] (!%p5881_p8)   ;;  %v6587_v5 = vld [vmem:[%s7769_s13 + $0x18] sm:$0xff] (!%p5881_p8)   ;;  %v7338_v11 = vmov (!%p5881_p8), -inf  }
  0xf9   : > { %506 = vst.msk [vmem:[#allocation5 + $0x10] sm:$0xff] (!%p5881_p8), %vm503_vm0, %v7337_v1  ;;  %507 = vst.msk [vmem:[#allocation5 + $0x18] sm:$0xff] (!%p5881_p8), %vm503_vm0, %v7337_v1  ;;  %6155 = vmatpush3.bf16.msra.mxu0 (!%p5881_p8), %v7797_v0  ;;  %6156 = vmatprep.mubr.msk.bf16.mxu0 (!%p5881_p8), %vm503_vm0, %v6584_v2  ;;  %v6588_v6 = vld [vmem:[%s7769_s13 + $0x20] sm:$0xff] (!%p5881_p8)   ;;  %v6589_v7 = vld [vmem:[%s7769_s13 + $0x28] sm:$0xff] (!%p5881_p8)   ;;  %s7339_s7 = smov (!%p5881_p8), 126   ;;  %s7340_s12 = smov (!%p5881_p8), 127  }
  0xfa   : > { %508 = vst.msk [vmem:[#allocation5 + $0x20] sm:$0xff] (!%p5881_p8), %vm503_vm0, %v7337_v1  ;;  %509 = vst.msk [vmem:[#allocation5 + $0x28] sm:$0xff] (!%p5881_p8), %vm503_vm0, %v7337_v1  ;;  %v6590_v8 = vld [vmem:[%s7769_s13 + $0x30] sm:$0xff] (!%p5881_p8)   ;;  %v6591_v9 = vld [vmem:[%s7769_s13 + $0x38] sm:$0xff] (!%p5881_p8)   ;;  %s7341_s8 = smov (!%p5881_p8), 125  }
  0xfb   : > { %510 = vst.msk [vmem:[#allocation5 + $0x30] sm:$0xff] (!%p5881_p8), %vm503_vm0, %v7337_v1  ;;  %511 = vst.msk [vmem:[#allocation5 + $0x38] sm:$0xff] (!%p5881_p8), %vm503_vm0, %v7337_v1  ;;  %v753_v10 = vld [vmem:[#allocation14 + $0x4] sm:$0xf] (!%p5881_p8) }
  0xfc   : > { %512 = vst.msk [vmem:[#allocation5 + $0x40] sm:$0xff] (!%p5881_p8), %vm503_vm0, %v7337_v1  ;;  %513 = vst.msk [vmem:[#allocation5 + $0x48] sm:$0xff] (!%p5881_p8), %vm503_vm0, %v7337_v1  ;;  %6157 = vmatmul.mubr.msk.bf16.vlgmr.msra.gmra.mrb[0].mxu0 (!%p5881_p8), %vm503_vm0, %v6585_v3  ;;  %6172 = vmatprep.subr.mxu1 (!%p5881_p8), %v753_v10 }
  0xfd   : > { %514 = vst.msk [vmem:[#allocation5 + $0x50] sm:$0xff] (!%p5881_p8), %vm503_vm0, %v7337_v1  ;;  %515 = vst.msk [vmem:[#allocation5 + $0x58] sm:$0xff] (!%p5881_p8), %vm503_vm0, %v7337_v1  ;;  %6160 = vmatprep.mubr.msk.bf16.mxu0 (!%p5881_p8), %vm503_vm0, %v6586_v4  ;;  %6173 = vmatpush3.xpose.msra.mxu1 (!%p5881_p8), %v753_v10 }
  0xfe   : > { %516 = vst.msk [vmem:[#allocation5 + $0x60] sm:$0xff] (!%p5881_p8), %vm503_vm0, %v7337_v1  ;;  %517 = vst.msk [vmem:[#allocation5 + $0x68] sm:$0xff] (!%p5881_p8), %vm503_vm0, %v7337_v1 }
  0xff   : > { %518 = vst.msk [vmem:[#allocation5 + $0x70] sm:$0xff] %vm503_vm0, %v7337_v1  ;;  %519 = vst.msk [vmem:[#allocation5 + $0x78] sm:$0xff] %vm503_vm0, %v7337_v1 }
 0x100   : > { %520 = vst.msk [vmem:[#allocation5 + $0x80] sm:$0xff] %vm503_vm0, %v7337_v1  ;;  %521 = vst.msk [vmem:[#allocation5 + $0x88] sm:$0xff] %vm503_vm0, %v7337_v1 }
 0x101   : > { %522 = vst.msk [vmem:[#allocation5 + $0x90] sm:$0xff] %vm503_vm0, %v7337_v1  ;;  %523 = vst.msk [vmem:[#allocation5 + $0x98] sm:$0xff] %vm503_vm0, %v7337_v1 }
 0x102   : > { %524 = vst.msk [vmem:[#allocation5 + $0xa0] sm:$0xff] %vm503_vm0, %v7337_v1  ;;  %525 = vst.msk [vmem:[#allocation5 + $0xa8] sm:$0xff] %vm503_vm0, %v7337_v1 }
 0x103   : > { %526 = vst.msk [vmem:[#allocation5 + $0xb0] sm:$0xff] %vm503_vm0, %v7337_v1  ;;  %527 = vst.msk [vmem:[#allocation5 + $0xb8] sm:$0xff] %vm503_vm0, %v7337_v1 }
 0x104   : > { %528 = vst.msk [vmem:[#allocation5 + $0xc0] sm:$0xff] %vm503_vm0, %v7337_v1  ;;  %529 = vst.msk [vmem:[#allocation5 + $0xc8] sm:$0xff] %vm503_vm0, %v7337_v1  ;;  %6161 = vmatmul.mubr.msk.bf16.gmra.mrb[4].mxu0 %vm503_vm0, %v6587_v5 }
 0x105   : > { %530 = vst.msk [vmem:[#allocation5 + $0xd0] sm:$0xff] %vm503_vm0, %v7337_v1  ;;  %531 = vst.msk [vmem:[#allocation5 + $0xd8] sm:$0xff] %vm503_vm0, %v7337_v1  ;;  %6164 = vmatprep.mubr.msk.bf16.mxu0 %vm503_vm0, %v6588_v6 }
 0x106   : > { %532 = vst.msk [vmem:[#allocation5 + $0xe0] sm:$0xff] %vm503_vm0, %v7337_v1  ;;  %533 = vst.msk [vmem:[#allocation5 + $0xe8] sm:$0xff] %vm503_vm0, %v7337_v1 }
 0x107   : > { %534 = vst.msk [vmem:[#allocation5 + $0xf0] sm:$0xff] %vm503_vm0, %v7337_v1  ;;  %535 = vst.msk [vmem:[#allocation5 + $0xf8] sm:$0xff] %vm503_vm0, %v7337_v1 }
 0x108   : > { %536 = vst.msk [vmem:[#allocation5 + $0x100] sm:$0xff] %vm503_vm0, %v7337_v1  ;;  %537 = vst.msk [vmem:[#allocation5 + $0x108] sm:$0xff] %vm503_vm0, %v7337_v1 }
 0x109   : > { %538 = vst.msk [vmem:[#allocation5 + $0x110] sm:$0xff] %vm503_vm0, %v7337_v1  ;;  %539 = vst.msk [vmem:[#allocation5 + $0x118] sm:$0xff] %vm503_vm0, %v7337_v1 }
 0x10a   : > { %540 = vst.msk [vmem:[#allocation5 + $0x120] sm:$0xff] %vm503_vm0, %v7337_v1  ;;  %541 = vst.msk [vmem:[#allocation5 + $0x128] sm:$0xff] %vm503_vm0, %v7337_v1 }
 0x10b   : > { %542 = vst.msk [vmem:[#allocation5 + $0x130] sm:$0xff] %vm503_vm0, %v7337_v1  ;;  %543 = vst.msk [vmem:[#allocation5 + $0x138] sm:$0xff] %vm503_vm0, %v7337_v1 }
 0x10c   : > { %544 = vst.msk [vmem:[#allocation5 + $0x140] sm:$0xff] %vm503_vm0, %v7337_v1  ;;  %545 = vst.msk [vmem:[#allocation5 + $0x148] sm:$0xff] %vm503_vm0, %v7337_v1  ;;  %6165 = vmatmul.mubr.msk.bf16.gmra.mrb[8].mxu0 %vm503_vm0, %v6589_v7 }
 0x10d   : > { %546 = vst.msk [vmem:[#allocation5 + $0x150] sm:$0xff] %vm503_vm0, %v7337_v1  ;;  %547 = vst.msk [vmem:[#allocation5 + $0x158] sm:$0xff] %vm503_vm0, %v7337_v1  ;;  %6168 = vmatprep.mubr.msk.bf16.mxu0 %vm503_vm0, %v6590_v8 }
 0x10e   : > { %548 = vst.msk [vmem:[#allocation5 + $0x160] sm:$0xff] %vm503_vm0, %v7337_v1  ;;  %549 = vst.msk [vmem:[#allocation5 + $0x168] sm:$0xff] %vm503_vm0, %v7337_v1 }
 0x10f   : > { %550 = vst.msk [vmem:[#allocation5 + $0x170] sm:$0xff] %vm503_vm0, %v7337_v1  ;;  %551 = vst.msk [vmem:[#allocation5 + $0x178] sm:$0xff] %vm503_vm0, %v7337_v1 }
 0x110   : > { %552 = vst.msk [vmem:[#allocation5 + $0x180] sm:$0xff] %vm503_vm0, %v7337_v1  ;;  %553 = vst.msk [vmem:[#allocation5 + $0x188] sm:$0xff] %vm503_vm0, %v7337_v1 }
 0x111   : > { %554 = vst.msk [vmem:[#allocation5 + $0x190] sm:$0xff] %vm503_vm0, %v7337_v1  ;;  %555 = vst.msk [vmem:[#allocation5 + $0x198] sm:$0xff] %vm503_vm0, %v7337_v1 }
 0x112   : > { %556 = vst.msk [vmem:[#allocation5 + $0x1a0] sm:$0xff] %vm503_vm0, %v7337_v1  ;;  %557 = vst.msk [vmem:[#allocation5 + $0x1a8] sm:$0xff] %vm503_vm0, %v7337_v1 }
 0x113   : > { %558 = vst.msk [vmem:[#allocation5 + $0x1b0] sm:$0xff] %vm503_vm0, %v7337_v1  ;;  %559 = vst.msk [vmem:[#allocation5 + $0x1b8] sm:$0xff] %vm503_vm0, %v7337_v1 }
 0x114   : > { %560 = vst.msk [vmem:[#allocation5 + $0x1c0] sm:$0xff] %vm503_vm0, %v7337_v1  ;;  %561 = vst.msk [vmem:[#allocation5 + $0x1c8] sm:$0xff] %vm503_vm0, %v7337_v1  ;;  %6169 = vmatmul.mubr.msk.bf16.gmra.mrb[12].mxu0 %vm503_vm0, %v6591_v9 }
 0x115   : > { %562 = vst.msk [vmem:[#allocation5 + $0x1d0] sm:$0xff] %vm503_vm0, %v7337_v1  ;;  %563 = vst.msk [vmem:[#allocation5 + $0x1d8] sm:$0xff] %vm503_vm0, %v7337_v1 }
 0x116   : > { %564 = vst.msk [vmem:[#allocation5 + $0x1e0] sm:$0xff] %vm503_vm0, %v7337_v1  ;;  %565 = vst.msk [vmem:[#allocation5 + $0x1e8] sm:$0xff] %vm503_vm0, %v7337_v1 }
 0x117   : > { %566 = vst.msk [vmem:[#allocation5 + $0x1f0] sm:$0xff] %vm503_vm0, %v7337_v1  ;;  %567 = vst.msk [vmem:[#allocation5 + $0x1f8] sm:$0xff] %vm503_vm0, %v7337_v1 }
 0x118   : > { %375 = vst.msk [vmem:[#allocation2] sm:$0xff] %vm374_vm1, %v7338_v11  ;;  %376 = vst.msk [vmem:[#allocation2 + $0x8] sm:$0xff] %vm374_vm1, %v7338_v11 }
 0x119   : > { %377 = vst.msk [vmem:[#allocation2 + $0x10] sm:$0xff] %vm374_vm1, %v7338_v11  ;;  %378 = vst.msk [vmem:[#allocation2 + $0x18] sm:$0xff] %vm374_vm1, %v7338_v11 }
 0x11a   : > { %379 = vst.msk [vmem:[#allocation2 + $0x20] sm:$0xff] %vm374_vm1, %v7338_v11  ;;  %380 = vst.msk [vmem:[#allocation2 + $0x28] sm:$0xff] %vm374_vm1, %v7338_v11 }
 0x11b   : > { %381 = vst.msk [vmem:[#allocation2 + $0x30] sm:$0xff] %vm374_vm1, %v7338_v11  ;;  %382 = vst.msk [vmem:[#allocation2 + $0x38] sm:$0xff] %vm374_vm1, %v7338_v11 }
 0x11c   : > { %383 = vst.msk [vmem:[#allocation2 + $0x40] sm:$0xff] %vm374_vm1, %v7338_v11  ;;  %384 = vst.msk [vmem:[#allocation2 + $0x48] sm:$0xff] %vm374_vm1, %v7338_v11 }
 0x11d   : > { %385 = vst.msk [vmem:[#allocation2 + $0x50] sm:$0xff] %vm374_vm1, %v7338_v11  ;;  %386 = vst.msk [vmem:[#allocation2 + $0x58] sm:$0xff] %vm374_vm1, %v7338_v11 }
 0x11e   : > { %387 = vst.msk [vmem:[#allocation2 + $0x60] sm:$0xff] %vm374_vm1, %v7338_v11  ;;  %388 = vst.msk [vmem:[#allocation2 + $0x68] sm:$0xff] %vm374_vm1, %v7338_v11 }
 0x11f   : > { %389 = vst.msk [vmem:[#allocation2 + $0x70] sm:$0xff] %vm374_vm1, %v7338_v11  ;;  %390 = vst.msk [vmem:[#allocation2 + $0x78] sm:$0xff] %vm374_vm1, %v7338_v11 }
 0x120   : > { %391 = vst.msk [vmem:[#allocation2 + $0x80] sm:$0xff] %vm374_vm1, %v7338_v11  ;;  %392 = vst.msk [vmem:[#allocation2 + $0x88] sm:$0xff] %vm374_vm1, %v7338_v11 }
 0x121   : > { %393 = vst.msk [vmem:[#allocation2 + $0x90] sm:$0xff] %vm374_vm1, %v7338_v11  ;;  %394 = vst.msk [vmem:[#allocation2 + $0x98] sm:$0xff] %vm374_vm1, %v7338_v11 }
 0x122   : > { %395 = vst.msk [vmem:[#allocation2 + $0xa0] sm:$0xff] %vm374_vm1, %v7338_v11  ;;  %396 = vst.msk [vmem:[#allocation2 + $0xa8] sm:$0xff] %vm374_vm1, %v7338_v11 }
 0x123   : > { %397 = vst.msk [vmem:[#allocation2 + $0xb0] sm:$0xff] %vm374_vm1, %v7338_v11  ;;  %398 = vst.msk [vmem:[#allocation2 + $0xb8] sm:$0xff] %vm374_vm1, %v7338_v11 }
 0x124   : > { %399 = vst.msk [vmem:[#allocation2 + $0xc0] sm:$0xff] %vm374_vm1, %v7338_v11  ;;  %400 = vst.msk [vmem:[#allocation2 + $0xc8] sm:$0xff] %vm374_vm1, %v7338_v11 }
 0x125   : > { %401 = vst.msk [vmem:[#allocation2 + $0xd0] sm:$0xff] %vm374_vm1, %v7338_v11  ;;  %402 = vst.msk [vmem:[#allocation2 + $0xd8] sm:$0xff] %vm374_vm1, %v7338_v11 }
 0x126   : > { %403 = vst.msk [vmem:[#allocation2 + $0xe0] sm:$0xff] %vm374_vm1, %v7338_v11  ;;  %404 = vst.msk [vmem:[#allocation2 + $0xe8] sm:$0xff] %vm374_vm1, %v7338_v11 }
 0x127   : > { %405 = vst.msk [vmem:[#allocation2 + $0xf0] sm:$0xff] %vm374_vm1, %v7338_v11  ;;  %406 = vst.msk [vmem:[#allocation2 + $0xf8] sm:$0xff] %vm374_vm1, %v7338_v11 }
 0x128   : > { %407 = vst.msk [vmem:[#allocation2 + $0x100] sm:$0xff] %vm374_vm1, %v7338_v11  ;;  %408 = vst.msk [vmem:[#allocation2 + $0x108] sm:$0xff] %vm374_vm1, %v7338_v11 }
 0x129   : > { %409 = vst.msk [vmem:[#allocation2 + $0x110] sm:$0xff] %vm374_vm1, %v7338_v11  ;;  %410 = vst.msk [vmem:[#allocation2 + $0x118] sm:$0xff] %vm374_vm1, %v7338_v11 }
 0x12a   : > { %411 = vst.msk [vmem:[#allocation2 + $0x120] sm:$0xff] %vm374_vm1, %v7338_v11  ;;  %412 = vst.msk [vmem:[#allocation2 + $0x128] sm:$0xff] %vm374_vm1, %v7338_v11 }
 0x12b   : > { %413 = vst.msk [vmem:[#allocation2 + $0x130] sm:$0xff] %vm374_vm1, %v7338_v11  ;;  %414 = vst.msk [vmem:[#allocation2 + $0x138] sm:$0xff] %vm374_vm1, %v7338_v11 }
 0x12c   : > { %415 = vst.msk [vmem:[#allocation2 + $0x140] sm:$0xff] %vm374_vm1, %v7338_v11  ;;  %416 = vst.msk [vmem:[#allocation2 + $0x148] sm:$0xff] %vm374_vm1, %v7338_v11 }
 0x12d   : > { %417 = vst.msk [vmem:[#allocation2 + $0x150] sm:$0xff] %vm374_vm1, %v7338_v11  ;;  %418 = vst.msk [vmem:[#allocation2 + $0x158] sm:$0xff] %vm374_vm1, %v7338_v11 }
 0x12e   : > { %419 = vst.msk [vmem:[#allocation2 + $0x160] sm:$0xff] %vm374_vm1, %v7338_v11  ;;  %420 = vst.msk [vmem:[#allocation2 + $0x168] sm:$0xff] %vm374_vm1, %v7338_v11 }
 0x12f   : > { %421 = vst.msk [vmem:[#allocation2 + $0x170] sm:$0xff] %vm374_vm1, %v7338_v11  ;;  %422 = vst.msk [vmem:[#allocation2 + $0x178] sm:$0xff] %vm374_vm1, %v7338_v11 }
 0x130   : > { %423 = vst.msk [vmem:[#allocation2 + $0x180] sm:$0xff] %vm374_vm1, %v7338_v11  ;;  %424 = vst.msk [vmem:[#allocation2 + $0x188] sm:$0xff] %vm374_vm1, %v7338_v11 }
 0x131   : > { %425 = vst.msk [vmem:[#allocation2 + $0x190] sm:$0xff] %vm374_vm1, %v7338_v11  ;;  %426 = vst.msk [vmem:[#allocation2 + $0x198] sm:$0xff] %vm374_vm1, %v7338_v11 }
 0x132   : > { %427 = vst.msk [vmem:[#allocation2 + $0x1a0] sm:$0xff] %vm374_vm1, %v7338_v11  ;;  %428 = vst.msk [vmem:[#allocation2 + $0x1a8] sm:$0xff] %vm374_vm1, %v7338_v11 }
 0x133   : > { %429 = vst.msk [vmem:[#allocation2 + $0x1b0] sm:$0xff] %vm374_vm1, %v7338_v11  ;;  %430 = vst.msk [vmem:[#allocation2 + $0x1b8] sm:$0xff] %vm374_vm1, %v7338_v11 }
 0x134   : > { %431 = vst.msk [vmem:[#allocation2 + $0x1c0] sm:$0xff] %vm374_vm1, %v7338_v11  ;;  %432 = vst.msk [vmem:[#allocation2 + $0x1c8] sm:$0xff] %vm374_vm1, %v7338_v11 }
 0x135   : > { %433 = vst.msk [vmem:[#allocation2 + $0x1d0] sm:$0xff] %vm374_vm1, %v7338_v11  ;;  %434 = vst.msk [vmem:[#allocation2 + $0x1d8] sm:$0xff] %vm374_vm1, %v7338_v11 }
 0x136   : > { %435 = vst.msk [vmem:[#allocation2 + $0x1e0] sm:$0xff] %vm374_vm1, %v7338_v11  ;;  %436 = vst.msk [vmem:[#allocation2 + $0x1e8] sm:$0xff] %vm374_vm1, %v7338_v11 }
 0x137   : > { %437 = vst.msk [vmem:[#allocation2 + $0x1f0] sm:$0xff] %vm374_vm1, %v7338_v11  ;;  %438 = vst.msk [vmem:[#allocation2 + $0x1f8] sm:$0xff] %vm374_vm1, %v7338_v11 }
 0x138   : > { %439 = vst.msk [vmem:[#allocation3] sm:$0xff] %vm374_vm1, %v7337_v1  ;;  %440 = vst.msk [vmem:[#allocation3 + $0x8] sm:$0xff] %vm374_vm1, %v7337_v1 }
 0x139   : > { %441 = vst.msk [vmem:[#allocation3 + $0x10] sm:$0xff] %vm374_vm1, %v7337_v1  ;;  %442 = vst.msk [vmem:[#allocation3 + $0x18] sm:$0xff] %vm374_vm1, %v7337_v1 }
 0x13a   : > { %443 = vst.msk [vmem:[#allocation3 + $0x20] sm:$0xff] %vm374_vm1, %v7337_v1  ;;  %444 = vst.msk [vmem:[#allocation3 + $0x28] sm:$0xff] %vm374_vm1, %v7337_v1 }
 0x13b   : > { %445 = vst.msk [vmem:[#allocation3 + $0x30] sm:$0xff] %vm374_vm1, %v7337_v1  ;;  %446 = vst.msk [vmem:[#allocation3 + $0x38] sm:$0xff] %vm374_vm1, %v7337_v1 }
 0x13c   : > { %447 = vst.msk [vmem:[#allocation3 + $0x40] sm:$0xff] %vm374_vm1, %v7337_v1  ;;  %448 = vst.msk [vmem:[#allocation3 + $0x48] sm:$0xff] %vm374_vm1, %v7337_v1 }
 0x13d   : > { %449 = vst.msk [vmem:[#allocation3 + $0x50] sm:$0xff] %vm374_vm1, %v7337_v1  ;;  %450 = vst.msk [vmem:[#allocation3 + $0x58] sm:$0xff] %vm374_vm1, %v7337_v1 }
 0x13e   : > { %451 = vst.msk [vmem:[#allocation3 + $0x60] sm:$0xff] %vm374_vm1, %v7337_v1  ;;  %452 = vst.msk [vmem:[#allocation3 + $0x68] sm:$0xff] %vm374_vm1, %v7337_v1 }
 0x13f   : > { %453 = vst.msk [vmem:[#allocation3 + $0x70] sm:$0xff] %vm374_vm1, %v7337_v1  ;;  %454 = vst.msk [vmem:[#allocation3 + $0x78] sm:$0xff] %vm374_vm1, %v7337_v1 }
 0x140   : > { %455 = vst.msk [vmem:[#allocation3 + $0x80] sm:$0xff] %vm374_vm1, %v7337_v1  ;;  %456 = vst.msk [vmem:[#allocation3 + $0x88] sm:$0xff] %vm374_vm1, %v7337_v1 }
 0x141   : > { %457 = vst.msk [vmem:[#allocation3 + $0x90] sm:$0xff] %vm374_vm1, %v7337_v1  ;;  %458 = vst.msk [vmem:[#allocation3 + $0x98] sm:$0xff] %vm374_vm1, %v7337_v1 }
 0x142   : > { %459 = vst.msk [vmem:[#allocation3 + $0xa0] sm:$0xff] %vm374_vm1, %v7337_v1  ;;  %460 = vst.msk [vmem:[#allocation3 + $0xa8] sm:$0xff] %vm374_vm1, %v7337_v1 }
 0x143   : > { %461 = vst.msk [vmem:[#allocation3 + $0xb0] sm:$0xff] %vm374_vm1, %v7337_v1  ;;  %462 = vst.msk [vmem:[#allocation3 + $0xb8] sm:$0xff] %vm374_vm1, %v7337_v1 }
 0x144   : > { %463 = vst.msk [vmem:[#allocation3 + $0xc0] sm:$0xff] %vm374_vm1, %v7337_v1  ;;  %464 = vst.msk [vmem:[#allocation3 + $0xc8] sm:$0xff] %vm374_vm1, %v7337_v1 }
 0x145   : > { %465 = vst.msk [vmem:[#allocation3 + $0xd0] sm:$0xff] %vm374_vm1, %v7337_v1  ;;  %466 = vst.msk [vmem:[#allocation3 + $0xd8] sm:$0xff] %vm374_vm1, %v7337_v1 }
 0x146   : > { %467 = vst.msk [vmem:[#allocation3 + $0xe0] sm:$0xff] %vm374_vm1, %v7337_v1  ;;  %468 = vst.msk [vmem:[#allocation3 + $0xe8] sm:$0xff] %vm374_vm1, %v7337_v1 }
 0x147   : > { %469 = vst.msk [vmem:[#allocation3 + $0xf0] sm:$0xff] %vm374_vm1, %v7337_v1  ;;  %470 = vst.msk [vmem:[#allocation3 + $0xf8] sm:$0xff] %vm374_vm1, %v7337_v1 }
 0x148   : > { %471 = vst.msk [vmem:[#allocation3 + $0x100] sm:$0xff] %vm374_vm1, %v7337_v1  ;;  %472 = vst.msk [vmem:[#allocation3 + $0x108] sm:$0xff] %vm374_vm1, %v7337_v1 }
 0x149   : > { %473 = vst.msk [vmem:[#allocation3 + $0x110] sm:$0xff] %vm374_vm1, %v7337_v1  ;;  %474 = vst.msk [vmem:[#allocation3 + $0x118] sm:$0xff] %vm374_vm1, %v7337_v1 }
 0x14a   : > { %475 = vst.msk [vmem:[#allocation3 + $0x120] sm:$0xff] %vm374_vm1, %v7337_v1  ;;  %476 = vst.msk [vmem:[#allocation3 + $0x128] sm:$0xff] %vm374_vm1, %v7337_v1 }
 0x14b   : > { %477 = vst.msk [vmem:[#allocation3 + $0x130] sm:$0xff] %vm374_vm1, %v7337_v1  ;;  %478 = vst.msk [vmem:[#allocation3 + $0x138] sm:$0xff] %vm374_vm1, %v7337_v1 }
 0x14c   : > { %479 = vst.msk [vmem:[#allocation3 + $0x140] sm:$0xff] %vm374_vm1, %v7337_v1  ;;  %480 = vst.msk [vmem:[#allocation3 + $0x148] sm:$0xff] %vm374_vm1, %v7337_v1 }
 0x14d   : > { %481 = vst.msk [vmem:[#allocation3 + $0x150] sm:$0xff] %vm374_vm1, %v7337_v1  ;;  %482 = vst.msk [vmem:[#allocation3 + $0x158] sm:$0xff] %vm374_vm1, %v7337_v1 }
 0x14e   : > { %483 = vst.msk [vmem:[#allocation3 + $0x160] sm:$0xff] %vm374_vm1, %v7337_v1  ;;  %484 = vst.msk [vmem:[#allocation3 + $0x168] sm:$0xff] %vm374_vm1, %v7337_v1 }
 0x14f   : > { %485 = vst.msk [vmem:[#allocation3 + $0x170] sm:$0xff] %vm374_vm1, %v7337_v1  ;;  %486 = vst.msk [vmem:[#allocation3 + $0x178] sm:$0xff] %vm374_vm1, %v7337_v1 }
 0x150   : > { %487 = vst.msk [vmem:[#allocation3 + $0x180] sm:$0xff] %vm374_vm1, %v7337_v1  ;;  %488 = vst.msk [vmem:[#allocation3 + $0x188] sm:$0xff] %vm374_vm1, %v7337_v1 }
 0x151   : > { %489 = vst.msk [vmem:[#allocation3 + $0x190] sm:$0xff] %vm374_vm1, %v7337_v1  ;;  %490 = vst.msk [vmem:[#allocation3 + $0x198] sm:$0xff] %vm374_vm1, %v7337_v1 }
 0x152   : > { %491 = vst.msk [vmem:[#allocation3 + $0x1a0] sm:$0xff] %vm374_vm1, %v7337_v1  ;;  %492 = vst.msk [vmem:[#allocation3 + $0x1a8] sm:$0xff] %vm374_vm1, %v7337_v1 }
 0x153   : > { %493 = vst.msk [vmem:[#allocation3 + $0x1b0] sm:$0xff] %vm374_vm1, %v7337_v1  ;;  %494 = vst.msk [vmem:[#allocation3 + $0x1b8] sm:$0xff] %vm374_vm1, %v7337_v1 }
 0x154   : > { %495 = vst.msk [vmem:[#allocation3 + $0x1c0] sm:$0xff] %vm374_vm1, %v7337_v1  ;;  %496 = vst.msk [vmem:[#allocation3 + $0x1c8] sm:$0xff] %vm374_vm1, %v7337_v1 }
 0x155   : > { %497 = vst.msk [vmem:[#allocation3 + $0x1d0] sm:$0xff] %vm374_vm1, %v7337_v1  ;;  %498 = vst.msk [vmem:[#allocation3 + $0x1d8] sm:$0xff] %vm374_vm1, %v7337_v1 }
 0x156   : > { %499 = vst.msk [vmem:[#allocation3 + $0x1e0] sm:$0xff] %vm374_vm1, %v7337_v1  ;;  %500 = vst.msk [vmem:[#allocation3 + $0x1e8] sm:$0xff] %vm374_vm1, %v7337_v1 }
 0x157   : > { %501 = vst.msk [vmem:[#allocation3 + $0x1f0] sm:$0xff] %vm374_vm1, %v7337_v1  ;;  %502 = vst.msk [vmem:[#allocation3 + $0x1f8] sm:$0xff] %vm374_vm1, %v7337_v1 }
 0x1cf   : > { %v6158_v12 = vpop.f32.mrb[0].mxu0 }
 0x1d0   : > { %v690_v13 = vpop.f32.mrb[1].mxu0 }
 0x1d1   : > { %v6159_v14 = vpop.f32.mrb[2].mxu0  ;;  %6174 = vmatprep.mubr.f32.mxu1 %v690_v13 }
 0x1d2   : > { %v693_v15 = vpop.f32.mrb[3].mxu0 }
 0x1d3   : > { %6175 = vmatmul.mubr.f32.vlgmr.msra.gmra.mrb[0].mxu1 %v693_v15 }
 0x1d4   : > { %6177 = vmatprep.mubr.f32.mxu1 %v6158_v12 }
 0x1d7   : > { %6178 = vmatmul.mubr.f32.gmra.mrb[2].mxu1 %v6159_v14  ;;  %v6162_v16 = vpop.f32.mrb[4].mxu0 }
 0x1d8   : > { %v706_v17 = vpop.f32.mrb[5].mxu0 }
 0x1d9   : > { %v6163_v18 = vpop.f32.mrb[6].mxu0  ;;  %6180 = vmatprep.mubr.f32.mxu1 %v706_v17 }
 0x1da   : > { %v709_v19 = vpop.f32.mrb[7].mxu0 }
 0x1db   : > { %6181 = vmatmul.mubr.f32.gmra.mrb[4].mxu1 %v709_v19 }
 0x1dc   : > { %6183 = vmatprep.mubr.f32.mxu1 %v6162_v16 }
 0x1df   : > { %6184 = vmatmul.mubr.f32.gmra.mrb[6].mxu1 %v6163_v18  ;;  %v6166_v20 = vpop.f32.mrb[8].mxu0 }
 0x1e0   : > { %v722_v21 = vpop.f32.mrb[9].mxu0 }
 0x1e1   : > { %v6167_v22 = vpop.f32.mrb[10].mxu0  ;;  %6186 = vmatprep.mubr.f32.mxu1 %v722_v21 }
 0x1e2   : > { %v725_v23 = vpop.f32.mrb[11].mxu0 }
 0x1e3   : > { %6187 = vmatmul.mubr.f32.gmra.mrb[8].mxu1 %v725_v23 }
 0x1e4   : > { %6189 = vmatprep.mubr.f32.mxu1 %v6166_v20 }
 0x1e7   : > { %6190 = vmatmul.mubr.f32.gmra.mrb[10].mxu1 %v6167_v22  ;;  %v6170_v24 = vpop.f32.mrb[12].mxu0 }
 0x1e8   : > { %v738_v25 = vpop.f32.mrb[13].mxu0 }
 0x1e9   : > { %v6171_v26 = vpop.f32.mrb[14].mxu0  ;;  %6192 = vmatprep.mubr.f32.mxu1 %v738_v25 }
 0x1ea   : > { %v741_v27 = vpop.f32.mrb[15].mxu0 }
 0x1eb   : > { %6193 = vmatmul.mubr.f32.gmra.mrb[12].mxu1 %v741_v27 }
 0x1ec   : > { %6195 = vmatprep.mubr.f32.mxu1 %v6170_v24 }
 0x1ef   : > { %6196 = vmatmul.mubr.f32.gmra.mrb[14].mxu1 %v6171_v26 }
 0x2a6   : > { %v6176_v28 = vpop.f32.mrb[0].mxu1 }
 0x2a7   : > { %900 = vst.msk [vmem:[#allocation4 + $0x8] sm:$0xff] %vm374_vm1, %v6176_v28  ;;  %998 = vrot.lane.b32.xlu1 %v6176_v28, %s7339_s7  ;;  %933 = vrot.lane.b32.xlu0 %v6176_v28, %s7340_s12  ;;  %v820_v29 = vpop.f32.mrb[1].mxu1 }
 0x2a8   : > { %899 = vst.msk [vmem:[#allocation4] sm:$0xff] %vm374_vm1, %v820_v29 }
 0x2aa   : > { %v6179_v30 = vpop.f32.mrb[2].mxu1 }
 0x2ab   : > { %902 = vst.msk [vmem:[#allocation4 + $0x18] sm:$0xff] %vm374_vm1, %v6179_v30  ;;  %1063 = vrot.lane.b32.xlu1 %v6176_v28, %s7341_s8  ;;  %931 = vrot.lane.b32.xlu0 %v820_v29, %s7340_s12  ;;  %v830_v31 = vpop.f32.mrb[3].mxu1 }
 0x2ac   : > { %901 = vst.msk [vmem:[#allocation4 + $0x10] sm:$0xff] %vm374_vm1, %v830_v31 }
 0x2ae   : > { %v6182_v32 = vpop.f32.mrb[4].mxu1 }
 0x2af   : > { %996 = vrot.lane.b32.xlu0 %v820_v29, %s7339_s7  ;;  %937 = vrot.lane.b32.xlu1 %v6179_v30, %s7340_s12  ;;  %904 = vst.msk [vmem:[#allocation4 + $0x28] sm:$0xff] %vm374_vm1, %v6182_v32  ;;  %v840_v33 = vpop.f32.mrb[5].mxu1 }
 0x2b0   : > { %903 = vst.msk [vmem:[#allocation4 + $0x20] sm:$0xff] %vm374_vm1, %v840_v33 }
 0x2b2   : > { %v6185_v34 = vpop.f32.mrb[6].mxu1 }
 0x2b3   : > { %1061 = vrot.lane.b32.xlu0 %v820_v29, %s7341_s8  ;;  %1002 = vrot.lane.b32.xlu1 %v6179_v30, %s7339_s7  ;;  %906 = vst.msk [vmem:[#allocation4 + $0x38] sm:$0xff] %vm374_vm1, %v6185_v34  ;;  %v850_v35 = vpop.f32.mrb[7].mxu1 }
 0x2b4   : > { %905 = vst.msk [vmem:[#allocation4 + $0x30] sm:$0xff] %vm374_vm1, %v850_v35 }
 0x2b6   : > { %v6188_v36 = vpop.f32.mrb[8].mxu1 }
 0x2b7   : > { %1067 = vrot.lane.b32.xlu1 %v6179_v30, %s7341_s8  ;;  %1000 = vrot.lane.b32.xlu0 %v830_v31, %s7339_s7  ;;  %908 = vst.msk [vmem:[#allocation4 + $0x48] sm:$0xff] %vm374_vm1, %v6188_v36  ;;  %v860_v37 = vpop.f32.mrb[9].mxu1 }
 0x2b8   : > { %907 = vst.msk [vmem:[#allocation4 + $0x40] sm:$0xff] %vm374_vm1, %v860_v37 }
 0x2ba   : > { %v6191_v38 = vpop.f32.mrb[10].mxu1 }
 0x2bb   : > { %1065 = vrot.lane.b32.xlu0 %v830_v31, %s7341_s8  ;;  %935 = vrot.lane.b32.xlu1 %v830_v31, %s7340_s12  ;;  %910 = vst.msk [vmem:[#allocation4 + $0x58] sm:$0xff] %vm374_vm1, %v6191_v38  ;;  %v870_v39 = vpop.f32.mrb[11].mxu1 }
 0x2bc   : > { %909 = vst.msk [vmem:[#allocation4 + $0x50] sm:$0xff] %vm374_vm1, %v870_v39 }
 0x2be   : > { %v6194_v40 = vpop.f32.mrb[12].mxu1 }
 0x2bf   : > { %941 = vrot.lane.b32.xlu1 %v6182_v32, %s7340_s12  ;;  %939 = vrot.lane.b32.xlu0 %v840_v33, %s7340_s12  ;;  %912 = vst.msk [vmem:[#allocation4 + $0x68] sm:$0xff] %vm374_vm1, %v6194_v40  ;;  %v880_v41 = vpop.f32.mrb[13].mxu1 }
 0x2c0   : > { %911 = vst.msk [vmem:[#allocation4 + $0x60] sm:$0xff] %vm374_vm1, %v880_v41 }
 0x2c2   : > { %v6197_v42 = vpop.f32.mrb[14].mxu1 }
 0x2c3   : > { %1006 = vrot.lane.b32.xlu1 %v6182_v32, %s7339_s7  ;;  %1004 = vrot.lane.b32.xlu0 %v840_v33, %s7339_s7  ;;  %914 = vst.msk [vmem:[#allocation4 + $0x78] sm:$0xff] %vm374_vm1, %v6197_v42  ;;  %v890_v43 = vpop.f32.mrb[15].mxu1 }
 0x2c4   : > { %913 = vst.msk [vmem:[#allocation4 + $0x70] sm:$0xff] %vm374_vm1, %v890_v43 }
 0x2c7   : > { %1071 = vrot.lane.b32.xlu1 %v6182_v32, %s7341_s8  ;;  %1069 = vrot.lane.b32.xlu0 %v840_v33, %s7341_s8 }
 0x2cb   : > { %945 = vrot.lane.b32.xlu1 %v6185_v34, %s7340_s12  ;;  %943 = vrot.lane.b32.xlu0 %v850_v35, %s7340_s12 }
 0x2cf   : > { %1010 = vrot.lane.b32.xlu1 %v6185_v34, %s7339_s7  ;;  %1008 = vrot.lane.b32.xlu0 %v850_v35, %s7339_s7 }
 0x2d3   : > { %1075 = vrot.lane.b32.xlu1 %v6185_v34, %s7341_s8  ;;  %1073 = vrot.lane.b32.xlu0 %v850_v35, %s7341_s8 }
 0x2d7   : > { %949 = vrot.lane.b32.xlu1 %v6188_v36, %s7340_s12  ;;  %947 = vrot.lane.b32.xlu0 %v860_v37, %s7340_s12 }
 0x2db   : > { %1014 = vrot.lane.b32.xlu1 %v6188_v36, %s7339_s7  ;;  %1012 = vrot.lane.b32.xlu0 %v860_v37, %s7339_s7 }
 0x2df   : > { %1079 = vrot.lane.b32.xlu1 %v6188_v36, %s7341_s8  ;;  %1077 = vrot.lane.b32.xlu0 %v860_v37, %s7341_s8 }
 0x2e3   : > { %953 = vrot.lane.b32.xlu1 %v6191_v38, %s7340_s12  ;;  %951 = vrot.lane.b32.xlu0 %v870_v39, %s7340_s12 }
 0x2e7   : > { %1018 = vrot.lane.b32.xlu1 %v6191_v38, %s7339_s7  ;;  %1016 = vrot.lane.b32.xlu0 %v870_v39, %s7339_s7 }
 0x2eb   : > { %1083 = vrot.lane.b32.xlu1 %v6191_v38, %s7341_s8  ;;  %1081 = vrot.lane.b32.xlu0 %v870_v39, %s7341_s8 }
 0x2ef   : > { %957 = vrot.lane.b32.xlu1 %v6194_v40, %s7340_s12  ;;  %955 = vrot.lane.b32.xlu0 %v880_v41, %s7340_s12 }
 0x2f3   : > { %1022 = vrot.lane.b32.xlu1 %v6194_v40, %s7339_s7  ;;  %1020 = vrot.lane.b32.xlu0 %v880_v41, %s7339_s7 }
 0x2f7   : > { %1087 = vrot.lane.b32.xlu1 %v6194_v40, %s7341_s8  ;;  %1085 = vrot.lane.b32.xlu0 %v880_v41, %s7341_s8 }
 0x2fb   : > { %961 = vrot.lane.b32.xlu1 %v6197_v42, %s7340_s12  ;;  %959 = vrot.lane.b32.xlu0 %v890_v43, %s7340_s12 }
 0x2ff   : > { %1026 = vrot.lane.b32.xlu1 %v6197_v42, %s7339_s7  ;;  %1024 = vrot.lane.b32.xlu0 %v890_v43, %s7339_s7 }
 0x303   : > { %1091 = vrot.lane.b32.xlu1 %v6197_v42, %s7341_s8  ;;  %1089 = vrot.lane.b32.xlu0 %v890_v43, %s7341_s8 }
 0x319   : > { %v999_v44 = vpop.permute.xlu1 %998  ;;  %v934_v45 = vpop.permute.xlu0 %933 }
 0x31a   : > { %1046 = vst.msk [vmem:[#allocation4 + $0x108] sm:$0xff] %vm374_vm1, %v999_v44  ;;  %981 = vst.msk [vmem:[#allocation4 + $0x88] sm:$0xff] %vm374_vm1, %v934_v45 }
 0x31d   : > { %v1064_v46 = vpop.permute.xlu1 %1063  ;;  %v932_v47 = vpop.permute.xlu0 %931 }
 0x31e   : > { %1111 = vst.msk [vmem:[#allocation4 + $0x188] sm:$0xff] %vm374_vm1, %v1064_v46  ;;  %980 = vst.msk [vmem:[#allocation4 + $0x80] sm:$0xff] %vm374_vm1, %v932_v47 }
 0x321   : > { %v997_v48 = vpop.permute.xlu0 %996  ;;  %v938_v49 = vpop.permute.xlu1 %937 }
 0x322   : > { %1045 = vst.msk [vmem:[#allocation4 + $0x100] sm:$0xff] %vm374_vm1, %v997_v48  ;;  %983 = vst.msk [vmem:[#allocation4 + $0x98] sm:$0xff] %vm374_vm1, %v938_v49 }
 0x325   : > { %v1062_v50 = vpop.permute.xlu0 %1061  ;;  %v1003_v51 = vpop.permute.xlu1 %1002 }
 0x326   : > { %1110 = vst.msk [vmem:[#allocation4 + $0x180] sm:$0xff] %vm374_vm1, %v1062_v50  ;;  %1048 = vst.msk [vmem:[#allocation4 + $0x118] sm:$0xff] %vm374_vm1, %v1003_v51 }
 0x329   : > { %v1068_v52 = vpop.permute.xlu1 %1067  ;;  %v1001_v53 = vpop.permute.xlu0 %1000 }
 0x32a   : > { %1113 = vst.msk [vmem:[#allocation4 + $0x198] sm:$0xff] %vm374_vm1, %v1068_v52  ;;  %1047 = vst.msk [vmem:[#allocation4 + $0x110] sm:$0xff] %vm374_vm1, %v1001_v53 }
 0x32d   : > { %v1066_v54 = vpop.permute.xlu0 %1065  ;;  %v936_v55 = vpop.permute.xlu1 %935 }
 0x32e   : > { %1112 = vst.msk [vmem:[#allocation4 + $0x190] sm:$0xff] %vm374_vm1, %v1066_v54  ;;  %982 = vst.msk [vmem:[#allocation4 + $0x90] sm:$0xff] %vm374_vm1, %v936_v55 }
 0x331   : > { %v942_v56 = vpop.permute.xlu1 %941  ;;  %v940_v57 = vpop.permute.xlu0 %939 }
 0x332   : > { %985 = vst.msk [vmem:[#allocation4 + $0xa8] sm:$0xff] %vm374_vm1, %v942_v56  ;;  %984 = vst.msk [vmem:[#allocation4 + $0xa0] sm:$0xff] %vm374_vm1, %v940_v57 }
 0x335   : > { %v1007_v58 = vpop.permute.xlu1 %1006  ;;  %v1005_v59 = vpop.permute.xlu0 %1004 }
 0x336   : > { %1050 = vst.msk [vmem:[#allocation4 + $0x128] sm:$0xff] %vm374_vm1, %v1007_v58  ;;  %1049 = vst.msk [vmem:[#allocation4 + $0x120] sm:$0xff] %vm374_vm1, %v1005_v59 }
 0x339   : > { %v1072_v60 = vpop.permute.xlu1 %1071  ;;  %v1070_v61 = vpop.permute.xlu0 %1069 }
 0x33a   : > { %1115 = vst.msk [vmem:[#allocation4 + $0x1a8] sm:$0xff] %vm374_vm1, %v1072_v60  ;;  %1114 = vst.msk [vmem:[#allocation4 + $0x1a0] sm:$0xff] %vm374_vm1, %v1070_v61 }
 0x33d   : > { %v946_v62 = vpop.permute.xlu1 %945  ;;  %v944_v63 = vpop.permute.xlu0 %943 }
 0x33e   : > { %987 = vst.msk [vmem:[#allocation4 + $0xb8] sm:$0xff] %vm374_vm1, %v946_v62  ;;  %986 = vst.msk [vmem:[#allocation4 + $0xb0] sm:$0xff] %vm374_vm1, %v944_v63 }
 0x341   : > { %v1011_v0 = vpop.permute.xlu1 %1010  ;;  %v1009_v1 = vpop.permute.xlu0 %1008 }
 0x342   : > { %1052 = vst.msk [vmem:[#allocation4 + $0x138] sm:$0xff] %vm374_vm1, %v1011_v0  ;;  %1051 = vst.msk [vmem:[#allocation4 + $0x130] sm:$0xff] %vm374_vm1, %v1009_v1 }
 0x345   : > { %v1076_v2 = vpop.permute.xlu1 %1075  ;;  %v1074_v3 = vpop.permute.xlu0 %1073 }
 0x346   : > { %1117 = vst.msk [vmem:[#allocation4 + $0x1b8] sm:$0xff] %vm374_vm1, %v1076_v2  ;;  %1116 = vst.msk [vmem:[#allocation4 + $0x1b0] sm:$0xff] %vm374_vm1, %v1074_v3 }
 0x349   : > { %v950_v4 = vpop.permute.xlu1 %949  ;;  %v948_v5 = vpop.permute.xlu0 %947 }
 0x34a   : > { %989 = vst.msk [vmem:[#allocation4 + $0xc8] sm:$0xff] %vm374_vm1, %v950_v4  ;;  %988 = vst.msk [vmem:[#allocation4 + $0xc0] sm:$0xff] %vm374_vm1, %v948_v5 }
 0x34d   : > { %v1015_v6 = vpop.permute.xlu1 %1014  ;;  %v1013_v7 = vpop.permute.xlu0 %1012 }
 0x34e   : > { %1054 = vst.msk [vmem:[#allocation4 + $0x148] sm:$0xff] %vm374_vm1, %v1015_v6  ;;  %1053 = vst.msk [vmem:[#allocation4 + $0x140] sm:$0xff] %vm374_vm1, %v1013_v7 }
 0x351   : > { %v1080_v8 = vpop.permute.xlu1 %1079  ;;  %v1078_v9 = vpop.permute.xlu0 %1077 }
 0x352   : > { %1119 = vst.msk [vmem:[#allocation4 + $0x1c8] sm:$0xff] %vm374_vm1, %v1080_v8  ;;  %1118 = vst.msk [vmem:[#allocation4 + $0x1c0] sm:$0xff] %vm374_vm1, %v1078_v9 }
 0x355   : > { %v954_v10 = vpop.permute.xlu1 %953  ;;  %v952_v11 = vpop.permute.xlu0 %951 }
 0x356   : > { %991 = vst.msk [vmem:[#allocation4 + $0xd8] sm:$0xff] %vm374_vm1, %v954_v10  ;;  %990 = vst.msk [vmem:[#allocation4 + $0xd0] sm:$0xff] %vm374_vm1, %v952_v11 }
 0x359   : > { %v1019_v12 = vpop.permute.xlu1 %1018  ;;  %v1017_v13 = vpop.permute.xlu0 %1016 }
 0x35a   : > { %1056 = vst.msk [vmem:[#allocation4 + $0x158] sm:$0xff] %vm374_vm1, %v1019_v12  ;;  %1055 = vst.msk [vmem:[#allocation4 + $0x150] sm:$0xff] %vm374_vm1, %v1017_v13 }
 0x35d   : > { %v1084_v14 = vpop.permute.xlu1 %1083  ;;  %v1082_v15 = vpop.permute.xlu0 %1081 }
 0x35e   : > { %1121 = vst.msk [vmem:[#allocation4 + $0x1d8] sm:$0xff] %vm374_vm1, %v1084_v14  ;;  %1120 = vst.msk [vmem:[#allocation4 + $0x1d0] sm:$0xff] %vm374_vm1, %v1082_v15 }
 0x361   : > { %v958_v16 = vpop.permute.xlu1 %957  ;;  %v956_v17 = vpop.permute.xlu0 %955 }
 0x362   : > { %993 = vst.msk [vmem:[#allocation4 + $0xe8] sm:$0xff] %vm374_vm1, %v958_v16  ;;  %992 = vst.msk [vmem:[#allocation4 + $0xe0] sm:$0xff] %vm374_vm1, %v956_v17 }
 0x365   : > { %v1023_v18 = vpop.permute.xlu1 %1022  ;;  %v1021_v19 = vpop.permute.xlu0 %1020 }
 0x366   : > { %1058 = vst.msk [vmem:[#allocation4 + $0x168] sm:$0xff] %vm374_vm1, %v1023_v18  ;;  %1057 = vst.msk [vmem:[#allocation4 + $0x160] sm:$0xff] %vm374_vm1, %v1021_v19 }
 0x369   : > { %v1088_v20 = vpop.permute.xlu1 %1087  ;;  %v1086_v21 = vpop.permute.xlu0 %1085 }
 0x36a   : > { %1123 = vst.msk [vmem:[#allocation4 + $0x1e8] sm:$0xff] %vm374_vm1, %v1088_v20  ;;  %1122 = vst.msk [vmem:[#allocation4 + $0x1e0] sm:$0xff] %vm374_vm1, %v1086_v21 }
 0x36d   : > { %v962_v22 = vpop.permute.xlu1 %961  ;;  %v960_v23 = vpop.permute.xlu0 %959 }
 0x36e   : > { %995 = vst.msk [vmem:[#allocation4 + $0xf8] sm:$0xff] %vm374_vm1, %v962_v22  ;;  %994 = vst.msk [vmem:[#allocation4 + $0xf0] sm:$0xff] %vm374_vm1, %v960_v23 }
 0x371   : > { %v1027_v24 = vpop.permute.xlu1 %1026  ;;  %v1025_v25 = vpop.permute.xlu0 %1024 }
 0x372   : > { %1060 = vst.msk [vmem:[#allocation4 + $0x178] sm:$0xff] %vm374_vm1, %v1027_v24  ;;  %1059 = vst.msk [vmem:[#allocation4 + $0x170] sm:$0xff] %vm374_vm1, %v1025_v25 }
 0x375   : > { %v1092_v26 = vpop.permute.xlu1 %1091  ;;  %v1090_v27 = vpop.permute.xlu0 %1089 }
 0x376   : > { %1125 = vst.msk [vmem:[#allocation4 + $0x1f8] sm:$0xff] %vm374_vm1, %v1092_v26  ;;  %1124 = vst.msk [vmem:[#allocation4 + $0x1f0] sm:$0xff] %vm374_vm1, %v1090_v27 }
 0x377 PF: > { %v6594_v28 = vld [vmem:[#allocation12] sm:$0xff]   ;;  %vm1190_vm2 = vcmask 130048   ;;  %v6596_v30 = vld [vmem:[%s7777_s21 + $0x8] sm:$0xff]   ;;  %v7342_v31 = vmov 0   ;;  %v6597_v32 = vld [vmem:[%s7777_s21 + $0x10] sm:$0xff]   ;;  %v7343_v17 = vmov 0.0|0.0  }
 0x378   : > { %v6595_v29 = vld [vmem:[%s7777_s21] sm:$0xff]   ;;  %6198 = vmatprep.subr.bf16.mxu0 %v6594_v28  ;;  %6593 = vset.pattern.permute.xlu1 %v7342_v31  ;;  %v1461_v33 = vld [vmem:[#allocation4 + $0x10] sm:$0xff]  ;;  %v6598_v34 = vld [vmem:[%s7777_s21 + $0x18] sm:$0xff]   ;;  %vm7344_vm3 = vmmov 0   ;;  %s7346_s11 = smov 112   ;;  %s7347_s28 = smov 96  }
 0x379   : > { %6199 = vmatpush3.bf16.msra.mxu0 %v6594_v28  ;;  %6200 = vmatprep.mubr.msk.bf16.mxu0 %vm1190_vm2, %v6595_v29  ;;  %v6599_v35 = vld [vmem:[%s7777_s21 + $0x20] sm:$0xff]   ;;  %v1462_v36 = vld [vmem:[#allocation4 + $0x18] sm:$0xff]  ;;  %v1464_v38 = vld [vmem:[#allocation4 + $0x28] sm:$0xff]  ;;  %s7348_s0 = smov 80   ;;  %s11771_s13 = sld [smem:[#allocation24_spill]] }
 0x37a   : > { %6592 = vset.pattern.permute.xlu0 %v7342_v31  ;;  %1487 = vperm.xlu1 %6593, %v1461_v33   ;;  %v1459_v37 = vld [vmem:[#allocation4] sm:$0xff]  ;;  %v1460_v39 = vld [vmem:[#allocation4 + $0x8] sm:$0xff]  ;;  %v6601_v41 = vld [vmem:[%s7777_s21 + $0x30] sm:$0xff]  }
 0x37b   : > { %1477 = vperm.xlu0 %6592, %v1459_v37   ;;  %v6600_v40 = vld [vmem:[%s7777_s21 + $0x28] sm:$0xff]   ;;  %v1466_v42 = vld [vmem:[#allocation4 + $0x38] sm:$0xff]  ;;  %v1463_v43 = vld [vmem:[#allocation4 + $0x20] sm:$0xff]  ;;  %6379 = vmatprep.subr.bf16.mxu1 %v7343_v17 }
 0x37c   : > { %6201 = vmatmul.mubr.msk.bf16.vlgmr.msra.gmra.mrb[0].mxu0 %vm1190_vm2, %v6596_v30  ;;  %v1468_v44 = vld [vmem:[#allocation4 + $0x48] sm:$0xff]  ;;  %v1465_v45 = vld [vmem:[#allocation4 + $0x30] sm:$0xff]  ;;  %v6602_v46 = vld [vmem:[%s7777_s21 + $0x38] sm:$0xff]  }
 0x37d   : > { %6204 = vmatprep.mubr.msk.bf16.mxu0 %vm1190_vm2, %v6597_v32  ;;  %v1470_v47 = vld [vmem:[#allocation4 + $0x58] sm:$0xff]  ;;  %v1467_v48 = vld [vmem:[#allocation4 + $0x40] sm:$0xff]  ;;  %v1472_v49 = vld [vmem:[#allocation4 + $0x68] sm:$0xff] }
 0x37e   : > { %1492 = vperm.xlu1 %6593, %v1462_v36   ;;  %v1469_v50 = vld [vmem:[#allocation4 + $0x50] sm:$0xff]  ;;  %v1474_v51 = vld [vmem:[#allocation4 + $0x78] sm:$0xff]  ;;  %v1471_v52 = vld [vmem:[#allocation4 + $0x60] sm:$0xff] }
 0x37f   : > { %1482 = vperm.xlu0 %6592, %v1460_v39   ;;  %v2243_v53 = vld [vmem:[#allocation4 + $0x88] sm:$0xff]  ;;  %v1473_v54 = vld [vmem:[#allocation4 + $0x70] sm:$0xff]  ;;  %v2245_v55 = vld [vmem:[#allocation4 + $0x98] sm:$0xff]  ;;  %p5932_p9 = scmp.ne.s32.totalorder %s11771_s13, 1 }
 0x380   : > { %v2242_v56 = vld [vmem:[#allocation4 + $0x80] sm:$0xff]  ;;  %v2247_v57 = vld [vmem:[#allocation4 + $0xa8] sm:$0xff]  ;;  %v2244_v58 = vld [vmem:[#allocation4 + $0x90] sm:$0xff]  ;;  %s7350_s5 = smov (!%p5932_p9), 16   ;;  %s7351_s18 = smov (!%p5932_p9), 32  }
 0x381   : > { %v2249_v59 = vld [vmem:[#allocation4 + $0xb8] sm:$0xff]  ;;  %v2246_v60 = vld [vmem:[#allocation4 + $0xa0] sm:$0xff]  ;;  %v2251_v61 = vld [vmem:[#allocation4 + $0xc8] sm:$0xff]  ;;  %s7352_s9 = smov (!%p5932_p9), 48  }
 0x382   : > { %1502 = vperm.xlu1 %6593, %v1464_v38   ;;  %v2248_v62 = vld [vmem:[#allocation4 + $0xb0] sm:$0xff]  ;;  %v2253_v63 = vld [vmem:[#allocation4 + $0xd8] sm:$0xff]  ;;  %v2250_v0 = vld [vmem:[#allocation4 + $0xc0] sm:$0xff]  ;;  %v7345_v38 = vmov 0.0  }
 0x383   : > { %1497 = vperm.xlu0 %6592, %v1463_v43   ;;  %v2255_v1 = vld [vmem:[#allocation4 + $0xe8] sm:$0xff]  ;;  %v2252_v2 = vld [vmem:[#allocation4 + $0xd0] sm:$0xff]  ;;  %v2257_v3 = vld [vmem:[#allocation4 + $0xf8] sm:$0xff]  ;;  %6248 = vmatprep.mubr.msk.f32.mxu1 %vm7344_vm3, %v7345_v38 }
 0x384   : > { %6205 = vmatmul.mubr.msk.bf16.gmra.mrb[4].mxu0 %vm1190_vm2, %v6598_v34  ;;  %v2254_v4 = vld [vmem:[#allocation4 + $0xe0] sm:$0xff]  ;;  %v3060_v5 = vld [vmem:[#allocation4 + $0x108] sm:$0xff]  ;;  %v2256_v6 = vld [vmem:[#allocation4 + $0xf0] sm:$0xff] }
 0x385   : > { %6208 = vmatprep.mubr.msk.bf16.mxu0 %vm1190_vm2, %v6599_v35  ;;  %v3062_v7 = vld [vmem:[#allocation4 + $0x118] sm:$0xff]  ;;  %v3059_v8 = vld [vmem:[#allocation4 + $0x100] sm:$0xff]  ;;  %v3064_v9 = vld [vmem:[#allocation4 + $0x128] sm:$0xff] }
 0x386   : > { %1512 = vperm.xlu1 %6593, %v1466_v42   ;;  %v3061_v10 = vld [vmem:[#allocation4 + $0x110] sm:$0xff]  ;;  %v3066_v11 = vld [vmem:[#allocation4 + $0x138] sm:$0xff]  ;;  %v3063_v12 = vld [vmem:[#allocation4 + $0x120] sm:$0xff] }
 0x387   : > { %1507 = vperm.xlu0 %6592, %v1465_v45   ;;  %v3068_v13 = vld [vmem:[#allocation4 + $0x148] sm:$0xff]  ;;  %v3065_v14 = vld [vmem:[#allocation4 + $0x130] sm:$0xff]  ;;  %v3070_v15 = vld [vmem:[#allocation4 + $0x158] sm:$0xff] }
 0x388   : > { %v3067_v16 = vld [vmem:[#allocation4 + $0x140] sm:$0xff]  ;;  %v3072_v18 = vld [vmem:[#allocation4 + $0x168] sm:$0xff]  ;;  %v3069_v19 = vld [vmem:[#allocation4 + $0x150] sm:$0xff] }
 0x389   : > { %v3074_v20 = vld [vmem:[#allocation4 + $0x178] sm:$0xff]  ;;  %v3071_v21 = vld [vmem:[#allocation4 + $0x160] sm:$0xff]  ;;  %v3073_v23 = vld [vmem:[#allocation4 + $0x170] sm:$0xff] }
 0x38a   : > { %1522 = vperm.xlu1 %6593, %v1468_v44   ;;  %v3868_v22 = vld [vmem:[#allocation4 + $0x180] sm:$0xff]  ;;  %v3869_v24 = vld [vmem:[#allocation4 + $0x188] sm:$0xff]  ;;  %v3870_v26 = vld [vmem:[#allocation4 + $0x190] sm:$0xff] }
 0x38b   : > { %1517 = vperm.xlu0 %6592, %v1467_v48   ;;  %v3876_v25 = vld [vmem:[#allocation4 + $0x1c0] sm:$0xff]  ;;  %v3883_v27 = vld [vmem:[#allocation4 + $0x1f8] sm:$0xff]  ;;  %v3873_v30 = vld [vmem:[#allocation4 + $0x1a8] sm:$0xff] }
 0x38c   : > { %6209 = vmatmul.mubr.msk.bf16.gmra.mrb[8].mxu0 %vm1190_vm2, %v6600_v40  ;;  %v3871_v28 = vld [vmem:[#allocation4 + $0x198] sm:$0xff]  ;;  %v3872_v29 = vld [vmem:[#allocation4 + $0x1a0] sm:$0xff]  ;;  %v3874_v31 = vld [vmem:[#allocation4 + $0x1b0] sm:$0xff] }
 0x38d   : > { %6212 = vmatprep.mubr.msk.bf16.mxu0 %vm1190_vm2, %v6601_v41  ;;  %v3875_v32 = vld [vmem:[#allocation4 + $0x1b8] sm:$0xff]  ;;  %v3877_v33 = vld [vmem:[#allocation4 + $0x1c8] sm:$0xff]  ;;  %v3878_v34 = vld [vmem:[#allocation4 + $0x1d0] sm:$0xff] }
 0x38e   : > { %1532 = vperm.xlu1 %6593, %v1470_v47   ;;  %v3879_v35 = vld [vmem:[#allocation4 + $0x1d8] sm:$0xff]  ;;  %v3880_v36 = vld [vmem:[#allocation4 + $0x1e0] sm:$0xff]  ;;  %v3881_v37 = vld [vmem:[#allocation4 + $0x1e8] sm:$0xff] }
 0x38f   : > { %1527 = vperm.xlu0 %6592, %v1469_v50   ;;  %v3882_v39 = vld [vmem:[#allocation4 + $0x1f0] sm:$0xff] }
 0x392   : > { %1542 = vperm.xlu1 %6593, %v1472_v49  }
 0x393   : > { %1537 = vperm.xlu0 %6592, %v1471_v52  }
 0x394   : > { %6213 = vmatmul.mubr.msk.bf16.gmra.mrb[12].mxu0 %vm1190_vm2, %v6602_v46 }
 0x396   : > { %1552 = vperm.xlu1 %6593, %v1474_v51  }
 0x397   : > { %1547 = vperm.xlu0 %6592, %v1473_v54  }
 0x39a   : > { %2265 = vperm.xlu1 %6593, %v2243_v53  }
 0x39b   : > { %2260 = vperm.xlu0 %6592, %v2242_v56  }
 0x39e   : > { %2275 = vperm.xlu1 %6593, %v2245_v55  }
 0x39f   : > { %2270 = vperm.xlu0 %6592, %v2244_v58  }
 0x3a2   : > { %2285 = vperm.xlu1 %6593, %v2247_v57  }
 0x3a3   : > { %2280 = vperm.xlu0 %6592, %v2246_v60  }
 0x3a6   : > { %2295 = vperm.xlu1 %6593, %v2249_v59  }
 0x3a7   : > { %2290 = vperm.xlu0 %6592, %v2248_v62  }
 0x3aa   : > { %2305 = vperm.xlu1 %6593, %v2251_v61  }
 0x3ab   : > { %2300 = vperm.xlu0 %6592, %v2250_v0  }
 0x3ae   : > { %2315 = vperm.xlu1 %6593, %v2253_v63  }
 0x3af   : > { %2310 = vperm.xlu0 %6592, %v2252_v2  }
 0x3b2   : > { %2325 = vperm.xlu1 %6593, %v2255_v1  }
 0x3b3   : > { %2320 = vperm.xlu0 %6592, %v2254_v4  }
 0x3b6   : > { %2335 = vperm.xlu1 %6593, %v2257_v3  }
 0x3b7   : > { %2330 = vperm.xlu0 %6592, %v2256_v6  }
 0x3ba   : > { %3082 = vperm.xlu1 %6593, %v3060_v5  }
 0x3bb   : > { %3077 = vperm.xlu0 %6592, %v3059_v8  }
 0x3be   : > { %3092 = vperm.xlu1 %6593, %v3062_v7  }
 0x3bf   : > { %3087 = vperm.xlu0 %6592, %v3061_v10  }
 0x3c2   : > { %3102 = vperm.xlu1 %6593, %v3064_v9  }
 0x3c3   : > { %3097 = vperm.xlu0 %6592, %v3063_v12  }
 0x3c6   : > { %3112 = vperm.xlu1 %6593, %v3066_v11  }
 0x3c7   : > { %3107 = vperm.xlu0 %6592, %v3065_v14  }
 0x3ca   : > { %3122 = vperm.xlu1 %6593, %v3068_v13  }
 0x3cb   : > { %3117 = vperm.xlu0 %6592, %v3067_v16  }
 0x3ce   : > { %3132 = vperm.xlu1 %6593, %v3070_v15  }
 0x3cf   : > { %3127 = vperm.xlu0 %6592, %v3069_v19  }
 0x3d2   : > { %3142 = vperm.xlu1 %6593, %v3072_v18   ;;  %v1312_v18 = vld [vmem:[#allocation14] sm:$0xf] }
 0x3d3   : > { %3137 = vperm.xlu0 %6592, %v3071_v21  }
 0x3d6   : > { %3152 = vperm.xlu1 %6593, %v3074_v20  }
 0x3d7   : > { %3147 = vperm.xlu0 %6592, %v3073_v23  }
 0x3da   : > { %3886 = vperm.xlu1 %6593, %v3868_v22  }
 0x3db   : > { %3926 = vperm.xlu0 %6592, %v3876_v25  }
 0x3de   : > { %3891 = vperm.xlu1 %6593, %v3869_v24  }
 0x3df   : > { %3961 = vperm.xlu0 %6592, %v3883_v27  }
 0x3e2   : > { %3896 = vperm.xlu1 %6593, %v3870_v26  }
 0x3e6   : > { %3901 = vperm.xlu1 %6593, %v3871_v28  }
 0x3ea   : > { %3906 = vperm.xlu1 %6593, %v3872_v29  }
 0x3ee   : > { %3911 = vperm.xlu1 %6593, %v3873_v30  }
 0x3f2   : > { %3916 = vperm.xlu1 %6593, %v3874_v31  }
 0x3f6   : > { %3921 = vperm.xlu1 %6593, %v3875_v32  }
 0x3f9   : > { %v8448_v28 = vpop.permute.xlu1 %1487 }
 0x3fa   : > { %3931 = vperm.xlu1 %6593, %v3877_v33   ;;  %v8330_v40 = vpop.permute.xlu0 %1477 }
 0x3fd   : > { %v8450_v29 = vpop.permute.xlu1 %1492 }
 0x3fe   : > { %3936 = vperm.xlu1 %6593, %v3878_v34   ;;  %v8332_v41 = vpop.permute.xlu0 %1482 }
 0x401   : > { %v8452_v30 = vpop.permute.xlu1 %1502 }
 0x402   : > { %3941 = vperm.xlu1 %6593, %v3879_v35   ;;  %v8334_v42 = vpop.permute.xlu0 %1497 }
 0x405   : > { %v8454_v31 = vpop.permute.xlu1 %1512 }
 0x406   : > { %3946 = vperm.xlu1 %6593, %v3880_v36   ;;  %v8336_v43 = vpop.permute.xlu0 %1507 }
 0x409   : > { %v8456_v32 = vpop.permute.xlu1 %1522 }
 0x40a   : > { %3951 = vperm.xlu1 %6593, %v3881_v37   ;;  %v8338_v44 = vpop.permute.xlu0 %1517 }
 0x40d   : > { %v8458_v33 = vpop.permute.xlu1 %1532 }
 0x40e   : > { %3956 = vperm.xlu1 %6593, %v3882_v39   ;;  %v8340_v45 = vpop.permute.xlu0 %1527 }
 0x411   : > { %v8460_v34 = vpop.permute.xlu1 %1542 }
 0x412   : > { %v8342_v47 = vpop.permute.xlu0 %1537 }
 0x415   : > { %v8462_v35 = vpop.permute.xlu1 %1552 }
 0x416   : > { %v8353_v53 = vpop.permute.xlu0 %1547 }
 0x419   : > { %v8464_v36 = vpop.permute.xlu1 %2265 }
 0x41a   : > { %v8364_v60 = vpop.permute.xlu0 %2260 }
 0x41d   : > { %v8466_v37 = vpop.permute.xlu1 %2275 }
 0x41e   : > { %v8375_v0 = vpop.permute.xlu0 %2270 }
 0x421   : > { %v8468_v38 = vpop.permute.xlu1 %2285 }
 0x422   : > { %v8390_v5 = vpop.permute.xlu0 %2280 }
 0x425   : > { %v8470_v39 = vpop.permute.xlu1 %2295 }
 0x426   : > { %v8402_v11 = vpop.permute.xlu0 %2290 }
 0x42a   : > { %v8410_v12 = vpop.permute.xlu0 %2300 }
 0x42e   : > { %v8414_v13 = vpop.permute.xlu0 %2310 }
 0x432   : > { %v8418_v14 = vpop.permute.xlu0 %2320 }
 0x436   : > { %v8421_v15 = vpop.permute.xlu0 %2330 }
 0x43a   : > { %v8424_v16 = vpop.permute.xlu0 %3077 }
 0x43e   : > { %v8427_v19 = vpop.permute.xlu0 %3087 }
 0x43f   : > { %11304 = vst [vmem:[#allocation41_spill] sm:$0xff] %v8427_v19 }
 0x442   : > { %v8429_v20 = vpop.permute.xlu0 %3097 }
 0x446   : > { %v8431_v21 = vpop.permute.xlu0 %3107 }
 0x447   : > { %11305 = vst [vmem:[#allocation42_spill] sm:$0xff] %v8431_v21 }
 0x44a   : > { %v8433_v22 = vpop.permute.xlu0 %3117 }
 0x44b   : > { %11306 = vst [vmem:[#allocation43_spill] sm:$0xff] %v8433_v22 }
 0x44e   : > { %v8435_v23 = vpop.permute.xlu0 %3127 }
 0x44f   : > { %v6202_v46 = vpop.f32.mrb[0].mxu0  ;;  %11307 = vst [vmem:[#allocation44_spill] sm:$0xff] %v8435_v23 }
 0x450   : > { %v1249_v48 = vpop.f32.mrb[1].mxu0 }
 0x451   : > { %v6203_v49 = vpop.f32.mrb[2].mxu0 }
 0x452   : > { %v8344_v50 = vpack.c.bf16 %v6203_v49, %v6202_v46  ;;  %v1252_v51 = vpop.f32.mrb[3].mxu0  ;;  %v8437_v24 = vpop.permute.xlu0 %3137 }
 0x453   : > { %v8346_v52 = vpack.c.bf16 %v1252_v51, %v1249_v48  ;;  %11308 = vst [vmem:[#allocation45_spill] sm:$0xff] %v8437_v24  ;;  %v8472_v46 = vpop.permute.xlu1 %2305 }
 0x454   : > { %11296 = vst [vmem:[#allocation33_spill] sm:$0xff] %v8344_v50  ;;  %2891 = vrot.lane.b32.xlu1 %v8344_v50, %s7346_s11 }
 0x455   : > { %11297 = vst [vmem:[#allocation34_spill] sm:$0xff] %v8346_v52  ;;  %2889 = vrot.lane.b32.xlu0 %v8346_v52, %s7346_s11  ;;  %6381 = vmatpush3.bf16.xpose.msra.mxu1 %v8346_v52 }
 0x456   : > { %6251 = vmatprep.subr.bf16.mxu0 %v8346_v52  ;;  %6382 = vmatprep.subr.bf16.mxu1 %v7343_v17  ;;  %v8439_v25 = vpop.permute.xlu0 %3147 }
 0x457   : > { %6252 = vmatpush3.bf16.msra.mxu0 %v8346_v52  ;;  %v6206_v54 = vpop.f32.mrb[4].mxu0  ;;  %11309 = vst [vmem:[#allocation46_spill] sm:$0xff] %v8439_v25  ;;  %v8474_v48 = vpop.permute.xlu1 %2315 }
 0x458   : > { %6253 = vmatprep.subr.bf16.mxu0 %v8344_v50  ;;  %v1265_v55 = vpop.f32.mrb[5].mxu0  ;;  %11313 = vst [vmem:[#allocation50_spill] sm:$0xff] %v8474_v48 }
 0x459   : > { %v6207_v56 = vpop.f32.mrb[6].mxu0 }
 0x45a   : > { %v8359_v57 = vpack.c.bf16 %v6207_v56, %v6206_v54  ;;  %v1268_v58 = vpop.f32.mrb[7].mxu0 }
 0x45b   : > { %v8361_v59 = vpack.c.bf16 %v1268_v58, %v1265_v55  ;;  %6254 = vmatpush3.bf16.msra.mxu0 %v8344_v50  ;;  %v8476_v49 = vpop.permute.xlu1 %2325 }
 0x45c   : > { %11298 = vst [vmem:[#allocation35_spill] sm:$0xff] %v8359_v57  ;;  %2895 = vrot.lane.b32.xlu1 %v8359_v57, %s7346_s11  ;;  %11314 = vst [vmem:[#allocation51_spill] sm:$0xff] %v8476_v49 }
 0x45d   : > { %11299 = vst [vmem:[#allocation36_spill] sm:$0xff] %v8361_v59  ;;  %6384 = vmatpush3.bf16.xpose.msra.mxu1 %v8344_v50  ;;  %6255 = vmatprep.subr.bf16.mxu0 %v8361_v59 }
 0x45e   : > { %2893 = vrot.lane.b32.xlu0 %v8361_v59, %s7346_s11  ;;  %6385 = vmatprep.subr.bf16.mxu1 %v7343_v17 }
 0x45f   : > { %6256 = vmatpush3.bf16.msra.mxu0 %v8361_v59  ;;  %v6210_v61 = vpop.f32.mrb[8].mxu0  ;;  %v8478_v51 = vpop.permute.xlu1 %2335 }
 0x460   : > { %6257 = vmatprep.subr.bf16.mxu0 %v8359_v57  ;;  %v1281_v62 = vpop.f32.mrb[9].mxu0  ;;  %11315 = vst [vmem:[#allocation52_spill] sm:$0xff] %v8478_v51 }
 0x461   : > { %v6211_v63 = vpop.f32.mrb[10].mxu0 }
 0x462   : > { %v8377_v1 = vpack.c.bf16 %v6211_v63, %v6210_v61  ;;  %v1284_v2 = vpop.f32.mrb[11].mxu0 }
 0x463   : > { %6258 = vmatpush3.bf16.msra.mxu0 %v8359_v57  ;;  %v8380_v3 = vpack.c.bf16 %v1284_v2, %v1281_v62  ;;  %v8480_v54 = vpop.permute.xlu1 %3082 }
 0x464   : > { %11300 = vst [vmem:[#allocation37_spill] sm:$0xff] %v8377_v1  ;;  %2899 = vrot.lane.b32.xlu1 %v8377_v1, %s7346_s11 }
 0x465   : > { %11301 = vst [vmem:[#allocation38_spill] sm:$0xff] %v8380_v3  ;;  %6387 = vmatpush3.bf16.xpose.msra.mxu1 %v8361_v59  ;;  %6259 = vmatprep.subr.bf16.mxu0 %v8380_v3 }
 0x466   : > { %6388 = vmatprep.subr.bf16.mxu1 %v7343_v17  ;;  %2897 = vrot.lane.b32.xlu0 %v8380_v3, %s7346_s11 }
 0x467   : > { %6260 = vmatpush3.bf16.msra.mxu0 %v8380_v3  ;;  %v6214_v4 = vpop.f32.mrb[12].mxu0  ;;  %v8482_v55 = vpop.permute.xlu1 %3092 }
 0x468   : > { %6261 = vmatprep.subr.bf16.mxu0 %v8377_v1  ;;  %v1297_v6 = vpop.f32.mrb[13].mxu0  ;;  %11316 = vst [vmem:[#allocation53_spill] sm:$0xff] %v8482_v55 }
 0x469   : > { %v6215_v7 = vpop.f32.mrb[14].mxu0 }
 0x46a   : > { %v8393_v8 = vpack.c.bf16 %v6215_v7, %v6214_v4  ;;  %v1300_v9 = vpop.f32.mrb[15].mxu0  ;;  %v1383_v4 = vld [vmem:[%s7784_s27] sm:$0xff] }
 0x46b   : > { %6262 = vmatpush3.bf16.msra.mxu0 %v8377_v1  ;;  %v8396_v10 = vpack.c.bf16 %v1300_v9, %v1297_v6  ;;  %v8484_v56 = vpop.permute.xlu1 %3102  ;;  %v8498_v6 = vld [vmem:[%s7784_s27 + $0x8] sm:$0xff]  ;;  %v1388_v7 = vunpack.c.1.s8 %v1383_v4  ;;  %v1387_v9 = vunpack.c.0.s8 %v1383_v4 }
 0x46c   : > { %11302 = vst [vmem:[#allocation39_spill] sm:$0xff] %v8393_v8  ;;  %2903 = vrot.lane.b32.xlu1 %v8393_v8, %s7346_s11  ;;  %11317 = vst [vmem:[#allocation54_spill] sm:$0xff] %v8484_v56  ;;  %v1394_v23 = vunpack.c.3.s8 %v8498_v6 }
 0x46d   : > { %11303 = vst [vmem:[#allocation40_spill] sm:$0xff] %v8396_v10  ;;  %6390 = vmatpush3.bf16.xpose.msra.mxu1 %v8359_v57  ;;  %6263 = vmatprep.subr.bf16.mxu0 %v8396_v10  ;;  %v1404_v57 = vcvt.s32.f32 %v1388_v7  ;;  %v1403_v59 = vcvt.s32.f32 %v1387_v9  ;;  %v1392_v7 = vunpack.c.1.s8 %v8498_v6 }
 0x46e   : > { %6391 = vmatprep.subr.bf16.mxu1 %v7343_v17  ;;  %2901 = vrot.lane.b32.xlu0 %v8396_v10, %s7346_s11  ;;  %v1410_v49 = vcvt.s32.f32 %v1394_v23 }
 0x46f   : > { %6264 = vmatpush3.bf16.msra.mxu0 %v8396_v10  ;;  %v8486_v58 = vpop.permute.xlu1 %3112  ;;  %v5916_v24 = vadd.f32 -1.0, %v1403_v59 }
 0x470   : > { %6265 = vmatprep.subr.bf16.mxu0 %v8393_v8  ;;  %11318 = vst [vmem:[#allocation55_spill] sm:$0xff] %v8486_v58 }
 0x473   : > { %6266 = vmatpush3.bf16.msra.mxu0 %v8393_v8  ;;  %v8488_v61 = vpop.permute.xlu1 %3122 }
 0x474   : > { %11319 = vst [vmem:[#allocation56_spill] sm:$0xff] %v8488_v61 }
 0x475   : > { %6393 = vmatpush3.bf16.xpose.msra.mxu1 %v8380_v3  ;;  %v1390_v3 = vunpack.c.3.s8 %v1383_v4 }
 0x476   : > { %6394 = vmatprep.subr.bf16.mxu1 %v7343_v17 }
 0x477   : > { %v8490_v62 = vpop.permute.xlu1 %3132  ;;  %v1406_v25 = vcvt.s32.f32 %v1390_v3 }
 0x478   : > { %11320 = vst [vmem:[#allocation57_spill] sm:$0xff] %v8490_v62 }
 0x47b   : > { %v8492_v63 = vpop.permute.xlu1 %3142 }
 0x47c   : > { %11321 = vst [vmem:[#allocation58_spill] sm:$0xff] %v8492_v63 }
 0x47d   : > { %6396 = vmatpush3.bf16.xpose.msra.mxu1 %v8377_v1  ;;  %v1555_v1 = vlaneseq }
 0x47e   : > { %6397 = vmatprep.subr.bf16.mxu1 %v7343_v17 }
 0x47f   : > { %v8494_v2 = vpop.permute.xlu1 %3152  ;;  %v8507_v55 = vshrl.u32 %v1555_v1, 7 }
 0x480   : > { %11322 = vst [vmem:[#allocation59_spill] sm:$0xff] %v8494_v2  ;;  %v5917_v2 = vadd.f32 -1.0, %v1404_v57 }
 0x481   : > { %v3966_v1 = vsub.s32 3, %v8507_v55 }
 0x482   : > { %v8516_v3 = vmul.f32 1e+30, %v5917_v2 }
 0x483   : > { %v8501_v50 = vpop.permute.xlu1 %3886 }
 0x484   : > { %11323 = vst [vmem:[#allocation60_spill] sm:$0xff] %v8501_v50 }
 0x485   : > { %6399 = vmatpush3.bf16.xpose.msra.mxu1 %v8396_v10  ;;  %v1393_v10 = vunpack.c.2.s8 %v8498_v6 }
 0x486   : > { %6400 = vmatprep.subr.bf16.mxu1 %v7343_v17  ;;  %v8441_v17 = vpop.permute.xlu0 %3926 }
 0x487   : > { %11310 = vst [vmem:[#allocation47_spill] sm:$0xff] %v8441_v17  ;;  %v1409_v56 = vcvt.s32.f32 %v1393_v10  ;;  %v8509_v19 = vpop.permute.xlu1 %3891  ;;  %v5919_v10 = vadd.f32 -1.0, %v1406_v25  ;;  %v1408_v25 = vcvt.s32.f32 %v1392_v7 }
 0x488   : > { %11324 = vst [vmem:[#allocation61_spill] sm:$0xff] %v8509_v19  ;;  %v8519_v19 = vmul.f32 1e+30, %v5916_v24 }
 0x489   : > { %v8540_v57 = vmul.f32 1e+30, %v5919_v10 }
 0x48a   : > { %v8443_v26 = vpop.permute.xlu0 %3961 }
 0x48b   : > { %11311 = vst [vmem:[#allocation48_spill] sm:$0xff] %v8443_v26 }
 0x48d   : > { %6402 = vmatpush3.bf16.xpose.msra.mxu1 %v8393_v8  ;;  %v1389_v8 = vunpack.c.2.s8 %v1383_v4  ;;  %v5922_v4 = vadd.f32 -1.0, %v1409_v56 }
 0x48f   : > { %v1405_v26 = vcvt.s32.f32 %v1389_v8  ;;  %v1557_v8 = vsub.s32 0, %v8507_v55  ;;  %v8532_v58 = vmul.f32 1e+30, %v5922_v4 }
 0x491   : > { %v5918_v17 = vadd.f32 -1.0, %v1405_v26  ;;  %v8526_v26 = vpop.permute.xlu1 %3896 }
 0x492   : > { %11325 = vst [vmem:[#allocation62_spill] sm:$0xff] %v8526_v26 }
 0x493   : > { %v8530_v61 = vmul.f32 1e+30, %v5918_v17 }
 0x494   : > { %6249 = vmatmul.mubr.f32.vlgmr.msra.gmra.mrb[0].mxu1 %v1312_v18  ;;  %v1391_v18 = vunpack.c.0.s8 %v8498_v6 }
 0x496   : > { %v1407_v52 = vcvt.s32.f32 %v1391_v18 }
 0x498   : > { %v5920_v62 = vadd.f32 -1.0, %v1407_v52  ;;  %v8524_v52 = vld [vmem:[%s7784_s27 + $0x18] sm:$0xff] }
 0x499   : > { %v1399_v51 = vunpack.c.0.s8 %v8524_v52  ;;  %v1401_v4 = vunpack.c.2.s8 %v8524_v52 }
 0x49a   : > { %v8521_v59 = vmul.f32 1e+30, %v5920_v62 }
 0x4c7   : > { %v8445_v27 = vpop.permute.xlu0 %2889 }
 0x4c8   : > { %11312 = vst [vmem:[#allocation49_spill] sm:$0xff] %v8445_v27  ;;  %6283 = vmatprep.subr.bf16.mxu0 %v8445_v27  ;;  %v8505_v27 = vld [vmem:[%s7784_s27 + $0x10] sm:$0xff] }
 0x4c9   : > { %v1395_v63 = vunpack.c.0.s8 %v8505_v27  ;;  %v1397_v9 = vunpack.c.2.s8 %v8505_v27  ;;  %v1396_v17 = vunpack.c.1.s8 %v8505_v27 }
 0x4cb   : > { %v1411_v18 = vcvt.s32.f32 %v1395_v63  ;;  %v1413_v2 = vcvt.s32.f32 %v1397_v9  ;;  %v1412_v23 = vcvt.s32.f32 %v1396_v17 }
 0x4cd   : > { %v5924_v26 = vadd.f32 -1.0, %v1411_v18  ;;  %v5921_v18 = vadd.f32 -1.0, %v1408_v25 }
 0x567   : > { %v8528_v56 = vpop.f32.mrb[0].mxu1 }
 0x568   : > { %v8535_v63 = vrot.slane %v8528_v56, %v1557_v8  ;;  %v8538_v24 = vrot.slane %v8528_v56, %v3966_v1  ;;  %v6250_v62 = vpop.f32.mrb[1].mxu1 }
 0x569   : > { %v5926_v62 = vadd.f32 -1.0, %v1413_v2 }
 0x56a   : > { %11326 = vst [vmem:[#allocation63_spill] sm:$0xff] %v8538_v24  ;;  %v1560_v7 = vadd.f32 %v8535_v63, %v8332_v41  ;;  %v1559_v9 = vadd.f32 %v8535_v63, %v8330_v40  ;;  %v1563_v8 = vadd.f32 %v8535_v63, %v8334_v42  ;;  %v1561_v1 = vadd.f32 %v8535_v63, %v8448_v28  ;;  %v8558_v24 = vpop.permute.xlu1 %3901 }
 0x56b   : > { %v1565_v6 = vadd.f32 %v8535_v63, %v8336_v43  ;;  %v1562_v10 = vadd.f32 %v8535_v63, %v8450_v29  ;;  %11327 = vst [vmem:[#allocation64_spill] sm:$0xff] %v8558_v24  ;;  %v1567_v43 = vadd.f32 %v8535_v63, %v8338_v44  ;;  %v8568_v24 = vmul.f32 1e+30, %v5924_v26 }
 0x56c   : > { %vm1576_vm4 = vcmp.gt.f32.partialorder %v1560_v7, 0.0  ;;  %v1592_v22 = vmul.f32 0.2, %v1560_v7  ;;  %vm1575_vm5 = vcmp.gt.f32.partialorder %v1559_v9, 0.0  ;;  %v1591_v41 = vmul.f32 0.2, %v1559_v9 }
 0x56d   : > { %vm1579_vm6 = vcmp.gt.f32.partialorder %v1563_v8, 0.0  ;;  %v1595_v40 = vmul.f32 0.2, %v1563_v8  ;;  %vm1577_vm7 = vcmp.gt.f32.partialorder %v1561_v1, 0.0  ;;  %v1593_v42 = vmul.f32 0.2, %v1561_v1 }
 0x56e   : > { %v1608_v50 = vsel %vm1576_vm4, %v1560_v7, %v1592_v22  ;;  %v1607_v28 = vsel %vm1575_vm5, %v1559_v9, %v1591_v41  ;;  %v1597_v21 = vmul.f32 0.2, %v1565_v6  ;;  %vm1581_vm8 = vcmp.gt.f32.partialorder %v1565_v6, 0.0 }
 0x56f   : > { %v8563_v29 = vadd.f32 %v1608_v50, %v8516_v3  ;;  %v8566_v25 = vadd.f32 %v1607_v28, %v8519_v19  ;;  %v1611_v2 = vsel %vm1579_vm6, %v1563_v8, %v1595_v40  ;;  %v1609_v48 = vsel %vm1577_vm7, %v1561_v1, %v1593_v42  ;;  %v8580_v1 = vpop.permute.xlu1 %3906 }
 0x570   : > { %v1564_v22 = vadd.f32 %v8535_v63, %v8452_v30  ;;  %vm1578_vm9 = vcmp.gt.f32.partialorder %v1562_v10, 0.0  ;;  %v1594_v44 = vmul.f32 0.2, %v1562_v10  ;;  %v1415_v50 = vcvt.s32.f32 %v1399_v51 }
 0x571   : > { %11328 = vst [vmem:[#allocation65_spill] sm:$0xff] %v8563_v29  ;;  %11329 = vst [vmem:[#allocation66_spill] sm:$0xff] %v8566_v25  ;;  %1657 = vmax.xlane.f32.xlu1 %v8563_v29  ;;  %1655 = vmax.xlane.f32.xlu0 %v8566_v25  ;;  %v8575_v7 = vadd.f32 %v1611_v2, %v8521_v59  ;;  %v8577_v9 = vmul.f32 1e+30, %v5921_v18  ;;  %v1417_v8 = vcvt.s32.f32 %v1401_v4  ;;  %v1398_v26 = vunpack.c.3.s8 %v8505_v27 }
 0x572   : > { %v8583_v30 = vadd.f32 %v1609_v48, %v8530_v61  ;;  %v1613_v41 = vsel %vm1581_vm8, %v1565_v6, %v1597_v21  ;;  %vm1583_vm10 = vcmp.gt.f32.partialorder %v1567_v43, 0.0  ;;  %v1599_v40 = vmul.f32 0.2, %v1567_v43 }
 0x573   : > { %11330 = vst [vmem:[#allocation67_spill] sm:$0xff] %v8575_v7  ;;  %v1610_v42 = vsel %vm1578_vm9, %v1562_v10, %v1594_v44  ;;  %v1596_v28 = vmul.f32 0.2, %v1564_v22  ;;  %v1569_v51 = vadd.f32 %v8535_v63, %v8340_v45  ;;  %v1566_v17 = vadd.f32 %v8535_v63, %v8454_v31 }
 0x574   : > { %11331 = vst [vmem:[#allocation68_spill] sm:$0xff] %v8583_v30  ;;  %vm1580_vm11 = vcmp.gt.f32.partialorder %v1564_v22, 0.0  ;;  %v8591_v27 = vmul.f32 1e+30, %v5926_v62  ;;  %v5923_v48 = vadd.f32 -1.0, %v1410_v49  ;;  %v5928_v4 = vadd.f32 -1.0, %v1415_v50 }
 0x575   : > { %1663 = vmax.xlane.f32.xlu1 %v8575_v7  ;;  %1659 = vmax.xlane.f32.xlu0 %v8583_v30  ;;  %v5925_v21 = vadd.f32 -1.0, %v1412_v23  ;;  %v5930_v6 = vadd.f32 -1.0, %v1417_v8  ;;  %v1414_v18 = vcvt.s32.f32 %v1398_v26  ;;  %v1400_v10 = vunpack.c.1.s8 %v8524_v52  ;;  %v8605_v23 = vpop.permute.xlu1 %3911  ;;  %v9339_v30 = vld [vmem:[#allocation2 + $0x130] sm:$0xff] }
 0x576   : > { %v8595_v2 = vadd.f32 %v1613_v41, %v8532_v58  ;;  %v8598_v45 = vadd.f32 %v1610_v42, %v8540_v57  ;;  %v1615_v31 = vsel %vm1583_vm10, %v1567_v43, %v1599_v40  ;;  %v1571_v44 = vadd.f32 %v8535_v63, %v8342_v47  ;;  %11439 = vst [vmem:[#allocation129_spill] sm:$0xff] %v9339_v30 }
 0x577   : > { %v1612_v62 = vsel %vm1580_vm11, %v1564_v22, %v1596_v28  ;;  %v1601_v7 = vmul.f32 0.2, %v1569_v51  ;;  %v1598_v49 = vmul.f32 0.2, %v1566_v17  ;;  %v1568_v50 = vadd.f32 %v8535_v63, %v8456_v32 }
 0x578   : > { %11332 = vst [vmem:[#allocation69_spill] sm:$0xff] %v8595_v2  ;;  %11333 = vst [vmem:[#allocation70_spill] sm:$0xff] %v8598_v45  ;;  %v11334_v8 = vsub.s32 1, %v8507_v55  ;;  %vm1585_vm12 = vcmp.gt.f32.partialorder %v1569_v51, 0.0  ;;  %vm1582_vm13 = vcmp.gt.f32.partialorder %v1566_v17, 0.0  ;;  %v1573_v47 = vadd.f32 %v8535_v63, %v8353_v53 }
 0x579   : > { %1667 = vmax.xlane.f32.xlu1 %v8595_v2  ;;  %1661 = vmax.xlane.f32.xlu0 %v8598_v45  ;;  %v8616_v43 = vmul.f32 1e+30, %v5923_v48  ;;  %v8618_v22 = vmul.f32 1e+30, %v5928_v4  ;;  %v5927_v32 = vadd.f32 -1.0, %v1414_v18  ;;  %v1570_v41 = vadd.f32 %v8535_v63, %v8458_v33 }
 0x57a   : > { %v8610_v26 = vrot.slane %v8528_v56, %v11334_v8  ;;  %v8623_v40 = vadd.f32 %v1615_v31, %v8568_v24  ;;  %v8626_v42 = vadd.f32 %v1612_v62, %v8577_v9  ;;  %v1416_v28 = vcvt.s32.f32 %v1400_v10 }
 0x57b   : > { %v1402_v8 = vunpack.c.3.s8 %v8524_v52  ;;  %v1617_v2 = vsel %vm1585_vm12, %v1569_v51, %v1601_v7  ;;  %v1614_v29 = vsel %vm1582_vm13, %v1566_v17, %v1598_v49  ;;  %v1603_v53 = vmul.f32 0.2, %v1571_v44  ;;  %v8637_v7 = vpop.permute.xlu1 %3916 }
 0x57c   : > { %11335 = vst [vmem:[#allocation71_spill] sm:$0xff] %v8623_v40  ;;  %11336 = vst [vmem:[#allocation72_spill] sm:$0xff] %v8626_v42  ;;  %v1600_v48 = vmul.f32 0.2, %v1568_v50  ;;  %vm1587_vm14 = vcmp.gt.f32.partialorder %v1571_v44, 0.0  ;;  %vm1584_vm15 = vcmp.gt.f32.partialorder %v1568_v50, 0.0  ;;  %v2343_v4 = vadd.f32 %v8610_v26, %v8464_v36 }
 0x57d   : > { %1671 = vmax.xlane.f32.xlu1 %v8623_v40  ;;  %1665 = vmax.xlane.f32.xlu0 %v8626_v42  ;;  %v1605_v33 = vmul.f32 0.2, %v1573_v47  ;;  %v8633_v18 = vmul.f32 1e+30, %v5925_v21  ;;  %vm1589_vm0 = vcmp.gt.f32.partialorder %v1573_v47, 0.0  ;;  %v1572_v52 = vadd.f32 %v8535_v63, %v8460_v34 }
 0x57e   : > { %v1602_v10 = vmul.f32 0.2, %v1570_v41  ;;  %v8640_v51 = vadd.f32 %v1617_v2, %v8591_v27  ;;  %v8643_v17 = vadd.f32 %v1614_v29, %v8616_v43  ;;  %v8645_v31 = vmul.f32 1e+30, %v5930_v6 }
 0x57f   : > { %vm1586_vm1 = vcmp.gt.f32.partialorder %v1570_v41, 0.0  ;;  %v1619_v62 = vsel %vm1587_vm14, %v1571_v44, %v1603_v53  ;;  %v1616_v36 = vsel %vm1584_vm15, %v1568_v50, %v1600_v48  ;;  %v8647_v21 = vmul.f32 1e+30, %v5927_v32 }
 0x580   : > { %11337 = vst [vmem:[#allocation73_spill] sm:$0xff] %v8640_v51  ;;  %11338 = vst [vmem:[#allocation74_spill] sm:$0xff] %v8643_v17  ;;  %v1418_v49 = vcvt.s32.f32 %v1402_v8  ;;  %v1621_v34 = vsel %vm1589_vm0, %v1573_v47, %v1605_v33  ;;  %v2375_v40 = vmul.f32 0.2, %v2343_v4  ;;  %v5929_v42 = vadd.f32 -1.0, %v1416_v28  ;;  %v8663_v28 = vpop.permute.xlu1 %3921 }
 0x581   : > { %1675 = vmax.xlane.f32.xlu1 %v8640_v51  ;;  %1669 = vmax.xlane.f32.xlu0 %v8643_v17  ;;  %v2346_v2 = vadd.f32 %v8610_v26, %v8390_v5  ;;  %v1618_v29 = vsel %vm1586_vm1, %v1570_v41, %v1602_v10  ;;  %vm2359_vm3 = vcmp.gt.f32.partialorder %v2343_v4, 0.0  ;;  %v1604_v6 = vmul.f32 0.2, %v1572_v52  ;;  %v9301_v17 = vld [vmem:[#allocation2 + $0xc8] sm:$0xff] }
 0x582   : > { %v1574_v44 = vadd.f32 %v8535_v63, %v8462_v35  ;;  %v8656_v50 = vadd.f32 %v1619_v62, %v8618_v22  ;;  %v8659_v32 = vadd.f32 %v1616_v36, %v8633_v18  ;;  %vm1588_vm4 = vcmp.gt.f32.partialorder %v1572_v52, 0.0  ;;  %11432 = vst [vmem:[#allocation122_spill] sm:$0xff] %v9301_v17 }
 0x583   : > { %v5931_v8 = vadd.f32 -1.0, %v1418_v49  ;;  %v2348_v47 = vadd.f32 %v8610_v26, %v8402_v11  ;;  %v8668_v5 = vadd.f32 %v1621_v34, %v8645_v31  ;;  %v8671_v35 = vadd.f32 %v1618_v29, %v8647_v21 }
 0x584   : > { %11339 = vst [vmem:[#allocation75_spill] sm:$0xff] %v8656_v50  ;;  %11340 = vst [vmem:[#allocation76_spill] sm:$0xff] %v8659_v32  ;;  %v2391_v63 = vsel %vm2359_vm3, %v2343_v4, %v2375_v40  ;;  %v8673_v41 = vmul.f32 1e+30, %v5929_v42  ;;  %v1620_v53 = vsel %vm1588_vm4, %v1572_v52, %v1604_v6  ;;  %v2378_v48 = vmul.f32 0.2, %v2346_v2  ;;  %v8696_v34 = vpop.permute.xlu1 %3931 }
 0x585   : > { %1679 = vmax.xlane.f32.xlu1 %v8656_v50  ;;  %1673 = vmax.xlane.f32.xlu0 %v8659_v32  ;;  %11341 = vst [vmem:[#allocation77_spill] sm:$0xff] %v8668_v5  ;;  %11342 = vst [vmem:[#allocation78_spill] sm:$0xff] %v8671_v35  ;;  %v1606_v33 = vmul.f32 0.2, %v1574_v44  ;;  %v2342_v11 = vadd.f32 %v8610_v26, %v8364_v60  ;;  %vm2362_vm5 = vcmp.gt.f32.partialorder %v2346_v2, 0.0  ;;  %vm1590_vm6 = vcmp.gt.f32.partialorder %v1574_v44, 0.0 }
 0x586   : > { %v2350_v10 = vadd.f32 %v8610_v26, %v8410_v12  ;;  %v2344_v62 = vadd.f32 %v8610_v26, %v8375_v0  ;;  %v3157_v36 = vsub.s32 2, %v8507_v55  ;;  %v8683_v40 = vadd.f32 %v2391_v63, %v8516_v3 }
 0x587   : > { %v8685_v42 = vmul.f32 1e+30, %v5931_v8  ;;  %vm2364_vm7 = vcmp.gt.f32.partialorder %v2348_v47, 0.0  ;;  %v8690_v60 = vadd.f32 %v1620_v53, %v8673_v41  ;;  %v2380_v4 = vmul.f32 0.2, %v2348_v47 }
 0x588   : > { %11343 = vst [vmem:[#allocation79_spill] sm:$0xff] %v8683_v40  ;;  %v2352_v12 = vadd.f32 %v8610_v26, %v8414_v13  ;;  %v2345_v0 = vadd.f32 %v8610_v26, %v8466_v37  ;;  %v2394_v55 = vsel %vm2362_vm5, %v2346_v2, %v2378_v48  ;;  %v1622_v52 = vsel %vm1590_vm6, %v1574_v44, %v1606_v33 }
 0x589   : > { %1683 = vmax.xlane.f32.xlu1 %v8668_v5  ;;  %1677 = vmax.xlane.f32.xlu0 %v8671_v35  ;;  %11344 = vst [vmem:[#allocation80_spill] sm:$0xff] %v8690_v60  ;;  %vm2358_vm8 = vcmp.gt.f32.partialorder %v2342_v11, 0.0  ;;  %v2374_v49 = vmul.f32 0.2, %v2342_v11  ;;  %v2382_v29 = vmul.f32 0.2, %v2350_v10  ;;  %v2354_v8 = vadd.f32 %v8610_v26, %v8418_v14 }
 0x58a   : > { %v2376_v6 = vmul.f32 0.2, %v2344_v62  ;;  %v2347_v63 = vadd.f32 %v8610_v26, %v8468_v38  ;;  %v8703_v53 = vrot.slane %v8528_v56, %v3157_v36  ;;  %vm2366_vm9 = vcmp.gt.f32.partialorder %v2350_v10, 0.0  ;;  %v11358_v5 = vld [vmem:[#allocation60_spill] sm:$0xff] }
 0x58b   : > { %vm2360_vm10 = vcmp.gt.f32.partialorder %v2344_v62, 0.0  ;;  %v8708_v13 = vadd.f32 %v2394_v55, %v8521_v59  ;;  %v2396_v37 = vsel %vm2364_vm7, %v2348_v47, %v2380_v4  ;;  %v2384_v2 = vmul.f32 0.2, %v2352_v12  ;;  %v8720_v4 = vpop.permute.xlu1 %3936 }
 0x58c   : > { %v2377_v44 = vmul.f32 0.2, %v2345_v0  ;;  %v8712_v14 = vadd.f32 %v1622_v52, %v8685_v42  ;;  %v2390_v38 = vsel %vm2358_vm8, %v2342_v11, %v2374_v49  ;;  %vm2368_vm11 = vcmp.gt.f32.partialorder %v2352_v12, 0.0 }
 0x58d   : > { %2441 = vmax.xlane.f32.xlu1 %v8683_v40  ;;  %1681 = vmax.xlane.f32.xlu0 %v8690_v60  ;;  %11345 = vst [vmem:[#allocation81_spill] sm:$0xff] %v8708_v13  ;;  %vm2361_vm12 = vcmp.gt.f32.partialorder %v2345_v0, 0.0  ;;  %v2398_v56 = vsel %vm2366_vm9, %v2350_v10, %v2382_v29  ;;  %v2392_v48 = vsel %vm2360_vm10, %v2344_v62, %v2376_v6  ;;  %v2386_v33 = vmul.f32 0.2, %v2354_v8 }
 0x58e   : > { %11346 = vst [vmem:[#allocation82_spill] sm:$0xff] %v8712_v14  ;;  %v2379_v36 = vmul.f32 0.2, %v2347_v63  ;;  %v8716_v40 = vadd.f32 %v2396_v37, %v8532_v58  ;;  %vm2370_vm13 = vcmp.gt.f32.partialorder %v2354_v8, 0.0  ;;  %vm2363_vm14 = vcmp.gt.f32.partialorder %v2347_v63, 0.0 }
 0x58f   : > { %v2356_v47 = vadd.f32 %v8610_v26, %v8421_v15  ;;  %v2400_v11 = vsel %vm2368_vm11, %v2352_v12, %v2384_v2  ;;  %v2393_v55 = vsel %vm2361_vm12, %v2345_v0, %v2377_v44  ;;  %v2349_v10 = vadd.f32 %v8610_v26, %v8470_v39 }
 0x590   : > { %11347 = vst [vmem:[#allocation83_spill] sm:$0xff] %v8716_v40  ;;  %v8727_v62 = vadd.f32 %v2390_v38, %v8519_v19  ;;  %v8730_v52 = vadd.f32 %v2398_v56, %v8568_v24  ;;  %v8733_v49 = vadd.f32 %v2392_v48, %v8530_v61  ;;  %v3160_v15 = vadd.f32 %v8703_v53, %v8480_v54 }
 0x591   : > { %2447 = vmax.xlane.f32.xlu1 %v8708_v13  ;;  %1685 = vmax.xlane.f32.xlu0 %v8712_v14  ;;  %v2402_v29 = vsel %vm2370_vm13, %v2354_v8, %v2386_v33  ;;  %v2395_v6 = vsel %vm2363_vm14, %v2347_v63, %v2379_v36  ;;  %v2351_v12 = vadd.f32 %v8610_v26, %v8472_v46  ;;  %v2388_v2 = vmul.f32 0.2, %v2356_v47  ;;  %v11353_v46 = vld [vmem:[#allocation50_spill] sm:$0xff]  ;;  %v11357_v36 = vld [vmem:[#allocation51_spill] sm:$0xff] }
 0x592   : > { %11348 = vst [vmem:[#allocation84_spill] sm:$0xff] %v8727_v62  ;;  %11349 = vst [vmem:[#allocation85_spill] sm:$0xff] %v8730_v52  ;;  %v3159_v39 = vadd.f32 %v8703_v53, %v8424_v16  ;;  %v8742_v0 = vadd.f32 %v2400_v11, %v8591_v27  ;;  %v8745_v37 = vadd.f32 %v2393_v55, %v8540_v57  ;;  %vm2372_vm15 = vcmp.gt.f32.partialorder %v2356_v47, 0.0  ;;  %v11354_v16 = vld [vmem:[#allocation42_spill] sm:$0xff] }
 0x593   : > { %11350 = vst [vmem:[#allocation86_spill] sm:$0xff] %v8733_v49  ;;  %v3163_v44 = vadd.f32 %v8703_v53, %v8429_v20  ;;  %v2381_v54 = vmul.f32 0.2, %v2349_v10  ;;  %v2353_v8 = vadd.f32 %v8610_v26, %v11353_v46  ;;  %v3165_v63 = vadd.f32 %v8703_v53, %v11354_v16  ;;  %v8761_v20 = vpop.permute.xlu1 %3941 }
 0x594   : > { %11351 = vst [vmem:[#allocation87_spill] sm:$0xff] %v8742_v0  ;;  %11352 = vst [vmem:[#allocation88_spill] sm:$0xff] %v8745_v37  ;;  %v8756_v38 = vadd.f32 %v2402_v29, %v8618_v22  ;;  %v8759_v56 = vadd.f32 %v2395_v6, %v8577_v9  ;;  %vm2365_vm0 = vcmp.gt.f32.partialorder %v2349_v10, 0.0  ;;  %vm3176_vm1 = vcmp.gt.f32.partialorder %v3160_v15, 0.0 }
 0x595   : > { %2451 = vmax.xlane.f32.xlu1 %v8716_v40  ;;  %2439 = vmax.xlane.f32.xlu0 %v8727_v62  ;;  %v3192_v48 = vmul.f32 0.2, %v3160_v15  ;;  %v2383_v33 = vmul.f32 0.2, %v2351_v12  ;;  %v2355_v11 = vadd.f32 %v8610_v26, %v11357_v36  ;;  %vm3175_vm3 = vcmp.gt.f32.partialorder %v3159_v39, 0.0  ;;  %v11359_v62 = vld [vmem:[#allocation63_spill] sm:$0xff] }
 0x596   : > { %11355 = vst [vmem:[#allocation50_spill] sm:$0xff] %v8756_v38  ;;  %11356 = vst [vmem:[#allocation42_spill] sm:$0xff] %v8759_v56  ;;  %v2404_v55 = vsel %vm2372_vm15, %v2356_v47, %v2388_v2  ;;  %vm2367_vm4 = vcmp.gt.f32.partialorder %v2351_v12, 0.0  ;;  %v3195_v46 = vmul.f32 0.2, %v3163_v44  ;;  %v2397_v29 = vsel %vm2365_vm0, %v2349_v10, %v2381_v54  ;;  %v11362_v54 = vld [vmem:[#allocation52_spill] sm:$0xff] }
 0x597   : > { %v3191_v16 = vmul.f32 0.2, %v3159_v39  ;;  %vm3179_vm5 = vcmp.gt.f32.partialorder %v3163_v44, 0.0  ;;  %v2385_v6 = vmul.f32 0.2, %v2353_v8  ;;  %vm2369_vm6 = vcmp.gt.f32.partialorder %v2353_v8, 0.0 }
 0x598   : > { %v3197_v40 = vmul.f32 0.2, %v3165_v63  ;;  %vm3181_vm7 = vcmp.gt.f32.partialorder %v3165_v63, 0.0  ;;  %v3968_v50 = vadd.f32 %v11359_v62, %v11358_v5  ;;  %v3208_v36 = vsel %vm3176_vm1, %v3160_v15, %v3192_v48 }
 0x599   : > { %2455 = vmax.xlane.f32.xlu1 %v8730_v52  ;;  %2443 = vmax.xlane.f32.xlu0 %v8733_v49  ;;  %v3207_v13 = vsel %vm3175_vm3, %v3159_v39, %v3191_v16  ;;  %v2399_v47 = vsel %vm2367_vm4, %v2351_v12, %v2383_v33  ;;  %v2387_v2 = vmul.f32 0.2, %v2355_v11  ;;  %v3211_v52 = vsel %vm3179_vm5, %v3163_v44, %v3195_v46  ;;  %v11361_v49 = vld [vmem:[#allocation43_spill] sm:$0xff]  ;;  %v8781_v39 = vpop.permute.xlu1 %3946 }
 0x59a   : > { %v8771_v14 = vadd.f32 %v3207_v13, %v8519_v19  ;;  %vm2371_vm8 = vcmp.gt.f32.partialorder %v2355_v11, 0.0  ;;  %v8775_v10 = vadd.f32 %v8703_v53, %v11361_v49  ;;  %v8779_v51 = vadd.f32 %v8610_v26, %v11362_v54  ;;  %v11375_v54 = vld [vmem:[#allocation47_spill] sm:$0xff] }
 0x59b   : > { %v2401_v5 = vsel %vm2369_vm6, %v2353_v8, %v2385_v6  ;;  %v3213_v15 = vsel %vm3181_vm7, %v3165_v63, %v3197_v40  ;;  %vm3984_vm9 = vcmp.gt.f32.partialorder %v3968_v50, 0.0  ;;  %v4000_v13 = vmul.f32 0.2, %v3968_v50  ;;  %v11368_v8 = vld [vmem:[#allocation44_spill] sm:$0xff] }
 0x59c   : > { %11360 = vst [vmem:[#allocation51_spill] sm:$0xff] %v8771_v14  ;;  %v8786_v12 = vadd.f32 %v2404_v55, %v8645_v31  ;;  %v8789_v49 = vadd.f32 %v2397_v29, %v8616_v43  ;;  %v8792_v44 = vadd.f32 %v3208_v36, %v8516_v3  ;;  %v8795_v26 = vadd.f32 %v2399_v47, %v8633_v18 }
 0x59d   : > { %2459 = vmax.xlane.f32.xlu1 %v8742_v0  ;;  %2445 = vmax.xlane.f32.xlu0 %v8745_v37  ;;  %v8798_v48 = vadd.f32 %v3211_v52, %v8521_v59  ;;  %v2403_v33 = vsel %vm2371_vm8, %v2355_v11, %v2387_v2  ;;  %v8802_v40 = vadd.f32 %v8703_v53, %v11368_v8  ;;  %v8811_v16 = vmul.f32 0.2, %v8775_v10  ;;  %v11372_v11 = vld [vmem:[#allocation55_spill] sm:$0xff]  ;;  %v8836_v8 = vpop.permute.xlu1 %3951 }
 0x59e   : > { %11363 = vst [vmem:[#allocation60_spill] sm:$0xff] %v8786_v12  ;;  %11364 = vst [vmem:[#allocation63_spill] sm:$0xff] %v8789_v49  ;;  %v4016_v63 = vsel %vm3984_vm9, %v3968_v50, %v4000_v13  ;;  %v8805_v55 = vadd.f32 %v2401_v5, %v8647_v21  ;;  %v8808_v46 = vadd.f32 %v3213_v15, %v8532_v58  ;;  %v8819_v52 = vmul.f32 0.2, %v8779_v51  ;;  %v11376_v15 = vld [vmem:[#allocation57_spill] sm:$0xff] }
 0x59f   : > { %11365 = vst [vmem:[#allocation43_spill] sm:$0xff] %v8792_v44  ;;  %11366 = vst [vmem:[#allocation52_spill] sm:$0xff] %v8795_v26  ;;  %v8814_v29 = vadd.f32 %v4016_v63, %v8519_v19  ;;  %v3972_v50 = vadd.f32 %v11359_v62, %v8580_v1  ;;  %v3166_v6 = vadd.f32 %v8703_v53, %v11372_v11  ;;  %v11374_v19 = vld [vmem:[#allocation56_spill] sm:$0xff]  ;;  %v11377_v1 = vld [vmem:[#allocation45_spill] sm:$0xff]  ;;  %vm3183_vm12 = vcmp.gt.f32.partialorder %v8775_v10, 0.0 }
 0x5a0   : > { %11367 = vst [vmem:[#allocation89_spill] sm:$0xff] %v8798_v48  ;;  %11369 = vst [vmem:[#allocation44_spill] sm:$0xff] %v8805_v55  ;;  %v3974_v36 = vadd.f32 %v11359_v62, %v8637_v7  ;;  %v8828_v47 = vadd.f32 %v2403_v33, %v8673_v41  ;;  %v3168_v2 = vadd.f32 %v8703_v53, %v11374_v19  ;;  %vm2373_vm15 = vcmp.gt.f32.partialorder %v8779_v51, 0.0 }
 0x5a1   : > { %11370 = vst [vmem:[#allocation90_spill] sm:$0xff] %v8808_v46  ;;  %11371 = vst [vmem:[#allocation91_spill] sm:$0xff] %v8814_v29  ;;  %2463 = vmax.xlane.f32.xlu1 %v8756_v38  ;;  %2449 = vmax.xlane.f32.xlu0 %v8759_v56  ;;  %v3976_v5 = vadd.f32 %v11359_v62, %v11375_v54  ;;  %v3170_v13 = vadd.f32 %v8703_v53, %v11376_v15  ;;  %vm3988_vm10 = vcmp.gt.f32.partialorder %v3972_v50, 0.0 }
 0x5a2   : > { %11373 = vst [vmem:[#allocation55_spill] sm:$0xff] %v8828_v47  ;;  %v8840_v63 = vadd.f32 %v8703_v53, %v11377_v1  ;;  %v4004_v7 = vmul.f32 0.2, %v3972_v50  ;;  %vm3182_vm11 = vcmp.gt.f32.partialorder %v3166_v6, 0.0  ;;  %v3198_v33 = vmul.f32 0.2, %v3166_v6 }
 0x5a3   : > { %vm3990_vm13 = vcmp.gt.f32.partialorder %v3974_v36, 0.0  ;;  %v4006_v11 = vmul.f32 0.2, %v3974_v36  ;;  %vm3184_vm14 = vcmp.gt.f32.partialorder %v3168_v2, 0.0  ;;  %vm3185_vm0 = vcmp.gt.f32.partialorder %v8802_v40, 0.0 }
 0x5a4   : > { %v4020_v19 = vsel %vm3988_vm10, %v3972_v50, %v4004_v7  ;;  %v3200_v54 = vmul.f32 0.2, %v3168_v2  ;;  %vm3992_vm1 = vcmp.gt.f32.partialorder %v3976_v5, 0.0  ;;  %v4008_v15 = vmul.f32 0.2, %v3976_v5 }
 0x5a5   : > { %2467 = vmax.xlane.f32.xlu1 %v8786_v12  ;;  %2453 = vmax.xlane.f32.xlu0 %v8789_v49  ;;  %v8848_v1 = vadd.f32 %v4020_v19, %v8521_v59  ;;  %v3214_v38 = vsel %vm3182_vm11, %v3166_v6, %v3198_v33  ;;  %v4022_v0 = vsel %vm3990_vm13, %v3974_v36, %v4006_v11  ;;  %vm3186_vm3 = vcmp.gt.f32.partialorder %v3170_v13, 0.0  ;;  %v3957_v6 = vpop.permute.xlu1 %3956  ;;  %v11384_v36 = vld [vmem:[#allocation59_spill] sm:$0xff] }
 0x5a6   : > { %v8851_v56 = vadd.f32 %v3214_v38, %v8616_v43  ;;  %v8854_v12 = vadd.f32 %v4022_v0, %v8532_v58  ;;  %v3216_v49 = vsel %vm3184_vm14, %v3168_v2, %v3200_v54  ;;  %v4024_v37 = vsel %vm3992_vm1, %v3976_v5, %v4008_v15  ;;  %v11383_v0 = vld [vmem:[#allocation58_spill] sm:$0xff] }
 0x5a7   : > { %11378 = vst [vmem:[#allocation56_spill] sm:$0xff] %v8848_v1  ;;  %v8857_v60 = vadd.f32 %v3216_v49, %v8633_v18  ;;  %v8860_v50 = vadd.f32 %v4024_v37, %v8568_v24  ;;  %v3202_v7 = vmul.f32 0.2, %v3170_v13  ;;  %v3978_v59 = vadd.f32 %v11359_v62, %v8720_v4 }
 0x5a8   : > { %11379 = vst [vmem:[#allocation47_spill] sm:$0xff] %v8851_v56  ;;  %11380 = vst [vmem:[#allocation57_spill] sm:$0xff] %v8854_v12  ;;  %v3201_v58 = vmul.f32 0.2, %v8802_v40  ;;  %v3172_v38 = vadd.f32 %v8703_v53, %v11383_v0  ;;  %v3980_v49 = vadd.f32 %v11359_v62, %v8781_v39  ;;  %v3174_v37 = vadd.f32 %v8703_v53, %v11384_v36 }
 0x5a9   : > { %11381 = vst [vmem:[#allocation45_spill] sm:$0xff] %v8857_v60  ;;  %11382 = vst [vmem:[#allocation92_spill] sm:$0xff] %v8860_v50  ;;  %3258 = vmax.xlane.f32.xlu1 %v8792_v44  ;;  %2457 = vmax.xlane.f32.xlu0 %v8795_v26  ;;  %v3218_v2 = vsel %vm3186_vm3, %v3170_v13, %v3202_v7  ;;  %vm3994_vm4 = vcmp.gt.f32.partialorder %v3978_v59, 0.0  ;;  %v4010_v4 = vmul.f32 0.2, %v3978_v59  ;;  %vm3187_vm9 = vcmp.gt.f32.partialorder %v8840_v63, 0.0 }
 0x5aa   : > { %v3982_v5 = vadd.f32 %v11359_v62, %v3957_v6  ;;  %v8876_v33 = vadd.f32 %v3218_v2, %v8647_v21  ;;  %vm3188_vm5 = vcmp.gt.f32.partialorder %v3172_v38, 0.0  ;;  %v3204_v11 = vmul.f32 0.2, %v3172_v38  ;;  %v11387_v6 = vld [vmem:[#allocation41_spill] sm:$0xff]  ;;  %v9259_v44 = vld [vmem:[#allocation2 + $0xe0] sm:$0xff]  ;;  %v9261_v26 = vld [vmem:[#allocation2 + $0xa8] sm:$0xff] }
 0x5ab   : > { %vm3996_vm6 = vcmp.gt.f32.partialorder %v3980_v49, 0.0  ;;  %v4026_v19 = vsel %vm3994_vm4, %v3978_v59, %v4010_v4  ;;  %v4012_v54 = vmul.f32 0.2, %v3980_v49  ;;  %vm3190_vm7 = vcmp.gt.f32.partialorder %v3174_v37, 0.0  ;;  %11425 = vst [vmem:[#allocation115_spill] sm:$0xff] %v9261_v26 }
 0x5ac   : > { %11385 = vst [vmem:[#allocation58_spill] sm:$0xff] %v8876_v33  ;;  %v3206_v15 = vmul.f32 0.2, %v3174_v37  ;;  %v8881_v39 = vadd.f32 %v4026_v19, %v8591_v27  ;;  %v3220_v13 = vsel %vm3188_vm5, %v3172_v38, %v3204_v11  ;;  %vm3998_vm8 = vcmp.gt.f32.partialorder %v3982_v5, 0.0 }
 0x5ad   : > { %3264 = vmax.xlane.f32.xlu1 %v8798_v48  ;;  %2461 = vmax.xlane.f32.xlu0 %v8805_v55  ;;  %v4014_v7 = vmul.f32 0.2, %v3982_v5  ;;  %v3161_v0 = vadd.f32 %v8703_v53, %v11387_v6  ;;  %v8886_v36 = vadd.f32 %v3220_v13, %v8673_v41  ;;  %v4028_v59 = vsel %vm3996_vm6, %v3980_v49, %v4012_v54  ;;  %v9279_v55 = vld [vmem:[#allocation2 + $0xf0] sm:$0xff] }
 0x5ae   : > { %11386 = vst [vmem:[#allocation59_spill] sm:$0xff] %v8881_v39  ;;  %v3222_v2 = vsel %vm3190_vm7, %v3174_v37, %v3206_v15  ;;  %v3215_v4 = vsel %vm3183_vm12, %v8775_v10, %v8811_v16  ;;  %v8893_v48 = vadd.f32 %v4028_v59, %v8618_v22  ;;  %v2405_v19 = vsel %vm2373_vm15, %v8779_v51, %v8819_v52  ;;  %v11391_v37 = vld [vmem:[#allocation46_spill] sm:$0xff] }
 0x5af   : > { %11388 = vst [vmem:[#allocation41_spill] sm:$0xff] %v8886_v36  ;;  %v8896_v38 = vadd.f32 %v3222_v2, %v8685_v42  ;;  %v4030_v11 = vsel %vm3998_vm8, %v3982_v5, %v4014_v7  ;;  %v3217_v49 = vsel %vm3185_vm0, %v8802_v40, %v3201_v58  ;;  %v3173_v54 = vadd.f32 %v8703_v53, %v11391_v37  ;;  %v11393_v5 = vld [vmem:[#allocation53_spill] sm:$0xff] }
 0x5b0   : > { %11389 = vst [vmem:[#allocation93_spill] sm:$0xff] %v8893_v48  ;;  %v8908_v10 = vadd.f32 %v4030_v11, %v8645_v31  ;;  %v3203_v16 = vmul.f32 0.2, %v8840_v63  ;;  %v3162_v15 = vadd.f32 %v8703_v53, %v11393_v5  ;;  %v3975_v51 = vadd.f32 %v11359_v62, %v8663_v28  ;;  %11427 = vst [vmem:[#allocation117_spill] sm:$0xff] %v9279_v55 }
 0x5b1   : > { %11390 = vst [vmem:[#allocation94_spill] sm:$0xff] %v8896_v38  ;;  %3268 = vmax.xlane.f32.xlu1 %v8808_v46  ;;  %2465 = vmax.xlane.f32.xlu0 %v8828_v47  ;;  %v3193_v40 = vmul.f32 0.2, %v3161_v0  ;;  %v3977_v52 = vadd.f32 %v11359_v62, %v8696_v34  ;;  %v8921_v58 = vadd.f32 %v3215_v4, %v8568_v24  ;;  %vm3177_vm10 = vcmp.gt.f32.partialorder %v3161_v0, 0.0  ;;  %v9241_v47 = vld [vmem:[#allocation2 + $0x98] sm:$0xff] }
 0x5b2   : > { %11392 = vst [vmem:[#allocation46_spill] sm:$0xff] %v8908_v10  ;;  %v8924_v13 = vadd.f32 %v2405_v19, %v8685_v42  ;;  %v8927_v7 = vadd.f32 %v3217_v49, %v8591_v27  ;;  %vm3189_vm11 = vcmp.gt.f32.partialorder %v3173_v54, 0.0  ;;  %v3205_v6 = vmul.f32 0.2, %v3173_v54  ;;  %v11397_v19 = vld [vmem:[#allocation54_spill] sm:$0xff]  ;;  %11423 = vst [vmem:[#allocation113_spill] sm:$0xff] %v9241_v47 }
 0x5b3   : > { %11394 = vst [vmem:[#allocation53_spill] sm:$0xff] %v8921_v58  ;;  %vm3991_vm12 = vcmp.gt.f32.partialorder %v3975_v51, 0.0  ;;  %v4007_v28 = vmul.f32 0.2, %v3975_v51  ;;  %v3219_v34 = vsel %vm3187_vm9, %v8840_v63, %v3203_v16  ;;  %v3194_v59 = vmul.f32 0.2, %v3162_v15 }
 0x5b4   : > { %11395 = vst [vmem:[#allocation95_spill] sm:$0xff] %v8924_v13  ;;  %11396 = vst [vmem:[#allocation96_spill] sm:$0xff] %v8927_v7  ;;  %vm3993_vm13 = vcmp.gt.f32.partialorder %v3977_v52, 0.0  ;;  %v4009_v24 = vmul.f32 0.2, %v3977_v52  ;;  %v3209_v2 = vsel %vm3177_vm10, %v3161_v0, %v3193_v40  ;;  %v3979_v27 = vadd.f32 %v11359_v62, %v8761_v20 }
 0x5b5   : > { %3272 = vmax.xlane.f32.xlu1 %v8921_v58  ;;  %2469 = vmax.xlane.f32.xlu0 %v8924_v13  ;;  %v4023_v4 = vsel %vm3991_vm12, %v3975_v51, %v4007_v28  ;;  %v3981_v11 = vadd.f32 %v11359_v62, %v8836_v8  ;;  %v3164_v49 = vadd.f32 %v8703_v53, %v11397_v19  ;;  %v11399_v58 = vld [vmem:[#allocation48_spill] sm:$0xff]  ;;  %vm3178_vm0 = vcmp.gt.f32.partialorder %v3162_v15, 0.0 }
 0x5b6   : > { %v8939_v37 = vadd.f32 %v4023_v4, %v8616_v43  ;;  %v4025_v5 = vsel %vm3993_vm13, %v3977_v52, %v4009_v24  ;;  %v3983_v63 = vadd.f32 %v11359_v62, %v11399_v58  ;;  %vm3995_vm14 = vcmp.gt.f32.partialorder %v3979_v27, 0.0 }
 0x5b7   : > { %v8944_v16 = vadd.f32 %v4025_v5, %v8633_v18  ;;  %v4011_v0 = vmul.f32 0.2, %v3979_v27  ;;  %vm3997_vm15 = vcmp.gt.f32.partialorder %v3981_v11, 0.0  ;;  %v4013_v20 = vmul.f32 0.2, %v3981_v11 }
 0x5b8   : > { %11398 = vst [vmem:[#allocation54_spill] sm:$0xff] %v8939_v37  ;;  %vm3999_vm1 = vcmp.gt.f32.partialorder %v3983_v63, 0.0  ;;  %v4015_v53 = vmul.f32 0.2, %v3983_v63  ;;  %v8949_v43 = vadd.f32 %v3219_v34, %v8618_v22  ;;  %v3221_v8 = vsel %vm3189_vm11, %v3173_v54, %v3205_v6  ;;  %v11410_v6 = vld [vmem:[#allocation62_spill] sm:$0xff] }
 0x5b9   : > { %11400 = vst [vmem:[#allocation48_spill] sm:$0xff] %v8944_v16  ;;  %3276 = vmax.xlane.f32.xlu1 %v8927_v7  ;;  %3256 = vmax.xlane.f32.xlu0 %v8771_v14  ;;  %v4027_v51 = vsel %vm3995_vm14, %v3979_v27, %v4011_v0  ;;  %v8953_v18 = vadd.f32 %v3209_v2, %v8530_v61  ;;  %v3196_v24 = vmul.f32 0.2, %v3164_v49  ;;  %vm3180_vm3 = vcmp.gt.f32.partialorder %v3164_v49, 0.0  ;;  %v11411_v27 = vld [vmem:[#allocation64_spill] sm:$0xff]  ;;  %v9201_v7 = vld [vmem:[#allocation2 + $0x80] sm:$0xff] }
 0x5ba   : > { %11401 = vst [vmem:[#allocation97_spill] sm:$0xff] %v8949_v43  ;;  %v8956_v40 = vadd.f32 %v4027_v51, %v8647_v21  ;;  %v4029_v52 = vsel %vm3997_vm15, %v3981_v11, %v4013_v20  ;;  %v4031_v58 = vsel %vm3999_vm1, %v3983_v63, %v4015_v53  ;;  %v3210_v28 = vsel %vm3178_vm0, %v3162_v15, %v3194_v59 }
 0x5bb   : > { %11402 = vst [vmem:[#allocation98_spill] sm:$0xff] %v8953_v18  ;;  %v8959_v4 = vadd.f32 %v4029_v52, %v8673_v41  ;;  %v8962_v19 = vadd.f32 %v4031_v58, %v8685_v42  ;;  %v8967_v22 = vadd.f32 %v3221_v8, %v8645_v31  ;;  %v8970_v21 = vadd.f32 %v3210_v28, %v8540_v57  ;;  %v11409_v31 = vld [vmem:[#allocation61_spill] sm:$0xff]  ;;  %v9020_v52 = vpop.permute.xlu0 %2893 }
 0x5bc   : > { %11403 = vst [vmem:[#allocation99_spill] sm:$0xff] %v8956_v40  ;;  %v3212_v54 = vsel %vm3180_vm3, %v3164_v49, %v3196_v24  ;;  %v3969_v42 = vadd.f32 %v11359_v62, %v11409_v31  ;;  %v3970_v34 = vadd.f32 %v11359_v62, %v11410_v6  ;;  %v3971_v11 = vadd.f32 %v11359_v62, %v11411_v27  ;;  %v9032_v24 = vld [vmem:[#allocation2 + $0x8] sm:$0xff] }
 0x5bd   : > { %11404 = vst [vmem:[#allocation100_spill] sm:$0xff] %v8959_v4  ;;  %11405 = vst [vmem:[#allocation101_spill] sm:$0xff] %v8962_v19  ;;  %3280 = vmax.xlane.f32.xlu1 %v8949_v43  ;;  %3260 = vmax.xlane.f32.xlu0 %v8953_v18  ;;  %v8975_v41 = vadd.f32 %v3212_v54, %v8577_v9  ;;  %v3973_v0 = vadd.f32 %v11359_v62, %v8605_v23  ;;  %v9034_v54 = vld [vmem:[#allocation2] sm:$0xff]  ;;  %vm1959_vm8 = vcmask 7168   ;;  %v9221_v18 = vld [vmem:[#allocation2 + $0x90] sm:$0xff]  ;;  %vm5464_vm9 = vcmask (!%p5932_p9), 261120  }
 0x5be   : > { %11406 = vst [vmem:[#allocation102_spill] sm:$0xff] %v8967_v22  ;;  %11407 = vst [vmem:[#allocation103_spill] sm:$0xff] %v8970_v21  ;;  %v4001_v15 = vmul.f32 0.2, %v3969_v42  ;;  %vm3985_vm4 = vcmp.gt.f32.partialorder %v3969_v42, 0.0  ;;  %vm3986_vm5 = vcmp.gt.f32.partialorder %v3970_v34, 0.0 }
 0x5bf   : > { %11408 = vst [vmem:[#allocation104_spill] sm:$0xff] %v8975_v41  ;;  %v4002_v2 = vmul.f32 0.2, %v3970_v34  ;;  %v4003_v63 = vmul.f32 0.2, %v3971_v11  ;;  %vm3987_vm6 = vcmp.gt.f32.partialorder %v3971_v11, 0.0  ;;  %v9025_v58 = vpop.permute.xlu0 %2897 }
 0x5c0   : > { %v4017_v59 = vsel %vm3985_vm4, %v3969_v42, %v4001_v15  ;;  %v4005_v8 = vmul.f32 0.2, %v3973_v0  ;;  %vm3989_vm7 = vcmp.gt.f32.partialorder %v3973_v0, 0.0  ;;  %11418 = vst [vmem:[#allocation108_spill] sm:$0xff] %v9020_v52  ;;  %11420 = vst [vmem:[#allocation110_spill] sm:$0xff] %v9025_v58  ;;  %v9281_v52 = vld [vmem:[#allocation2 + $0xb8] sm:$0xff] }
 0x5c1   : > { %3284 = vmax.xlane.f32.xlu1 %v8967_v22  ;;  %3262 = vmax.xlane.f32.xlu0 %v8970_v21  ;;  %v8996_v49 = vadd.f32 %v4017_v59, %v8516_v3  ;;  %v4018_v5 = vsel %vm3986_vm5, %v3970_v34, %v4002_v2  ;;  %v4019_v53 = vsel %vm3987_vm6, %v3971_v11, %v4003_v63  ;;  %v9043_v34 = vld [vmem:[#allocation2 + $0x20] sm:$0xff]  ;;  %v9045_v59 = vld [vmem:[#allocation2 + $0x10] sm:$0xff]  ;;  %v9083_v2 = vld [vmem:[#allocation2 + $0x28] sm:$0xff]  ;;  %vm5481_vm10 = vcmask (!%p5932_p9), 392192  }
 0x5c2   : > { %v9003_v20 = vadd.f32 %v4018_v5, %v8530_v61  ;;  %v9007_v3 = vadd.f32 %v4019_v53, %v8540_v57  ;;  %v4021_v51 = vsel %vm3989_vm7, %v3973_v0, %v4005_v8  ;;  %v9015_v61 = vpop.permute.xlu1 %2891  ;;  %v9062_v53 = vld [vmem:[#allocation2 + $0x30] sm:$0xff]  ;;  %v9064_v8 = vld [vmem:[#allocation2 + $0x18] sm:$0xff]  ;;  %11428 = vst [vmem:[#allocation118_spill] sm:$0xff] %v9281_v52  ;;  %vm5498_vm11 = vcmask (!%p5932_p9), 523264  }
 0x5c3   : > { %11412 = vst [vmem:[#allocation61_spill] sm:$0xff] %v8996_v49  ;;  %v9011_v23 = vadd.f32 %v4021_v51, %v8577_v9  ;;  %11416 = vst [vmem:[#allocation106_spill] sm:$0xff] %v9015_v61  ;;  %v9030_v28 = vpop.permute.xlu0 %2901  ;;  %v9081_v51 = vld [vmem:[#allocation2 + $0x40] sm:$0xff] }
 0x5c4   : > { %11413 = vst [vmem:[#allocation62_spill] sm:$0xff] %v9003_v20  ;;  %11414 = vst [vmem:[#allocation64_spill] sm:$0xff] %v9007_v3  ;;  %v9319_v61 = vld [vmem:[#allocation2 + $0x120] sm:$0xff] }
 0x5c5   : > { %4065 = vmax.xlane.f32.xlu1 %v8814_v29  ;;  %3266 = vmax.xlane.f32.xlu0 %v8975_v41  ;;  %11415 = vst [vmem:[#allocation105_spill] sm:$0xff] %v9011_v23  ;;  %11422 = vst [vmem:[#allocation112_spill] sm:$0xff] %v9030_v28  ;;  %v9181_v29 = vld [vmem:[#allocation2 + $0x78] sm:$0xff]  ;;  %v9219_v41 = vld [vmem:[#allocation2 + $0xc0] sm:$0xff] }
 0x5c6   : > { %v9018_v62 = vpop.permute.xlu1 %2895  ;;  %11435 = vst [vmem:[#allocation125_spill] sm:$0xff] %v9319_v61 }
 0x5c7   : > { %11417 = vst [vmem:[#allocation107_spill] sm:$0xff] %v9018_v62 }
 0x5c9   : > { %4073 = vmax.xlane.f32.xlu1 %v8848_v1  ;;  %3270 = vmax.xlane.f32.xlu0 %v8851_v56  ;;  %v9141_v1 = vld [vmem:[#allocation2 + $0x58] sm:$0xff]  ;;  %v9239_v56 = vld [vmem:[#allocation2 + $0xd0] sm:$0xff] }
 0x5ca   : > { %v9023_v57 = vpop.permute.xlu1 %2899 }
 0x5cb   : > { %11419 = vst [vmem:[#allocation109_spill] sm:$0xff] %v9023_v57  ;;  %v9299_v57 = vld [vmem:[#allocation2 + $0x108] sm:$0xff] }
 0x5cc   : > { %11431 = vst [vmem:[#allocation121_spill] sm:$0xff] %v9299_v57 }
 0x5cd   : > { %4077 = vmax.xlane.f32.xlu1 %v8854_v12  ;;  %3274 = vmax.xlane.f32.xlu0 %v8857_v60  ;;  %v9121_v12 = vld [vmem:[#allocation2 + $0x48] sm:$0xff] }
 0x5ce   : > { %v9028_v9 = vpop.permute.xlu1 %2903 }
 0x5cf   : > { %11421 = vst [vmem:[#allocation111_spill] sm:$0xff] %v9028_v9 }
 0x5d1   : > { %4081 = vmax.xlane.f32.xlu1 %v8860_v50  ;;  %3278 = vmax.xlane.f32.xlu0 %v8876_v33  ;;  %v9159_v50 = vld [vmem:[#allocation2 + $0x88] sm:$0xff] }
 0x5d5   : > { %4085 = vmax.xlane.f32.xlu1 %v8881_v39  ;;  %3282 = vmax.xlane.f32.xlu0 %v8886_v36  ;;  %v9102_v39 = vld [vmem:[#allocation2 + $0x38] sm:$0xff]  ;;  %v9199_v36 = vld [vmem:[#allocation2 + $0xb0] sm:$0xff] }
 0x5d9   : > { %4089 = vmax.xlane.f32.xlu1 %v8893_v48  ;;  %3286 = vmax.xlane.f32.xlu0 %v8896_v38  ;;  %v9139_v48 = vld [vmem:[#allocation2 + $0x70] sm:$0xff]  ;;  %v9161_v38 = vld [vmem:[#allocation2 + $0x68] sm:$0xff] }
 0x5dd   : > { %4093 = vmax.xlane.f32.xlu1 %v8908_v10  ;;  %4067 = vmax.xlane.f32.xlu0 %v8996_v49 }
 0x5e1   : > { %4069 = vmax.xlane.f32.xlu0 %v9003_v20  ;;  %v9179_v20 = vld [vmem:[#allocation2 + $0xa0] sm:$0xff] }
 0x5e5   : > { %4071 = vmax.xlane.f32.xlu0 %v9007_v3 }
 0x5e9   : > { %4075 = vmax.xlane.f32.xlu0 %v9011_v23 }
 0x5ed   : > { %4079 = vmax.xlane.f32.xlu0 %v8939_v37 }
 0x5f1   : > { %4083 = vmax.xlane.f32.xlu0 %v8944_v16 }
 0x5f5   : > { %4087 = vmax.xlane.f32.xlu0 %v8956_v40 }
 0x5f9   : > { %4091 = vmax.xlane.f32.xlu0 %v8959_v4 }
 0x5fd   : > { %4095 = vmax.xlane.f32.xlu0 %v8962_v19  ;;  %v9119_v19 = vld [vmem:[#allocation2 + $0x60] sm:$0xff] }
 0x5fe   : > { %v1658_v31 = vpop.xlane.xlu1 %1657  ;;  %v1656_v42 = vpop.xlane.xlu0 %1655 }
 0x5ff   : > { %v9038_v15 = vmax.f32 %v9032_v24, %v1658_v31  ;;  %v9041_v6 = vmax.f32 %v9034_v54, %v1656_v42  ;;  %v9100_v31 = vld [vmem:[#allocation2 + $0x50] sm:$0xff] }
 0x601   : > { %2226 = vst.msk [vmem:[#allocation2 + $0x8] sm:$0xff] %vm1959_vm8, %v9038_v15  ;;  %2225 = vst.msk [vmem:[#allocation2] sm:$0xff] %vm1959_vm8, %v9041_v6  ;;  %1753 = vperm.xlu1 %6593, %v9041_v6  }
 0x602   : > { %v1664_v11 = vpop.xlane.xlu1 %1663  ;;  %v1660_v5 = vpop.xlane.xlu0 %1659 }
 0x603   : > { %v9057_v63 = vmax.f32 %v9043_v34, %v1664_v11  ;;  %v9060_v0 = vmax.f32 %v9045_v59, %v1660_v5 }
 0x605   : > { %2229 = vst.msk [vmem:[#allocation2 + $0x20] sm:$0xff] %vm1959_vm8, %v9057_v63  ;;  %2227 = vst.msk [vmem:[#allocation2 + $0x10] sm:$0xff] %vm1959_vm8, %v9060_v0  ;;  %1763 = vperm.xlu1 %6593, %v9060_v0  }
 0x606   : > { %v1668_v42 = vpop.xlane.xlu1 %1667  ;;  %v1662_v11 = vpop.xlane.xlu0 %1661 }
 0x607   : > { %v9076_v5 = vmax.f32 %v9062_v53, %v1668_v42  ;;  %v9079_v27 = vmax.f32 %v9064_v8, %v1662_v11 }
 0x609   : > { %2231 = vst.msk [vmem:[#allocation2 + $0x30] sm:$0xff] %vm1959_vm8, %v9076_v5  ;;  %2228 = vst.msk [vmem:[#allocation2 + $0x18] sm:$0xff] %vm1959_vm8, %v9079_v27  ;;  %1768 = vperm.xlu1 %6593, %v9079_v27  }
 0x60a   : > { %v1672_v42 = vpop.xlane.xlu1 %1671  ;;  %v1666_v11 = vpop.xlane.xlu0 %1665 }
 0x60b   : > { %v9095_v4 = vmax.f32 %v9081_v51, %v1672_v42  ;;  %v9098_v10 = vmax.f32 %v9083_v2, %v1666_v11 }
 0x60d   : > { %2233 = vst.msk [vmem:[#allocation2 + $0x40] sm:$0xff] %vm1959_vm8, %v9095_v4  ;;  %2230 = vst.msk [vmem:[#allocation2 + $0x28] sm:$0xff] %vm1959_vm8, %v9098_v10  ;;  %1778 = vperm.xlu1 %6593, %v9098_v10  }
 0x60e   : > { %v1676_v42 = vpop.xlane.xlu1 %1675  ;;  %v1670_v11 = vpop.xlane.xlu0 %1669 }
 0x60f   : > { %v9114_v16 = vmax.f32 %v9100_v31, %v1676_v42  ;;  %v9117_v40 = vmax.f32 %v9102_v39, %v1670_v11 }
 0x611   : > { %2235 = vst.msk [vmem:[#allocation2 + $0x50] sm:$0xff] %vm1959_vm8, %v9114_v16  ;;  %2232 = vst.msk [vmem:[#allocation2 + $0x38] sm:$0xff] %vm1959_vm8, %v9117_v40  ;;  %1788 = vperm.xlu1 %6593, %v9117_v40  }
 0x612   : > { %v1680_v42 = vpop.xlane.xlu1 %1679  ;;  %v1674_v11 = vpop.xlane.xlu0 %1673 }
 0x613   : > { %v9133_v23 = vmax.f32 %v9119_v19, %v1680_v42  ;;  %v9136_v37 = vmax.f32 %v9121_v12, %v1674_v11  ;;  %1758 = vperm.xlu0 %6592, %v9038_v15  }
 0x615   : > { %2237 = vst.msk [vmem:[#allocation2 + $0x60] sm:$0xff] %vm1959_vm8, %v9133_v23  ;;  %2234 = vst.msk [vmem:[#allocation2 + $0x48] sm:$0xff] %vm1959_vm8, %v9136_v37  ;;  %1798 = vperm.xlu1 %6593, %v9136_v37  }
 0x616   : > { %v1684_v42 = vpop.xlane.xlu1 %1683  ;;  %v1678_v11 = vpop.xlane.xlu0 %1677 }
 0x617   : > { %v9153_v3 = vmax.f32 %v9139_v48, %v1684_v42  ;;  %v9156_v49 = vmax.f32 %v9141_v1, %v1678_v11  ;;  %1773 = vperm.xlu0 %6592, %v9057_v63  }
 0x619   : > { %2239 = vst.msk [vmem:[#allocation2 + $0x70] sm:$0xff] %vm1959_vm8, %v9153_v3  ;;  %2236 = vst.msk [vmem:[#allocation2 + $0x58] sm:$0xff] %vm1959_vm8, %v9156_v49  ;;  %1808 = vperm.xlu1 %6593, %v9156_v49  }
 0x61a   : > { %v2442_v42 = vpop.xlane.xlu1 %2441  ;;  %v1682_v11 = vpop.xlane.xlu0 %1681 }
 0x61b   : > { %v9173_v33 = vmax.f32 %v9159_v50, %v2442_v42  ;;  %v9176_v60 = vmax.f32 %v9161_v38, %v1682_v11  ;;  %1783 = vperm.xlu0 %6592, %v9076_v5  }
 0x61d   : > { %3043 = vst.msk [vmem:[#allocation2 + $0x88] sm:$0xff] %vm1959_vm8, %v9173_v33  ;;  %2238 = vst.msk [vmem:[#allocation2 + $0x68] sm:$0xff] %vm1959_vm8, %v9176_v60  ;;  %1818 = vperm.xlu1 %6593, %v9176_v60  }
 0x61e   : > { %v2448_v42 = vpop.xlane.xlu1 %2447  ;;  %v1686_v11 = vpop.xlane.xlu0 %1685 }
 0x61f   : > { %v9193_v22 = vmax.f32 %v9179_v20, %v2448_v42  ;;  %v9196_v43 = vmax.f32 %v9181_v29, %v1686_v11  ;;  %1793 = vperm.xlu0 %6592, %v9095_v4  }
 0x621   : > { %3046 = vst.msk [vmem:[#allocation2 + $0xa0] sm:$0xff] %vm1959_vm8, %v9193_v22  ;;  %2240 = vst.msk [vmem:[#allocation2 + $0x78] sm:$0xff] %vm1959_vm8, %v9196_v43  ;;  %1828 = vperm.xlu1 %6593, %v9196_v43  }
 0x622   : > { %v2452_v42 = vpop.xlane.xlu1 %2451  ;;  %v2440_v11 = vpop.xlane.xlu0 %2439 }
 0x623   : > { %v9213_v46 = vmax.f32 %v9199_v36, %v2452_v42  ;;  %v9216_v21 = vmax.f32 %v9201_v7, %v2440_v11  ;;  %1803 = vperm.xlu0 %6592, %v9114_v16  }
 0x625   : > { %3048 = vst.msk [vmem:[#allocation2 + $0xb0] sm:$0xff] %vm1959_vm8, %v9213_v46  ;;  %3042 = vst.msk [vmem:[#allocation2 + $0x80] sm:$0xff] %vm1959_vm8, %v9216_v21  ;;  %2537 = vperm.xlu1 %6593, %v9216_v21  }
 0x626   : > { %v2456_v42 = vpop.xlane.xlu1 %2455  ;;  %v2444_v11 = vpop.xlane.xlu0 %2443 }
 0x627   : > { %v9233_v14 = vmax.f32 %v9219_v41, %v2456_v42  ;;  %v9236_v13 = vmax.f32 %v9221_v18, %v2444_v11  ;;  %1813 = vperm.xlu0 %6592, %v9133_v23  }
 0x629   : > { %3050 = vst.msk [vmem:[#allocation2 + $0xc0] sm:$0xff] %vm1959_vm8, %v9233_v14  ;;  %3044 = vst.msk [vmem:[#allocation2 + $0x90] sm:$0xff] %vm1959_vm8, %v9236_v13  ;;  %2547 = vperm.xlu1 %6593, %v9236_v13  }
 0x62a   : > { %v2460_v42 = vpop.xlane.xlu1 %2459  ;;  %v2446_v11 = vpop.xlane.xlu0 %2445 }
 0x62b   : > { %v9253_v9 = vmax.f32 %v9239_v56, %v2460_v42  ;;  %v9256_v28 = vmax.f32 %v9241_v47, %v2446_v11  ;;  %1823 = vperm.xlu0 %6592, %v9153_v3  }
 0x62d   : > { %11424 = vst [vmem:[#allocation114_spill] sm:$0xff] %v9256_v28  ;;  %3052 = vst.msk [vmem:[#allocation2 + $0xd0] sm:$0xff] %vm1959_vm8, %v9253_v9  ;;  %2552 = vperm.xlu1 %6593, %v9256_v28  }
 0x62e   : > { %3045 = vst.msk [vmem:[#allocation2 + $0x98] sm:$0xff] %vm1959_vm8, %v9256_v28  ;;  %v2464_v42 = vpop.xlane.xlu1 %2463  ;;  %v2450_v11 = vpop.xlane.xlu0 %2449 }
 0x62f   : > { %v9273_v58 = vmax.f32 %v9259_v44, %v2464_v42  ;;  %v9276_v62 = vmax.f32 %v9261_v26, %v2450_v11  ;;  %2542 = vperm.xlu0 %6592, %v9173_v33   ;;  %v9321_v26 = vld [vmem:[#allocation2 + $0xd8] sm:$0xff] }
 0x630   : > { %11436 = vst [vmem:[#allocation126_spill] sm:$0xff] %v9321_v26 }
 0x631   : > { %11426 = vst [vmem:[#allocation116_spill] sm:$0xff] %v9276_v62  ;;  %3054 = vst.msk [vmem:[#allocation2 + $0xe0] sm:$0xff] %vm1959_vm8, %v9273_v58  ;;  %2562 = vperm.xlu1 %6593, %v9276_v62  }
 0x632   : > { %3047 = vst.msk [vmem:[#allocation2 + $0xa8] sm:$0xff] %vm1959_vm8, %v9276_v62  ;;  %v2468_v42 = vpop.xlane.xlu1 %2467  ;;  %v2454_v11 = vpop.xlane.xlu0 %2453 }
 0x633   : > { %v9293_v35 = vmax.f32 %v9279_v55, %v2468_v42  ;;  %v9296_v32 = vmax.f32 %v9281_v52, %v2454_v11  ;;  %2557 = vperm.xlu0 %6592, %v9193_v22  }
 0x635   : > { %11429 = vst [vmem:[#allocation119_spill] sm:$0xff] %v9293_v35  ;;  %11430 = vst [vmem:[#allocation120_spill] sm:$0xff] %v9296_v32  ;;  %2572 = vperm.xlu1 %6593, %v9296_v32  }
 0x636   : > { %3056 = vst.msk [vmem:[#allocation2 + $0xf0] sm:$0xff] %vm1959_vm8, %v9293_v35  ;;  %3049 = vst.msk [vmem:[#allocation2 + $0xb8] sm:$0xff] %vm1959_vm8, %v9296_v32  ;;  %v3259_v42 = vpop.xlane.xlu1 %3258  ;;  %v2458_v11 = vpop.xlane.xlu0 %2457  ;;  %v9359_v32 = vld [vmem:[#allocation2 + $0x140] sm:$0xff] }
 0x637   : > { %v9313_v45 = vmax.f32 %v9299_v57, %v3259_v42  ;;  %v9316_v62 = vmax.f32 %v9301_v17, %v2458_v11  ;;  %2567 = vperm.xlu0 %6592, %v9213_v46   ;;  %v9341_v57 = vld [vmem:[#allocation2 + $0xe8] sm:$0xff]  ;;  %11443 = vst [vmem:[#allocation133_spill] sm:$0xff] %v9359_v32 }
 0x638   : > { %11440 = vst [vmem:[#allocation130_spill] sm:$0xff] %v9341_v57 }
 0x639   : > { %11433 = vst [vmem:[#allocation123_spill] sm:$0xff] %v9313_v45  ;;  %11434 = vst [vmem:[#allocation124_spill] sm:$0xff] %v9316_v62  ;;  %2582 = vperm.xlu1 %6593, %v9316_v62  }
 0x63a   : > { %3852 = vst.msk [vmem:[#allocation2 + $0x108] sm:$0xff] %vm1959_vm8, %v9313_v45  ;;  %3051 = vst.msk [vmem:[#allocation2 + $0xc8] sm:$0xff] %vm1959_vm8, %v9316_v62  ;;  %v3265_v42 = vpop.xlane.xlu1 %3264  ;;  %v2462_v11 = vpop.xlane.xlu0 %2461  ;;  %v9379_v62 = vld [vmem:[#allocation2 + $0x150] sm:$0xff] }
 0x63b   : > { %v9333_v52 = vmax.f32 %v9319_v61, %v3265_v42  ;;  %v9336_v25 = vmax.f32 %v9321_v26, %v2462_v11  ;;  %2577 = vperm.xlu0 %6592, %v9233_v14   ;;  %v9361_v61 = vld [vmem:[#allocation2 + $0xf8] sm:$0xff]  ;;  %11447 = vst [vmem:[#allocation137_spill] sm:$0xff] %v9379_v62 }
 0x63c   : > { %11444 = vst [vmem:[#allocation134_spill] sm:$0xff] %v9361_v61 }
 0x63d   : > { %11437 = vst [vmem:[#allocation127_spill] sm:$0xff] %v9333_v52  ;;  %11438 = vst [vmem:[#allocation128_spill] sm:$0xff] %v9336_v25  ;;  %2592 = vperm.xlu1 %6593, %v9336_v25  }
 0x63e   : > { %3855 = vst.msk [vmem:[#allocation2 + $0x120] sm:$0xff] %vm1959_vm8, %v9333_v52  ;;  %3053 = vst.msk [vmem:[#allocation2 + $0xd8] sm:$0xff] %vm1959_vm8, %v9336_v25  ;;  %v3269_v42 = vpop.xlane.xlu1 %3268  ;;  %v2466_v11 = vpop.xlane.xlu0 %2465  ;;  %v9399_v25 = vld [vmem:[#allocation2 + $0x160] sm:$0xff] }
 0x63f   : > { %v9353_v17 = vmax.f32 %v9339_v30, %v3269_v42  ;;  %v9356_v55 = vmax.f32 %v9341_v57, %v2466_v11  ;;  %2587 = vperm.xlu0 %6592, %v9253_v9   ;;  %v9381_v30 = vld [vmem:[#allocation2 + $0x100] sm:$0xff]  ;;  %11451 = vst [vmem:[#allocation141_spill] sm:$0xff] %v9399_v25 }
 0x640   : > { %11448 = vst [vmem:[#allocation138_spill] sm:$0xff] %v9381_v30 }
 0x641   : > { %11441 = vst [vmem:[#allocation131_spill] sm:$0xff] %v9353_v17  ;;  %11442 = vst [vmem:[#allocation132_spill] sm:$0xff] %v9356_v55  ;;  %2602 = vperm.xlu1 %6593, %v9356_v55  }
 0x642   : > { %3857 = vst.msk [vmem:[#allocation2 + $0x130] sm:$0xff] %vm1959_vm8, %v9353_v17  ;;  %3055 = vst.msk [vmem:[#allocation2 + $0xe8] sm:$0xff] %vm1959_vm8, %v9356_v55  ;;  %v3273_v42 = vpop.xlane.xlu1 %3272  ;;  %v2470_v11 = vpop.xlane.xlu0 %2469  ;;  %v9419_v55 = vld [vmem:[#allocation2 + $0x170] sm:$0xff] }
 0x643   : > { %v9373_v26 = vmax.f32 %v9359_v32, %v3273_v42  ;;  %v9376_v28 = vmax.f32 %v9361_v61, %v2470_v11  ;;  %2597 = vperm.xlu0 %6592, %v9273_v58   ;;  %v9401_v32 = vld [vmem:[#allocation2 + $0x110] sm:$0xff]  ;;  %11455 = vst [vmem:[#allocation145_spill] sm:$0xff] %v9419_v55 }
 0x644   : > { %11452 = vst [vmem:[#allocation142_spill] sm:$0xff] %v9401_v32 }
 0x645   : > { %11445 = vst [vmem:[#allocation135_spill] sm:$0xff] %v9373_v26  ;;  %11446 = vst [vmem:[#allocation136_spill] sm:$0xff] %v9376_v28  ;;  %2612 = vperm.xlu1 %6593, %v9376_v28  }
 0x646   : > { %3859 = vst.msk [vmem:[#allocation2 + $0x140] sm:$0xff] %vm1959_vm8, %v9373_v26  ;;  %3057 = vst.msk [vmem:[#allocation2 + $0xf8] sm:$0xff] %vm1959_vm8, %v9376_v28  ;;  %v3277_v42 = vpop.xlane.xlu1 %3276  ;;  %v3257_v11 = vpop.xlane.xlu0 %3256  ;;  %v9439_v28 = vld [vmem:[#allocation2 + $0x180] sm:$0xff] }
 0x647   : > { %v9393_v57 = vmax.f32 %v9379_v62, %v3277_v42  ;;  %v9396_v47 = vmax.f32 %v9381_v30, %v3257_v11  ;;  %2607 = vperm.xlu0 %6592, %v9293_v35   ;;  %v9421_v62 = vld [vmem:[#allocation2 + $0x118] sm:$0xff]  ;;  %11459 = vst [vmem:[#allocation149_spill] sm:$0xff] %v9439_v28 }
 0x648   : > { %11456 = vst [vmem:[#allocation146_spill] sm:$0xff] %v9421_v62 }
 0x649   : > { %11449 = vst [vmem:[#allocation139_spill] sm:$0xff] %v9393_v57  ;;  %11450 = vst [vmem:[#allocation140_spill] sm:$0xff] %v9396_v47  ;;  %3354 = vperm.xlu1 %6593, %v9396_v47  }
 0x64a   : > { %3861 = vst.msk [vmem:[#allocation2 + $0x150] sm:$0xff] %vm1959_vm8, %v9393_v57  ;;  %3851 = vst.msk [vmem:[#allocation2 + $0x100] sm:$0xff] %vm1959_vm8, %v9396_v47  ;;  %v3281_v42 = vpop.xlane.xlu1 %3280  ;;  %v3261_v11 = vpop.xlane.xlu0 %3260  ;;  %v9459_v47 = vld [vmem:[#allocation2 + $0x1a0] sm:$0xff] }
 0x64b   : > { %v9413_v61 = vmax.f32 %v9399_v25, %v3281_v42  ;;  %v9416_v35 = vmax.f32 %v9401_v32, %v3261_v11  ;;  %3359 = vperm.xlu0 %6592, %v9313_v45   ;;  %v9441_v25 = vld [vmem:[#allocation2 + $0x128] sm:$0xff]  ;;  %11463 = vst [vmem:[#allocation153_spill] sm:$0xff] %v9459_v47 }
 0x64c   : > { %11460 = vst [vmem:[#allocation150_spill] sm:$0xff] %v9441_v25 }
 0x64d   : > { %11453 = vst [vmem:[#allocation143_spill] sm:$0xff] %v9413_v61  ;;  %11454 = vst [vmem:[#allocation144_spill] sm:$0xff] %v9416_v35  ;;  %3364 = vperm.xlu1 %6593, %v9416_v35  }
 0x64e   : > { %3863 = vst.msk [vmem:[#allocation2 + $0x160] sm:$0xff] %vm1959_vm8, %v9413_v61  ;;  %3853 = vst.msk [vmem:[#allocation2 + $0x110] sm:$0xff] %vm1959_vm8, %v9416_v35  ;;  %v3285_v42 = vpop.xlane.xlu1 %3284  ;;  %v3263_v11 = vpop.xlane.xlu0 %3262  ;;  %v9480_v35 = vld [vmem:[#allocation2 + $0x1b0] sm:$0xff] }
 0x64f   : > { %v9433_v45 = vmax.f32 %v9419_v55, %v3285_v42  ;;  %v9436_v30 = vmax.f32 %v9421_v62, %v3263_v11  ;;  %3374 = vperm.xlu0 %6592, %v9333_v52   ;;  %v9461_v55 = vld [vmem:[#allocation2 + $0x138] sm:$0xff]  ;;  %11468 = vst [vmem:[#allocation157_spill] sm:$0xff] %v9480_v35 }
 0x650   : > { %11464 = vst [vmem:[#allocation154_spill] sm:$0xff] %v9461_v55 }
 0x651   : > { %11457 = vst [vmem:[#allocation147_spill] sm:$0xff] %v9433_v45  ;;  %11458 = vst [vmem:[#allocation148_spill] sm:$0xff] %v9436_v30  ;;  %3369 = vperm.xlu1 %6593, %v9436_v30  }
 0x652   : > { %3865 = vst.msk [vmem:[#allocation2 + $0x170] sm:$0xff] %vm1959_vm8, %v9433_v45  ;;  %3854 = vst.msk [vmem:[#allocation2 + $0x118] sm:$0xff] %vm1959_vm8, %v9436_v30  ;;  %v4066_v42 = vpop.xlane.xlu1 %4065  ;;  %v3267_v11 = vpop.xlane.xlu0 %3266  ;;  %v11467_v30 = vsub.f32 %v9032_v24, %v9038_v15  ;;  %v11472_v15 = vsub.f32 %v9043_v34, %v9057_v63 }
 0x653   : > { %v9453_v52 = vmax.f32 %v9439_v28, %v4066_v42  ;;  %v9456_v32 = vmax.f32 %v9441_v25, %v3267_v11  ;;  %3384 = vperm.xlu0 %6592, %v9353_v17   ;;  %v9482_v25 = vld [vmem:[#allocation2 + $0x148] sm:$0xff] }
 0x654   : > { %v1721_v62 = vmul.f32 1.442695, %v11467_v30  ;;  %11469 = vst [vmem:[#allocation158_spill] sm:$0xff] %v9482_v25 }
 0x655   : > { %11461 = vst [vmem:[#allocation151_spill] sm:$0xff] %v9453_v52  ;;  %11462 = vst [vmem:[#allocation152_spill] sm:$0xff] %v9456_v32  ;;  %3379 = vperm.xlu1 %6593, %v9456_v32  }
 0x656   : > { %4660 = vst.msk [vmem:[#allocation2 + $0x180] sm:$0xff] %vm1959_vm8, %v9453_v52  ;;  %3856 = vst.msk [vmem:[#allocation2 + $0x128] sm:$0xff] %vm1959_vm8, %v9456_v32  ;;  %v4074_v42 = vpop.xlane.xlu1 %4073  ;;  %v3271_v11 = vpop.xlane.xlu0 %3270  ;;  %6603 = vpow2.f32 %v1721_v62  ;;  %v9501_v32 = vld [vmem:[#allocation2 + $0x1c0] sm:$0xff] }
 0x657   : > { %v9471_v28 = vmax.f32 %v9459_v47, %v4074_v42  ;;  %v9474_v17 = vmax.f32 %v9461_v55, %v3271_v11  ;;  %3394 = vperm.xlu0 %6592, %v9373_v26   ;;  %v1727_v42 = vmul.f32 1.442695, %v11472_v15  ;;  %11473 = vst [vmem:[#allocation161_spill] sm:$0xff] %v9501_v32  ;;  %v9503_v26 = vld [vmem:[#allocation2 + $0x158] sm:$0xff] }
 0x658   : > { %11474 = vst [vmem:[#allocation162_spill] sm:$0xff] %v9503_v26 }
 0x659   : > { %11465 = vst [vmem:[#allocation155_spill] sm:$0xff] %v9471_v28  ;;  %11466 = vst [vmem:[#allocation156_spill] sm:$0xff] %v9474_v17  ;;  %3389 = vperm.xlu1 %6593, %v9474_v17   ;;  %6605 = vpow2.f32 %v1727_v42 }
 0x65a   : > { %4664 = vst.msk [vmem:[#allocation2 + $0x1a0] sm:$0xff] %vm1959_vm8, %v9471_v28  ;;  %3858 = vst.msk [vmem:[#allocation2 + $0x138] sm:$0xff] %vm1959_vm8, %v9474_v17  ;;  %v4078_v11 = vpop.xlane.xlu1 %4077  ;;  %v3275_v47 = vpop.xlane.xlu0 %3274 }
 0x65b   : > { %v9492_v24 = vmax.f32 %v9480_v35, %v4078_v11  ;;  %v9495_v30 = vmax.f32 %v9482_v25, %v3275_v47  ;;  %3404 = vperm.xlu0 %6592, %v9393_v57   ;;  %v11475_v47 = vsub.f32 %v9034_v54, %v9041_v6  ;;  %v11478_v11 = vsub.f32 %v9062_v53, %v9076_v5  ;;  %v9527_v57 = vld [vmem:[#allocation2 + $0x168] sm:$0xff]  ;;  %v9551_v54 = vld [vmem:[#allocation2 + $0x178] sm:$0xff] }
 0x65c   : > { %11480 = vst [vmem:[#allocation166_spill] sm:$0xff] %v9527_v57  ;;  %v11481_v6 = vsub.f32 %v9045_v59, %v9060_v0  ;;  %11486 = vst [vmem:[#allocation170_spill] sm:$0xff] %v9551_v54 }
 0x65d   : > { %11470 = vst [vmem:[#allocation159_spill] sm:$0xff] %v9492_v24  ;;  %11471 = vst [vmem:[#allocation160_spill] sm:$0xff] %v9495_v30  ;;  %3399 = vperm.xlu1 %6593, %v9495_v30   ;;  %v1719_v62 = vmul.f32 1.442695, %v11475_v47  ;;  %v1731_v25 = vmul.f32 1.442695, %v11478_v11 }
 0x65e   : > { %4666 = vst.msk [vmem:[#allocation2 + $0x1b0] sm:$0xff] %vm1959_vm8, %v9492_v24  ;;  %3860 = vst.msk [vmem:[#allocation2 + $0x148] sm:$0xff] %vm1959_vm8, %v9495_v30  ;;  %v4082_v34 = vpop.xlane.xlu1 %4081  ;;  %v3279_v63 = vpop.xlane.xlu0 %3278  ;;  %v9525_v30 = vld [vmem:[#allocation2 + $0x1d0] sm:$0xff]  ;;  %v1723_v53 = vmul.f32 1.442695, %v11481_v6 }
 0x65f   : > { %v9516_v15 = vmax.f32 %v9501_v32, %v4082_v34  ;;  %v9519_v35 = vmax.f32 %v9503_v26, %v3279_v63  ;;  %3414 = vperm.xlu0 %6592, %v9413_v61   ;;  %11479 = vst [vmem:[#allocation165_spill] sm:$0xff] %v9525_v30  ;;  %6607 = vpow2.f32 %v1719_v62  ;;  %v11484_v34 = vsub.f32 %v9081_v51, %v9095_v4  ;;  %v9549_v62 = vld [vmem:[#allocation2 + $0x1e0] sm:$0xff] }
 0x660   : > { %6609 = vpow2.f32 %v1731_v25  ;;  %11485 = vst [vmem:[#allocation169_spill] sm:$0xff] %v9549_v62  ;;  %v9560_v25 = vpop.eup %6603  ;;  %v11487_v4 = vsub.f32 %v9064_v8, %v9079_v27 }
 0x661   : > { %11476 = vst [vmem:[#allocation163_spill] sm:$0xff] %v9516_v15  ;;  %11477 = vst [vmem:[#allocation164_spill] sm:$0xff] %v9519_v35  ;;  %3409 = vperm.xlu1 %6593, %v9519_v35   ;;  %v1735_v63 = vmul.f32 1.442695, %v11484_v34  ;;  %6611 = vpow2.f32 %v1723_v53  ;;  %v11490_v34 = vsub.f32 %v9100_v31, %v9114_v16  ;;  %v9575_v53 = vld [vmem:[#allocation2 + $0x1f0] sm:$0xff]  ;;  %v11493_v16 = vsub.f32 %v9083_v2, %v9098_v10 }
 0x662   : > { %4668 = vst.msk [vmem:[#allocation2 + $0x1c0] sm:$0xff] %vm1959_vm8, %v9516_v15  ;;  %3862 = vst.msk [vmem:[#allocation2 + $0x158] sm:$0xff] %vm1959_vm8, %v9519_v35  ;;  %v4086_v5 = vpop.xlane.xlu1 %4085  ;;  %v3283_v42 = vpop.xlane.xlu0 %3282  ;;  %v1725_v0 = vmul.f32 1.442695, %v11487_v4  ;;  %v11497_v2 = vsub.f32 %v9102_v39, %v9117_v40  ;;  %v11501_v40 = vsub.f32 %v9121_v12, %v9136_v37  ;;  %v11506_v37 = vsub.f32 %v9141_v1, %v9156_v49 }
 0x663   : > { %v9540_v11 = vmax.f32 %v9525_v30, %v4086_v5  ;;  %v9543_v47 = vmax.f32 %v9527_v57, %v3283_v42  ;;  %3424 = vperm.xlu0 %6592, %v9433_v45   ;;  %6613 = vpow2.f32 %v1735_v63  ;;  %v1739_v59 = vmul.f32 1.442695, %v11490_v34  ;;  %11491 = vst [vmem:[#allocation173_spill] sm:$0xff] %v9575_v53  ;;  %v9577_v30 = vld [vmem:[#allocation2 + $0x188] sm:$0xff]  ;;  %v9586_v8 = vpop.eup %6605 }
 0x664   : > { %11492 = vst [vmem:[#allocation174_spill] sm:$0xff] %v9577_v30  ;;  %6615 = vpow2.f32 %v1725_v0  ;;  %v1729_v31 = vmul.f32 1.442695, %v11493_v16  ;;  %v11495_v0 = vsub.f32 %v9119_v19, %v9133_v23  ;;  %v11510_v49 = vsub.f32 %v9161_v38, %v9176_v60 }
 0x665   : > { %11482 = vst [vmem:[#allocation167_spill] sm:$0xff] %v9540_v11  ;;  %11483 = vst [vmem:[#allocation168_spill] sm:$0xff] %v9543_v47  ;;  %3419 = vperm.xlu1 %6593, %v9543_v47   ;;  %6617 = vpow2.f32 %v1739_v59  ;;  %v1733_v59 = vmul.f32 1.442695, %v11497_v2  ;;  %v11515_v38 = vsub.f32 %v9181_v29, %v9196_v43  ;;  %v11520_v43 = vsub.f32 %v9201_v7, %v9216_v21 }
 0x666   : > { %4670 = vst.msk [vmem:[#allocation2 + $0x1d0] sm:$0xff] %vm1959_vm8, %v9540_v11  ;;  %3864 = vst.msk [vmem:[#allocation2 + $0x168] sm:$0xff] %vm1959_vm8, %v9543_v47  ;;  %v4090_v51 = vpop.xlane.xlu1 %4089  ;;  %v3287_v6 = vpop.xlane.xlu0 %3286  ;;  %v1743_v27 = vmul.f32 1.442695, %v11495_v0  ;;  %6619 = vpow2.f32 %v1729_v31  ;;  %v9624_v0 = vld [vmem:[#allocation2 + $0x198] sm:$0xff]  ;;  %v11525_v21 = vsub.f32 %v9221_v18, %v9236_v13 }
 0x667   : > { %v9566_v5 = vmax.f32 %v9549_v62, %v4090_v51  ;;  %v9569_v42 = vmax.f32 %v9551_v54, %v3287_v6  ;;  %1999 = vperm.xlu0 %6592, %v9560_v25   ;;  %v9603_v62 = vld [vmem:[#allocation2 + $0x190] sm:$0xff]  ;;  %11500 = vst [vmem:[#allocation178_spill] sm:$0xff] %v9624_v0  ;;  %v1737_v31 = vmul.f32 1.442695, %v11501_v40  ;;  %v11530_v18 = vld [vmem:[#allocation113_spill] sm:$0xff] }
 0x668   : > { %11496 = vst [vmem:[#allocation176_spill] sm:$0xff] %v9603_v62  ;;  %6621 = vpow2.f32 %v1743_v27 }
 0x669   : > { %11488 = vst [vmem:[#allocation171_spill] sm:$0xff] %v9566_v5  ;;  %11489 = vst [vmem:[#allocation172_spill] sm:$0xff] %v9569_v42  ;;  %3429 = vperm.xlu1 %6593, %v9569_v42   ;;  %v9598_v34 = vpop.eup %6607  ;;  %6623 = vpow2.f32 %v1733_v59  ;;  %v1741_v59 = vmul.f32 1.442695, %v11506_v37 }
 0x66a   : > { %4672 = vst.msk [vmem:[#allocation2 + $0x1e0] sm:$0xff] %vm1959_vm8, %v9566_v5  ;;  %3866 = vst.msk [vmem:[#allocation2 + $0x178] sm:$0xff] %vm1959_vm8, %v9569_v42  ;;  %v4094_v63 = vpop.xlane.xlu1 %4093  ;;  %v4068_v4 = vpop.xlane.xlu0 %4067 }
 0x66b   : > { %v9592_v51 = vmax.f32 %v9575_v53, %v4094_v63  ;;  %v9595_v6 = vmax.f32 %v9577_v30, %v4068_v4  ;;  %2014 = vperm.xlu0 %6592, %v9586_v8   ;;  %v9610_v10 = vpop.eup %6609  ;;  %v11499_v63 = vsub.f32 %v9139_v48, %v9153_v3  ;;  %v11503_v3 = vsub.f32 %v9159_v50, %v9173_v33  ;;  %v11546_v30 = vld [vmem:[#allocation68_spill] sm:$0xff] }
 0x66c   : > { %v9619_v23 = vpop.eup %6611  ;;  %v11507_v33 = vsub.f32 %v9179_v20, %v9193_v22  ;;  %v11512_v20 = vsub.f32 %v9199_v36, %v9213_v46  ;;  %v11517_v36 = vsub.f32 %v9219_v41, %v9233_v14  ;;  %v11522_v41 = vsub.f32 %v9239_v56, %v9253_v9 }
 0x66d   : > { %11494 = vst [vmem:[#allocation175_spill] sm:$0xff] %v9592_v51  ;;  %4674 = vst.msk [vmem:[#allocation2 + $0x1f0] sm:$0xff] %vm1959_vm8, %v9592_v51  ;;  %1994 = vperm.xlu1 %6593, %v9598_v34   ;;  %v1747_v4 = vmul.f32 1.442695, %v11499_v63  ;;  %v9629_v39 = vpop.eup %6613  ;;  %v9643_v63 = vld [vmem:[#allocation2 + $0x1a8] sm:$0xff]  ;;  %v11527_v9 = vsub.f32 %v9259_v44, %v9273_v58  ;;  %v11534_v58 = vld [vmem:[#allocation117_spill] sm:$0xff] }
 0x66e   : > { %4661 = vst.msk [vmem:[#allocation2 + $0x188] sm:$0xff] %vm1959_vm8, %v9595_v6  ;;  %v4070_v16 = vpop.xlane.xlu0 %4069  ;;  %v9638_v48 = vpop.eup %6615  ;;  %11504 = vst [vmem:[#allocation180_spill] sm:$0xff] %v9643_v63 }
 0x66f   : > { %v9616_v19 = vmax.f32 %v9603_v62, %v4070_v16  ;;  %2024 = vperm.xlu0 %6592, %v9610_v10   ;;  %6625 = vpow2.f32 %v1747_v4  ;;  %v2505_v16 = vmul.f32 1.442695, %v11503_v3  ;;  %v9648_v12 = vpop.eup %6617  ;;  %v9662_v3 = vld [vmem:[#allocation2 + $0x1b8] sm:$0xff]  ;;  %v11537_v62 = vld [vmem:[#allocation66_spill] sm:$0xff] }
 0x670   : > { %11505 = vst [vmem:[#allocation181_spill] sm:$0xff] %v9648_v12  ;;  %6627 = vpow2.f32 %v1737_v31  ;;  %v9657_v50 = vpop.eup %6619  ;;  %11508 = vst [vmem:[#allocation182_spill] sm:$0xff] %v9662_v3  ;;  %v1745_v31 = vmul.f32 1.442695, %v11510_v49 }
 0x671   : > { %11498 = vst [vmem:[#allocation177_spill] sm:$0xff] %v9616_v19  ;;  %4662 = vst.msk [vmem:[#allocation2 + $0x190] sm:$0xff] %vm1959_vm8, %v9616_v19  ;;  %2004 = vperm.xlu1 %6593, %v9619_v23   ;;  %6629 = vpow2.f32 %v2505_v16 }
 0x672   : > { %v4072_v2 = vpop.xlane.xlu0 %4071  ;;  %v9667_v1 = vpop.eup %6621  ;;  %6631 = vpow2.f32 %v1741_v59  ;;  %v1749_v59 = vmul.f32 1.442695, %v11515_v38 }
 0x673   : > { %v9635_v27 = vmax.f32 %v9624_v0, %v4072_v2  ;;  %2034 = vperm.xlu0 %6592, %v9629_v39   ;;  %v2511_v2 = vmul.f32 1.442695, %v11507_v33  ;;  %11509 = vst [vmem:[#allocation183_spill] sm:$0xff] %v9667_v1  ;;  %v9676_v22 = vpop.eup %6623  ;;  %v9681_v33 = vld [vmem:[#allocation2 + $0x1c8] sm:$0xff] }
 0x674   : > { %11513 = vst [vmem:[#allocation185_spill] sm:$0xff] %v9681_v33 }
 0x675   : > { %11502 = vst [vmem:[#allocation179_spill] sm:$0xff] %v9635_v27  ;;  %4663 = vst.msk [vmem:[#allocation2 + $0x198] sm:$0xff] %vm1959_vm8, %v9635_v27  ;;  %2009 = vperm.xlu1 %6593, %v9638_v48   ;;  %6633 = vpow2.f32 %v2511_v2 }
 0x676   : > { %v4076_v40 = vpop.xlane.xlu0 %4075  ;;  %6635 = vpow2.f32 %v1745_v31  ;;  %v2503_v31 = vmul.f32 1.442695, %v11520_v43 }
 0x677   : > { %v9654_v4 = vmax.f32 %v9643_v63, %v4076_v40  ;;  %2044 = vperm.xlu0 %6592, %v9648_v12   ;;  %v2515_v40 = vmul.f32 1.442695, %v11512_v20  ;;  %v11607_v12 = vld [vmem:[#allocation43_spill] sm:$0xff] }
 0x679   : > { %4665 = vst.msk [vmem:[#allocation2 + $0x1a8] sm:$0xff] %vm1959_vm8, %v9654_v4  ;;  %2019 = vperm.xlu1 %6593, %v9657_v50   ;;  %v9686_v60 = vpop.eup %6625  ;;  %6637 = vpow2.f32 %v2515_v40 }
 0x67a   : > { %v4080_v37 = vpop.xlane.xlu0 %4079  ;;  %11514 = vst [vmem:[#allocation186_spill] sm:$0xff] %v9686_v60  ;;  %v9695_v46 = vpop.eup %6627  ;;  %6639 = vpow2.f32 %v1749_v59  ;;  %v2507_v59 = vmul.f32 1.442695, %v11525_v21 }
 0x67b   : > { %v9673_v16 = vmax.f32 %v9662_v3, %v4080_v37  ;;  %2054 = vperm.xlu0 %6592, %v9667_v1   ;;  %v2519_v37 = vmul.f32 1.442695, %v11517_v36  ;;  %v9700_v3 = vld [vmem:[#allocation2 + $0x1d8] sm:$0xff]  ;;  %v9705_v29 = vpop.eup %6629 }
 0x67c   : > { %11518 = vst [vmem:[#allocation188_spill] sm:$0xff] %v9700_v3  ;;  %11519 = vst [vmem:[#allocation189_spill] sm:$0xff] %v9705_v29  ;;  %v9714_v14 = vpop.eup %6631 }
 0x67d   : > { %11511 = vst [vmem:[#allocation184_spill] sm:$0xff] %v9673_v16  ;;  %4667 = vst.msk [vmem:[#allocation2 + $0x1b8] sm:$0xff] %vm1959_vm8, %v9673_v16  ;;  %2029 = vperm.xlu1 %6593, %v9676_v22   ;;  %6641 = vpow2.f32 %v2519_v37 }
 0x67e   : > { %v4084_v49 = vpop.xlane.xlu0 %4083  ;;  %6643 = vpow2.f32 %v2503_v31  ;;  %v11531_v31 = vld [vmem:[#allocation114_spill] sm:$0xff] }
 0x67f   : > { %v9692_v2 = vmax.f32 %v9681_v33, %v4084_v49  ;;  %2064 = vperm.xlu0 %6592, %v9686_v60   ;;  %v2523_v49 = vmul.f32 1.442695, %v11522_v41  ;;  %v9719_v33 = vld [vmem:[#allocation2 + $0x1e8] sm:$0xff]  ;;  %v9724_v7 = vpop.eup %6633  ;;  %v11532_v21 = vsub.f32 %v11530_v18, %v11531_v31 }
 0x680   : > { %v1754_v20 = vpop.permute.xlu1 %1753  ;;  %11523 = vst [vmem:[#allocation191_spill] sm:$0xff] %v9719_v33  ;;  %11524 = vst [vmem:[#allocation192_spill] sm:$0xff] %v9724_v7  ;;  %v9733_v56 = vpop.eup %6635  ;;  %v11539_v31 = vld [vmem:[#allocation115_spill] sm:$0xff] }
 0x681   : > { %11516 = vst [vmem:[#allocation187_spill] sm:$0xff] %v9692_v2  ;;  %4669 = vst.msk [vmem:[#allocation2 + $0x1c8] sm:$0xff] %vm1959_vm8, %v9692_v2  ;;  %2039 = vperm.xlu1 %6593, %v9695_v46   ;;  %6645 = vpow2.f32 %v2523_v49 }
 0x682   : > { %v4088_v40 = vpop.xlane.xlu0 %4087  ;;  %6647 = vpow2.f32 %v2507_v59  ;;  %v1831_v59 = vsub.f32 %v11537_v62, %v1754_v20  ;;  %v11543_v62 = vld [vmem:[#allocation118_spill] sm:$0xff]  ;;  %v11544_v20 = vld [vmem:[#allocation120_spill] sm:$0xff] }
 0x683   : > { %v9711_v38 = vmax.f32 %v9700_v3, %v4088_v40  ;;  %2784 = vperm.xlu0 %6592, %v9705_v29   ;;  %v2527_v40 = vmul.f32 1.442695, %v11527_v9  ;;  %v9738_v3 = vld [vmem:[#allocation2 + $0x1f8] sm:$0xff]  ;;  %v9743_v13 = vpop.eup %6637  ;;  %v11535_v9 = vld [vmem:[#allocation119_spill] sm:$0xff] }
 0x684   : > { %v1764_v36 = vpop.permute.xlu1 %1763  ;;  %11528 = vst [vmem:[#allocation194_spill] sm:$0xff] %v9738_v3  ;;  %11529 = vst [vmem:[#allocation195_spill] sm:$0xff] %v9743_v13  ;;  %v9752_v44 = vpop.eup %6639  ;;  %v11536_v53 = vsub.f32 %v11534_v58, %v11535_v9  ;;  %v11545_v58 = vsub.f32 %v11543_v62, %v11544_v20  ;;  %v1847_v47 = vmul.f32 1.442695, %v1831_v59  ;;  %v11551_v59 = vld [vmem:[#allocation124_spill] sm:$0xff] }
 0x685   : > { %11521 = vst [vmem:[#allocation190_spill] sm:$0xff] %v9711_v38  ;;  %4671 = vst.msk [vmem:[#allocation2 + $0x1d8] sm:$0xff] %vm1959_vm8, %v9711_v38  ;;  %2049 = vperm.xlu1 %6593, %v9714_v14   ;;  %6649 = vpow2.f32 %v2527_v40  ;;  %v11542_v40 = vld [vmem:[#allocation70_spill] sm:$0xff]  ;;  %v1833_v42 = vsub.f32 %v11546_v30, %v1764_v36 }
 0x686   : > { %v4092_v37 = vpop.xlane.xlu0 %4091  ;;  %v2531_v63 = vmul.f32 1.442695, %v11536_v53  ;;  %v2517_v9 = vmul.f32 1.442695, %v11545_v58  ;;  %v11550_v36 = vld [vmem:[#allocation122_spill] sm:$0xff] }
 0x687   : > { %v9730_v43 = vmax.f32 %v9719_v33, %v4092_v37  ;;  %2799 = vperm.xlu0 %6592, %v9724_v7   ;;  %v2509_v37 = vmul.f32 1.442695, %v11532_v21  ;;  %v9761_v18 = vpop.eup %6641  ;;  %v11540_v21 = vld [vmem:[#allocation116_spill] sm:$0xff]  ;;  %v1851_v62 = vmul.f32 1.442695, %v1833_v42  ;;  %v11552_v20 = vsub.f32 %v11550_v36, %v11551_v59  ;;  %v11588_v7 = vld [vmem:[#allocation79_spill] sm:$0xff] }
 0x688   : > { %v1769_v41 = vpop.permute.xlu1 %1768  ;;  %11538 = vst [vmem:[#allocation114_spill] sm:$0xff] %v9761_v18  ;;  %v9768_v53 = vpop.eup %6643 }
 0x689   : > { %11526 = vst [vmem:[#allocation193_spill] sm:$0xff] %v9730_v43  ;;  %4673 = vst.msk [vmem:[#allocation2 + $0x1e8] sm:$0xff] %vm1959_vm8, %v9730_v43  ;;  %2059 = vperm.xlu1 %6593, %v9733_v56   ;;  %6651 = vpow2.f32 %v2509_v37  ;;  %v1834_v32 = vsub.f32 %v11542_v40, %v1769_v41  ;;  %v11548_v41 = vld [vmem:[#allocation72_spill] sm:$0xff]  ;;  %v11549_v40 = vld [vmem:[#allocation65_spill] sm:$0xff]  ;;  %v2521_v58 = vmul.f32 1.442695, %v11552_v20 }
 0x68a   : > { %v4096_v49 = vpop.xlane.xlu0 %4095  ;;  %6653 = vpow2.f32 %v2531_v63 }
 0x68b   : > { %v9749_v33 = vmax.f32 %v9738_v3, %v4096_v49  ;;  %2809 = vperm.xlu0 %6592, %v9743_v13   ;;  %v11541_v49 = vsub.f32 %v11539_v31, %v11540_v21  ;;  %v9775_v37 = vpop.eup %6645  ;;  %v1853_v31 = vmul.f32 1.442695, %v1834_v32 }
 0x68c   : > { %v1779_v0 = vpop.permute.xlu1 %1778  ;;  %11547 = vst [vmem:[#allocation117_spill] sm:$0xff] %v9775_v37  ;;  %v9780_v63 = vpop.eup %6647 }
 0x68d   : > { %11533 = vst [vmem:[#allocation113_spill] sm:$0xff] %v9749_v33  ;;  %4675 = vst.msk [vmem:[#allocation2 + $0x1f8] sm:$0xff] %vm1959_vm8, %v9749_v33  ;;  %2069 = vperm.xlu1 %6593, %v9752_v44   ;;  %v2513_v3 = vmul.f32 1.442695, %v11541_v49  ;;  %v1836_v21 = vsub.f32 %v11548_v41, %v1779_v0 }
 0x68f   : > { %2819 = vperm.xlu0 %6592, %v9761_v18   ;;  %6655 = vpow2.f32 %v2513_v3  ;;  %v9786_v32 = vpop.eup %6649  ;;  %v1857_v0 = vmul.f32 1.442695, %v1836_v21  ;;  %v11554_v3 = vld [vmem:[#allocation74_spill] sm:$0xff] }
 0x690   : > { %v1789_v54 = vpop.permute.xlu1 %1788  ;;  %6657 = vpow2.f32 %v2517_v9  ;;  %11553 = vst [vmem:[#allocation119_spill] sm:$0xff] %v9786_v32 }
 0x691   : > { %2779 = vperm.xlu1 %6593, %v9768_v53   ;;  %6659 = vpow2.f32 %v1847_v47  ;;  %v1838_v41 = vsub.f32 %v11554_v3, %v1789_v54  ;;  %v11558_v47 = vld [vmem:[#allocation128_spill] sm:$0xff] }
 0x692   : > { %v1759_v49 = vpop.permute.xlu0 %1758  ;;  %6661 = vpow2.f32 %v1853_v31  ;;  %v11561_v54 = vld [vmem:[#allocation76_spill] sm:$0xff] }
 0x693   : > { %v1832_v57 = vsub.f32 %v11549_v40, %v1759_v49  ;;  %2829 = vperm.xlu0 %6592, %v9775_v37   ;;  %v11555_v40 = vld [vmem:[#allocation67_spill] sm:$0xff]  ;;  %v9791_v42 = vpop.eup %6651 }
 0x694   : > { %v1799_v30 = vpop.permute.xlu1 %1798  ;;  %11556 = vst [vmem:[#allocation66_spill] sm:$0xff] %v9791_v42  ;;  %v9797_v31 = vpop.eup %6653 }
 0x695   : > { %v1849_v35 = vmul.f32 1.442695, %v1832_v57  ;;  %2789 = vperm.xlu1 %6593, %v9780_v63   ;;  %v11557_v57 = vld [vmem:[#allocation126_spill] sm:$0xff]  ;;  %11560 = vst [vmem:[#allocation115_spill] sm:$0xff] %v9797_v31  ;;  %v1840_v21 = vsub.f32 %v11561_v54, %v1799_v30 }
 0x696   : > { %v1774_v49 = vpop.permute.xlu0 %1773  ;;  %v11559_v59 = vsub.f32 %v11557_v57, %v11558_v47  ;;  %v11564_v57 = vld [vmem:[#allocation130_spill] sm:$0xff] }
 0x697   : > { %6663 = vpow2.f32 %v1849_v35  ;;  %v1835_v9 = vsub.f32 %v11555_v40, %v1774_v49  ;;  %2839 = vperm.xlu0 %6592, %v9786_v32   ;;  %v1861_v35 = vmul.f32 1.442695, %v1838_v41  ;;  %v11562_v49 = vld [vmem:[#allocation69_spill] sm:$0xff]  ;;  %v1865_v30 = vmul.f32 1.442695, %v1840_v21 }
 0x698   : > { %6665 = vpow2.f32 %v1851_v62  ;;  %v1809_v36 = vpop.permute.xlu1 %1808  ;;  %v2525_v20 = vmul.f32 1.442695, %v11559_v59 }
 0x699   : > { %6667 = vpow2.f32 %v2521_v58  ;;  %v1855_v26 = vmul.f32 1.442695, %v1835_v9  ;;  %2794 = vperm.xlu1 %6593, %v9791_v42   ;;  %v9802_v62 = vpop.eup %6655  ;;  %v11565_v9 = vld [vmem:[#allocation132_spill] sm:$0xff] }
 0x69a   : > { %6669 = vpow2.f32 %v1857_v0  ;;  %v1784_v3 = vpop.permute.xlu0 %1783  ;;  %11563 = vst [vmem:[#allocation116_spill] sm:$0xff] %v9802_v62  ;;  %v11566_v47 = vsub.f32 %v11564_v57, %v11565_v9  ;;  %v9808_v0 = vpop.eup %6657  ;;  %v11571_v9 = vld [vmem:[#allocation136_spill] sm:$0xff] }
 0x69b   : > { %6671 = vpow2.f32 %v1855_v26  ;;  %v1837_v40 = vsub.f32 %v11562_v49, %v1784_v3  ;;  %2849 = vperm.xlu0 %6592, %v9797_v31   ;;  %11567 = vst [vmem:[#allocation70_spill] sm:$0xff] %v9808_v0  ;;  %v11568_v26 = vld [vmem:[#allocation78_spill] sm:$0xff]  ;;  %v9811_v3 = vpop.eup %6659  ;;  %v11569_v49 = vld [vmem:[#allocation71_spill] sm:$0xff] }
 0x69c   : > { %v1819_v58 = vpop.permute.xlu1 %1818  ;;  %6673 = vpow2.f32 %v2525_v20  ;;  %v2529_v59 = vmul.f32 1.442695, %v11566_v47  ;;  %v1842_v41 = vsub.f32 %v11568_v26, %v1809_v36  ;;  %v9814_v20 = vpop.eup %6661 }
 0x69d   : > { %v1859_v45 = vmul.f32 1.442695, %v1837_v40  ;;  %2804 = vperm.xlu1 %6593, %v9802_v62   ;;  %6675 = vpow2.f32 %v1861_v35  ;;  %v11570_v40 = vld [vmem:[#allocation134_spill] sm:$0xff] }
 0x69e   : > { %v1794_v54 = vpop.permute.xlu0 %1793  ;;  %v11572_v47 = vsub.f32 %v11570_v40, %v11571_v9  ;;  %v1869_v21 = vmul.f32 1.442695, %v1842_v41 }
 0x69f   : > { %6677 = vpow2.f32 %v1859_v45  ;;  %v1839_v61 = vsub.f32 %v11569_v49, %v1794_v54  ;;  %v11573_v45 = vld [vmem:[#allocation80_spill] sm:$0xff] }
 0x6a0   : > { %v1829_v17 = vpop.permute.xlu1 %1828  ;;  %6679 = vpow2.f32 %v2529_v59  ;;  %v2533_v55 = vmul.f32 1.442695, %v11572_v47  ;;  %v1844_v26 = vsub.f32 %v11573_v45, %v1819_v58  ;;  %v11575_v59 = vld [vmem:[#allocation73_spill] sm:$0xff]  ;;  %v11576_v47 = vld [vmem:[#allocation82_spill] sm:$0xff] }
 0x6a1   : > { %v9816_v57 = vpop.eup %6663  ;;  %v1863_v35 = vmul.f32 1.442695, %v1839_v61  ;;  %2814 = vperm.xlu1 %6593, %v9808_v0   ;;  %6681 = vpow2.f32 %v1865_v30  ;;  %v11577_v45 = vld [vmem:[#allocation49_spill] sm:$0xff] }
 0x6a2   : > { %v9822_v36 = vpop.eup %6665  ;;  %v1804_v54 = vpop.permute.xlu0 %1803  ;;  %v2088_v49 = vpack.c.bf16 %v9816_v57, %v9811_v3  ;;  %v1873_v41 = vmul.f32 1.442695, %v1844_v26 }
 0x6a3   : > { %v9827_v31 = vpop.eup %6667  ;;  %6683 = vpow2.f32 %v1863_v35  ;;  %v1841_v32 = vsub.f32 %v11575_v59, %v1804_v54  ;;  %v2089_v61 = vpack.c.bf16 %v9814_v20, %v9822_v36  ;;  %v1846_v35 = vsub.f32 %v11576_v47, %v1829_v17  ;;  %v11581_v47 = vld [vmem:[#allocation84_spill] sm:$0xff] }
 0x6a4   : > { %11574 = vst [vmem:[#allocation118_spill] sm:$0xff] %v9827_v31  ;;  %v9832_v40 = vpop.eup %6669  ;;  %v2538_v9 = vpop.permute.xlu1 %2537  ;;  %6267 = vmatprep.mubr.bf16.mxu0 %v2088_v49  ;;  %6685 = vpow2.f32 %v2533_v55  ;;  %v11579_v49 = vld [vmem:[#allocation106_spill] sm:$0xff]  ;;  %v11580_v55 = vld [vmem:[#allocation75_spill] sm:$0xff] }
 0x6a5   : > { %v9834_v30 = vpop.eup %6671  ;;  %v1867_v58 = vmul.f32 1.442695, %v1841_v32  ;;  %2824 = vperm.xlu1 %6593, %v9827_v31   ;;  %6268 = vmatmul.mubr.bf16.vlgmr.msra.gmra.mrb[16].mxu0 %v2089_v61  ;;  %6687 = vpow2.f32 %v1869_v21  ;;  %v1877_v26 = vmul.f32 1.442695, %v1846_v35 }
 0x6a6   : > { %6284 = vmatpush3.bf16.msra.mxu0 %v11577_v45  ;;  %v1814_v54 = vpop.permute.xlu0 %1813  ;;  %v2090_v59 = vpack.c.bf16 %v9832_v40, %v9834_v30  ;;  %v9841_v33 = vpop.eup %6673  ;;  %v2615_v45 = vsub.f32 %v11581_v47, %v2538_v9 }
 0x6a7   : > { %11578 = vst [vmem:[#allocation120_spill] sm:$0xff] %v9841_v33  ;;  %6689 = vpow2.f32 %v1867_v58  ;;  %6285 = vmatprep.subr.bf16.mxu0 %v11579_v49  ;;  %v1843_v32 = vsub.f32 %v11580_v55, %v1814_v54  ;;  %v9845_v37 = vpop.eup %6675  ;;  %v11583_v55 = vld [vmem:[#allocation108_spill] sm:$0xff] }
 0x6a8   : > { %v2548_v61 = vpop.permute.xlu1 %2547  ;;  %6271 = vmatprep.mubr.bf16.mxu0 %v2090_v59  ;;  %6691 = vpow2.f32 %v1873_v41  ;;  %v11584_v59 = vld [vmem:[#allocation77_spill] sm:$0xff]  ;;  %v2631_v9 = vmul.f32 1.442695, %v2615_v45 }
 0x6a9   : > { %v9847_v21 = vpop.eup %6677  ;;  %v1871_v17 = vmul.f32 1.442695, %v1843_v32  ;;  %2834 = vperm.xlu1 %6593, %v9841_v33  }
 0x6aa   : > { %6286 = vmatpush3.bf16.msra.mxu0 %v11579_v49  ;;  %v1824_v58 = vpop.permute.xlu0 %1823  ;;  %v2091_v43 = vpack.c.bf16 %v9845_v37, %v9847_v21  ;;  %v9854_v54 = vpop.eup %6679  ;;  %v11585_v49 = vld [vmem:[#allocation88_spill] sm:$0xff] }
 0x6ab   : > { %11582 = vst [vmem:[#allocation68_spill] sm:$0xff] %v9854_v54  ;;  %6693 = vpow2.f32 %v1871_v17  ;;  %6287 = vmatprep.subr.bf16.mxu0 %v11583_v55  ;;  %v1845_v18 = vsub.f32 %v11584_v59, %v1824_v58  ;;  %v9858_v32 = vpop.eup %6681  ;;  %v11587_v59 = vld [vmem:[#allocation107_spill] sm:$0xff] }
 0x6ac   : > { %v2553_v13 = vpop.permute.xlu1 %2552  ;;  %6695 = vpow2.f32 %v1877_v26 }
 0x6ad   : > { %v9860_v41 = vpop.eup %6683  ;;  %v1875_v35 = vmul.f32 1.442695, %v1845_v18  ;;  %2844 = vperm.xlu1 %6593, %v9854_v54   ;;  %6272 = vmatmul.mubr.bf16.gmra.mrb[20].mxu0 %v2091_v43  ;;  %v2618_v47 = vsub.f32 %v11585_v49, %v2553_v13  ;;  %v11589_v43 = vld [vmem:[#allocation86_spill] sm:$0xff] }
 0x6ae   : > { %6288 = vmatpush3.bf16.msra.mxu0 %v11583_v55  ;;  %v2543_v17 = vpop.permute.xlu0 %2542  ;;  %v2092_v33 = vpack.c.bf16 %v9858_v32, %v9860_v41  ;;  %v9867_v58 = vpop.eup %6685  ;;  %v2617_v26 = vsub.f32 %v11589_v43, %v2548_v61  ;;  %v11590_v49 = vld [vmem:[#allocation42_spill] sm:$0xff]  ;;  %v11592_v61 = vld [vmem:[#allocation81_spill] sm:$0xff] }
 0x6af   : > { %11586 = vst [vmem:[#allocation72_spill] sm:$0xff] %v9867_v58  ;;  %6697 = vpow2.f32 %v1875_v35  ;;  %6289 = vmatprep.subr.bf16.mxu0 %v11587_v59  ;;  %v2616_v18 = vsub.f32 %v11588_v7, %v2543_v17  ;;  %v9871_v11 = vpop.eup %6687  ;;  %v2637_v31 = vmul.f32 1.442695, %v2618_v47  ;;  %v11591_v17 = vld [vmem:[#allocation110_spill] sm:$0xff] }
 0x6b0   : > { %v2563_v45 = vpop.permute.xlu1 %2562  ;;  %6275 = vmatprep.mubr.bf16.mxu0 %v2092_v33  ;;  %6699 = vpow2.f32 %v2631_v9 }
 0x6b1   : > { %v9874_v13 = vpop.eup %6689  ;;  %v2633_v55 = vmul.f32 1.442695, %v2616_v18  ;;  %v2620_v54 = vsub.f32 %v11590_v49, %v2563_v45  ;;  %2854 = vperm.xlu1 %6593, %v9867_v58   ;;  %v2635_v18 = vmul.f32 1.442695, %v2617_v26  ;;  %v11595_v26 = vld [vmem:[#allocation63_spill] sm:$0xff] }
 0x6b2   : > { %6290 = vmatpush3.bf16.msra.mxu0 %v11587_v59  ;;  %v2558_v35 = vpop.permute.xlu0 %2557  ;;  %v2093_v7 = vpack.c.bf16 %v9871_v11, %v9874_v13  ;;  %v9883_v43 = vpop.eup %6691 }
 0x6b3   : > { %6701 = vpow2.f32 %v2633_v55  ;;  %6291 = vmatprep.subr.bf16.mxu0 %v11591_v17  ;;  %v2619_v33 = vsub.f32 %v11592_v61, %v2558_v35  ;;  %v2641_v49 = vmul.f32 1.442695, %v2620_v54  ;;  %v11593_v55 = vld [vmem:[#allocation109_spill] sm:$0xff]  ;;  %v11594_v35 = vld [vmem:[#allocation83_spill] sm:$0xff] }
 0x6b4   : > { %v2573_v29 = vpop.permute.xlu1 %2572  ;;  %6703 = vpow2.f32 %v2637_v31  ;;  %v11596_v31 = vld [vmem:[#allocation52_spill] sm:$0xff] }
 0x6b5   : > { %v9885_v45 = vpop.eup %6693  ;;  %v2639_v9 = vmul.f32 1.442695, %v2619_v33  ;;  %6276 = vmatmul.mubr.bf16.gmra.mrb[24].mxu0 %v2093_v7  ;;  %v2622_v2 = vsub.f32 %v11595_v26, %v2573_v29 }
 0x6b6   : > { %6292 = vmatpush3.bf16.msra.mxu0 %v11591_v17  ;;  %v2568_v47 = vpop.permute.xlu0 %2567  ;;  %v2094_v59 = vpack.c.bf16 %v9883_v43, %v9885_v45  ;;  %v9892_v58 = vpop.eup %6695 }
 0x6b7   : > { %6705 = vpow2.f32 %v2639_v9  ;;  %6293 = vmatprep.subr.bf16.mxu0 %v11593_v55  ;;  %v2621_v61 = vsub.f32 %v11594_v35, %v2568_v47  ;;  %v11597_v35 = vld [vmem:[#allocation112_spill] sm:$0xff] }
 0x6b8   : > { %6707 = vpow2.f32 %v2635_v18  ;;  %v2583_v54 = vpop.permute.xlu1 %2582  ;;  %6279 = vmatprep.mubr.bf16.mxu0 %v2094_v59  ;;  %v11598_v18 = vld [vmem:[#allocation85_spill] sm:$0xff]  ;;  %v2645_v59 = vmul.f32 1.442695, %v2622_v2 }
 0x6b9   : > { %v9895_v7 = vpop.eup %6697  ;;  %6709 = vpow2.f32 %v2641_v49  ;;  %v2624_v17 = vsub.f32 %v11596_v31, %v2583_v54  ;;  %v2643_v33 = vmul.f32 1.442695, %v2621_v61  ;;  %v11599_v31 = vld [vmem:[#allocation111_spill] sm:$0xff] }
 0x6ba   : > { %6294 = vmatpush3.bf16.msra.mxu0 %v11593_v55  ;;  %1911 = vadd.xlane.f32.xlu0 %v9811_v3  ;;  %v2578_v9 = vpop.permute.xlu0 %2577  ;;  %v2095_v47 = vpack.c.bf16 %v9892_v58, %v9895_v7  ;;  %v9904_v26 = vpop.eup %6699 }
 0x6bb   : > { %6295 = vmatprep.subr.bf16.mxu0 %v11597_v35  ;;  %v2623_v29 = vsub.f32 %v11598_v18, %v2578_v9  ;;  %v2649_v54 = vmul.f32 1.442695, %v2624_v17  ;;  %6711 = vpow2.f32 %v2643_v33  ;;  %v11600_v9 = vld [vmem:[#allocation87_spill] sm:$0xff]  ;;  %v11601_v17 = vld [vmem:[#allocation44_spill] sm:$0xff] }
 0x6bc   : > { %v2593_v0 = vpop.permute.xlu1 %2592 }
 0x6bd   : > { %v9906_v49 = vpop.eup %6701  ;;  %v2647_v61 = vmul.f32 1.442695, %v2623_v29  ;;  %6280 = vmatmul.mubr.bf16.gmra.mrb[28].mxu0 %v2095_v47  ;;  %v2626_v29 = vsub.f32 %v11601_v17, %v2593_v0 }
 0x6be   : > { %6296 = vmatpush3.bf16.msra.mxu0 %v11597_v35  ;;  %1915 = vadd.xlane.f32.xlu0 %v9822_v36  ;;  %v2588_v3 = vpop.permute.xlu0 %2587  ;;  %v2873_v55 = vpack.c.bf16 %v9906_v49, %v9904_v26  ;;  %v9914_v18 = vpop.eup %6703  ;;  %v11602_v36 = vld [vmem:[#allocation55_spill] sm:$0xff] }
 0x6bf   : > { %6713 = vpow2.f32 %v2647_v61  ;;  %6297 = vmatprep.subr.bf16.mxu0 %v11599_v31  ;;  %v2625_v2 = vsub.f32 %v11600_v9, %v2588_v3 }
 0x6c0   : > { %6715 = vpow2.f32 %v2645_v59  ;;  %v2603_v47 = vpop.permute.xlu1 %2602  ;;  %6299 = vmatprep.mubr.bf16.mxu0 %v2873_v55  ;;  %v11603_v59 = vld [vmem:[#allocation50_spill] sm:$0xff]  ;;  %v2653_v55 = vmul.f32 1.442695, %v2626_v29 }
 0x6c1   : > { %v9917_v33 = vpop.eup %6705  ;;  %6717 = vpow2.f32 %v2649_v54  ;;  %v2628_v35 = vsub.f32 %v11602_v36, %v2603_v47  ;;  %v2651_v62 = vmul.f32 1.442695, %v2625_v2 }
 0x6c2   : > { %v9920_v60 = vpop.eup %6707  ;;  %6298 = vmatpush3.bf16.msra.mxu0 %v11599_v31  ;;  %1917 = vadd.xlane.f32.xlu0 %v9814_v20  ;;  %v2598_v61 = vpop.permute.xlu0 %2597  ;;  %v11604_v31 = vld [vmem:[#allocation60_spill] sm:$0xff] }
 0x6c3   : > { %v9924_v3 = vpop.eup %6709  ;;  %v2627_v9 = vsub.f32 %v11603_v59, %v2598_v61  ;;  %v2874_v0 = vpack.c.bf16 %v9914_v18, %v9920_v60  ;;  %v2657_v47 = vmul.f32 1.442695, %v2628_v35  ;;  %6719 = vpow2.f32 %v2651_v62  ;;  %v11605_v59 = vld [vmem:[#allocation95_spill] sm:$0xff] }
 0x6c4   : > { %v2613_v17 = vpop.permute.xlu1 %2612  ;;  %v2875_v54 = vpack.c.bf16 %v9924_v3, %v9917_v33 }
 0x6c5   : > { %v2655_v36 = vmul.f32 1.442695, %v2627_v9  ;;  %6300 = vmatmul.mubr.bf16.vlgmr.msra.gmra.mrb[32].mxu0 %v2874_v0  ;;  %v9933_v61 = vpop.eup %6711  ;;  %v2630_v29 = vsub.f32 %v11605_v59, %v2613_v17  ;;  %v11606_v9 = vld [vmem:[#allocation51_spill] sm:$0xff] }
 0x6c6   : > { %1921 = vadd.xlane.f32.xlu0 %v9832_v40  ;;  %6303 = vmatprep.mubr.bf16.mxu0 %v2875_v54  ;;  %v2608_v20 = vpop.permute.xlu0 %2607 }
 0x6c7   : > { %6721 = vpow2.f32 %v2655_v36  ;;  %v2629_v2 = vsub.f32 %v11604_v31, %v2608_v20 }
 0x6c8   : > { %6723 = vpow2.f32 %v2653_v55  ;;  %v3355_v1 = vpop.permute.xlu1 %3354  ;;  %v2661_v55 = vmul.f32 1.442695, %v2630_v29 }
 0x6c9   : > { %v9936_v42 = vpop.eup %6713  ;;  %6725 = vpow2.f32 %v2657_v47  ;;  %v2659_v35 = vmul.f32 1.442695, %v2629_v2  ;;  %v3432_v0 = vsub.f32 %v11606_v9, %v3355_v1 }
 0x6ca   : > { %v6716_v62 = vpop.eup %6715  ;;  %1925 = vadd.xlane.f32.xlu0 %v9845_v37  ;;  %v3360_v40 = vpop.permute.xlu0 %3359 }
 0x6cb   : > { %v6718_v54 = vpop.eup %6717  ;;  %v3448_v36 = vmul.f32 1.442695, %v3432_v0  ;;  %v3433_v20 = vsub.f32 %v11607_v12, %v3360_v40  ;;  %v2876_v31 = vpack.c.bf16 %v6716_v62, %v9933_v61  ;;  %6727 = vpow2.f32 %v2659_v35 }
 0x6cc   : > { %v3365_v24 = vpop.permute.xlu1 %3364  ;;  %v2877_v17 = vpack.c.bf16 %v6718_v54, %v9936_v42 }
 0x6cd   : > { %v3450_v59 = vmul.f32 1.442695, %v3433_v20  ;;  %6304 = vmatmul.mubr.bf16.gmra.mrb[36].mxu0 %v2876_v31  ;;  %6729 = vpow2.f32 %v3448_v36  ;;  %v6720_v1 = vpop.eup %6719 }
 0x6ce   : > { %1929 = vadd.xlane.f32.xlu0 %v9858_v32  ;;  %6307 = vmatprep.mubr.bf16.mxu0 %v2877_v17  ;;  %v9946_v12 = vpop.permute.xlu0 %3374 }
 0x6cf   : > { %6731 = vpow2.f32 %v3450_v59 }
 0x6d0   : > { %6733 = vpow2.f32 %v2661_v55  ;;  %v9944_v37 = vpop.permute.xlu1 %3369 }
 0x6d1   : > { %v6722_v47 = vpop.eup %6721 }
 0x6d2   : > { %v6724_v2 = vpop.eup %6723  ;;  %1933 = vadd.xlane.f32.xlu0 %v9871_v11  ;;  %v9953_v40 = vpop.permute.xlu0 %3384 }
 0x6d3   : > { %v6726_v29 = vpop.eup %6725  ;;  %v2878_v9 = vpack.c.bf16 %v6724_v2, %v6720_v1 }
 0x6d4   : > { %v9949_v35 = vpop.permute.xlu1 %3379  ;;  %v2879_v0 = vpack.c.bf16 %v6726_v29, %v6722_v47 }
 0x6d5   : > { %11608 = vst [vmem:[#allocation65_spill] sm:$0xff] %v9949_v35  ;;  %1913 = vadd.xlane.f32.xlu1 %v9816_v57  ;;  %6308 = vmatmul.mubr.bf16.gmra.mrb[40].mxu0 %v2878_v9  ;;  %v6728_v32 = vpop.eup %6727 }
 0x6d6   : > { %1937 = vadd.xlane.f32.xlu0 %v9883_v43  ;;  %6311 = vmatprep.mubr.bf16.mxu0 %v2879_v0  ;;  %v9959_v57 = vpop.permute.xlu0 %3394 }
 0x6d7   : > { %v6730_v36 = vpop.eup %6729 }
 0x6d8   : > { %v9956_v11 = vpop.permute.xlu1 %3389 }
 0x6d9   : > { %v6732_v20 = vpop.eup %6731  ;;  %1919 = vadd.xlane.f32.xlu1 %v9834_v30 }
 0x6da   : > { %v6734_v31 = vpop.eup %6733  ;;  %1941 = vadd.xlane.f32.xlu0 %v9892_v58  ;;  %v3690_v55 = vpack.c.bf16 %v6732_v20, %v6730_v36  ;;  %v9967_v30 = vpop.permute.xlu0 %3404 }
 0x6db   : > { %v2880_v17 = vpack.c.bf16 %v6734_v31, %v6728_v32 }
 0x6dc   : > { %6331 = vmatprep.mubr.bf16.mxu1 %v3690_v55  ;;  %v9963_v43 = vpop.permute.xlu1 %3399 }
 0x6dd   : > { %1923 = vadd.xlane.f32.xlu1 %v9847_v21  ;;  %6312 = vmatmul.mubr.bf16.gmra.mrb[44].mxu0 %v2880_v17  ;;  %11609 = vst [vmem:[#allocation122_spill] sm:$0xff] %v9963_v43  ;;  %v11625_v43 = vld [vmem:[#allocation37_spill] sm:$0xff] }
 0x6de   : > { %2696 = vadd.xlane.f32.xlu0 %v9904_v26  ;;  %v9973_v59 = vpop.permute.xlu0 %3414 }
 0x6e0   : > { %v9970_v58 = vpop.permute.xlu1 %3409 }
 0x6e1   : > { %1927 = vadd.xlane.f32.xlu1 %v9860_v41  ;;  %11610 = vst [vmem:[#allocation124_spill] sm:$0xff] %v9970_v58 }
 0x6e2   : > { %2700 = vadd.xlane.f32.xlu0 %v9920_v60  ;;  %v9980_v60 = vpop.permute.xlu0 %3424 }
 0x6e4   : > { %v9977_v21 = vpop.permute.xlu1 %3419 }
 0x6e5   : > { %1931 = vadd.xlane.f32.xlu1 %v9874_v13  ;;  %11611 = vst [vmem:[#allocation74_spill] sm:$0xff] %v9977_v21  ;;  %v11613_v13 = vld [vmem:[#allocation98_spill] sm:$0xff] }
 0x6e6   : > { %2702 = vadd.xlane.f32.xlu0 %v9914_v18  ;;  %v3434_v26 = vsub.f32 %v11613_v13, %v3365_v24  ;;  %v9986_v18 = vpop.permute.xlu0 %1999  ;;  %v11620_v13 = vld [vmem:[#allocation35_spill] sm:$0xff]  ;;  %v11623_v21 = vld [vmem:[#allocation38_spill] sm:$0xff] }
 0x6e8   : > { %v9983_v41 = vpop.permute.xlu1 %3429 }
 0x6e9   : > { %1935 = vadd.xlane.f32.xlu1 %v9885_v45  ;;  %11612 = vst [vmem:[#allocation67_spill] sm:$0xff] %v9983_v41  ;;  %v3452_v45 = vmul.f32 1.442695, %v3434_v26 }
 0x6ea   : > { %2706 = vadd.xlane.f32.xlu0 %v9924_v3 }
 0x6eb   : > { %6735 = vpow2.f32 %v3452_v45  ;;  %v11621_v45 = vld [vmem:[#allocation103_spill] sm:$0xff] }
 0x6ec   : > { %v9989_v3 = vpop.permute.xlu1 %1994 }
 0x6ed   : > { %1939 = vadd.xlane.f32.xlu1 %v9895_v7  ;;  %v9992_v7 = vpop.permute.xlu0 %2014 }
 0x6ee   : > { %2710 = vadd.xlane.f32.xlu0 %v6716_v62 }
 0x6f1   : > { %2698 = vadd.xlane.f32.xlu1 %v9906_v49  ;;  %v9995_v49 = vpop.permute.xlu1 %2004  ;;  %v9997_v24 = vpop.permute.xlu0 %2024 }
 0x6f2   : > { %2714 = vadd.xlane.f32.xlu0 %v6718_v54 }
 0x6f5   : > { %2704 = vadd.xlane.f32.xlu1 %v9917_v33  ;;  %v9999_v33 = vpop.permute.xlu1 %2009  ;;  %v10001_v62 = vpop.eup %6735 }
 0x6f6   : > { %2718 = vadd.xlane.f32.xlu0 %v6724_v2  ;;  %11614 = vst [vmem:[#allocation126_spill] sm:$0xff] %v10001_v62 }
 0x6f9   : > { %2708 = vadd.xlane.f32.xlu1 %v9933_v61  ;;  %v10004_v61 = vpop.permute.xlu0 %2034  ;;  %v10006_v54 = vpop.permute.xlu1 %2019 }
 0x6fa   : > { %2722 = vadd.xlane.f32.xlu0 %v6726_v29 }
 0x6fd   : > { %2712 = vadd.xlane.f32.xlu1 %v9936_v42  ;;  %v10008_v42 = vpop.permute.xlu0 %2044  ;;  %v10010_v2 = vpop.permute.xlu1 %2029 }
 0x6fe   : > { %2726 = vadd.xlane.f32.xlu0 %v6734_v31 }
 0x701   : > { %2716 = vadd.xlane.f32.xlu1 %v6720_v1  ;;  %v10012_v29 = vpop.permute.xlu0 %2054  ;;  %v10014_v1 = vpop.permute.xlu1 %2039 }
 0x702   : > { %3513 = vadd.xlane.f32.xlu0 %v6730_v36 }
 0x705   : > { %2720 = vadd.xlane.f32.xlu1 %v6722_v47  ;;  %v10016_v9 = vpop.permute.xlu0 %2064  ;;  %v10018_v0 = vpop.permute.xlu1 %2049  ;;  %v11615_v47 = vld [vmem:[#allocation34_spill] sm:$0xff] }
 0x706   : > { %3517 = vadd.xlane.f32.xlu0 %v10001_v62 }
 0x709   : > { %2724 = vadd.xlane.f32.xlu1 %v6728_v32  ;;  %v10024_v32 = vpop.permute.xlu0 %2784  ;;  %v10027_v36 = vpop.permute.xlu1 %2059 }
 0x70a   : > { %11616 = vst [vmem:[#allocation128_spill] sm:$0xff] %v10024_v32  ;;  %v11631_v32 = vld [vmem:[#allocation39_spill] sm:$0xff] }
 0x70d   : > { %3515 = vadd.xlane.f32.xlu1 %v6732_v20  ;;  %v11617_v20 = vld [vmem:[#allocation36_spill] sm:$0xff]  ;;  %v10031_v31 = vpop.permute.xlu0 %2799  ;;  %v10033_v55 = vpop.permute.xlu1 %2069 }
 0x70e   : > { %11618 = vst [vmem:[#allocation76_spill] sm:$0xff] %v10031_v31 }
 0x711   : > { %v10036_v17 = vpop.permute.xlu0 %2809  ;;  %v10040_v26 = vpop.permute.xlu1 %2779 }
 0x712   : > { %11619 = vst [vmem:[#allocation69_spill] sm:$0xff] %v10036_v17 }
 0x715   : > { %v10047_v41 = vpop.permute.xlu1 %2789 }
 0x719   : > { %v10054_v58 = vpop.permute.xlu1 %2794 }
 0x71c   : > { %3698 = vrot.lane.b32.xlu0 %v11615_v47, %s7347_s28 }
 0x71e   : > { %4507 = vrot.lane.b32.xlu1 %v11615_v47, %s7348_s0  ;;  %v3435_v47 = vsub.f32 %v11621_v45, %v9944_v37  ;;  %v10060_v45 = vpop.permute.xlu1 %2804 }
 0x71f   : > { %11627 = vst [vmem:[#allocation71_spill] sm:$0xff] %v10060_v45  ;;  %v1882_v45 = vld [vmem:[#allocation3 + $0x18] sm:$0xff] }
 0x720   : > { %4163 = vperm.xlu0 %6592, %v9453_v52   ;;  %v10045_v52 = vpop.permute.xlu0 %2819  ;;  %v3454_v62 = vmul.f32 1.442695, %v3435_v47 }
 0x721   : > { %11622 = vst [vmem:[#allocation130_spill] sm:$0xff] %v10045_v52 }
 0x722   : > { %6737 = vpow2.f32 %v3454_v62  ;;  %v10070_v52 = vpop.permute.xlu1 %2814 }
 0x724   : > { %3702 = vrot.lane.b32.xlu0 %v11617_v20, %s7347_s28 }
 0x728   : > { %4178 = vperm.xlu0 %6592, %v9635_v27   ;;  %v10051_v27 = vpop.permute.xlu0 %2829 }
 0x729   : > { %11624 = vst [vmem:[#allocation132_spill] sm:$0xff] %v10051_v27 }
 0x72c   : > { %3704 = vrot.lane.b32.xlu0 %v11620_v13, %s7347_s28  ;;  %v10058_v37 = vpop.permute.xlu0 %2839  ;;  %v10063_v47 = vpop.eup %6737 }
 0x72d   : > { %11626 = vst [vmem:[#allocation78_spill] sm:$0xff] %v10058_v37  ;;  %11628 = vst [vmem:[#allocation134_spill] sm:$0xff] %v10063_v47  ;;  %v1881_v37 = vld [vmem:[#allocation3 + $0x10] sm:$0xff] }
 0x730   : > { %4183 = vperm.xlu0 %6592, %v9471_v28   ;;  %v10066_v62 = vpop.permute.xlu0 %2849  ;;  %v1879_v28 = vld [vmem:[#allocation3] sm:$0xff] }
 0x731   : > { %11629 = vst [vmem:[#allocation136_spill] sm:$0xff] %v10066_v62  ;;  %v1895_v27 = vmul.f32 %v9598_v34, %v1879_v28  ;;  %v10076_v62 = vpop.permute.xlu1 %2824  ;;  %v1898_v28 = vmul.f32 %v9638_v48, %v1882_v45  ;;  %v1888_v45 = vld [vmem:[#allocation3 + $0x48] sm:$0xff] }
 0x734   : > { %3706 = vrot.lane.b32.xlu0 %v11623_v21, %s7347_s28 }
 0x738   : > { %4198 = vperm.xlu0 %6592, %v9673_v16   ;;  %v11630_v16 = vld [vmem:[#allocation40_spill] sm:$0xff] }
 0x73c   : > { %3708 = vrot.lane.b32.xlu0 %v11625_v43, %s7347_s28 }
 0x740   : > { %4203 = vperm.xlu0 %6592, %v9516_v15   ;;  %v1897_v15 = vmul.f32 %v9619_v23, %v1881_v37 }
 0x742   : > { %3519 = vadd.xlane.f32.xlu1 %v10063_v47 }
 0x744   : > { %3710 = vrot.lane.b32.xlu0 %v11630_v16, %s7347_s28 }
 0x747   : > { %v1912_v31 = vpop.xlane.xlu0 %1911 }
 0x748   : > { %v1943_v35 = vadd.f32 %v1912_v31, %v1895_v27  ;;  %4218 = vperm.xlu0 %6592, %v9711_v38   ;;  %v1884_v27 = vld [vmem:[#allocation3 + $0x28] sm:$0xff] }
 0x749   : > { %v1900_v23 = vmul.f32 %v9657_v50, %v1884_v27 }
 0x74a   : > { %1960 = vst.msk [vmem:[#allocation3] sm:$0xff] %vm1959_vm8, %v1943_v35  ;;  %v10083_v35 = vpop.permute.xlu1 %2834 }
 0x74b   : > { %v1916_v47 = vpop.xlane.xlu0 %1915 }
 0x74c   : > { %v1945_v17 = vadd.f32 %v1916_v47, %v1897_v15  ;;  %3712 = vrot.lane.b32.xlu0 %v11631_v32, %s7347_s28  ;;  %v11632_v15 = vld [vmem:[#allocation33_spill] sm:$0xff] }
 0x74d   : > { %v1886_v47 = vld [vmem:[#allocation3 + $0x38] sm:$0xff] }
 0x74e   : > { %1962 = vst.msk [vmem:[#allocation3 + $0x10] sm:$0xff] %vm1959_vm8, %v1945_v17  ;;  %v1902_v48 = vmul.f32 %v9676_v22, %v1886_v47  ;;  %v1892_v47 = vld [vmem:[#allocation3 + $0x68] sm:$0xff] }
 0x74f   : > { %v1918_v34 = vpop.xlane.xlu0 %1917 }
 0x750   : > { %v1946_v31 = vadd.f32 %v1918_v34, %v1898_v28  ;;  %4223 = vperm.xlu0 %6592, %v9566_v5   ;;  %v10094_v28 = vpop.permute.xlu1 %2844  ;;  %v1904_v34 = vmul.f32 %v9695_v46, %v1888_v45  ;;  %v11634_v5 = vld [vmem:[#allocation90_spill] sm:$0xff] }
 0x752   : > { %1963 = vst.msk [vmem:[#allocation3 + $0x18] sm:$0xff] %vm1959_vm8, %v1946_v31  ;;  %v1890_v31 = vld [vmem:[#allocation3 + $0x58] sm:$0xff] }
 0x753   : > { %3700 = vrot.lane.b32.xlu1 %v11632_v15, %s7347_s28  ;;  %v1922_v37 = vpop.xlane.xlu0 %1921  ;;  %v1906_v22 = vmul.f32 %v9714_v14, %v1890_v31  ;;  %v1894_v31 = vld [vmem:[#allocation3 + $0x78] sm:$0xff] }
 0x754   : > { %v1948_v38 = vadd.f32 %v1922_v37, %v1900_v23  ;;  %4233 = vperm.xlu0 %6592, %v9592_v51  }
 0x756   : > { %1965 = vst.msk [vmem:[#allocation3 + $0x28] sm:$0xff] %vm1959_vm8, %v1948_v38  ;;  %v10099_v38 = vpop.permute.xlu1 %2854 }
 0x757   : > { %4509 = vrot.lane.b32.xlu1 %v11632_v15, %s7348_s0  ;;  %v1926_v17 = vpop.xlane.xlu0 %1925  ;;  %v1880_v15 = vld [vmem:[#allocation3 + $0x8] sm:$0xff] }
 0x758   : > { %v1950_v50 = vadd.f32 %v1926_v17, %v1902_v48  ;;  %v11633_v48 = vld [vmem:[#allocation89_spill] sm:$0xff]  ;;  %v1896_v45 = vmul.f32 %v9560_v25, %v1880_v15  ;;  %v1885_v15 = vld [vmem:[#allocation3 + $0x30] sm:$0xff] }
 0x759   : > { %v3436_v17 = vsub.f32 %v11633_v48, %v9946_v12 }
 0x75a   : > { %1967 = vst.msk [vmem:[#allocation3 + $0x38] sm:$0xff] %vm1959_vm8, %v1950_v50 }
 0x75b   : > { %4168 = vperm.xlu1 %6593, %v9595_v6   ;;  %v1930_v27 = vpop.xlane.xlu0 %1929  ;;  %v3456_v51 = vmul.f32 1.442695, %v3436_v17 }
 0x75c   : > { %v1952_v23 = vadd.f32 %v1930_v27, %v1904_v34  ;;  %v1908_v34 = vmul.f32 %v9733_v56, %v1892_v47  ;;  %v1883_v27 = vld [vmem:[#allocation3 + $0x20] sm:$0xff]  ;;  %v1910_v56 = vmul.f32 %v9752_v44, %v1894_v31  ;;  %v11637_v31 = vld [vmem:[#allocation96_spill] sm:$0xff] }
 0x75d   : > { %v1899_v25 = vmul.f32 %v9586_v8, %v1883_v27  ;;  %v2664_v47 = vld [vmem:[#allocation3 + $0x80] sm:$0xff]  ;;  %6739 = vpow2.f32 %v3456_v51  ;;  %v1901_v8 = vmul.f32 %v9610_v10, %v1885_v15  ;;  %v2666_v51 = vld [vmem:[#allocation3 + $0x90] sm:$0xff] }
 0x75e   : > { %1969 = vst.msk [vmem:[#allocation3 + $0x48] sm:$0xff] %vm1959_vm8, %v1952_v23 }
 0x75f   : > { %4173 = vperm.xlu1 %6593, %v9616_v19   ;;  %v1934_v37 = vpop.xlane.xlu0 %1933  ;;  %v3438_v19 = vsub.f32 %v11634_v5, %v9953_v40  ;;  %v11635_v5 = vld [vmem:[#allocation47_spill] sm:$0xff] }
 0x760   : > { %v1954_v46 = vadd.f32 %v1934_v37, %v1906_v22  ;;  %v3439_v40 = vsub.f32 %v11635_v5, %v9956_v11 }
 0x761   : > { %v3460_v48 = vmul.f32 1.442695, %v3438_v19  ;;  %v11636_v19 = vld [vmem:[#allocation53_spill] sm:$0xff] }
 0x762   : > { %1971 = vst.msk [vmem:[#allocation3 + $0x58] sm:$0xff] %vm1959_vm8, %v1954_v46  ;;  %v1914_v50 = vpop.xlane.xlu1 %1913  ;;  %v2680_v46 = vmul.f32 %v9768_v53, %v2664_v47  ;;  %v3440_v11 = vsub.f32 %v11636_v19, %v9959_v57  ;;  %v2682_v53 = vmul.f32 %v9780_v63, %v2666_v51  ;;  %v2667_v57 = vld [vmem:[#allocation3 + $0x98] sm:$0xff]  ;;  %v1976_v51 = vld [vmem:[#allocation5] sm:$0xff]  ;;  %v11642_v19 = vld [vmem:[#allocation183_spill] sm:$0xff] }
 0x763   : > { %v1944_v23 = vadd.f32 %v1914_v50, %v1896_v45  ;;  %4511 = vrot.lane.b32.xlu1 %v11617_v20, %s7348_s0  ;;  %v1938_v14 = vpop.xlane.xlu0 %1937  ;;  %v1887_v45 = vld [vmem:[#allocation3 + $0x40] sm:$0xff]  ;;  %6741 = vpow2.f32 %v3460_v48 }
 0x764   : > { %v1956_v12 = vadd.f32 %v1938_v14, %v1908_v34  ;;  %v3462_v34 = vmul.f32 1.442695, %v3439_v40  ;;  %v1903_v10 = vmul.f32 %v9629_v39, %v1887_v45  ;;  %v1889_v14 = vld [vmem:[#allocation3 + $0x50] sm:$0xff]  ;;  %v3464_v15 = vmul.f32 1.442695, %v3440_v11  ;;  %v11639_v39 = vld [vmem:[#allocation181_spill] sm:$0xff] }
 0x765   : > { %1961 = vst.msk [vmem:[#allocation3 + $0x8] sm:$0xff] %vm1959_vm8, %v1944_v23  ;;  %v11640_v48 = vld [vmem:[#allocation66_spill] sm:$0xff] }
 0x766   : > { %1973 = vst.msk [vmem:[#allocation3 + $0x68] sm:$0xff] %vm1959_vm8, %v1956_v12  ;;  %v1920_v22 = vpop.xlane.xlu1 %1919  ;;  %v3442_v12 = vsub.f32 %v11637_v31, %v9967_v30  ;;  %6743 = vpow2.f32 %v3462_v34  ;;  %v2683_v5 = vmul.f32 %v11640_v48, %v2667_v57  ;;  %v1891_v30 = vld [vmem:[#allocation3 + $0x60] sm:$0xff] }
 0x767   : > { %v1947_v37 = vadd.f32 %v1920_v22, %v1899_v25  ;;  %4513 = vrot.lane.b32.xlu1 %v11620_v13, %s7348_s0  ;;  %v1942_v20 = vpop.xlane.xlu0 %1941  ;;  %v11638_v22 = vld [vmem:[#allocation159_spill] sm:$0xff]  ;;  %v10137_v47 = vpop.eup %6739  ;;  %6745 = vpow2.f32 %v3464_v15  ;;  %v1907_v11 = vmul.f32 %v11642_v19, %v1891_v30  ;;  %v11644_v57 = vld [vmem:[#allocation102_spill] sm:$0xff] }
 0x768   : > { %v1958_v17 = vadd.f32 %v1942_v20, %v1910_v56  ;;  %v1905_v20 = vmul.f32 %v11639_v39, %v1889_v14  ;;  %v3468_v40 = vmul.f32 1.442695, %v3442_v12  ;;  %v1977_v14 = vld [vmem:[#allocation5 + $0x8] sm:$0xff]  ;;  %v3446_v15 = vsub.f32 %v11644_v57, %v9980_v60 }
 0x769   : > { %1964 = vst.msk [vmem:[#allocation3 + $0x20] sm:$0xff] %vm1959_vm8, %v1947_v37  ;;  %v2673_v19 = vld [vmem:[#allocation3 + $0xc8] sm:$0xff] }
 0x76a   : > { %1975 = vst.msk [vmem:[#allocation3 + $0x78] sm:$0xff] %vm1959_vm8, %v1958_v17  ;;  %v1924_v44 = vpop.xlane.xlu1 %1923  ;;  %6747 = vpow2.f32 %v3468_v40  ;;  %v2073_v40 = vmul.f32 %v9986_v18, %v1977_v14  ;;  %v3476_v18 = vmul.f32 1.442695, %v3446_v15 }
 0x76b   : > { %v1949_v50 = vadd.f32 %v1924_v44, %v1901_v8  ;;  %4188 = vperm.xlu1 %6593, %v9654_v4   ;;  %v2697_v13 = vpop.xlane.xlu0 %2696  ;;  %v2669_v44 = vld [vmem:[#allocation3 + $0xa8] sm:$0xff] }
 0x76c   : > { %v2728_v27 = vadd.f32 %v2697_v13, %v2680_v46  ;;  %v11641_v46 = vld [vmem:[#allocation97_spill] sm:$0xff] }
 0x76d   : > { %1966 = vst.msk [vmem:[#allocation3 + $0x30] sm:$0xff] %vm1959_vm8, %v1949_v50  ;;  %v3444_v45 = vsub.f32 %v11641_v46, %v9973_v59  ;;  %v1978_v50 = vld [vmem:[#allocation5 + $0x10] sm:$0xff]  ;;  %v10148_v34 = vpop.eup %6741  ;;  %v2665_v46 = vld [vmem:[#allocation3 + $0x88] sm:$0xff] }
 0x76e   : > { %2744 = vst.msk [vmem:[#allocation3 + $0x80] sm:$0xff] %vm1959_vm8, %v2728_v27  ;;  %v1928_v23 = vpop.xlane.xlu1 %1927  ;;  %v1979_v27 = vld [vmem:[#allocation5 + $0x18] sm:$0xff]  ;;  %v2074_v59 = vmul.f32 %v9995_v49, %v1978_v50 }
 0x76f   : > { %v1951_v25 = vadd.f32 %v1928_v23, %v1903_v10  ;;  %4193 = vperm.xlu1 %6593, %v11638_v22   ;;  %v2701_v56 = vpop.xlane.xlu0 %2700  ;;  %v11643_v10 = vld [vmem:[#allocation116_spill] sm:$0xff] }
 0x770   : > { %v2730_v37 = vadd.f32 %v2701_v56, %v2682_v53  ;;  %v2685_v23 = vmul.f32 %v11643_v10, %v2669_v44  ;;  %v1893_v53 = vld [vmem:[#allocation3 + $0x70] sm:$0xff]  ;;  %v3472_v56 = vmul.f32 1.442695, %v3444_v45  ;;  %v10162_v30 = vpop.eup %6743  ;;  %v11648_v10 = vld [vmem:[#allocation138_spill] sm:$0xff] }
 0x771   : > { %1968 = vst.msk [vmem:[#allocation3 + $0x40] sm:$0xff] %vm1959_vm8, %v1951_v25  ;;  %v2671_v25 = vld [vmem:[#allocation3 + $0xb8] sm:$0xff]  ;;  %v10177_v57 = vpop.eup %6745 }
 0x772   : > { %2746 = vst.msk [vmem:[#allocation3 + $0x90] sm:$0xff] %vm1959_vm8, %v2730_v37  ;;  %v1932_v63 = vpop.xlane.xlu1 %1931  ;;  %v2072_v37 = vmul.f32 %v9989_v3, %v1976_v51  ;;  %v11646_v3 = vld [vmem:[#allocation70_spill] sm:$0xff]  ;;  %6749 = vpow2.f32 %v3472_v56  ;;  %v1983_v56 = vld [vmem:[#allocation5 + $0x38] sm:$0xff] }
 0x773   : > { %v1953_v17 = vadd.f32 %v1932_v63, %v1905_v20  ;;  %4515 = vrot.lane.b32.xlu1 %v11623_v21, %s7348_s0  ;;  %3521 = vadd.xlane.f32.xlu0 %v10137_v47  ;;  %v2703_v8 = vpop.xlane.xlu0 %2702  ;;  %v2075_v63 = vmul.f32 %v9999_v33, %v1979_v27  ;;  %v2687_v44 = vmul.f32 %v11646_v3, %v2671_v25  ;;  %v2668_v25 = vld [vmem:[#allocation3 + $0xa0] sm:$0xff]  ;;  %6751 = vpow2.f32 %v3476_v18 }
 0x774   : > { %v2731_v13 = vadd.f32 %v2703_v8, %v2683_v5  ;;  %v11645_v5 = vld [vmem:[#allocation186_spill] sm:$0xff] }
 0x775   : > { %1970 = vst.msk [vmem:[#allocation3 + $0x50] sm:$0xff] %vm1959_vm8, %v1953_v17 }
 0x776   : > { %2747 = vst.msk [vmem:[#allocation3 + $0x98] sm:$0xff] %vm1959_vm8, %v2731_v13  ;;  %v1936_v21 = vpop.xlane.xlu1 %1935  ;;  %v11647_v13 = vld [vmem:[#allocation187_spill] sm:$0xff] }
 0x777   : > { %v1955_v31 = vadd.f32 %v1936_v21, %v1907_v11  ;;  %4517 = vrot.lane.b32.xlu1 %v11625_v43, %s7348_s0  ;;  %3525 = vadd.xlane.f32.xlu0 %v10148_v34  ;;  %v2707_v12 = vpop.xlane.xlu0 %2706  ;;  %v1909_v43 = vmul.f32 %v11645_v5, %v1893_v53  ;;  %v1982_v11 = vld [vmem:[#allocation5 + $0x30] sm:$0xff] }
 0x778   : > { %v2733_v39 = vadd.f32 %v2707_v12, %v2685_v23  ;;  %v6269_v20 = vpop.f32.mrb[16].mxu0  ;;  %v11649_v23 = vld [vmem:[#allocation140_spill] sm:$0xff] }
 0x779   : > { %1972 = vst.msk [vmem:[#allocation3 + $0x60] sm:$0xff] %vm1959_vm8, %v1955_v31  ;;  %v2195_v49 = vadd.f32 %v6269_v20, %v2074_v59  ;;  %v2130_v48 = vpop.f32.mrb[17].mxu0  ;;  %v11650_v53 = vsub.f32 %v11648_v10, %v11649_v23  ;;  %v1980_v59 = vld [vmem:[#allocation5 + $0x20] sm:$0xff]  ;;  %v11651_v31 = vld [vmem:[#allocation189_spill] sm:$0xff]  ;;  %v2078_v20 = vmul.f32 %v9997_v24, %v1982_v11  ;;  %v11656_v24 = vld [vmem:[#allocation144_spill] sm:$0xff] }
 0x77a   : > { %2749 = vst.msk [vmem:[#allocation3 + $0xa8] sm:$0xff] %vm1959_vm8, %v2733_v39  ;;  %v2193_v17 = vadd.f32 %v2130_v48, %v2072_v37  ;;  %v6270_v60 = vpop.f32.mrb[18].mxu0  ;;  %v1940_v8 = vpop.xlane.xlu1 %1939  ;;  %v2681_v12 = vmul.f32 %v11651_v31, %v2665_v46  ;;  %v11652_v37 = vld [vmem:[#allocation118_spill] sm:$0xff]  ;;  %v11653_v48 = vld [vmem:[#allocation167_spill] sm:$0xff]  ;;  %v2670_v23 = vld [vmem:[#allocation3 + $0xb0] sm:$0xff] }
 0x77b   : > { %2211 = vst.msk [vmem:[#allocation5 + $0x10] sm:$0xff] %vm1190_vm2, %v2195_v49  ;;  %v2196_v33 = vadd.f32 %v6270_v60, %v2075_v63  ;;  %v1957_v45 = vadd.f32 %v1940_v8, %v1909_v43  ;;  %v2133_v50 = vpop.f32.mrb[19].mxu0  ;;  %4208 = vperm.xlu1 %6593, %v11647_v13   ;;  %3527 = vadd.xlane.f32.xlu0 %v10162_v30  ;;  %v2711_v51 = vpop.xlane.xlu0 %2710  ;;  %v3320_v14 = vmul.f32 1.442695, %v11650_v53  ;;  %v1981_v63 = vld [vmem:[#allocation5 + $0x28] sm:$0xff]  ;;  %v2675_v43 = vld [vmem:[#allocation3 + $0xd8] sm:$0xff] }
 0x77c   : > { %2209 = vst.msk [vmem:[#allocation5] sm:$0xff] %vm1190_vm2, %v2193_v17  ;;  %v2194_v27 = vadd.f32 %v2133_v50, %v2073_v40  ;;  %v2735_v21 = vadd.f32 %v2711_v51, %v2687_v44  ;;  %v2689_v39 = vmul.f32 %v11652_v37, %v2673_v19  ;;  %v2076_v40 = vmul.f32 %v9992_v7, %v1980_v59  ;;  %v11654_v8 = vld [vmem:[#allocation192_spill] sm:$0xff]  ;;  %v10187_v44 = vpop.eup %6747  ;;  %v11655_v46 = vld [vmem:[#allocation142_spill] sm:$0xff] }
 0x77d   : > { %2212 = vst.msk [vmem:[#allocation5 + $0x18] sm:$0xff] %vm1190_vm2, %v2196_v33  ;;  %v2684_v3 = vmul.f32 %v11654_v8, %v2668_v25  ;;  %6753 = vpow2.f32 %v3320_v14  ;;  %v11657_v33 = vsub.f32 %v11655_v46, %v11656_v24  ;;  %v2079_v50 = vmul.f32 %v10010_v2, %v1983_v56  ;;  %v1986_v31 = vld [vmem:[#allocation5 + $0x50] sm:$0xff]  ;;  %v1984_v56 = vld [vmem:[#allocation5 + $0x40] sm:$0xff]  ;;  %v2679_v8 = vld [vmem:[#allocation3 + $0xf8] sm:$0xff] }
 0x77e   : > { %1974 = vst.msk [vmem:[#allocation3 + $0x70] sm:$0xff] %vm1959_vm8, %v1957_v45  ;;  %2751 = vst.msk [vmem:[#allocation3 + $0xb8] sm:$0xff] %vm1959_vm8, %v2735_v21  ;;  %v2699_v15 = vpop.xlane.xlu1 %2698  ;;  %v2077_v18 = vmul.f32 %v10006_v54, %v1981_v63  ;;  %v11658_v21 = vld [vmem:[#allocation120_spill] sm:$0xff]  ;;  %v2677_v54 = vld [vmem:[#allocation3 + $0xe8] sm:$0xff] }
 0x77f   : > { %2210 = vst.msk [vmem:[#allocation5 + $0x8] sm:$0xff] %vm1190_vm2, %v2194_v27  ;;  %v2729_v49 = vadd.f32 %v2699_v15, %v2681_v12  ;;  %4213 = vperm.xlu1 %6593, %v11653_v48   ;;  %3529 = vadd.xlane.f32.xlu0 %v10177_v57  ;;  %v2715_v5 = vpop.xlane.xlu0 %2714  ;;  %v3324_v45 = vmul.f32 1.442695, %v11657_v33  ;;  %v2691_v10 = vmul.f32 %v11658_v21, %v2675_v43  ;;  %v11659_v15 = vld [vmem:[#allocation195_spill] sm:$0xff]  ;;  %v11660_v63 = vld [vmem:[#allocation68_spill] sm:$0xff] }
 0x780   : > { %v2737_v17 = vadd.f32 %v2715_v5, %v2689_v39  ;;  %v6273_v60 = vpop.f32.mrb[20].mxu0  ;;  %v2686_v37 = vmul.f32 %v11659_v15, %v2670_v23  ;;  %v10205_v39 = vpop.eup %6749  ;;  %v2672_v5 = vld [vmem:[#allocation3 + $0xc0] sm:$0xff]  ;;  %v2082_v43 = vmul.f32 %v10008_v42, %v1986_v31  ;;  %v11662_v46 = vld [vmem:[#allocation123_spill] sm:$0xff]  ;;  %v11666_v31 = vld [vmem:[#allocation193_spill] sm:$0xff] }
 0x781   : > { %2745 = vst.msk [vmem:[#allocation3 + $0x88] sm:$0xff] %vm1959_vm8, %v2729_v49  ;;  %v2199_v51 = vadd.f32 %v6273_v60, %v2078_v20  ;;  %v2146_v19 = vpop.f32.mrb[21].mxu0  ;;  %6755 = vpow2.f32 %v3324_v45  ;;  %v2693_v49 = vmul.f32 %v11660_v63, %v2677_v54  ;;  %v2080_v45 = vmul.f32 %v10004_v61, %v1984_v56  ;;  %v11665_v61 = vld [vmem:[#allocation72_spill] sm:$0xff]  ;;  %v1991_v63 = vld [vmem:[#allocation5 + $0x78] sm:$0xff] }
 0x782   : > { %2753 = vst.msk [vmem:[#allocation3 + $0xc8] sm:$0xff] %vm1959_vm8, %v2737_v17  ;;  %v2197_v7 = vadd.f32 %v2146_v19, %v2076_v40  ;;  %v6274_v11 = vpop.f32.mrb[22].mxu0  ;;  %v2705_v27 = vpop.xlane.xlu1 %2704  ;;  %v1985_v40 = vld [vmem:[#allocation5 + $0x48] sm:$0xff] }
 0x783   : > { %2215 = vst.msk [vmem:[#allocation5 + $0x30] sm:$0xff] %vm1190_vm2, %v2199_v51  ;;  %v2200_v53 = vadd.f32 %v6274_v11, %v2079_v50  ;;  %v2732_v14 = vadd.f32 %v2705_v27, %v2684_v3  ;;  %v2149_v59 = vpop.f32.mrb[23].mxu0  ;;  %4519 = vrot.lane.b32.xlu1 %v11630_v16, %s7348_s0  ;;  %3533 = vadd.xlane.f32.xlu0 %v10187_v44  ;;  %v2719_v2 = vpop.xlane.xlu0 %2718  ;;  %v1987_v16 = vld [vmem:[#allocation5 + $0x58] sm:$0xff] }
 0x784   : > { %2213 = vst.msk [vmem:[#allocation5 + $0x20] sm:$0xff] %vm1190_vm2, %v2197_v7  ;;  %v2198_v12 = vadd.f32 %v2149_v59, %v2077_v18  ;;  %v2739_v25 = vadd.f32 %v2719_v2, %v2691_v10  ;;  %v11661_v3 = vld [vmem:[#allocation121_spill] sm:$0xff]  ;;  %v2083_v19 = vmul.f32 %v10018_v0, %v1987_v16  ;;  %v11664_v7 = vld [vmem:[#allocation114_spill] sm:$0xff]  ;;  %v10221_v11 = vpop.eup %6751  ;;  %v2081_v27 = vmul.f32 %v10014_v1, %v1985_v40 }
 0x785   : > { %2216 = vst.msk [vmem:[#allocation5 + $0x38] sm:$0xff] %vm1190_vm2, %v2200_v53  ;;  %v11663_v24 = vsub.f32 %v11661_v3, %v11662_v46  ;;  %v2695_v53 = vmul.f32 %v11665_v61, %v2679_v8  ;;  %v11667_v16 = vld [vmem:[#allocation117_spill] sm:$0xff] }
 0x786   : > { %2748 = vst.msk [vmem:[#allocation3 + $0xa0] sm:$0xff] %vm1959_vm8, %v2732_v14  ;;  %2755 = vst.msk [vmem:[#allocation3 + $0xd8] sm:$0xff] %vm1959_vm8, %v2739_v25  ;;  %v2709_v20 = vpop.xlane.xlu1 %2708  ;;  %v2674_v14 = vld [vmem:[#allocation3 + $0xd0] sm:$0xff]  ;;  %v11668_v3 = vld [vmem:[#allocation113_spill] sm:$0xff] }
 0x787   : > { %2214 = vst.msk [vmem:[#allocation5 + $0x28] sm:$0xff] %vm1190_vm2, %v2198_v12  ;;  %v2734_v17 = vadd.f32 %v2709_v20, %v2686_v37  ;;  %4521 = vrot.lane.b32.xlu1 %v11631_v32, %s7348_s0  ;;  %3537 = vadd.xlane.f32.xlu0 %v10205_v39  ;;  %v2723_v60 = vpop.xlane.xlu0 %2722  ;;  %v3322_v33 = vmul.f32 1.442695, %v11663_v24  ;;  %v2688_v32 = vmul.f32 %v11664_v7, %v2672_v5  ;;  %v10226_v59 = vpop.eup %6753  ;;  %v3481_v12 = vld [vmem:[#allocation3 + $0x100] sm:$0xff]  ;;  %v1990_v25 = vld [vmem:[#allocation5 + $0x70] sm:$0xff] }
 0x788   : > { %v2741_v50 = vadd.f32 %v2723_v60, %v2693_v49  ;;  %v6277_v51 = vpop.f32.mrb[24].mxu0  ;;  %v1988_v37 = vld [vmem:[#allocation5 + $0x60] sm:$0xff]  ;;  %v2690_v20 = vmul.f32 %v11667_v16, %v2674_v14  ;;  %v3497_v5 = vmul.f32 %v10226_v59, %v3481_v12  ;;  %v1989_v60 = vld [vmem:[#allocation5 + $0x68] sm:$0xff]  ;;  %v3483_v24 = vld [vmem:[#allocation3 + $0x110] sm:$0xff] }
 0x789   : > { %2750 = vst.msk [vmem:[#allocation3 + $0xb0] sm:$0xff] %vm1959_vm8, %v2734_v17  ;;  %v2203_v42 = vadd.f32 %v6277_v51, %v2082_v43  ;;  %v2162_v18 = vpop.f32.mrb[25].mxu0  ;;  %6757 = vpow2.f32 %v3322_v33  ;;  %v2676_v43 = vld [vmem:[#allocation3 + $0xe0] sm:$0xff]  ;;  %v2086_v17 = vmul.f32 %v10016_v9, %v1990_v25  ;;  %v2084_v33 = vmul.f32 %v10012_v29, %v1988_v37  ;;  %v2678_v29 = vld [vmem:[#allocation3 + $0xf0] sm:$0xff]  ;;  %v2764_v25 = vld [vmem:[#allocation5 + $0x98] sm:$0xff] }
 0x78a   : > { %2757 = vst.msk [vmem:[#allocation3 + $0xe8] sm:$0xff] %vm1959_vm8, %v2741_v50  ;;  %v2201_v21 = vadd.f32 %v2162_v18, %v2080_v45  ;;  %v6278_v10 = vpop.f32.mrb[26].mxu0  ;;  %v2713_v23 = vpop.xlane.xlu1 %2712  ;;  %v2087_v51 = vmul.f32 %v10033_v55, %v1991_v63  ;;  %v11669_v18 = vld [vmem:[#allocation119_spill] sm:$0xff]  ;;  %v2085_v9 = vmul.f32 %v10027_v36, %v1989_v60  ;;  %v2763_v14 = vld [vmem:[#allocation5 + $0x90] sm:$0xff]  ;;  %v2761_v36 = vld [vmem:[#allocation5 + $0x80] sm:$0xff] }
 0x78b   : > { %2219 = vst.msk [vmem:[#allocation5 + $0x50] sm:$0xff] %vm1190_vm2, %v2203_v42  ;;  %v2204_v0 = vadd.f32 %v6278_v10, %v2083_v19  ;;  %v2736_v2 = vadd.f32 %v2713_v23, %v2688_v32  ;;  %v2165_v54 = vpop.f32.mrb[27].mxu0  ;;  %4228 = vperm.xlu1 %6593, %v11666_v31   ;;  %3541 = vadd.xlane.f32.xlu0 %v10221_v11  ;;  %v2727_v1 = vpop.xlane.xlu0 %2726  ;;  %v2762_v37 = vld [vmem:[#allocation5 + $0x88] sm:$0xff] }
 0x78c   : > { %2217 = vst.msk [vmem:[#allocation5 + $0x40] sm:$0xff] %vm1190_vm2, %v2201_v21  ;;  %v2202_v56 = vadd.f32 %v2165_v54, %v2081_v27  ;;  %v2743_v15 = vadd.f32 %v2727_v1, %v2695_v53  ;;  %v10238_v40 = vpop.eup %6755  ;;  %v2692_v7 = vmul.f32 %v11669_v18, %v2676_v43  ;;  %v11670_v54 = vld [vmem:[#allocation115_spill] sm:$0xff]  ;;  %v2859_v16 = vmul.f32 %v10047_v41, %v2763_v14  ;;  %v2768_v18 = vld [vmem:[#allocation5 + $0xb8] sm:$0xff] }
 0x78d   : > { %2220 = vst.msk [vmem:[#allocation5 + $0x58] sm:$0xff] %vm1190_vm2, %v2204_v0  ;;  %v3499_v10 = vmul.f32 %v10238_v40, %v3483_v24  ;;  %v2694_v1 = vmul.f32 %v11670_v54, %v2678_v29  ;;  %v2860_v43 = vmul.f32 %v10054_v58, %v2764_v25  ;;  %v11674_v29 = vld [vmem:[#allocation104_spill] sm:$0xff] }
 0x78e   : > { %2752 = vst.msk [vmem:[#allocation3 + $0xc0] sm:$0xff] %vm1959_vm8, %v2736_v2  ;;  %2759 = vst.msk [vmem:[#allocation3 + $0xf8] sm:$0xff] %vm1959_vm8, %v2743_v15  ;;  %v2717_v49 = vpop.xlane.xlu1 %2716  ;;  %v3482_v15 = vld [vmem:[#allocation3 + $0x108] sm:$0xff] }
 0x78f   : > { %2218 = vst.msk [vmem:[#allocation5 + $0x48] sm:$0xff] %vm1190_vm2, %v2202_v56  ;;  %v2738_v8 = vadd.f32 %v2717_v49, %v2690_v20  ;;  %4238 = vperm.xlu1 %6593, %v11668_v3   ;;  %v3514_v46 = vpop.xlane.xlu0 %3513  ;;  %v2857_v49 = vmul.f32 %v10040_v26, %v2761_v36 }
 0x790   : > { %v3545_v45 = vadd.f32 %v3514_v46, %v3497_v5  ;;  %v6281_v50 = vpop.f32.mrb[28].mxu0  ;;  %v11671_v46 = vld [vmem:[#allocation128_spill] sm:$0xff] }
 0x791   : > { %2754 = vst.msk [vmem:[#allocation3 + $0xd0] sm:$0xff] %vm1959_vm8, %v2738_v8  ;;  %v2207_v19 = vadd.f32 %v6281_v50, %v2086_v17  ;;  %v2178_v42 = vpop.f32.mrb[29].mxu0  ;;  %v2858_v24 = vmul.f32 %v11671_v46, %v2762_v37  ;;  %v11680_v46 = vld [vmem:[#allocation132_spill] sm:$0xff] }
 0x792   : > { %3561 = vst.msk [vmem:[#allocation3 + $0x100] sm:$0xff] %vm1959_vm8, %v3545_v45  ;;  %v2205_v32 = vadd.f32 %v2178_v42, %v2084_v33  ;;  %v6282_v27 = vpop.f32.mrb[30].mxu0  ;;  %v2721_v21 = vpop.xlane.xlu1 %2720  ;;  %v2765_v42 = vld [vmem:[#allocation5 + $0xa0] sm:$0xff] }
 0x793   : > { %2223 = vst.msk [vmem:[#allocation5 + $0x70] sm:$0xff] %vm1190_vm2, %v2207_v19  ;;  %v2208_v23 = vadd.f32 %v6282_v27, %v2087_v51  ;;  %v2740_v55 = vadd.f32 %v2721_v21, %v2692_v7  ;;  %v2181_v61 = vpop.f32.mrb[31].mxu0  ;;  %v3518_v53 = vpop.xlane.xlu0 %3517  ;;  %v2767_v19 = vld [vmem:[#allocation5 + $0xb0] sm:$0xff]  ;;  %v2766_v27 = vld [vmem:[#allocation5 + $0xa8] sm:$0xff] }
 0x794   : > { %2221 = vst.msk [vmem:[#allocation5 + $0x60] sm:$0xff] %vm1190_vm2, %v2205_v32  ;;  %v2206_v0 = vadd.f32 %v2181_v61, %v2085_v9  ;;  %v3547_v2 = vadd.f32 %v3518_v53, %v3499_v10  ;;  %v10254_v12 = vpop.eup %6757  ;;  %v11672_v9 = vld [vmem:[#allocation69_spill] sm:$0xff]  ;;  %v11676_v53 = vld [vmem:[#allocation91_spill] sm:$0xff] }
 0x795   : > { %2224 = vst.msk [vmem:[#allocation5 + $0x78] sm:$0xff] %vm1190_vm2, %v2208_v23  ;;  %v3498_v8 = vmul.f32 %v10254_v12, %v3482_v15  ;;  %v2863_v32 = vmul.f32 %v11672_v9, %v2767_v19  ;;  %v11673_v10 = vld [vmem:[#allocation65_spill] sm:$0xff] }
 0x796   : > { %2756 = vst.msk [vmem:[#allocation3 + $0xe0] sm:$0xff] %vm1959_vm8, %v2740_v55  ;;  %3563 = vst.msk [vmem:[#allocation3 + $0x110] sm:$0xff] %vm1959_vm8, %v3547_v2  ;;  %v2725_v56 = vpop.xlane.xlu1 %2724  ;;  %v3437_v23 = vsub.f32 %v11674_v29, %v11673_v10  ;;  %v11675_v55 = vld [vmem:[#allocation76_spill] sm:$0xff]  ;;  %v2864_v2 = vmul.f32 %v10070_v52, %v2768_v18 }
 0x797   : > { %2222 = vst.msk [vmem:[#allocation5 + $0x68] sm:$0xff] %vm1190_vm2, %v2206_v0  ;;  %v2742_v20 = vadd.f32 %v2725_v56, %v2694_v1  ;;  %v3699_v63 = vpop.permute.xlu0 %3698  ;;  %v2861_v61 = vmul.f32 %v11675_v55, %v2765_v42  ;;  %v11677_v1 = vld [vmem:[#allocation71_spill] sm:$0xff]  ;;  %v11685_v55 = vld [vmem:[#allocation41_spill] sm:$0xff] }
 0x798   : > { %v6301_v5 = vpop.f32.mrb[32].mxu0  ;;  %6315 = vmatprep.subr.bf16.mxu1 %v3699_v63  ;;  %v2862_v25 = vmul.f32 %v11677_v1, %v2766_v27  ;;  %v2774_v1 = vld [vmem:[#allocation5 + $0xe8] sm:$0xff] }
 0x799   : > { %2758 = vst.msk [vmem:[#allocation3 + $0xf0] sm:$0xff] %vm1959_vm8, %v2742_v20  ;;  %v3012_v17 = vadd.f32 %v6301_v5, %v2859_v16  ;;  %v2947_v60 = vpop.f32.mrb[33].mxu0  ;;  %6316 = vmatpush3.bf16.msra.mxu1 %v3699_v63  ;;  %v3458_v63 = vmul.f32 1.442695, %v3437_v23  ;;  %v11679_v5 = vld [vmem:[#allocation45_spill] sm:$0xff]  ;;  %v11684_v23 = vld [vmem:[#allocation74_spill] sm:$0xff] }
 0x79a   : > { %v3010_v33 = vadd.f32 %v2947_v60, %v2857_v49  ;;  %v6302_v45 = vpop.f32.mrb[34].mxu0  ;;  %v3516_v41 = vpop.xlane.xlu1 %3515  ;;  %v11678_v49 = vld [vmem:[#allocation122_spill] sm:$0xff] }
 0x79b   : > { %3028 = vst.msk [vmem:[#allocation5 + $0x90] sm:$0xff] %vm1190_vm2, %v3012_v17  ;;  %v3013_v50 = vadd.f32 %v6302_v45, %v2860_v43  ;;  %v3546_v26 = vadd.f32 %v3516_v41, %v3498_v8  ;;  %v2950_v51 = vpop.f32.mrb[35].mxu0  ;;  %v3441_v43 = vsub.f32 %v11679_v5, %v11678_v49  ;;  %v2771_v17 = vld [vmem:[#allocation5 + $0xd0] sm:$0xff]  ;;  %v2769_v60 = vld [vmem:[#allocation5 + $0xc0] sm:$0xff]  ;;  %v2772_v8 = vld [vmem:[#allocation5 + $0xd8] sm:$0xff] }
 0x79c   : > { %3026 = vst.msk [vmem:[#allocation5 + $0x80] sm:$0xff] %vm1190_vm2, %v3010_v33  ;;  %v3011_v58 = vadd.f32 %v2950_v51, %v2858_v24  ;;  %v2867_v24 = vmul.f32 %v11680_v46, %v2771_v17  ;;  %v2770_v33 = vld [vmem:[#allocation5 + $0xc8] sm:$0xff]  ;;  %v11681_v41 = vld [vmem:[#allocation124_spill] sm:$0xff]  ;;  %v11683_v51 = vld [vmem:[#allocation130_spill] sm:$0xff]  ;;  %v2868_v42 = vmul.f32 %v10083_v35, %v2772_v8 }
 0x79d   : > { %3029 = vst.msk [vmem:[#allocation5 + $0x98] sm:$0xff] %vm1190_vm2, %v3013_v50  ;;  %v3466_v45 = vmul.f32 1.442695, %v3441_v43  ;;  %v11682_v50 = vld [vmem:[#allocation58_spill] sm:$0xff]  ;;  %v2865_v19 = vmul.f32 %v11683_v51, %v2769_v60  ;;  %v2866_v9 = vmul.f32 %v10076_v62, %v2770_v33  ;;  %v11691_v51 = vld [vmem:[#allocation148_spill] sm:$0xff] }
 0x79e   : > { %3562 = vst.msk [vmem:[#allocation3 + $0x108] sm:$0xff] %vm1959_vm8, %v3546_v26  ;;  %v4508_v7 = vpop.permute.xlu1 %4507  ;;  %v3443_v26 = vsub.f32 %v11682_v50, %v11681_v41  ;;  %v2773_v35 = vld [vmem:[#allocation5 + $0xe0] sm:$0xff] }
 0x79f   : > { %3027 = vst.msk [vmem:[#allocation5 + $0x88] sm:$0xff] %vm1190_vm2, %v3011_v58  ;;  %6347 = vmatprep.subr.bf16.mxu0 %v4508_v7  ;;  %v4164_v21 = vpop.permute.xlu0 %4163 }
 0x7a0   : > { %v4241_v14 = vsub.f32 %v11676_v53, %v4164_v21  ;;  %v6305_v0 = vpop.f32.mrb[36].mxu0  ;;  %6348 = vmatpush3.bf16.msra.mxu0 %v4508_v7  ;;  %v3470_v29 = vmul.f32 1.442695, %v3443_v26  ;;  %v2775_v53 = vld [vmem:[#allocation5 + $0xf0] sm:$0xff]  ;;  %v11690_v26 = vld [vmem:[#allocation146_spill] sm:$0xff] }
 0x7a1   : > { %v3016_v36 = vadd.f32 %v6305_v0, %v2863_v32  ;;  %v2963_v54 = vpop.f32.mrb[37].mxu0 }
 0x7a2   : > { %v4257_v56 = vmul.f32 1.442695, %v4241_v14  ;;  %v3014_v15 = vadd.f32 %v2963_v54, %v2861_v61  ;;  %v6306_v37 = vpop.f32.mrb[38].mxu0  ;;  %v3445_v61 = vsub.f32 %v11685_v55, %v11684_v23 }
 0x7a3   : > { %3032 = vst.msk [vmem:[#allocation5 + $0xb0] sm:$0xff] %vm1190_vm2, %v3016_v36  ;;  %v3017_v16 = vadd.f32 %v6306_v37, %v2864_v2  ;;  %v2966_v20 = vpop.f32.mrb[39].mxu0  ;;  %v3703_v0 = vpop.permute.xlu0 %3702  ;;  %v2776_v2 = vld [vmem:[#allocation5 + $0xf8] sm:$0xff]  ;;  %v11686_v36 = vld [vmem:[#allocation136_spill] sm:$0xff] }
 0x7a4   : > { %6759 = vpow2.f32 %v4257_v56  ;;  %3030 = vst.msk [vmem:[#allocation5 + $0xa0] sm:$0xff] %vm1190_vm2, %v3014_v15  ;;  %v3015_v52 = vadd.f32 %v2966_v20, %v2862_v25  ;;  %v2871_v54 = vmul.f32 %v11686_v36, %v2775_v53  ;;  %v3474_v25 = vmul.f32 1.442695, %v3445_v61  ;;  %v11687_v56 = vld [vmem:[#allocation67_spill] sm:$0xff]  ;;  %v11688_v15 = vld [vmem:[#allocation94_spill] sm:$0xff] }
 0x7a5   : > { %3033 = vst.msk [vmem:[#allocation5 + $0xb8] sm:$0xff] %vm1190_vm2, %v3017_v16  ;;  %6761 = vpow2.f32 %v3458_v63  ;;  %v3447_v37 = vsub.f32 %v11688_v15, %v11687_v56  ;;  %v11689_v16 = vld [vmem:[#allocation78_spill] sm:$0xff]  ;;  %v2872_v49 = vmul.f32 %v10099_v38, %v2776_v2  ;;  %v11693_v2 = vld [vmem:[#allocation61_spill] sm:$0xff]  ;;  %v11694_v56 = vld [vmem:[#allocation64_spill] sm:$0xff] }
 0x7a6   : > { %3031 = vst.msk [vmem:[#allocation5 + $0xa8] sm:$0xff] %vm1190_vm2, %v3015_v52  ;;  %6763 = vpow2.f32 %v3466_v45  ;;  %v2869_v20 = vmul.f32 %v11689_v16, %v2773_v35  ;;  %v2870_v52 = vmul.f32 %v10094_v28, %v2774_v1 }
 0x7a7   : > { %6765 = vpow2.f32 %v3470_v29  ;;  %v4179_v46 = vpop.permute.xlu0 %4178  ;;  %v3478_v45 = vmul.f32 1.442695, %v3447_v37  ;;  %v11695_v37 = vld [vmem:[#allocation62_spill] sm:$0xff] }
 0x7a8   : > { %v6309_v58 = vpop.f32.mrb[40].mxu0  ;;  %6767 = vpow2.f32 %v3474_v25  ;;  %v4244_v15 = vsub.f32 %v11694_v56, %v4179_v46 }
 0x7a9   : > { %v3020_v18 = vadd.f32 %v6309_v58, %v2867_v24  ;;  %v2979_v7 = vpop.f32.mrb[41].mxu0  ;;  %6769 = vpow2.f32 %v3478_v45 }
 0x7aa   : > { %v3018_v32 = vadd.f32 %v2979_v7, %v2865_v19  ;;  %v6310_v27 = vpop.f32.mrb[42].mxu0  ;;  %v11692_v19 = vsub.f32 %v11690_v26, %v11691_v51 }
 0x7ab   : > { %3036 = vst.msk [vmem:[#allocation5 + $0xd0] sm:$0xff] %vm1190_vm2, %v3020_v18  ;;  %v3021_v21 = vadd.f32 %v6310_v27, %v2868_v42  ;;  %v2982_v10 = vpop.f32.mrb[43].mxu0  ;;  %v3705_v28 = vpop.permute.xlu0 %3704 }
 0x7ac   : > { %3034 = vst.msk [vmem:[#allocation5 + $0xc0] sm:$0xff] %vm1190_vm2, %v3018_v32  ;;  %v3019_v14 = vadd.f32 %v2982_v10, %v2866_v9  ;;  %v3326_v58 = vmul.f32 1.442695, %v11692_v19  ;;  %v11699_v19 = vld [vmem:[#allocation125_spill] sm:$0xff] }
 0x7ad   : > { %3037 = vst.msk [vmem:[#allocation5 + $0xd8] sm:$0xff] %vm1190_vm2, %v3021_v21  ;;  %v3484_v21 = vld [vmem:[#allocation3 + $0x118] sm:$0xff] }
 0x7ae   : > { %v10293_v62 = vpop.eup %6759  ;;  %3035 = vst.msk [vmem:[#allocation5 + $0xc8] sm:$0xff] %vm1190_vm2, %v3019_v14  ;;  %6771 = vpow2.f32 %v3326_v58  ;;  %v11700_v58 = vld [vmem:[#allocation127_spill] sm:$0xff] }
 0x7af   : > { %4322 = vadd.xlane.f32.xlu0 %v10293_v62  ;;  %v10302_v17 = vpop.eup %6761  ;;  %v4184_v18 = vpop.permute.xlu0 %4183 }
 0x7b0   : > { %v6313_v63 = vpop.f32.mrb[44].mxu0  ;;  %v10309_v41 = vpop.eup %6763 }
 0x7b1   : > { %v3024_v5 = vadd.f32 %v6313_v63, %v2871_v54  ;;  %v2995_v43 = vpop.f32.mrb[45].mxu0  ;;  %v10313_v50 = vpop.eup %6765 }
 0x7b2   : > { %v3022_v60 = vadd.f32 %v2995_v43, %v2869_v20  ;;  %v6314_v8 = vpop.f32.mrb[46].mxu0  ;;  %v10319_v42 = vpop.eup %6767 }
 0x7b3   : > { %3040 = vst.msk [vmem:[#allocation5 + $0xf0] sm:$0xff] %vm1190_vm2, %v3024_v5  ;;  %v3025_v24 = vadd.f32 %v6314_v8, %v2872_v49  ;;  %v2998_v33 = vpop.f32.mrb[47].mxu0  ;;  %3523 = vadd.xlane.f32.xlu1 %v10302_v17  ;;  %v10322_v7 = vpop.eup %6769  ;;  %v4263_v49 = vmul.f32 1.442695, %v4244_v15  ;;  %v11696_v5 = vld [vmem:[#allocation56_spill] sm:$0xff] }
 0x7b4   : > { %3038 = vst.msk [vmem:[#allocation5 + $0xe0] sm:$0xff] %vm1190_vm2, %v3022_v60  ;;  %v3023_v38 = vadd.f32 %v2998_v33, %v2870_v52  ;;  %v3707_v9 = vpop.permute.xlu0 %3706  ;;  %v4245_v43 = vsub.f32 %v11696_v5, %v4184_v18  ;;  %v11701_v18 = vsub.f32 %v11699_v19, %v11700_v58  ;;  %v3693_v5 = vpack.c.bf16 %v10162_v30, %v10148_v34  ;;  %v11715_v34 = vld [vmem:[#allocation99_spill] sm:$0xff] }
 0x7b5   : > { %3041 = vst.msk [vmem:[#allocation5 + $0xf8] sm:$0xff] %vm1190_vm2, %v3025_v24  ;;  %v11697_v24 = vld [vmem:[#allocation54_spill] sm:$0xff] }
 0x7b6   : > { %3039 = vst.msk [vmem:[#allocation5 + $0xe8] sm:$0xff] %vm1190_vm2, %v3023_v38  ;;  %v4265_v60 = vmul.f32 1.442695, %v4245_v43 }
 0x7b7   : > { %3531 = vadd.xlane.f32.xlu1 %v10309_v41 }
 0x7b8   : > { %v10325_v32 = vpop.eup %6771  ;;  %v4199_v27 = vpop.permute.xlu0 %4198 }
 0x7b9   : > { %v3500_v10 = vmul.f32 %v10325_v32, %v3484_v21  ;;  %v4248_v33 = vsub.f32 %v11697_v24, %v4199_v27 }
 0x7bb   : > { %3535 = vadd.xlane.f32.xlu1 %v10313_v50  ;;  %v4271_v27 = vmul.f32 1.442695, %v4248_v33 }
 0x7bc   : > { %v3709_v55 = vpop.permute.xlu0 %3708 }
 0x7bf   : > { %3539 = vadd.xlane.f32.xlu1 %v10319_v42 }
 0x7c0   : > { %v10329_v53 = vpop.permute.xlu0 %4203 }
 0x7c3   : > { %3543 = vadd.xlane.f32.xlu1 %v10322_v7 }
 0x7c4   : > { %v3711_v54 = vpop.permute.xlu0 %3710 }
 0x7c8   : > { %v10334_v63 = vpop.permute.xlu0 %4218 }
 0x7c9   : > { %v4252_v30 = vsub.f32 %v11715_v34, %v10334_v63  ;;  %v3695_v63 = vpack.c.bf16 %v10313_v50, %v10187_v44  ;;  %v3487_v50 = vld [vmem:[#allocation3 + $0x130] sm:$0xff]  ;;  %v3697_v34 = vpack.c.bf16 %v10322_v7, %v10221_v11 }
 0x7cc   : > { %v3713_v8 = vpop.permute.xlu0 %3712 }
 0x7cf   : > { %v3520_v29 = vpop.xlane.xlu1 %3519 }
 0x7d0   : > { %v3548_v23 = vadd.f32 %v3520_v29, %v3500_v10  ;;  %v11702_v10 = vld [vmem:[#allocation126_spill] sm:$0xff] }
 0x7d1   : > { %v11703_v29 = vld [vmem:[#allocation134_spill] sm:$0xff] }
 0x7d2   : > { %3564 = vst.msk [vmem:[#allocation3 + $0x118] sm:$0xff] %vm1959_vm8, %v3548_v23  ;;  %v3691_v23 = vpack.c.bf16 %v11703_v29, %v11702_v10 }
 0x7d3   : > { %v3701_v61 = vpop.permute.xlu1 %3700 }
 0x7d4   : > { %6317 = vmatprep.subr.bf16.mxu1 %v3701_v61 }
 0x7d5   : > { %6318 = vmatpush3.bf16.msra.mxu1 %v3701_v61  ;;  %v11704_v61 = vld [vmem:[#allocation92_spill] sm:$0xff] }
 0x7d6   : > { %6319 = vmatprep.subr.bf16.mxu1 %v3703_v0 }
 0x7d7   : > { %v4510_v14 = vpop.permute.xlu1 %4509 }
 0x7d8   : > { %6349 = vmatprep.subr.bf16.mxu0 %v4510_v14 }
 0x7d9   : > { %6320 = vmatpush3.bf16.msra.mxu1 %v3703_v0  ;;  %6350 = vmatpush3.bf16.msra.mxu0 %v4510_v14  ;;  %v4249_v14 = vsub.f32 %v11704_v61, %v10329_v53  ;;  %v11709_v53 = vld [vmem:[#allocation154_spill] sm:$0xff] }
 0x7da   : > { %6321 = vmatprep.subr.bf16.mxu1 %v3705_v28 }
 0x7db   : > { %v4169_v35 = vpop.permute.xlu1 %4168 }
 0x7dc   : > { %v4242_v36 = vsub.f32 %v11693_v2, %v4169_v35  ;;  %v11705_v35 = vld [vmem:[#allocation57_spill] sm:$0xff] }
 0x7dd   : > { %6322 = vmatpush3.bf16.msra.mxu1 %v3705_v28  ;;  %v11698_v28 = vld [vmem:[#allocation105_spill] sm:$0xff] }
 0x7de   : > { %v4259_v1 = vmul.f32 1.442695, %v4242_v36  ;;  %6323 = vmatprep.subr.bf16.mxu1 %v3707_v9 }
 0x7df   : > { %v4174_v25 = vpop.permute.xlu1 %4173 }
 0x7e0   : > { %6773 = vpow2.f32 %v4259_v1  ;;  %v4243_v16 = vsub.f32 %v11695_v37, %v4174_v25  ;;  %v11707_v1 = vld [vmem:[#allocation131_spill] sm:$0xff] }
 0x7e1   : > { %6324 = vmatpush3.bf16.msra.mxu1 %v3707_v9  ;;  %v3328_v9 = vmul.f32 1.442695, %v11701_v18  ;;  %v11717_v18 = vld [vmem:[#allocation137_spill] sm:$0xff] }
 0x7e2   : > { %v4261_v20 = vmul.f32 1.442695, %v4243_v16  ;;  %6325 = vmatprep.subr.bf16.mxu1 %v3709_v55  ;;  %v11710_v16 = vld [vmem:[#allocation156_spill] sm:$0xff] }
 0x7e3   : > { %v4512_v0 = vpop.permute.xlu1 %4511 }
 0x7e4   : > { %6775 = vpow2.f32 %v4261_v20  ;;  %6351 = vmatprep.subr.bf16.mxu0 %v4512_v0  ;;  %v11711_v20 = vsub.f32 %v11709_v53, %v11710_v16 }
 0x7e5   : > { %6326 = vmatpush3.bf16.msra.mxu1 %v3709_v55  ;;  %6352 = vmatpush3.bf16.msra.mxu0 %v4512_v0  ;;  %6777 = vpow2.f32 %v4263_v49  ;;  %v4224_v49 = vpop.permute.xlu0 %4223 }
 0x7e6   : > { %6327 = vmatprep.subr.bf16.mxu1 %v3711_v54  ;;  %6779 = vpow2.f32 %v4265_v60  ;;  %v3334_v0 = vmul.f32 1.442695, %v11711_v20 }
 0x7e7   : > { %v4514_v52 = vpop.permute.xlu1 %4513 }
 0x7e8   : > { %6353 = vmatprep.subr.bf16.mxu0 %v4514_v52 }
 0x7e9   : > { %6328 = vmatpush3.bf16.msra.mxu1 %v3711_v54  ;;  %6354 = vmatpush3.bf16.msra.mxu0 %v4514_v52  ;;  %v11706_v54 = vld [vmem:[#allocation129_spill] sm:$0xff]  ;;  %v3694_v52 = vpack.c.bf16 %v10309_v41, %v10177_v57  ;;  %v4234_v57 = vpop.permute.xlu0 %4233  ;;  %v11716_v41 = vld [vmem:[#allocation48_spill] sm:$0xff] }
 0x7ea   : > { %v6774_v46 = vpop.eup %6773  ;;  %6329 = vmatprep.subr.bf16.mxu1 %v3713_v8  ;;  %v11708_v25 = vsub.f32 %v11706_v54, %v11707_v1 }
 0x7eb   : > { %4324 = vadd.xlane.f32.xlu1 %v6774_v46  ;;  %v4189_v45 = vpop.permute.xlu1 %4188  ;;  %v4499_v38 = vpack.c.bf16 %v6774_v46, %v10293_v62  ;;  %v3692_v62 = vpack.c.bf16 %v10302_v17, %v10137_v47  ;;  %v4273_v47 = vmul.f32 1.442695, %v4249_v14  ;;  %v11713_v46 = vld [vmem:[#allocation135_spill] sm:$0xff]  ;;  %v11720_v14 = vld [vmem:[#allocation93_spill] sm:$0xff] }
 0x7ec   : > { %v4246_v26 = vsub.f32 %v11698_v28, %v4189_v45  ;;  %v3332_v56 = vmul.f32 1.442695, %v11708_v25 }
 0x7ed   : > { %6330 = vmatpush3.bf16.msra.mxu1 %v3713_v8  ;;  %6363 = vmatprep.mubr.bf16.mxu0 %v4499_v38  ;;  %v11712_v8 = vld [vmem:[#allocation133_spill] sm:$0xff] }
 0x7ee   : > { %v10340_v51 = vpop.eup %6775  ;;  %v4267_v21 = vmul.f32 1.442695, %v4246_v26  ;;  %v11714_v24 = vsub.f32 %v11712_v8, %v11713_v46  ;;  %v3485_v26 = vld [vmem:[#allocation3 + $0x120] sm:$0xff]  ;;  %v11726_v8 = vld [vmem:[#allocation145_spill] sm:$0xff]  ;;  %v11727_v46 = vld [vmem:[#allocation147_spill] sm:$0xff] }
 0x7ef   : > { %v4194_v55 = vpop.permute.xlu1 %4193  ;;  %4326 = vadd.xlane.f32.xlu0 %v10340_v51  ;;  %v10353_v36 = vpop.eup %6777 }
 0x7f0   : > { %6781 = vpow2.f32 %v4267_v21  ;;  %v4247_v2 = vsub.f32 %v11705_v35, %v4194_v55  ;;  %6332 = vmatmul.mubr.bf16.vlgmr.msra.gmra.mrb[4].mxu1 %v3691_v23  ;;  %v10359_v17 = vpop.eup %6779  ;;  %v3336_v33 = vmul.f32 1.442695, %v11714_v24  ;;  %v4279_v23 = vmul.f32 1.442695, %v4252_v30 }
 0x7f1   : > { %6335 = vmatprep.mubr.bf16.mxu1 %v3692_v62  ;;  %6783 = vpow2.f32 %v3328_v9  ;;  %v11718_v9 = vld [vmem:[#allocation139_spill] sm:$0xff]  ;;  %v3696_v62 = vpack.c.bf16 %v10319_v42, %v10205_v39  ;;  %v4253_v35 = vsub.f32 %v11720_v14, %v4224_v49  ;;  %v11728_v24 = vsub.f32 %v11726_v8, %v11727_v46 }
 0x7f2   : > { %v4269_v15 = vmul.f32 1.442695, %v4247_v2  ;;  %6785 = vpow2.f32 %v4271_v27  ;;  %v11719_v21 = vsub.f32 %v11717_v18, %v11718_v9  ;;  %v11721_v2 = vld [vmem:[#allocation59_spill] sm:$0xff]  ;;  %v4500_v11 = vpack.c.bf16 %v10353_v36, %v10340_v51 }
 0x7f3   : > { %v4516_v37 = vpop.permute.xlu1 %4515  ;;  %4328 = vadd.xlane.f32.xlu0 %v10353_v36  ;;  %v4281_v20 = vmul.f32 1.442695, %v4253_v35 }
 0x7f4   : > { %6787 = vpow2.f32 %v4269_v15  ;;  %6355 = vmatprep.subr.bf16.mxu0 %v4516_v37  ;;  %v3340_v10 = vmul.f32 1.442695, %v11719_v21  ;;  %v11723_v15 = vld [vmem:[#allocation143_spill] sm:$0xff] }
 0x7f5   : > { %6356 = vmatpush3.bf16.msra.mxu0 %v4516_v37  ;;  %6789 = vpow2.f32 %v3332_v56  ;;  %v11722_v56 = vld [vmem:[#allocation141_spill] sm:$0xff] }
 0x7f6   : > { %6791 = vpow2.f32 %v4273_v47  ;;  %v11724_v37 = vsub.f32 %v11722_v56, %v11723_v15 }
 0x7f7   : > { %v4518_v43 = vpop.permute.xlu1 %4517  ;;  %4330 = vadd.xlane.f32.xlu0 %v10359_v17  ;;  %6793 = vpow2.f32 %v3334_v0  ;;  %v11725_v0 = vld [vmem:[#allocation46_spill] sm:$0xff] }
 0x7f8   : > { %6336 = vmatmul.mubr.bf16.gmra.mrb[8].mxu1 %v3693_v5  ;;  %6357 = vmatprep.subr.bf16.mxu0 %v4518_v43  ;;  %6795 = vpow2.f32 %v3336_v33  ;;  %v3344_v47 = vmul.f32 1.442695, %v11724_v37  ;;  %v4255_v49 = vsub.f32 %v11725_v0, %v4234_v57  ;;  %v3348_v33 = vmul.f32 1.442695, %v11728_v24  ;;  %v11731_v24 = vld [vmem:[#allocation151_spill] sm:$0xff] }
 0x7f9   : > { %6339 = vmatprep.mubr.bf16.mxu1 %v3694_v52  ;;  %6358 = vmatpush3.bf16.msra.mxu0 %v4518_v43  ;;  %v3488_v43 = vld [vmem:[#allocation3 + $0x138] sm:$0xff] }
 0x7fa   : > { %v10369_v60 = vpop.eup %6781 }
 0x7fb   : > { %4332 = vadd.xlane.f32.xlu1 %v10369_v60  ;;  %v4209_v45 = vpop.permute.xlu1 %4208  ;;  %v10377_v38 = vpop.eup %6783 }
 0x7fc   : > { %v4250_v28 = vsub.f32 %v11716_v41, %v4209_v45  ;;  %v10380_v19 = vpop.eup %6785  ;;  %v3501_v55 = vmul.f32 %v10377_v38, %v3485_v26  ;;  %v4285_v41 = vmul.f32 1.442695, %v4255_v49  ;;  %v3489_v26 = vld [vmem:[#allocation3 + $0x140] sm:$0xff] }
 0x7fe   : > { %v10382_v58 = vpop.eup %6787  ;;  %v4275_v29 = vmul.f32 1.442695, %v4250_v28 }
 0x7ff   : > { %v4214_v27 = vpop.permute.xlu1 %4213  ;;  %4334 = vadd.xlane.f32.xlu0 %v10382_v58  ;;  %4336 = vadd.xlane.f32.xlu1 %v10380_v19  ;;  %v10394_v61 = vpop.eup %6789  ;;  %v4502_v37 = vpack.c.bf16 %v10380_v19, %v10382_v58 }
 0x800   : > { %6797 = vpow2.f32 %v4275_v29  ;;  %v4251_v54 = vsub.f32 %v11721_v2, %v4214_v27  ;;  %6340 = vmatmul.mubr.bf16.gmra.mrb[12].mxu1 %v3695_v63  ;;  %v3522_v44 = vpop.xlane.xlu0 %3521  ;;  %v10398_v25 = vpop.eup %6791  ;;  %v3503_v53 = vmul.f32 %v10394_v61, %v3487_v50  ;;  %v11729_v63 = vld [vmem:[#allocation100_spill] sm:$0xff]  ;;  %v11730_v2 = vld [vmem:[#allocation101_spill] sm:$0xff]  ;;  %v3493_v50 = vld [vmem:[#allocation3 + $0x160] sm:$0xff] }
 0x801   : > { %v3549_v1 = vadd.f32 %v3522_v44, %v3501_v55  ;;  %6343 = vmatprep.mubr.bf16.mxu1 %v3696_v62  ;;  %6799 = vpow2.f32 %v3340_v10  ;;  %v10406_v16 = vpop.eup %6793  ;;  %v4501_v10 = vpack.c.bf16 %v10369_v60, %v10359_v17  ;;  %v3491_v55 = vld [vmem:[#allocation3 + $0x150] sm:$0xff] }
 0x802   : > { %v4277_v39 = vmul.f32 1.442695, %v4251_v54  ;;  %6801 = vpow2.f32 %v4279_v23  ;;  %v3504_v45 = vmul.f32 %v10406_v16, %v3488_v43  ;;  %v10416_v57 = vpop.eup %6795 }
 0x803   : > { %3565 = vst.msk [vmem:[#allocation3 + $0x120] sm:$0xff] %vm1959_vm8, %v3549_v1  ;;  %v4520_v42 = vpop.permute.xlu1 %4519  ;;  %4338 = vadd.xlane.f32.xlu0 %v10398_v25  ;;  %v3505_v21 = vmul.f32 %v10416_v57, %v3489_v26 }
 0x804   : > { %6803 = vpow2.f32 %v4277_v39  ;;  %6359 = vmatprep.subr.bf16.mxu0 %v4520_v42  ;;  %v3526_v5 = vpop.xlane.xlu0 %3525 }
 0x805   : > { %v3551_v52 = vadd.f32 %v3526_v5, %v3503_v53  ;;  %6360 = vmatpush3.bf16.msra.mxu0 %v4520_v42  ;;  %6805 = vpow2.f32 %v3344_v47 }
 0x806   : > { %6807 = vpow2.f32 %v4281_v20  ;;  %v3495_v20 = vld [vmem:[#allocation3 + $0x170] sm:$0xff] }
 0x807   : > { %3567 = vst.msk [vmem:[#allocation3 + $0x130] sm:$0xff] %vm1959_vm8, %v3551_v52  ;;  %v4522_v30 = vpop.permute.xlu1 %4521  ;;  %6809 = vpow2.f32 %v3348_v33  ;;  %v11732_v33 = vld [vmem:[#allocation149_spill] sm:$0xff] }
 0x808   : > { %6344 = vmatmul.mubr.bf16.gmra.mrb[16].mxu1 %v3697_v34  ;;  %6361 = vmatprep.subr.bf16.mxu0 %v4522_v30  ;;  %v3528_v28 = vpop.xlane.xlu0 %3527  ;;  %6811 = vpow2.f32 %v4285_v41  ;;  %v4113_v34 = vsub.f32 %v11732_v33, %v11731_v24  ;;  %v11734_v41 = vld [vmem:[#allocation152_spill] sm:$0xff]  ;;  %v11756_v24 = vld [vmem:[#allocation165_spill] sm:$0xff] }
 0x809   : > { %v3552_v18 = vadd.f32 %v3528_v28, %v3504_v45  ;;  %6362 = vmatpush3.bf16.msra.mxu0 %v4522_v30  ;;  %v11733_v45 = vld [vmem:[#allocation150_spill] sm:$0xff]  ;;  %v4123_v33 = vsub.f32 %v11756_v24, %v11653_v48 }
 0x80a   : > { %v6798_v9 = vpop.eup %6797  ;;  %v4129_v30 = vmul.f32 1.442695, %v4113_v34  ;;  %v11735_v28 = vsub.f32 %v11733_v45, %v11734_v41  ;;  %v3494_v41 = vld [vmem:[#allocation3 + $0x168] sm:$0xff] }
 0x80b   : > { %3568 = vst.msk [vmem:[#allocation3 + $0x138] sm:$0xff] %vm1959_vm8, %v3552_v18  ;;  %v4229_v7 = vpop.permute.xlu1 %4228  ;;  %4340 = vadd.xlane.f32.xlu1 %v6798_v9  ;;  %v10424_v29 = vpop.eup %6799  ;;  %v4503_v39 = vpack.c.bf16 %v6798_v9, %v10398_v25  ;;  %v11736_v18 = vld [vmem:[#allocation158_spill] sm:$0xff]  ;;  %v11737_v9 = vld [vmem:[#allocation160_spill] sm:$0xff] }
 0x80c   : > { %v4254_v23 = vsub.f32 %v11729_v63, %v4229_v7  ;;  %6364 = vmatmul.mubr.bf16.vlgmr.msra.gmra.mrb[48].mxu0 %v4500_v11  ;;  %v3530_v27 = vpop.xlane.xlu0 %3529  ;;  %v6802_v62 = vpop.eup %6801  ;;  %v3507_v17 = vmul.f32 %v10424_v29, %v3491_v55  ;;  %v3330_v26 = vmul.f32 1.442695, %v11735_v28  ;;  %v11738_v11 = vsub.f32 %v11736_v18, %v11737_v9  ;;  %v11743_v55 = vld [vmem:[#allocation153_spill] sm:$0xff]  ;;  %v11758_v18 = vld [vmem:[#allocation178_spill] sm:$0xff] }
 0x80d   : > { %v3553_v14 = vadd.f32 %v3530_v27, %v3505_v21  ;;  %6367 = vmatprep.mubr.bf16.mxu0 %v4501_v10  ;;  %v11739_v21 = vld [vmem:[#allocation162_spill] sm:$0xff]  ;;  %v11740_v10 = vld [vmem:[#allocation164_spill] sm:$0xff]  ;;  %v11742_v27 = vld [vmem:[#allocation155_spill] sm:$0xff] }
 0x80e   : > { %v6804_v51 = vpop.eup %6803  ;;  %v4283_v36 = vmul.f32 1.442695, %v4254_v23  ;;  %v3338_v7 = vmul.f32 1.442695, %v11738_v11  ;;  %v11741_v63 = vsub.f32 %v11739_v21, %v11740_v10  ;;  %v11760_v21 = vld [vmem:[#allocation169_spill] sm:$0xff] }
 0x80f   : > { %3569 = vst.msk [vmem:[#allocation3 + $0x140] sm:$0xff] %vm1959_vm8, %v3553_v14  ;;  %v4239_v35 = vpop.permute.xlu1 %4238  ;;  %4342 = vadd.xlane.f32.xlu0 %v6804_v51  ;;  %4344 = vadd.xlane.f32.xlu1 %v6802_v62  ;;  %v10429_v60 = vpop.eup %6805  ;;  %v4504_v52 = vpack.c.bf16 %v6802_v62, %v6804_v51  ;;  %v11744_v62 = vld [vmem:[#allocation166_spill] sm:$0xff]  ;;  %v11745_v14 = vld [vmem:[#allocation168_spill] sm:$0xff] }
 0x810   : > { %6813 = vpow2.f32 %v4283_v36  ;;  %v4256_v54 = vsub.f32 %v11730_v2, %v4239_v35  ;;  %v3534_v44 = vpop.xlane.xlu0 %3533  ;;  %v6808_v56 = vpop.eup %6807  ;;  %v3509_v47 = vmul.f32 %v10429_v60, %v3493_v50  ;;  %v3342_v23 = vmul.f32 1.442695, %v11741_v63  ;;  %v11748_v50 = vld [vmem:[#allocation170_spill] sm:$0xff] }
 0x811   : > { %v3555_v1 = vadd.f32 %v3534_v44, %v3507_v17  ;;  %v10437_v42 = vpop.eup %6809  ;;  %v3486_v17 = vld [vmem:[#allocation3 + $0x128] sm:$0xff] }
 0x812   : > { %v4287_v15 = vmul.f32 1.442695, %v4256_v54  ;;  %v6812_v49 = vpop.eup %6811  ;;  %v3511_v19 = vmul.f32 %v10437_v42, %v3495_v20 }
 0x813   : > { %3571 = vst.msk [vmem:[#allocation3 + $0x150] sm:$0xff] %vm1959_vm8, %v3555_v1  ;;  %4346 = vadd.xlane.f32.xlu0 %v6808_v56 }
 0x814   : > { %6815 = vpow2.f32 %v4287_v15  ;;  %6368 = vmatmul.mubr.bf16.gmra.mrb[52].mxu0 %v4502_v37  ;;  %v3538_v53 = vpop.xlane.xlu0 %3537 }
 0x815   : > { %v3557_v0 = vadd.f32 %v3538_v53, %v3509_v47  ;;  %6371 = vmatprep.mubr.bf16.mxu0 %v4503_v39  ;;  %6817 = vpow2.f32 %v4129_v30  ;;  %v3490_v39 = vld [vmem:[#allocation3 + $0x148] sm:$0xff]  ;;  %v11751_v53 = vld [vmem:[#allocation174_spill] sm:$0xff] }
 0x816   : > { %6819 = vpow2.f32 %v3330_v26  ;;  %v11757_v26 = vld [vmem:[#allocation179_spill] sm:$0xff] }
 0x817   : > { %3573 = vst.msk [vmem:[#allocation3 + $0x160] sm:$0xff] %vm1959_vm8, %v3557_v0  ;;  %4350 = vadd.xlane.f32.xlu0 %v6812_v49  ;;  %6821 = vpow2.f32 %v3338_v7  ;;  %v11752_v0 = vld [vmem:[#allocation163_spill] sm:$0xff]  ;;  %v4116_v9 = vsub.f32 %v11758_v18, %v11757_v26  ;;  %v4293_v26 = vld [vmem:[#allocation3 + $0x198] sm:$0xff] }
 0x818   : > { %v3542_v58 = vpop.xlane.xlu0 %3541  ;;  %6823 = vpow2.f32 %v3342_v23  ;;  %v11759_v7 = vld [vmem:[#allocation171_spill] sm:$0xff] }
 0x819   : > { %v3559_v5 = vadd.f32 %v3542_v58, %v3511_v19  ;;  %v4125_v10 = vsub.f32 %v11760_v21, %v11759_v7 }
 0x81a   : > { %v6814_v43 = vpop.eup %6813 }
 0x81b   : > { %3575 = vst.msk [vmem:[#allocation3 + $0x170] sm:$0xff] %vm1959_vm8, %v3559_v5  ;;  %4348 = vadd.xlane.f32.xlu1 %v6814_v43  ;;  %v4505_v25 = vpack.c.bf16 %v6814_v43, %v6808_v56 }
 0x81c   : > { %6372 = vmatmul.mubr.bf16.gmra.mrb[56].mxu0 %v4504_v52 }
 0x81d   : > { %6375 = vmatprep.mubr.bf16.mxu0 %v4505_v25  ;;  %v11754_v25 = vld [vmem:[#allocation177_spill] sm:$0xff] }
 0x81e   : > { %v6816_v8 = vpop.eup %6815 }
 0x81f   : > { %4352 = vadd.xlane.f32.xlu1 %v6816_v8  ;;  %v4506_v46 = vpack.c.bf16 %v6816_v8, %v6812_v49  ;;  %v11753_v49 = vld [vmem:[#allocation161_spill] sm:$0xff]  ;;  %v11755_v8 = vld [vmem:[#allocation176_spill] sm:$0xff] }
 0x820   : > { %v4121_v19 = vsub.f32 %v11753_v49, %v11752_v0 }
 0x824   : > { %6376 = vmatmul.mubr.bf16.gmra.mrb[60].mxu0 %v4506_v46  ;;  %v4115_v46 = vsub.f32 %v11755_v8, %v11754_v25 }
 0x826   : > { %v4133_v28 = vmul.f32 1.442695, %v4115_v46 }
 0x82d   : > { %3596 = vperm.xlu0 %6592, %v10226_v59   ;;  %v6818_v59 = vpop.eup %6817 }
 0x830   : > { %3601 = vperm.xlu1 %6593, %v10254_v12   ;;  %v4290_v12 = vld [vmem:[#allocation3 + $0x180] sm:$0xff] }
 0x831   : > { %3616 = vperm.xlu0 %6592, %v10377_v38   ;;  %v4117_v38 = vsub.f32 %v11743_v55, %v11742_v27  ;;  %v4306_v36 = vmul.f32 %v6818_v59, %v4290_v12  ;;  %v3496_v27 = vld [vmem:[#allocation3 + $0x178] sm:$0xff]  ;;  %v4135_v55 = vmul.f32 1.442695, %v4116_v9 }
 0x833   : > { %v4137_v2 = vmul.f32 1.442695, %v4117_v38  ;;  %v11761_v38 = vld [vmem:[#allocation180_spill] sm:$0xff] }
 0x834   : > { %3606 = vperm.xlu1 %6593, %v10238_v40   ;;  %v11746_v40 = vsub.f32 %v11744_v62, %v11745_v14  ;;  %v4118_v62 = vsub.f32 %v11761_v38, %v9654_v4  ;;  %v4153_v14 = vmul.f32 1.442695, %v4125_v10  ;;  %v4296_v38 = vld [vmem:[#allocation3 + $0x1b0] sm:$0xff] }
 0x835   : > { %3626 = vperm.xlu0 %6592, %v10394_v61   ;;  %v6820_v61 = vpop.eup %6819 }
 0x836   : > { %v3346_v51 = vmul.f32 1.442695, %v11746_v40  ;;  %v3502_v15 = vmul.f32 %v6820_v61, %v3486_v17  ;;  %v6822_v37 = vpop.eup %6821  ;;  %v11762_v40 = vld [vmem:[#allocation175_spill] sm:$0xff] }
 0x837   : > { %v3506_v58 = vmul.f32 %v6822_v37, %v3490_v39  ;;  %v6824_v5 = vpop.eup %6823 }
 0x838   : > { %3611 = vperm.xlu1 %6593, %v10325_v32   ;;  %v11747_v32 = vld [vmem:[#allocation157_spill] sm:$0xff]  ;;  %6825 = vpow2.f32 %v3346_v51 }
 0x839   : > { %3636 = vperm.xlu0 %6592, %v10416_v57   ;;  %v4119_v44 = vsub.f32 %v11747_v32, %v11638_v22  ;;  %v11749_v57 = vld [vmem:[#allocation172_spill] sm:$0xff]  ;;  %6827 = vpow2.f32 %v4137_v2  ;;  %v11763_v51 = vld [vmem:[#allocation173_spill] sm:$0xff]  ;;  %v4139_v2 = vmul.f32 1.442695, %v4118_v62  ;;  %v11765_v32 = vld [vmem:[#allocation182_spill] sm:$0xff] }
 0x83a   : > { %v11750_v1 = vsub.f32 %v11748_v50, %v11749_v57 }
 0x83b   : > { %v4141_v22 = vmul.f32 1.442695, %v4119_v44 }
 0x83c   : > { %3621 = vperm.xlu1 %6593, %v6820_v61   ;;  %v4323_v35 = vpop.xlane.xlu0 %4322  ;;  %v3350_v56 = vmul.f32 1.442695, %v11750_v1  ;;  %v4127_v61 = vsub.f32 %v11763_v51, %v11762_v40 }
 0x83d   : > { %v4354_v54 = vadd.f32 %v4323_v35, %v4306_v36  ;;  %3646 = vperm.xlu0 %6592, %v10424_v29   ;;  %v4114_v29 = vsub.f32 %v11751_v53, %v9595_v6 }
 0x83e   : > { %6829 = vpow2.f32 %v3350_v56  ;;  %v4157_v50 = vmul.f32 1.442695, %v4127_v61  ;;  %v4298_v61 = vld [vmem:[#allocation3 + $0x1c0] sm:$0xff] }
 0x83f   : > { %4370 = vst.msk [vmem:[#allocation3 + $0x180] sm:$0xff] %vm1959_vm8, %v4354_v54  ;;  %v4131_v52 = vmul.f32 1.442695, %v4114_v29  ;;  %6831 = vpow2.f32 %v4141_v22  ;;  %v11764_v54 = vld [vmem:[#allocation184_spill] sm:$0xff]  ;;  %v11767_v29 = vld [vmem:[#allocation190_spill] sm:$0xff] }
 0x840   : > { %v3524_v47 = vpop.xlane.xlu1 %3523  ;;  %3631 = vperm.xlu1 %6593, %v10406_v16   ;;  %v3492_v16 = vld [vmem:[#allocation3 + $0x158] sm:$0xff]  ;;  %v4120_v4 = vsub.f32 %v11765_v32, %v11764_v54  ;;  %v4299_v32 = vld [vmem:[#allocation3 + $0x1c8] sm:$0xff] }
 0x841   : > { %v3550_v20 = vadd.f32 %v3524_v47, %v3502_v15  ;;  %3656 = vperm.xlu0 %6592, %v10429_v60   ;;  %v4145_v60 = vmul.f32 1.442695, %v4121_v19  ;;  %v3508_v34 = vmul.f32 %v6824_v5, %v3492_v16  ;;  %6833 = vpow2.f32 %v4131_v52  ;;  %v11766_v15 = vld [vmem:[#allocation185_spill] sm:$0xff]  ;;  %v11769_v19 = vld [vmem:[#allocation191_spill] sm:$0xff]  ;;  %v11770_v52 = vld [vmem:[#allocation194_spill] sm:$0xff] }
 0x842   : > { %v6826_v30 = vpop.eup %6825  ;;  %v4143_v56 = vmul.f32 1.442695, %v4120_v4  ;;  %v4128_v25 = vsub.f32 %v11770_v52, %v11668_v3  ;;  %v4291_v3 = vld [vmem:[#allocation3 + $0x188] sm:$0xff] }
 0x843   : > { %3566 = vst.msk [vmem:[#allocation3 + $0x128] sm:$0xff] %vm1959_vm8, %v3550_v20  ;;  %6835 = vpow2.f32 %v4145_v60  ;;  %v10489_v48 = vpop.eup %6827  ;;  %v3510_v63 = vmul.f32 %v6826_v30, %v3494_v41  ;;  %v11768_v20 = vld [vmem:[#allocation188_spill] sm:$0xff] }
 0x844   : > { %v3532_v43 = vpop.xlane.xlu1 %3531  ;;  %3641 = vperm.xlu1 %6593, %v6822_v37   ;;  %6837 = vpow2.f32 %v4133_v28  ;;  %v4122_v37 = vsub.f32 %v11766_v15, %v11647_v13  ;;  %v4124_v22 = vsub.f32 %v11768_v20, %v11767_v29  ;;  %v4159_v46 = vmul.f32 1.442695, %v4128_v25  ;;  %v4305_v25 = vld [vmem:[#allocation3 + $0x1f8] sm:$0xff] }
 0x845   : > { %v3554_v6 = vadd.f32 %v3532_v43, %v3506_v58  ;;  %3666 = vperm.xlu0 %6592, %v10437_v42   ;;  %v4149_v42 = vmul.f32 1.442695, %v4123_v33  ;;  %v4126_v58 = vsub.f32 %v11769_v19, %v11666_v31 }
 0x846   : > { %v4147_v53 = vmul.f32 1.442695, %v4122_v37  ;;  %v4151_v13 = vmul.f32 1.442695, %v4124_v22 }
 0x847   : > { %3570 = vst.msk [vmem:[#allocation3 + $0x148] sm:$0xff] %vm1959_vm8, %v3554_v6  ;;  %6839 = vpow2.f32 %v4149_v42  ;;  %v4155_v16 = vmul.f32 1.442695, %v4126_v58  ;;  %v4294_v42 = vld [vmem:[#allocation3 + $0x1a0] sm:$0xff] }
 0x848   : > { %v3536_v45 = vpop.xlane.xlu1 %3535  ;;  %3651 = vperm.xlu1 %6593, %v6824_v5   ;;  %v6830_v23 = vpop.eup %6829  ;;  %6841 = vpow2.f32 %v4135_v55  ;;  %v4310_v21 = vmul.f32 %v10489_v48, %v4294_v42  ;;  %v4297_v55 = vld [vmem:[#allocation3 + $0x1b8] sm:$0xff]  ;;  %v3579_v42 = vld [vmem:[#allocation5 + $0x108] sm:$0xff] }
 0x849   : > { %v3556_v11 = vadd.f32 %v3536_v45, %v3508_v34  ;;  %4405 = vperm.xlu0 %6592, %v6818_v59   ;;  %v3512_v36 = vmul.f32 %v6830_v23, %v3496_v27  ;;  %v10498_v35 = vpop.eup %6831  ;;  %6843 = vpow2.f32 %v4153_v14 }
 0x84a   : > { %6845 = vpow2.f32 %v4139_v2  ;;  %v4312_v14 = vmul.f32 %v10498_v35, %v4296_v38 }
 0x84b   : > { %3572 = vst.msk [vmem:[#allocation3 + $0x158] sm:$0xff] %vm1959_vm8, %v3556_v11  ;;  %v6834_v57 = vpop.eup %6833  ;;  %6847 = vpow2.f32 %v4157_v50  ;;  %v4301_v50 = vld [vmem:[#allocation3 + $0x1d8] sm:$0xff] }
 0x84c   : > { %v3540_v12 = vpop.xlane.xlu1 %3539  ;;  %3661 = vperm.xlu1 %6593, %v6826_v30   ;;  %6849 = vpow2.f32 %v4143_v56  ;;  %v4307_v33 = vmul.f32 %v6834_v57, %v4291_v3  ;;  %v4292_v30 = vld [vmem:[#allocation3 + $0x190] sm:$0xff] }
 0x84d   : > { %v3558_v59 = vadd.f32 %v3540_v12, %v3510_v63  ;;  %4425 = vperm.xlu0 %6592, %v10489_v48   ;;  %v10504_v1 = vpop.eup %6835  ;;  %6851 = vpow2.f32 %v4147_v53  ;;  %v4295_v63 = vld [vmem:[#allocation3 + $0x1a8] sm:$0xff]  ;;  %v4302_v53 = vld [vmem:[#allocation3 + $0x1e0] sm:$0xff] }
 0x84e   : > { %v6838_v47 = vpop.eup %6837  ;;  %6853 = vpow2.f32 %v4151_v13 }
 0x84f   : > { %3574 = vst.msk [vmem:[#allocation3 + $0x168] sm:$0xff] %vm1959_vm8, %v3558_v59  ;;  %6855 = vpow2.f32 %v4155_v16  ;;  %v4308_v41 = vmul.f32 %v6838_v47, %v4292_v30 }
 0x850   : > { %v3544_v17 = vpop.xlane.xlu1 %3543  ;;  %3671 = vperm.xlu1 %6593, %v6830_v23   ;;  %6857 = vpow2.f32 %v4159_v46 }
 0x851   : > { %v3560_v44 = vadd.f32 %v3544_v17, %v3512_v36  ;;  %4435 = vperm.xlu0 %6592, %v10498_v35   ;;  %v10509_v39 = vpop.eup %6839  ;;  %v4314_v17 = vmul.f32 %v10504_v1, %v4298_v61  ;;  %v4300_v35 = vld [vmem:[#allocation3 + $0x1d0] sm:$0xff]  ;;  %v3582_v61 = vld [vmem:[#allocation5 + $0x120] sm:$0xff] }
 0x852   : > { %v6842_v0 = vpop.eup %6841  ;;  %v4316_v15 = vmul.f32 %v10509_v39, %v4300_v35 }
 0x853   : > { %3576 = vst.msk [vmem:[#allocation3 + $0x178] sm:$0xff] %vm1959_vm8, %v3560_v44  ;;  %v10514_v49 = vpop.eup %6843  ;;  %v4309_v9 = vmul.f32 %v6842_v0, %v4293_v26 }
 0x854   : > { %4410 = vperm.xlu1 %6593, %v6834_v57   ;;  %v6846_v5 = vpop.eup %6845  ;;  %v4318_v20 = vmul.f32 %v10514_v49, %v4302_v53 }
 0x855   : > { %4445 = vperm.xlu0 %6592, %v10504_v1   ;;  %v10519_v43 = vpop.eup %6847  ;;  %v4311_v12 = vmul.f32 %v6846_v5, %v4295_v63 }
 0x856   : > { %v6850_v8 = vpop.eup %6849 }
 0x857   : > { %v6852_v6 = vpop.eup %6851  ;;  %v4313_v59 = vmul.f32 %v6850_v8, %v4297_v55 }
 0x858   : > { %4415 = vperm.xlu1 %6593, %v6838_v47   ;;  %v6854_v31 = vpop.eup %6853  ;;  %v4315_v4 = vmul.f32 %v6852_v6, %v4299_v32 }
 0x859   : > { %4455 = vperm.xlu0 %6592, %v10509_v39   ;;  %v10524_v60 = vpop.eup %6855  ;;  %v4317_v56 = vmul.f32 %v6854_v31, %v4301_v50  ;;  %v4303_v39 = vld [vmem:[#allocation3 + $0x1e8] sm:$0xff] }
 0x85a   : > { %v10527_v24 = vpop.eup %6857  ;;  %v4319_v16 = vmul.f32 %v10524_v60, %v4303_v39 }
 0x85c   : > { %4420 = vperm.xlu1 %6593, %v6842_v0   ;;  %v4304_v0 = vld [vmem:[#allocation3 + $0x1f0] sm:$0xff] }
 0x85d   : > { %4465 = vperm.xlu0 %6592, %v10514_v49   ;;  %v4320_v19 = vmul.f32 %v10519_v43, %v4304_v0  ;;  %v4321_v49 = vmul.f32 %v10527_v24, %v4305_v25 }
 0x860   : > { %4430 = vperm.xlu1 %6593, %v6846_v5  }
 0x861   : > { %4475 = vperm.xlu0 %6592, %v10519_v43  }
 0x864   : > { %4440 = vperm.xlu1 %6593, %v6850_v8  }
 0x868   : > { %4450 = vperm.xlu1 %6593, %v6852_v6  }
 0x86c   : > { %4460 = vperm.xlu1 %6593, %v6854_v31  }
 0x870   : > { %4470 = vperm.xlu1 %6593, %v10524_v60  }
 0x874   : > { %4480 = vperm.xlu1 %6593, %v10527_v24  }
 0x878   : > { %v4325_v34 = vpop.xlane.xlu1 %4324 }
 0x879   : > { %v4355_v45 = vadd.f32 %v4325_v34, %v4307_v33 }
 0x87b   : > { %4371 = vst.msk [vmem:[#allocation3 + $0x188] sm:$0xff] %vm1959_vm8, %v4355_v45 }
 0x87c   : > { %v4327_v28 = vpop.xlane.xlu0 %4326 }
 0x87d   : > { %v4356_v18 = vadd.f32 %v4327_v28, %v4308_v41  ;;  %v3580_v28 = vld [vmem:[#allocation5 + $0x110] sm:$0xff] }
 0x87f   : > { %4372 = vst.msk [vmem:[#allocation3 + $0x190] sm:$0xff] %vm1959_vm8, %v4356_v18  ;;  %v3578_v18 = vld [vmem:[#allocation5 + $0x100] sm:$0xff] }
 0x880   : > { %v4329_v11 = vpop.xlane.xlu0 %4328 }
 0x881   : > { %v4357_v7 = vadd.f32 %v4329_v11, %v4309_v9  ;;  %v3581_v11 = vld [vmem:[#allocation5 + $0x118] sm:$0xff] }
 0x883   : > { %4373 = vst.msk [vmem:[#allocation3 + $0x198] sm:$0xff] %vm1959_vm8, %v4357_v7 }
 0x884   : > { %v4331_v10 = vpop.xlane.xlu0 %4330 }
 0x885   : > { %v4358_v23 = vadd.f32 %v4331_v10, %v4310_v21 }
 0x887   : > { %4374 = vst.msk [vmem:[#allocation3 + $0x1a0] sm:$0xff] %vm1959_vm8, %v4358_v23 }
 0x888   : > { %v4333_v27 = vpop.xlane.xlu1 %4332 }
 0x889   : > { %v4359_v62 = vadd.f32 %v4333_v27, %v4311_v12 }
 0x88b   : > { %4375 = vst.msk [vmem:[#allocation3 + $0x1a8] sm:$0xff] %vm1959_vm8, %v4359_v62  ;;  %v3584_v62 = vld [vmem:[#allocation5 + $0x130] sm:$0xff] }
 0x88c   : > { %v4337_v40 = vpop.xlane.xlu1 %4336  ;;  %v4335_v51 = vpop.xlane.xlu0 %4334 }
 0x88d   : > { %v4361_v36 = vadd.f32 %v4337_v40, %v4313_v59  ;;  %v4360_v48 = vadd.f32 %v4335_v51, %v4312_v14 }
 0x88f   : > { %4377 = vst.msk [vmem:[#allocation3 + $0x1b8] sm:$0xff] %vm1959_vm8, %v4361_v36  ;;  %4376 = vst.msk [vmem:[#allocation3 + $0x1b0] sm:$0xff] %vm1959_vm8, %v4360_v48 }
 0x890   : > { %v4339_v2 = vpop.xlane.xlu0 %4338 }
 0x891   : > { %v4362_v54 = vadd.f32 %v4339_v2, %v4314_v17  ;;  %v3585_v17 = vld [vmem:[#allocation5 + $0x138] sm:$0xff]  ;;  %v3583_v2 = vld [vmem:[#allocation5 + $0x128] sm:$0xff] }
 0x893   : > { %4378 = vst.msk [vmem:[#allocation3 + $0x1c0] sm:$0xff] %vm1959_vm8, %v4362_v54 }
 0x898   : > { %v4341_v44 = vpop.xlane.xlu1 %4340 }
 0x899   : > { %v4363_v57 = vadd.f32 %v4341_v44, %v4315_v4 }
 0x89b   : > { %4379 = vst.msk [vmem:[#allocation3 + $0x1c8] sm:$0xff] %vm1959_vm8, %v4363_v57 }
 0x89c   : > { %v4345_v37 = vpop.xlane.xlu1 %4344  ;;  %v4343_v47 = vpop.xlane.xlu0 %4342 }
 0x89d   : > { %v4365_v29 = vadd.f32 %v4345_v37, %v4317_v56  ;;  %v4364_v1 = vadd.f32 %v4343_v47, %v4316_v15  ;;  %v3588_v37 = vld [vmem:[#allocation5 + $0x150] sm:$0xff] }
 0x89f   : > { %4381 = vst.msk [vmem:[#allocation3 + $0x1d8] sm:$0xff] %vm1959_vm8, %v4365_v29  ;;  %4380 = vst.msk [vmem:[#allocation3 + $0x1d0] sm:$0xff] %vm1959_vm8, %v4364_v1 }
 0x8a0   : > { %v4347_v22 = vpop.xlane.xlu0 %4346 }
 0x8a1   : > { %v4366_v13 = vadd.f32 %v4347_v22, %v4318_v20  ;;  %v3586_v22 = vld [vmem:[#allocation5 + $0x140] sm:$0xff] }
 0x8a3   : > { %4382 = vst.msk [vmem:[#allocation3 + $0x1e0] sm:$0xff] %vm1959_vm8, %v4366_v13  ;;  %v3589_v13 = vld [vmem:[#allocation5 + $0x158] sm:$0xff] }
 0x8a4   : > { %v4351_v58 = vpop.xlane.xlu0 %4350 }
 0x8a5   : > { %v4368_v5 = vadd.f32 %v4351_v58, %v4320_v19  ;;  %v3587_v19 = vld [vmem:[#allocation5 + $0x148] sm:$0xff] }
 0x8a7   : > { %4384 = vst.msk [vmem:[#allocation3 + $0x1f0] sm:$0xff] %vm1959_vm8, %v4368_v5 }
 0x8a8   : > { %v4349_v52 = vpop.xlane.xlu1 %4348 }
 0x8a9   : > { %v4367_v8 = vadd.f32 %v4349_v52, %v4319_v16 }
 0x8ab   : > { %4383 = vst.msk [vmem:[#allocation3 + $0x1e8] sm:$0xff] %vm1959_vm8, %v4367_v8 }
 0x8ac   : > { %v4353_v46 = vpop.xlane.xlu1 %4352  ;;  %v3597_v6 = vpop.permute.xlu0 %3596 }
 0x8ad   : > { %v4369_v31 = vadd.f32 %v4353_v46, %v4321_v49  ;;  %v3674_v21 = vmul.f32 %v3597_v6, %v3578_v18 }
 0x8af   : > { %4385 = vst.msk [vmem:[#allocation3 + $0x1f8] sm:$0xff] %vm1959_vm8, %v4369_v31  ;;  %v3592_v31 = vld [vmem:[#allocation5 + $0x170] sm:$0xff] }
 0x8b0   : > { %v3602_v43 = vpop.permute.xlu1 %3601  ;;  %v3617_v3 = vpop.permute.xlu0 %3616 }
 0x8b1   : > { %v3675_v27 = vmul.f32 %v3602_v43, %v3579_v42  ;;  %v3678_v32 = vmul.f32 %v3617_v3, %v3582_v61 }
 0x8b4   : > { %v3607_v33 = vpop.permute.xlu1 %3606  ;;  %v3627_v34 = vpop.permute.xlu0 %3626 }
 0x8b5   : > { %v3676_v9 = vmul.f32 %v3607_v33, %v3580_v28  ;;  %v3680_v48 = vmul.f32 %v3627_v34, %v3584_v62 }
 0x8b8   : > { %v3612_v30 = vpop.permute.xlu1 %3611  ;;  %v3637_v45 = vpop.permute.xlu0 %3636 }
 0x8b9   : > { %v3677_v23 = vmul.f32 %v3612_v30, %v3581_v11  ;;  %v3682_v39 = vmul.f32 %v3637_v45, %v3586_v22  ;;  %v3590_v30 = vld [vmem:[#allocation5 + $0x160] sm:$0xff] }
 0x8ba   : > { %v4387_v11 = vld [vmem:[#allocation5 + $0x180] sm:$0xff] }
 0x8bc   : > { %v3622_v41 = vpop.permute.xlu1 %3621  ;;  %v3647_v60 = vpop.permute.xlu0 %3646 }
 0x8bd   : > { %v3679_v57 = vmul.f32 %v3622_v41, %v3583_v2  ;;  %v3684_v0 = vmul.f32 %v3647_v60, %v3588_v37  ;;  %v3593_v41 = vld [vmem:[#allocation5 + $0x178] sm:$0xff]  ;;  %v3591_v60 = vld [vmem:[#allocation5 + $0x168] sm:$0xff] }
 0x8c0   : > { %v3632_v26 = vpop.permute.xlu1 %3631  ;;  %v10553_v24 = vpop.permute.xlu0 %3656 }
 0x8c1   : > { %v3681_v50 = vmul.f32 %v3632_v26, %v3585_v17  ;;  %v4389_v26 = vld [vmem:[#allocation5 + $0x190] sm:$0xff] }
 0x8c3   : > { %v6333_v7 = vpop.f32.mrb[4].mxu1 }
 0x8c4   : > { %v3821_v10 = vadd.f32 %v6333_v7, %v3676_v9  ;;  %v3642_v63 = vpop.permute.xlu1 %3641  ;;  %v3756_v12 = vpop.f32.mrb[5].mxu1  ;;  %v3686_v9 = vmul.f32 %v10553_v24, %v3590_v30 }
 0x8c5   : > { %v3819_v55 = vadd.f32 %v3756_v12, %v3674_v21  ;;  %v6334_v38 = vpop.f32.mrb[6].mxu1  ;;  %v3667_v36 = vpop.permute.xlu0 %3666  ;;  %v3683_v49 = vmul.f32 %v3642_v63, %v3587_v19  ;;  %v4388_v12 = vld [vmem:[#allocation5 + $0x188] sm:$0xff] }
 0x8c6   : > { %3837 = vst.msk [vmem:[#allocation5 + $0x110] sm:$0xff] %vm1190_vm2, %v3821_v10  ;;  %v3822_v59 = vadd.f32 %v6334_v38, %v3677_v23  ;;  %v3759_v14 = vpop.f32.mrb[7].mxu1  ;;  %v3688_v45 = vmul.f32 %v3667_v36, %v3592_v31  ;;  %v4390_v10 = vld [vmem:[#allocation5 + $0x198] sm:$0xff] }
 0x8c7   : > { %3835 = vst.msk [vmem:[#allocation5 + $0x100] sm:$0xff] %vm1190_vm2, %v3819_v55  ;;  %v3820_v40 = vadd.f32 %v3759_v14, %v3675_v27 }
 0x8c8   : > { %v3652_v51 = vpop.permute.xlu1 %3651  ;;  %3838 = vst.msk [vmem:[#allocation5 + $0x118] sm:$0xff] %vm1190_vm2, %v3822_v59 }
 0x8c9   : > { %3836 = vst.msk [vmem:[#allocation5 + $0x108] sm:$0xff] %vm1190_vm2, %v3820_v40  ;;  %v4406_v47 = vpop.permute.xlu0 %4405  ;;  %v3685_v52 = vmul.f32 %v3652_v51, %v3589_v13 }
 0x8ca   : > { %v4483_v62 = vmul.f32 %v4406_v47, %v4387_v11  ;;  %v4392_v47 = vld [vmem:[#allocation5 + $0x1a8] sm:$0xff]  ;;  %v4401_v11 = vld [vmem:[#allocation5 + $0x1f0] sm:$0xff] }
 0x8cb   : > { %v6337_v54 = vpop.f32.mrb[8].mxu1 }
 0x8cc   : > { %v3825_v4 = vadd.f32 %v6337_v54, %v3680_v48  ;;  %v3662_v44 = vpop.permute.xlu1 %3661  ;;  %v3772_v35 = vpop.f32.mrb[9].mxu1 }
 0x8cd   : > { %v3823_v56 = vadd.f32 %v3772_v35, %v3678_v32  ;;  %v6338_v15 = vpop.f32.mrb[10].mxu1  ;;  %v10563_v25 = vpop.permute.xlu0 %4425  ;;  %v3687_v23 = vmul.f32 %v3662_v44, %v3591_v60 }
 0x8ce   : > { %3841 = vst.msk [vmem:[#allocation5 + $0x130] sm:$0xff] %vm1190_vm2, %v3825_v4  ;;  %v3826_v53 = vadd.f32 %v6338_v15, %v3681_v50  ;;  %v3775_v29 = vpop.f32.mrb[11].mxu1  ;;  %v4393_v50 = vld [vmem:[#allocation5 + $0x1b0] sm:$0xff]  ;;  %v4394_v15 = vld [vmem:[#allocation5 + $0x1b8] sm:$0xff] }
 0x8cf   : > { %3839 = vst.msk [vmem:[#allocation5 + $0x120] sm:$0xff] %vm1190_vm2, %v3823_v56  ;;  %v3824_v1 = vadd.f32 %v3775_v29, %v3679_v57  ;;  %v4391_v57 = vld [vmem:[#allocation5 + $0x1a0] sm:$0xff] }
 0x8d0   : > { %v3672_v20 = vpop.permute.xlu1 %3671  ;;  %3842 = vst.msk [vmem:[#allocation5 + $0x138] sm:$0xff] %vm1190_vm2, %v3826_v53  ;;  %v4487_v53 = vmul.f32 %v10563_v25, %v4391_v57 }
 0x8d1   : > { %3840 = vst.msk [vmem:[#allocation5 + $0x128] sm:$0xff] %vm1190_vm2, %v3824_v1  ;;  %v4436_v28 = vpop.permute.xlu0 %4435  ;;  %v3689_v21 = vmul.f32 %v3672_v20, %v3593_v41 }
 0x8d2   : > { %v4489_v37 = vmul.f32 %v4436_v28, %v4393_v50  ;;  %v4687_v50 = vld [vmem:[#allocation3 + $0x38] sm:$0xff] (!%p5932_p9) }
 0x8d3   : > { %v6341_v58 = vpop.f32.mrb[12].mxu1 }
 0x8d4   : > { %v3829_v5 = vadd.f32 %v6341_v58, %v3684_v0  ;;  %v4411_v16 = vpop.permute.xlu1 %4410  ;;  %v3788_v8 = vpop.f32.mrb[13].mxu1 }
 0x8d5   : > { %v3827_v46 = vadd.f32 %v3788_v8, %v3682_v39  ;;  %v6342_v6 = vpop.f32.mrb[14].mxu1  ;;  %v4484_v17 = vmul.f32 %v4411_v16, %v4388_v12  ;;  %v4446_v2 = vpop.permute.xlu0 %4445  ;;  %v4400_v12 = vld [vmem:[#allocation5 + $0x1e8] sm:$0xff] }
 0x8d6   : > { %3845 = vst.msk [vmem:[#allocation5 + $0x150] sm:$0xff] %vm1190_vm2, %v3829_v5  ;;  %v3830_v43 = vadd.f32 %v6342_v6, %v3685_v52  ;;  %v3791_v3 = vpop.f32.mrb[15].mxu1  ;;  %v4397_v52 = vld [vmem:[#allocation5 + $0x1d0] sm:$0xff]  ;;  %v4398_v6 = vld [vmem:[#allocation5 + $0x1d8] sm:$0xff] }
 0x8d7   : > { %3843 = vst.msk [vmem:[#allocation5 + $0x140] sm:$0xff] %vm1190_vm2, %v3827_v46  ;;  %v3828_v33 = vadd.f32 %v3791_v3, %v3683_v49  ;;  %v4395_v49 = vld [vmem:[#allocation5 + $0x1c0] sm:$0xff] }
 0x8d8   : > { %v4416_v34 = vpop.permute.xlu1 %4415  ;;  %3846 = vst.msk [vmem:[#allocation5 + $0x158] sm:$0xff] %vm1190_vm2, %v3830_v43  ;;  %v4396_v43 = vld [vmem:[#allocation5 + $0x1c8] sm:$0xff]  ;;  %v4491_v3 = vmul.f32 %v4446_v2, %v4395_v49  ;;  %v4683_v2 = vld [vmem:[#allocation3 + $0x18] sm:$0xff] (!%p5932_p9) }
 0x8d9   : > { %3844 = vst.msk [vmem:[#allocation5 + $0x148] sm:$0xff] %vm1190_vm2, %v3828_v33  ;;  %v4485_v27 = vmul.f32 %v4416_v34, %v4389_v26  ;;  %v4456_v29 = vpop.permute.xlu0 %4455 }
 0x8da   : > { %v4493_v31 = vmul.f32 %v4456_v29, %v4397_v52  ;;  %v4691_v29 = vld [vmem:[#allocation3 + $0x58] sm:$0xff] (!%p5932_p9) }
 0x8db   : > { %v6345_v18 = vpop.f32.mrb[16].mxu1 }
 0x8dc   : > { %v3833_v42 = vadd.f32 %v6345_v18, %v3688_v45  ;;  %v4421_v7 = vpop.permute.xlu1 %4420  ;;  %v3804_v63 = vpop.f32.mrb[17].mxu1 }
 0x8dd   : > { %v3831_v55 = vadd.f32 %v3804_v63, %v3686_v9  ;;  %v6346_v38 = vpop.f32.mrb[18].mxu1  ;;  %v4486_v51 = vmul.f32 %v4421_v7, %v4390_v10  ;;  %v4466_v46 = vpop.permute.xlu0 %4465  ;;  %v4402_v10 = vld [vmem:[#allocation5 + $0x1f8] sm:$0xff] }
 0x8de   : > { %3849 = vst.msk [vmem:[#allocation5 + $0x170] sm:$0xff] %vm1190_vm2, %v3833_v42  ;;  %v3834_v59 = vadd.f32 %v6346_v38, %v3689_v21  ;;  %v3807_v14 = vpop.f32.mrb[19].mxu1  ;;  %v4399_v21 = vld [vmem:[#allocation5 + $0x1e0] sm:$0xff] }
 0x8df   : > { %v6365_v40 = vpop.f32.mrb[48].mxu0  ;;  %3847 = vst.msk [vmem:[#allocation5 + $0x160] sm:$0xff] %vm1190_vm2, %v3831_v55  ;;  %v3832_v24 = vadd.f32 %v3807_v14, %v3687_v23 }
 0x8e0   : > { %v4630_v61 = vadd.f32 %v6365_v40, %v4485_v27  ;;  %v4565_v36 = vpop.f32.mrb[49].mxu0  ;;  %v4431_v48 = vpop.permute.xlu1 %4430  ;;  %3850 = vst.msk [vmem:[#allocation5 + $0x178] sm:$0xff] %vm1190_vm2, %v3834_v59  ;;  %v4495_v27 = vmul.f32 %v4466_v46, %v4399_v21 }
 0x8e1   : > { %v4628_v54 = vadd.f32 %v4565_v36, %v4483_v62  ;;  %v6366_v32 = vpop.f32.mrb[50].mxu0  ;;  %3848 = vst.msk [vmem:[#allocation5 + $0x168] sm:$0xff] %vm1190_vm2, %v3832_v24  ;;  %v4488_v19 = vmul.f32 %v4431_v48, %v4392_v47  ;;  %v4476_v42 = vpop.permute.xlu0 %4475  ;;  %v4682_v48 = vld [vmem:[#allocation3 + $0x10] sm:$0xff] (!%p5932_p9)  ;;  %v4688_v47 = vld [vmem:[#allocation3 + $0x40] sm:$0xff] (!%p5932_p9) }
 0x8e2   : > { %4646 = vst.msk [vmem:[#allocation5 + $0x190] sm:$0xff] %vm1190_vm2, %v4630_v61  ;;  %v4631_v4 = vadd.f32 %v6366_v32, %v4486_v51  ;;  %v4568_v44 = vpop.f32.mrb[51].mxu0  ;;  %v4497_v23 = vmul.f32 %v4476_v42, %v4401_v11  ;;  %6861 = vrcp.f32 (!%p5932_p9), %v4682_v48  ;;  %v4681_v32 = vld [vmem:[#allocation3 + $0x8] sm:$0xff] (!%p5932_p9)  ;;  %v4832_v11 = vld [vmem:[#allocation3 + $0xc0] sm:$0xff] (!%p5932_p9) }
 0x8e3   : > { %4644 = vst.msk [vmem:[#allocation5 + $0x180] sm:$0xff] %vm1190_vm2, %v4628_v54  ;;  %v4629_v35 = vadd.f32 %v4568_v44, %v4484_v17  ;;  %v4680_v17 = vld [vmem:[#allocation3] sm:$0xff] (!%p5932_p9)  ;;  %v7349_v54 = vmov (!%p5932_p9), 0  }
 0x8e4   : > { %4647 = vst.msk [vmem:[#allocation5 + $0x198] sm:$0xff] %vm1190_vm2, %v4631_v4  ;;  %v4441_v56 = vpop.permute.xlu1 %4440  ;;  %6860 = vset.pattern.permute.xlu1 (!%p5932_p9), %v7349_v54  ;;  %6859 = vset.pattern.permute.xlu0 (!%p5932_p9), %v7349_v54  ;;  %6863 = vrcp.f32 (!%p5932_p9), %v4680_v17  ;;  %v4685_v4 = vld [vmem:[#allocation3 + $0x28] sm:$0xff] (!%p5932_p9)  ;;  %v4684_v44 = vld [vmem:[#allocation3 + $0x20] sm:$0xff] (!%p5932_p9)  ;;  %v4970_v17 = vld [vmem:[#allocation3 + $0x110] sm:$0xff] (!%p5932_p9) }
 0x8e5   : > { %4645 = vst.msk [vmem:[#allocation5 + $0x188] sm:$0xff] %vm1190_vm2, %v4629_v35  ;;  %v4490_v20 = vmul.f32 %v4441_v56, %v4394_v15  ;;  %6865 = vrcp.f32 (!%p5932_p9), %v4683_v2  ;;  %v4686_v35 = vld [vmem:[#allocation3 + $0x30] sm:$0xff] (!%p5932_p9)  ;;  %v4689_v15 = vld [vmem:[#allocation3 + $0x48] sm:$0xff] (!%p5932_p9) }
 0x8e6   : > { %6867 = vrcp.f32 (!%p5932_p9), %v4681_v32  ;;  %v4973_v54 = vld [vmem:[#allocation3 + $0x128] sm:$0xff] (!%p5932_p9) }
 0x8e7   : > { %v6369_v1 = vpop.f32.mrb[52].mxu0  ;;  %6869 = vrcp.f32 (!%p5932_p9), %v4685_v4  ;;  %v4972_v4 = vld [vmem:[#allocation3 + $0x120] sm:$0xff] (!%p5932_p9) }
 0x8e8   : > { %v4634_v22 = vadd.f32 %v6369_v1, %v4489_v37  ;;  %v4581_v0 = vpop.f32.mrb[53].mxu0  ;;  %v4451_v13 = vpop.permute.xlu1 %4450  ;;  %6871 = vrcp.f32 (!%p5932_p9), %v4684_v44 }
 0x8e9   : > { %v4632_v58 = vadd.f32 %v4581_v0, %v4487_v53  ;;  %v6370_v39 = vpop.f32.mrb[54].mxu0  ;;  %v4492_v60 = vmul.f32 %v4451_v13, %v4396_v43  ;;  %6873 = vrcp.f32 (!%p5932_p9), %v4687_v50  ;;  %v4693_v0 = vld [vmem:[#allocation3 + $0x68] sm:$0xff] (!%p5932_p9)  ;;  %v4826_v43 = vld [vmem:[#allocation3 + $0x90] sm:$0xff] (!%p5932_p9)  ;;  %v4975_v50 = vld [vmem:[#allocation3 + $0x138] sm:$0xff] (!%p5932_p9) }
 0x8ea   : > { %4650 = vst.msk [vmem:[#allocation5 + $0x1b0] sm:$0xff] %vm1190_vm2, %v4634_v22  ;;  %v4635_v5 = vadd.f32 %v6370_v39, %v4490_v20  ;;  %v4584_v16 = vpop.f32.mrb[55].mxu0  ;;  %6875 = vrcp.f32 (!%p5932_p9), %v4686_v35  ;;  %v4690_v20 = vld [vmem:[#allocation3 + $0x50] sm:$0xff] (!%p5932_p9)  ;;  %v4695_v39 = vld [vmem:[#allocation3 + $0x78] sm:$0xff] (!%p5932_p9) }
 0x8eb   : > { %4648 = vst.msk [vmem:[#allocation5 + $0x1a0] sm:$0xff] %vm1190_vm2, %v4632_v58  ;;  %v4633_v8 = vadd.f32 %v4584_v16, %v4488_v19  ;;  %6877 = vrcp.f32 (!%p5932_p9), %v4689_v15  ;;  %v4692_v19 = vld [vmem:[#allocation3 + $0x60] sm:$0xff] (!%p5932_p9)  ;;  %v4694_v16 = vld [vmem:[#allocation3 + $0x70] sm:$0xff] (!%p5932_p9)  ;;  %v4977_v15 = vld [vmem:[#allocation3 + $0x148] sm:$0xff] (!%p5932_p9) }
 0x8ec   : > { %4651 = vst.msk [vmem:[#allocation5 + $0x1b8] sm:$0xff] %vm1190_vm2, %v4635_v5  ;;  %v4461_v25 = vpop.permute.xlu1 %4460  ;;  %v6862_v57 = vpop.eup (!%p5932_p9), %6861  ;;  %6879 = vrcp.f32 (!%p5932_p9), %v4688_v47  ;;  %v4976_v47 = vld [vmem:[#allocation3 + $0x140] sm:$0xff] (!%p5932_p9) }
 0x8ed   : > { %4649 = vst.msk [vmem:[#allocation5 + $0x1a8] sm:$0xff] %vm1190_vm2, %v4633_v8  ;;  %v4494_v34 = vmul.f32 %v4461_v25, %v4398_v6  ;;  %4740 = vperm.xlu1 (!%p5932_p9), %6860, %v6862_v57   ;;  %6881 = vrcp.f32 (!%p5932_p9), %v4691_v29  ;;  %v4825_v8 = vld [vmem:[#allocation3 + $0x88] sm:$0xff] (!%p5932_p9)  ;;  %v4824_v25 = vld [vmem:[#allocation3 + $0x80] sm:$0xff] (!%p5932_p9)  ;;  %v4827_v6 = vld [vmem:[#allocation3 + $0x98] sm:$0xff] (!%p5932_p9) }
 0x8ee   : > { %v6864_v56 = vpop.eup (!%p5932_p9), %6863  ;;  %6883 = vrcp.f32 (!%p5932_p9), %v4690_v20  ;;  %v4974_v57 = vld [vmem:[#allocation3 + $0x130] sm:$0xff] (!%p5932_p9)  ;;  %v4979_v29 = vld [vmem:[#allocation3 + $0x158] sm:$0xff] (!%p5932_p9) }
 0x8ef   : > { %v6373_v33 = vpop.f32.mrb[56].mxu0  ;;  %v6866_v37 = vpop.eup (!%p5932_p9), %6865  ;;  %4730 = vperm.xlu0 (!%p5932_p9), %6859, %v6864_v56   ;;  %6885 = vrcp.f32 (!%p5932_p9), %v4693_v0  ;;  %v4978_v20 = vld [vmem:[#allocation3 + $0x150] sm:$0xff] (!%p5932_p9)  ;;  %v4981_v0 = vld [vmem:[#allocation3 + $0x168] sm:$0xff] (!%p5932_p9) }
 0x8f0   : > { %v4638_v30 = vadd.f32 %v6373_v33, %v4493_v31  ;;  %v4471_v45 = vpop.permute.xlu1 %4470  ;;  %v4597_v41 = vpop.f32.mrb[57].mxu0  ;;  %6887 = vrcp.f32 (!%p5932_p9), %v4692_v19  ;;  %v4829_v33 = vld [vmem:[#allocation3 + $0xa8] sm:$0xff] (!%p5932_p9)  ;;  %v4980_v19 = vld [vmem:[#allocation3 + $0x160] sm:$0xff] (!%p5932_p9) }
 0x8f1   : > { %v4636_v28 = vadd.f32 %v4597_v41, %v4491_v3  ;;  %v6374_v26 = vpop.f32.mrb[58].mxu0  ;;  %v4496_v14 = vmul.f32 %v4471_v45, %v4400_v12  ;;  %v6868_v53 = vpop.eup (!%p5932_p9), %6867  ;;  %4745 = vperm.xlu1 (!%p5932_p9), %6860, %v6866_v37   ;;  %6889 = vrcp.f32 (!%p5932_p9), %v4695_v39  ;;  %v4831_v41 = vld [vmem:[#allocation3 + $0xb8] sm:$0xff] (!%p5932_p9) }
 0x8f2   : > { %4654 = vst.msk [vmem:[#allocation5 + $0x1d0] sm:$0xff] %vm1190_vm2, %v4638_v30  ;;  %v4639_v18 = vadd.f32 %v6374_v26, %v4494_v34  ;;  %v4600_v9 = vpop.f32.mrb[59].mxu0  ;;  %v6870_v1 = vpop.eup (!%p5932_p9), %6869  ;;  %6891 = vrcp.f32 (!%p5932_p9), %v4694_v16  ;;  %v4828_v30 = vld [vmem:[#allocation3 + $0xa0] sm:$0xff] (!%p5932_p9)  ;;  %v4983_v39 = vld [vmem:[#allocation3 + $0x178] sm:$0xff] (!%p5932_p9)  ;;  %v4982_v16 = vld [vmem:[#allocation3 + $0x170] sm:$0xff] (!%p5932_p9) }
 0x8f3   : > { %4652 = vst.msk [vmem:[#allocation5 + $0x1c0] sm:$0xff] %vm1190_vm2, %v4636_v28  ;;  %v4637_v7 = vadd.f32 %v4600_v9, %v4492_v60  ;;  %4735 = vperm.xlu0 (!%p5932_p9), %6859, %v6868_v53   ;;  %v6872_v22 = vpop.eup (!%p5932_p9), %6871  ;;  %6893 = vrcp.f32 (!%p5932_p9), %v4825_v8  ;;  %v4830_v28 = vld [vmem:[#allocation3 + $0xb0] sm:$0xff] (!%p5932_p9)  ;;  %v5113_v8 = vld [vmem:[#allocation3 + $0x188] sm:$0xff] (!%p5932_p9) }
 0x8f4   : > { %4655 = vst.msk [vmem:[#allocation5 + $0x1d8] sm:$0xff] %vm1190_vm2, %v4639_v18  ;;  %v4481_v63 = vpop.permute.xlu1 %4480  ;;  %v6874_v13 = vpop.eup (!%p5932_p9), %6873  ;;  %6895 = vrcp.f32 (!%p5932_p9), %v4824_v25  ;;  %v4833_v18 = vld [vmem:[#allocation3 + $0xc8] sm:$0xff] (!%p5932_p9)  ;;  %v5112_v25 = vld [vmem:[#allocation3 + $0x180] sm:$0xff] (!%p5932_p9) }
 0x8f5   : > { %4653 = vst.msk [vmem:[#allocation5 + $0x1c8] sm:$0xff] %vm1190_vm2, %v4637_v7  ;;  %v4498_v38 = vmul.f32 %v4481_v63, %v4402_v10  ;;  %4755 = vperm.xlu1 (!%p5932_p9), %6860, %v6870_v1   ;;  %v6876_v58 = vpop.eup (!%p5932_p9), %6875  ;;  %6897 = vrcp.f32 (!%p5932_p9), %v4827_v6  ;;  %v4835_v7 = vld [vmem:[#allocation3 + $0xd8] sm:$0xff] (!%p5932_p9)  ;;  %v4834_v10 = vld [vmem:[#allocation3 + $0xd0] sm:$0xff] (!%p5932_p9) }
 0x8f6   : > { %v6878_v5 = vpop.eup (!%p5932_p9), %6877  ;;  %6899 = vrcp.f32 (!%p5932_p9), %v4826_v43  ;;  %v5115_v6 = vld [vmem:[#allocation3 + $0x198] sm:$0xff] (!%p5932_p9)  ;;  %v5114_v43 = vld [vmem:[#allocation3 + $0x190] sm:$0xff] (!%p5932_p9) }
 0x8f7   : > { %v6377_v55 = vpop.f32.mrb[60].mxu0  ;;  %4679 = sbr.rel (%p5932_p9) target bundleno = 2679 (0xa77), region = 68  ;;  %4750 = vperm.xlu0 (!%p5932_p9), %6859, %v6872_v22   ;;  %v6880_v52 = vpop.eup (!%p5932_p9), %6879  ;;  %6901 = vrcp.f32 (!%p5932_p9), %v4829_v33  ;;  %v5117_v33 = vld [vmem:[#allocation3 + $0x1a8] sm:$0xff] (!%p5932_p9) }
 0x8f8   : > { %v4642_v62 = vadd.f32 %v6377_v55, %v4497_v23  ;;  %v4613_v59 = vpop.f32.mrb[61].mxu0  ;;  %v6882_v49 = vpop.eup (!%p5932_p9), %6881  ;;  %6903 = vrcp.f32 (!%p5932_p9), %v4828_v30  ;;  %v4837_v23 = vld [vmem:[#allocation3 + $0xe8] sm:$0xff] (!%p5932_p9)  ;;  %v5116_v30 = vld [vmem:[#allocation3 + $0x1a0] sm:$0xff] (!%p5932_p9) }
 0x8f9   : > { %v4640_v40 = vadd.f32 %v4613_v59, %v4495_v27  ;;  %v6378_v51 = vpop.f32.mrb[62].mxu0  ;;  %4765 = vperm.xlu1 (!%p5932_p9), %6860, %v6874_v13   ;;  %v6884_v46 = vpop.eup (!%p5932_p9), %6883  ;;  %6905 = vrcp.f32 (!%p5932_p9), %v4831_v41  ;;  %v4836_v27 = vld [vmem:[#allocation3 + $0xe0] sm:$0xff] (!%p5932_p9)  ;;  %v4838_v59 = vld [vmem:[#allocation3 + $0xf0] sm:$0xff] (!%p5932_p9)  ;;  %v5119_v41 = vld [vmem:[#allocation3 + $0x1b8] sm:$0xff] (!%p5932_p9) }
 0x8fa   : > { %4658 = vst.msk [vmem:[#allocation5 + $0x1f0] sm:$0xff] %vm1190_vm2, %v4642_v62  ;;  %v4643_v24 = vadd.f32 %v6378_v51, %v4498_v38  ;;  %v4616_v61 = vpop.f32.mrb[63].mxu0  ;;  %v6886_v31 = vpop.eup (!%p5932_p9), %6885  ;;  %6907 = vrcp.f32 (!%p5932_p9), %v4830_v28  ;;  %v4839_v38 = vld [vmem:[#allocation3 + $0xf8] sm:$0xff] (!%p5932_p9)  ;;  %v5118_v28 = vld [vmem:[#allocation3 + $0x1b0] sm:$0xff] (!%p5932_p9) }
 0x8fb   : > { %4656 = vst.msk [vmem:[#allocation5 + $0x1e0] sm:$0xff] %vm1190_vm2, %v4640_v40  ;;  %v4641_v36 = vadd.f32 %v4616_v61, %v4496_v14  ;;  %4760 = vperm.xlu0 (!%p5932_p9), %6859, %v6876_v58   ;;  %v6888_v3 = vpop.eup (!%p5932_p9), %6887  ;;  %6909 = vrcp.f32 (!%p5932_p9), %v4833_v18  ;;  %v4969_v40 = vld [vmem:[#allocation3 + $0x108] sm:$0xff] (!%p5932_p9) }
 0x8fc   : > { %4659 = vst.msk [vmem:[#allocation5 + $0x1f8] sm:$0xff] %vm1190_vm2, %v4643_v24  ;;  %v6890_v34 = vpop.eup (!%p5932_p9), %6889  ;;  %6911 = vrcp.f32 (!%p5932_p9), %v4832_v11  ;;  %v4968_v24 = vld [vmem:[#allocation3 + $0x100] sm:$0xff] (!%p5932_p9)  ;;  %v5121_v18 = vld [vmem:[#allocation3 + $0x1c8] sm:$0xff] (!%p5932_p9) }
 0x8fd   : > { %4657 = vst.msk [vmem:[#allocation5 + $0x1e8] sm:$0xff] %vm1190_vm2, %v4641_v36  ;;  %4775 = vperm.xlu1 (!%p5932_p9), %6860, %v6878_v5   ;;  %v6892_v45 = vpop.eup (!%p5932_p9), %6891  ;;  %6913 = vrcp.f32 (!%p5932_p9), %v4835_v7  ;;  %v4971_v36 = vld [vmem:[#allocation3 + $0x118] sm:$0xff] (!%p5932_p9)  ;;  %v5120_v11 = vld [vmem:[#allocation3 + $0x1c0] sm:$0xff] (!%p5932_p9) }
 0x8fe   : > { %v6894_v60 = vpop.eup %6893  ;;  %6915 = vrcp.f32 %v4834_v10  ;;  %v5123_v7 = vld [vmem:[#allocation3 + $0x1d8] sm:$0xff]  ;;  %v5122_v10 = vld [vmem:[#allocation3 + $0x1d0] sm:$0xff] }
 0x8ff   : > { %4770 = vperm.xlu0 %6859, %v6880_v52   ;;  %v6896_v26 = vpop.eup %6895  ;;  %6917 = vrcp.f32 %v4837_v23  ;;  %v5125_v23 = vld [vmem:[#allocation3 + $0x1e8] sm:$0xff] }
 0x900   : > { %v6898_v9 = vpop.eup %6897  ;;  %6919 = vrcp.f32 %v4836_v27  ;;  %v5124_v27 = vld [vmem:[#allocation3 + $0x1e0] sm:$0xff] }
 0x901   : > { %4785 = vperm.xlu1 %6860, %v6882_v49   ;;  %v6900_v42 = vpop.eup %6899  ;;  %6921 = vrcp.f32 %v4839_v38  ;;  %v5127_v38 = vld [vmem:[#allocation3 + $0x1f8] sm:$0xff] }
 0x902   : > { %v6902_v21 = vpop.eup %6901  ;;  %6923 = vrcp.f32 %v4838_v59  ;;  %v5126_v59 = vld [vmem:[#allocation3 + $0x1f0] sm:$0xff] }
 0x903   : > { %4780 = vperm.xlu0 %6859, %v6884_v46   ;;  %v6904_v63 = vpop.eup %6903  ;;  %6925 = vrcp.f32 %v4969_v40 }
 0x904   : > { %v6906_v12 = vpop.eup %6905  ;;  %6927 = vrcp.f32 %v4968_v24 }
 0x905   : > { %4795 = vperm.xlu1 %6860, %v6886_v31   ;;  %v6908_v55 = vpop.eup %6907  ;;  %6929 = vrcp.f32 %v4971_v36 }
 0x906   : > { %v6910_v62 = vpop.eup %6909  ;;  %6931 = vrcp.f32 %v4970_v17 }
 0x907   : > { %4790 = vperm.xlu0 %6859, %v6888_v3   ;;  %v6912_v14 = vpop.eup %6911  ;;  %6933 = vrcp.f32 %v4973_v54 }
 0x908   : > { %v6914_v51 = vpop.eup %6913  ;;  %6935 = vrcp.f32 %v4972_v4 }
 0x909   : > { %4805 = vperm.xlu1 %6860, %v6890_v34   ;;  %v6916_v61 = vpop.eup %6915  ;;  %6937 = vrcp.f32 %v4975_v50 }
 0x90a   : > { %v6918_v48 = vpop.eup %6917  ;;  %6939 = vrcp.f32 %v4974_v57 }
 0x90b   : > { %4800 = vperm.xlu0 %6859, %v6892_v45   ;;  %v6920_v2 = vpop.eup %6919  ;;  %6941 = vrcp.f32 %v4977_v15 }
 0x90c   : > { %v6922_v32 = vpop.eup %6921  ;;  %6943 = vrcp.f32 %v4976_v47 }
 0x90d   : > { %4879 = vperm.xlu1 %6860, %v6894_v60   ;;  %v6924_v44 = vpop.eup %6923  ;;  %6945 = vrcp.f32 %v4979_v29 }
 0x90e   : > { %v6926_v35 = vpop.eup %6925  ;;  %6947 = vrcp.f32 %v4978_v20  ;;  %v4857_v20 = vld [vmem:[#allocation5 + $0x88] sm:$0xff] }
 0x90f   : > { %4874 = vperm.xlu0 %6859, %v6896_v26   ;;  %v6928_v56 = vpop.eup %6927  ;;  %6949 = vrcp.f32 %v4981_v0 }
 0x910   : > { %v6930_v37 = vpop.eup %6929  ;;  %6951 = vrcp.f32 %v4980_v19 }
 0x911   : > { %4889 = vperm.xlu1 %6860, %v6898_v9   ;;  %v6932_v53 = vpop.eup %6931  ;;  %6953 = vrcp.f32 %v4983_v39  ;;  %v4859_v39 = vld [vmem:[#allocation5 + $0x98] sm:$0xff] }
 0x912   : > { %v6934_v1 = vpop.eup %6933  ;;  %6955 = vrcp.f32 %v4982_v16 }
 0x913   : > { %4884 = vperm.xlu0 %6859, %v6900_v42   ;;  %v6936_v22 = vpop.eup %6935  ;;  %6957 = vrcp.f32 %v5113_v8 }
 0x914   : > { %v6938_v13 = vpop.eup %6937  ;;  %6959 = vrcp.f32 %v5112_v25  ;;  %v4861_v25 = vld [vmem:[#allocation5 + $0xa8] sm:$0xff] }
 0x915   : > { %4899 = vperm.xlu1 %6860, %v6902_v21   ;;  %v6940_v58 = vpop.eup %6939  ;;  %6961 = vrcp.f32 %v5115_v6 }
 0x916   : > { %v6942_v5 = vpop.eup %6941  ;;  %6963 = vrcp.f32 %v5114_v43 }
 0x917   : > { %4894 = vperm.xlu0 %6859, %v6904_v63   ;;  %v6944_v52 = vpop.eup %6943  ;;  %6965 = vrcp.f32 %v5117_v33  ;;  %v4863_v33 = vld [vmem:[#allocation5 + $0xb8] sm:$0xff] }
 0x918   : > { %v6946_v49 = vpop.eup %6945  ;;  %6967 = vrcp.f32 %v5116_v30 }
 0x919   : > { %4909 = vperm.xlu1 %6860, %v6906_v12   ;;  %v6948_v46 = vpop.eup %6947  ;;  %6969 = vrcp.f32 %v5119_v41 }
 0x91a   : > { %v6950_v31 = vpop.eup %6949  ;;  %6971 = vrcp.f32 %v5118_v28  ;;  %v4865_v28 = vld [vmem:[#allocation5 + $0xc8] sm:$0xff] }
 0x91b   : > { %4904 = vperm.xlu0 %6859, %v6908_v55   ;;  %v6952_v3 = vpop.eup %6951  ;;  %6973 = vrcp.f32 %v5121_v18 }
 0x91c   : > { %v6954_v34 = vpop.eup %6953  ;;  %6975 = vrcp.f32 %v5120_v11 }
 0x91d   : > { %4919 = vperm.xlu1 %6860, %v6910_v62   ;;  %v6956_v45 = vpop.eup %6955  ;;  %6977 = vrcp.f32 %v5123_v7  ;;  %v4867_v7 = vld [vmem:[#allocation5 + $0xd8] sm:$0xff] }
 0x91e   : > { %v6958_v60 = vpop.eup %6957  ;;  %6979 = vrcp.f32 %v5122_v10 }
 0x91f   : > { %4914 = vperm.xlu0 %6859, %v6912_v14   ;;  %v6960_v26 = vpop.eup %6959  ;;  %6981 = vrcp.f32 %v5125_v23 }
 0x920   : > { %v6962_v9 = vpop.eup %6961  ;;  %6983 = vrcp.f32 %v5124_v27  ;;  %v4869_v27 = vld [vmem:[#allocation5 + $0xe8] sm:$0xff] }
 0x921   : > { %4929 = vperm.xlu1 %6860, %v6914_v51   ;;  %v6964_v42 = vpop.eup %6963  ;;  %6985 = vrcp.f32 %v5127_v38 }
 0x922   : > { %v6966_v21 = vpop.eup %6965  ;;  %6987 = vrcp.f32 %v5126_v59 }
 0x923   : > { %4924 = vperm.xlu0 %6859, %v6916_v61   ;;  %v6968_v63 = vpop.eup %6967 }
 0x924   : > { %v6970_v12 = vpop.eup %6969 }
 0x925   : > { %4939 = vperm.xlu1 %6860, %v6918_v48   ;;  %v6972_v55 = vpop.eup %6971 }
 0x926   : > { %v6974_v62 = vpop.eup %6973 }
 0x927   : > { %4934 = vperm.xlu0 %6859, %v6920_v2   ;;  %v6976_v14 = vpop.eup %6975 }
 0x928   : > { %v6978_v40 = vpop.eup %6977 }
 0x929   : > { %4949 = vperm.xlu1 %6860, %v6922_v32   ;;  %v6980_v51 = vpop.eup %6979 }
 0x92a   : > { %v6982_v24 = vpop.eup %6981 }
 0x92b   : > { %4944 = vperm.xlu0 %6859, %v6924_v44   ;;  %v6984_v61 = vpop.eup %6983 }
 0x92c   : > { %v6986_v36 = vpop.eup %6985 }
 0x92d   : > { %5023 = vperm.xlu1 %6860, %v6926_v35   ;;  %v6988_v48 = vpop.eup %6987 }
 0x92f   : > { %5018 = vperm.xlu0 %6859, %v6928_v56  }
 0x931   : > { %5033 = vperm.xlu1 %6860, %v6930_v37  }
 0x933   : > { %5028 = vperm.xlu0 %6859, %v6932_v53  }
 0x935   : > { %5043 = vperm.xlu1 %6860, %v6934_v1  }
 0x937   : > { %5038 = vperm.xlu0 %6859, %v6936_v22   ;;  %v4856_v22 = vld [vmem:[#allocation5 + $0x80] sm:$0xff] }
 0x939   : > { %5053 = vperm.xlu1 %6860, %v6938_v13  }
 0x93b   : > { %5048 = vperm.xlu0 %6859, %v6940_v58  }
 0x93d   : > { %5063 = vperm.xlu1 %6860, %v6942_v5   ;;  %v4858_v5 = vld [vmem:[#allocation5 + $0x90] sm:$0xff] }
 0x93f   : > { %5058 = vperm.xlu0 %6859, %v6944_v52  }
 0x941   : > { %5073 = vperm.xlu1 %6860, %v6946_v49  }
 0x943   : > { %5068 = vperm.xlu0 %6859, %v6948_v46   ;;  %v4860_v46 = vld [vmem:[#allocation5 + $0xa0] sm:$0xff] }
 0x945   : > { %5083 = vperm.xlu1 %6860, %v6950_v31  }
 0x947   : > { %5078 = vperm.xlu0 %6859, %v6952_v3  }
 0x949   : > { %5093 = vperm.xlu1 %6860, %v6954_v34   ;;  %v4862_v34 = vld [vmem:[#allocation5 + $0xb0] sm:$0xff] }
 0x94b   : > { %5088 = vperm.xlu0 %6859, %v6956_v45  }
 0x94d   : > { %5167 = vperm.xlu1 %6860, %v6958_v60  }
 0x94f   : > { %5162 = vperm.xlu0 %6859, %v6960_v26   ;;  %v4864_v26 = vld [vmem:[#allocation5 + $0xc0] sm:$0xff] }
 0x951   : > { %5177 = vperm.xlu1 %6860, %v6962_v9  }
 0x953   : > { %5172 = vperm.xlu0 %6859, %v6964_v42  }
 0x955   : > { %5187 = vperm.xlu1 %6860, %v6966_v21   ;;  %v4866_v21 = vld [vmem:[#allocation5 + $0xd0] sm:$0xff] }
 0x957   : > { %5182 = vperm.xlu0 %6859, %v6968_v63  }
 0x959   : > { %5197 = vperm.xlu1 %6860, %v6970_v12  }
 0x95b   : > { %5192 = vperm.xlu0 %6859, %v6972_v55   ;;  %v4868_v55 = vld [vmem:[#allocation5 + $0xe0] sm:$0xff] }
 0x95d   : > { %5207 = vperm.xlu1 %6860, %v6974_v62  }
 0x95f   : > { %5202 = vperm.xlu0 %6859, %v6976_v14  }
 0x961   : > { %5217 = vperm.xlu1 %6860, %v6978_v40   ;;  %v4871_v40 = vld [vmem:[#allocation5 + $0xf8] sm:$0xff] }
 0x963   : > { %5212 = vperm.xlu0 %6859, %v6980_v51   ;;  %v4870_v51 = vld [vmem:[#allocation5 + $0xf0] sm:$0xff] }
 0x965   : > { %5227 = vperm.xlu1 %6860, %v6982_v24  }
 0x967   : > { %5222 = vperm.xlu0 %6859, %v6984_v61  }
 0x969   : > { %5237 = vperm.xlu1 %6860, %v6986_v36  }
 0x96b   : > { %5232 = vperm.xlu0 %6859, %v6988_v48  }
 0x96c   : > { %v10592_v17 = vpop.permute.xlu1 %4740 }
 0x96e   : > { %v10594_v2 = vpop.permute.xlu0 %4730 }
 0x970   : > { %v10596_v54 = vpop.permute.xlu1 %4745 }
 0x972   : > { %v10598_v32 = vpop.permute.xlu0 %4735 }
 0x974   : > { %v10600_v4 = vpop.permute.xlu1 %4755 }
 0x976   : > { %v10602_v44 = vpop.permute.xlu0 %4750 }
 0x978   : > { %v10604_v50 = vpop.permute.xlu1 %4765 }
 0x97a   : > { %v10606_v35 = vpop.permute.xlu0 %4760 }
 0x97c   : > { %v10608_v57 = vpop.permute.xlu1 %4775 }
 0x97e   : > { %v10610_v56 = vpop.permute.xlu0 %4770 }
 0x980   : > { %v10612_v15 = vpop.permute.xlu1 %4785 }
 0x982   : > { %v10614_v37 = vpop.permute.xlu0 %4780 }
 0x984   : > { %v10616_v47 = vpop.permute.xlu1 %4795 }
 0x986   : > { %v10618_v53 = vpop.permute.xlu0 %4790 }
 0x988   : > { %v10620_v29 = vpop.permute.xlu1 %4805 }
 0x98a   : > { %v10622_v1 = vpop.permute.xlu0 %4800 }
 0x98c   : > { %v4880_v0 = vpop.permute.xlu1 %4879 }
 0x98d   : > { %v4953_v13 = vmul.f32 %v4880_v0, %v4857_v20  ;;  %v5001_v20 = vld [vmem:[#allocation5 + $0x108] sm:$0xff] }
 0x98e   : > { %v4875_v19 = vpop.permute.xlu0 %4874 }
 0x98f   : > { %v4952_v58 = vmul.f32 %v4875_v19, %v4856_v22  ;;  %5274 = vrot.lane.b32.xlu1 %v4953_v13, %s7350_s5  ;;  %v5000_v22 = vld [vmem:[#allocation5 + $0x100] sm:$0xff] }
 0x990   : > { %v4890_v16 = vpop.permute.xlu1 %4889 }
 0x991   : > { %5272 = vrot.lane.b32.xlu0 %v4952_v58, %s7350_s5  ;;  %v4955_v52 = vmul.f32 %v4890_v16, %v4859_v39  ;;  %v5003_v39 = vld [vmem:[#allocation5 + $0x118] sm:$0xff] }
 0x992   : > { %v4885_v8 = vpop.permute.xlu0 %4884 }
 0x993   : > { %v4954_v49 = vmul.f32 %v4885_v8, %v4858_v5  ;;  %5278 = vrot.lane.b32.xlu1 %v4955_v52, %s7350_s5  ;;  %v5002_v5 = vld [vmem:[#allocation5 + $0x110] sm:$0xff] }
 0x994   : > { %v4900_v6 = vpop.permute.xlu1 %4899 }
 0x995   : > { %5276 = vrot.lane.b32.xlu0 %v4954_v49, %s7350_s5  ;;  %v4957_v31 = vmul.f32 %v4900_v6, %v4861_v25  ;;  %v5005_v25 = vld [vmem:[#allocation5 + $0x128] sm:$0xff] }
 0x996   : > { %v4895_v43 = vpop.permute.xlu0 %4894 }
 0x997   : > { %v4956_v3 = vmul.f32 %v4895_v43, %v4860_v46  ;;  %5282 = vrot.lane.b32.xlu1 %v4957_v31, %s7350_s5  ;;  %v5004_v46 = vld [vmem:[#allocation5 + $0x120] sm:$0xff] }
 0x998   : > { %v4910_v30 = vpop.permute.xlu1 %4909 }
 0x999   : > { %5280 = vrot.lane.b32.xlu0 %v4956_v3, %s7350_s5  ;;  %v4959_v45 = vmul.f32 %v4910_v30, %v4863_v33  ;;  %v5007_v33 = vld [vmem:[#allocation5 + $0x138] sm:$0xff] }
 0x99a   : > { %v4905_v41 = vpop.permute.xlu0 %4904 }
 0x99b   : > { %v4958_v60 = vmul.f32 %v4905_v41, %v4862_v34  ;;  %5286 = vrot.lane.b32.xlu1 %v4959_v45, %s7350_s5  ;;  %v5006_v34 = vld [vmem:[#allocation5 + $0x130] sm:$0xff] }
 0x99c   : > { %v4920_v18 = vpop.permute.xlu1 %4919 }
 0x99d   : > { %5284 = vrot.lane.b32.xlu0 %v4958_v60, %s7350_s5  ;;  %v4961_v9 = vmul.f32 %v4920_v18, %v4865_v28  ;;  %v5009_v28 = vld [vmem:[#allocation5 + $0x148] sm:$0xff] }
 0x99e   : > { %v4915_v11 = vpop.permute.xlu0 %4914 }
 0x99f   : > { %v4960_v42 = vmul.f32 %v4915_v11, %v4864_v26  ;;  %5290 = vrot.lane.b32.xlu1 %v4961_v9, %s7350_s5  ;;  %v5008_v26 = vld [vmem:[#allocation5 + $0x140] sm:$0xff] }
 0x9a0   : > { %v4930_v10 = vpop.permute.xlu1 %4929 }
 0x9a1   : > { %5288 = vrot.lane.b32.xlu0 %v4960_v42, %s7350_s5  ;;  %v4963_v63 = vmul.f32 %v4930_v10, %v4867_v7  ;;  %v5011_v7 = vld [vmem:[#allocation5 + $0x158] sm:$0xff] }
 0x9a2   : > { %v4925_v23 = vpop.permute.xlu0 %4924 }
 0x9a3   : > { %v4962_v12 = vmul.f32 %v4925_v23, %v4866_v21  ;;  %5294 = vrot.lane.b32.xlu1 %v4963_v63, %s7350_s5  ;;  %v5010_v21 = vld [vmem:[#allocation5 + $0x150] sm:$0xff] }
 0x9a4   : > { %v4940_v38 = vpop.permute.xlu1 %4939 }
 0x9a5   : > { %5292 = vrot.lane.b32.xlu0 %v4962_v12, %s7350_s5  ;;  %v4965_v62 = vmul.f32 %v4940_v38, %v4869_v27  ;;  %v5013_v27 = vld [vmem:[#allocation5 + $0x168] sm:$0xff] }
 0x9a6   : > { %v4935_v59 = vpop.permute.xlu0 %4934 }
 0x9a7   : > { %v4964_v14 = vmul.f32 %v4935_v59, %v4868_v55  ;;  %5298 = vrot.lane.b32.xlu1 %v4965_v62, %s7350_s5  ;;  %v5012_v55 = vld [vmem:[#allocation5 + $0x160] sm:$0xff] }
 0x9a8   : > { %v4950_v24 = vpop.permute.xlu1 %4949 }
 0x9a9   : > { %5296 = vrot.lane.b32.xlu0 %v4964_v14, %s7350_s5  ;;  %v4967_v61 = vmul.f32 %v4950_v24, %v4871_v40  ;;  %v5015_v40 = vld [vmem:[#allocation5 + $0x178] sm:$0xff] }
 0x9aa   : > { %v4945_v36 = vpop.permute.xlu0 %4944 }
 0x9ab   : > { %v4966_v48 = vmul.f32 %v4945_v36, %v4870_v51  ;;  %5302 = vrot.lane.b32.xlu1 %v4967_v61, %s7350_s5  ;;  %v5014_v51 = vld [vmem:[#allocation5 + $0x170] sm:$0xff] }
 0x9ac   : > { %v5024_v0 = vpop.permute.xlu1 %5023 }
 0x9ad   : > { %5300 = vrot.lane.b32.xlu0 %v4966_v48, %s7350_s5  ;;  %v5097_v13 = vmul.f32 %v5024_v0, %v5001_v20  ;;  %v5145_v20 = vld [vmem:[#allocation5 + $0x188] sm:$0xff] }
 0x9ae   : > { %v5019_v19 = vpop.permute.xlu0 %5018 }
 0x9af   : > { %v5096_v58 = vmul.f32 %v5019_v19, %v5000_v22  ;;  %5338 = vrot.lane.b32.xlu1 %v5097_v13, %s7351_s18  ;;  %v5144_v22 = vld [vmem:[#allocation5 + $0x180] sm:$0xff] }
 0x9b0   : > { %v5034_v16 = vpop.permute.xlu1 %5033 }
 0x9b1   : > { %5336 = vrot.lane.b32.xlu0 %v5096_v58, %s7351_s18  ;;  %v5099_v52 = vmul.f32 %v5034_v16, %v5003_v39  ;;  %v5147_v39 = vld [vmem:[#allocation5 + $0x198] sm:$0xff] }
 0x9b2   : > { %v5029_v8 = vpop.permute.xlu0 %5028 }
 0x9b3   : > { %v5098_v49 = vmul.f32 %v5029_v8, %v5002_v5  ;;  %5342 = vrot.lane.b32.xlu1 %v5099_v52, %s7351_s18  ;;  %v5146_v5 = vld [vmem:[#allocation5 + $0x190] sm:$0xff] }
 0x9b4   : > { %v5044_v6 = vpop.permute.xlu1 %5043 }
 0x9b5   : > { %5340 = vrot.lane.b32.xlu0 %v5098_v49, %s7351_s18  ;;  %v5101_v31 = vmul.f32 %v5044_v6, %v5005_v25  ;;  %v5149_v25 = vld [vmem:[#allocation5 + $0x1a8] sm:$0xff] }
 0x9b6   : > { %v5039_v43 = vpop.permute.xlu0 %5038 }
 0x9b7   : > { %v5100_v3 = vmul.f32 %v5039_v43, %v5004_v46  ;;  %5346 = vrot.lane.b32.xlu1 %v5101_v31, %s7351_s18  ;;  %v5148_v46 = vld [vmem:[#allocation5 + $0x1a0] sm:$0xff] }
 0x9b8   : > { %v5054_v30 = vpop.permute.xlu1 %5053 }
 0x9b9   : > { %5344 = vrot.lane.b32.xlu0 %v5100_v3, %s7351_s18  ;;  %v5103_v45 = vmul.f32 %v5054_v30, %v5007_v33  ;;  %v5151_v33 = vld [vmem:[#allocation5 + $0x1b8] sm:$0xff] }
 0x9ba   : > { %v5049_v41 = vpop.permute.xlu0 %5048 }
 0x9bb   : > { %v5102_v60 = vmul.f32 %v5049_v41, %v5006_v34  ;;  %5350 = vrot.lane.b32.xlu1 %v5103_v45, %s7351_s18  ;;  %v5150_v34 = vld [vmem:[#allocation5 + $0x1b0] sm:$0xff] }
 0x9bc   : > { %v5064_v18 = vpop.permute.xlu1 %5063 }
 0x9bd   : > { %5348 = vrot.lane.b32.xlu0 %v5102_v60, %s7351_s18  ;;  %v5105_v9 = vmul.f32 %v5064_v18, %v5009_v28  ;;  %v5153_v28 = vld [vmem:[#allocation5 + $0x1c8] sm:$0xff] }
 0x9be   : > { %v5059_v11 = vpop.permute.xlu0 %5058 }
 0x9bf   : > { %v5104_v42 = vmul.f32 %v5059_v11, %v5008_v26  ;;  %5354 = vrot.lane.b32.xlu1 %v5105_v9, %s7351_s18  ;;  %v5152_v26 = vld [vmem:[#allocation5 + $0x1c0] sm:$0xff] }
 0x9c0   : > { %v5074_v10 = vpop.permute.xlu1 %5073 }
 0x9c1   : > { %5352 = vrot.lane.b32.xlu0 %v5104_v42, %s7351_s18  ;;  %v5107_v63 = vmul.f32 %v5074_v10, %v5011_v7  ;;  %v5155_v7 = vld [vmem:[#allocation5 + $0x1d8] sm:$0xff] }
 0x9c2   : > { %v5069_v23 = vpop.permute.xlu0 %5068 }
 0x9c3   : > { %v5106_v12 = vmul.f32 %v5069_v23, %v5010_v21  ;;  %5358 = vrot.lane.b32.xlu1 %v5107_v63, %s7351_s18  ;;  %v5154_v21 = vld [vmem:[#allocation5 + $0x1d0] sm:$0xff] }
 0x9c4   : > { %v5084_v38 = vpop.permute.xlu1 %5083 }
 0x9c5   : > { %5356 = vrot.lane.b32.xlu0 %v5106_v12, %s7351_s18  ;;  %v5109_v62 = vmul.f32 %v5084_v38, %v5013_v27  ;;  %v5157_v27 = vld [vmem:[#allocation5 + $0x1e8] sm:$0xff] }
 0x9c6   : > { %v5079_v59 = vpop.permute.xlu0 %5078 }
 0x9c7   : > { %v5108_v14 = vmul.f32 %v5079_v59, %v5012_v55  ;;  %5362 = vrot.lane.b32.xlu1 %v5109_v62, %s7351_s18  ;;  %v5156_v55 = vld [vmem:[#allocation5 + $0x1e0] sm:$0xff] }
 0x9c8   : > { %v5094_v24 = vpop.permute.xlu1 %5093 }
 0x9c9   : > { %5360 = vrot.lane.b32.xlu0 %v5108_v14, %s7351_s18  ;;  %v5111_v61 = vmul.f32 %v5094_v24, %v5015_v40  ;;  %v5159_v40 = vld [vmem:[#allocation5 + $0x1f8] sm:$0xff] }
 0x9ca   : > { %v5089_v36 = vpop.permute.xlu0 %5088 }
 0x9cb   : > { %v5110_v48 = vmul.f32 %v5089_v36, %v5014_v51  ;;  %5366 = vrot.lane.b32.xlu1 %v5111_v61, %s7351_s18  ;;  %v5158_v51 = vld [vmem:[#allocation5 + $0x1f0] sm:$0xff] }
 0x9cc   : > { %v5168_v0 = vpop.permute.xlu1 %5167 }
 0x9cd   : > { %5364 = vrot.lane.b32.xlu0 %v5110_v48, %s7351_s18  ;;  %v5241_v13 = vmul.f32 %v5168_v0, %v5145_v20 }
 0x9ce   : > { %v5163_v19 = vpop.permute.xlu0 %5162 }
 0x9cf   : > { %v5240_v58 = vmul.f32 %v5163_v19, %v5144_v22  ;;  %5402 = vrot.lane.b32.xlu1 %v5241_v13, %s7352_s9 }
 0x9d0   : > { %v5178_v16 = vpop.permute.xlu1 %5177 }
 0x9d1   : > { %5400 = vrot.lane.b32.xlu0 %v5240_v58, %s7352_s9  ;;  %v5243_v52 = vmul.f32 %v5178_v16, %v5147_v39 }
 0x9d2   : > { %v5173_v8 = vpop.permute.xlu0 %5172 }
 0x9d3   : > { %v5242_v49 = vmul.f32 %v5173_v8, %v5146_v5  ;;  %5406 = vrot.lane.b32.xlu1 %v5243_v52, %s7352_s9 }
 0x9d4   : > { %v5188_v6 = vpop.permute.xlu1 %5187 }
 0x9d5   : > { %5404 = vrot.lane.b32.xlu0 %v5242_v49, %s7352_s9  ;;  %v5245_v31 = vmul.f32 %v5188_v6, %v5149_v25  ;;  %v4727_v25 = vld [vmem:[#allocation5 + $0x78] sm:$0xff]  ;;  %v4726_v6 = vld [vmem:[#allocation5 + $0x70] sm:$0xff] }
 0x9d6   : > { %v5183_v43 = vpop.permute.xlu0 %5182 }
 0x9d7   : > { %v5244_v3 = vmul.f32 %v5183_v43, %v5148_v46  ;;  %5410 = vrot.lane.b32.xlu1 %v5245_v31, %s7352_s9  ;;  %v4823_v43 = vmul.f32 %v10620_v29, %v4727_v25 }
 0x9d8   : > { %v5198_v30 = vpop.permute.xlu1 %5197 }
 0x9d9   : > { %5408 = vrot.lane.b32.xlu0 %v5244_v3, %s7352_s9  ;;  %v5247_v45 = vmul.f32 %v5198_v30, %v5151_v33  ;;  %v4822_v3 = vmul.f32 %v10622_v1, %v4726_v6 }
 0x9da   : > { %v5193_v41 = vpop.permute.xlu0 %5192 }
 0x9db   : > { %v5246_v60 = vmul.f32 %v5193_v41, %v5150_v34  ;;  %5414 = vrot.lane.b32.xlu1 %v5247_v45, %s7352_s9 }
 0x9dc   : > { %v5208_v18 = vpop.permute.xlu1 %5207 }
 0x9dd   : > { %5412 = vrot.lane.b32.xlu0 %v5246_v60, %s7352_s9  ;;  %v5249_v9 = vmul.f32 %v5208_v18, %v5153_v28 }
 0x9de   : > { %v5203_v11 = vpop.permute.xlu0 %5202 }
 0x9df   : > { %v5248_v42 = vmul.f32 %v5203_v11, %v5152_v26  ;;  %5418 = vrot.lane.b32.xlu1 %v5249_v9, %s7352_s9 }
 0x9e0   : > { %v5218_v10 = vpop.permute.xlu1 %5217 }
 0x9e1   : > { %5416 = vrot.lane.b32.xlu0 %v5248_v42, %s7352_s9  ;;  %v5251_v63 = vmul.f32 %v5218_v10, %v5155_v7 }
 0x9e2   : > { %v5213_v23 = vpop.permute.xlu0 %5212 }
 0x9e3   : > { %v5250_v12 = vmul.f32 %v5213_v23, %v5154_v21  ;;  %5422 = vrot.lane.b32.xlu1 %v5251_v63, %s7352_s9  ;;  %v4714_v23 = vld [vmem:[#allocation5 + $0x10] sm:$0xff] }
 0x9e4   : > { %v5228_v38 = vpop.permute.xlu1 %5227 }
 0x9e5   : > { %5420 = vrot.lane.b32.xlu0 %v5250_v12, %s7352_s9  ;;  %v5253_v62 = vmul.f32 %v5228_v38, %v5157_v27  ;;  %v4712_v12 = vld [vmem:[#allocation5] sm:$0xff]  ;;  %v4713_v27 = vld [vmem:[#allocation5 + $0x8] sm:$0xff] }
 0x9e6   : > { %v5223_v59 = vpop.permute.xlu0 %5222  ;;  %v4717_v38 = vld [vmem:[#allocation5 + $0x28] sm:$0xff] }
 0x9e7   : > { %v5252_v14 = vmul.f32 %v5223_v59, %v5156_v55  ;;  %5426 = vrot.lane.b32.xlu1 %v5253_v62, %s7352_s9  ;;  %v4715_v55 = vld [vmem:[#allocation5 + $0x18] sm:$0xff]  ;;  %v4716_v62 = vld [vmem:[#allocation5 + $0x20] sm:$0xff] }
 0x9e8   : > { %v5238_v24 = vpop.permute.xlu1 %5237  ;;  %v4719_v59 = vld [vmem:[#allocation5 + $0x38] sm:$0xff]  ;;  %v4811_v6 = vmul.f32 %v10596_v54, %v4715_v55  ;;  %v10749_v55 = vld [vmem:[#allocation14 + $0x8] ss:$0 sm:$0xff] }
 0x9e9   : > { %5424 = vrot.lane.b32.xlu0 %v5252_v14, %s7352_s9  ;;  %v5255_v61 = vmul.f32 %v5238_v24, %v5159_v40  ;;  %v4718_v14 = vld [vmem:[#allocation5 + $0x30] sm:$0xff]  ;;  %v4808_v24 = vmul.f32 %v10594_v2, %v4712_v12 }
 0x9ea   : > { %v5233_v36 = vpop.permute.xlu0 %5232  ;;  %v4814_v2 = vmul.f32 %v10606_v35, %v4718_v14 }
 0x9eb   : > { %v5254_v48 = vmul.f32 %v5233_v36, %v5158_v51  ;;  %5430 = vrot.lane.b32.xlu1 %v5255_v61, %s7352_s9  ;;  %v4810_v51 = vmul.f32 %v10592_v17, %v4714_v23  ;;  %v4809_v61 = vmul.f32 %v10598_v32, %v4713_v27  ;;  %v4721_v36 = vld [vmem:[#allocation5 + $0x48] sm:$0xff]  ;;  %v4815_v17 = vmul.f32 %v10604_v50, %v4719_v59  ;;  %v4724_v32 = vld [vmem:[#allocation5 + $0x60] sm:$0xff] }
 0x9ec   : > { %v4725_v23 = vld [vmem:[#allocation5 + $0x68] sm:$0xff]  ;;  %v4817_v27 = vmul.f32 %v10608_v57, %v4721_v36 }
 0x9ed   : > { %5428 = vrot.lane.b32.xlu0 %v5254_v48, %s7352_s9  ;;  %v4720_v48 = vld [vmem:[#allocation5 + $0x40] sm:$0xff]  ;;  %v4821_v57 = vmul.f32 %v10616_v47, %v4725_v23 }
 0x9ee   : > { %v4816_v54 = vmul.f32 %v10610_v56, %v4720_v48  ;;  %v4820_v56 = vmul.f32 %v10618_v53, %v4724_v32 }
 0xa01   : > { %v10672_v20 = vpop.permute.xlu1 %5274 }
 0xa02   : > { %v5449_v12 = vsel %vm1190_vm2, %v4809_v61, %v10672_v20 }
 0xa03   : > { %v10674_v22 = vpop.permute.xlu0 %5272 }
 0xa05   : > { %v10676_v0 = vpop.permute.xlu1 %5278 }
 0xa06   : > { %v5451_v14 = vsel %vm1190_vm2, %v4811_v6, %v10676_v0 }
 0xa07   : > { %v10678_v13 = vpop.permute.xlu0 %5276 }
 0xa09   : > { %v10680_v19 = vpop.permute.xlu1 %5282 }
 0xa0b   : > { %v10682_v58 = vpop.permute.xlu0 %5280 }
 0xa0d   : > { %v10684_v39 = vpop.permute.xlu1 %5286 }
 0xa0f   : > { %v10686_v5 = vpop.permute.xlu0 %5284 }
 0xa11   : > { %v10688_v16 = vpop.permute.xlu1 %5290 }
 0xa13   : > { %v10690_v52 = vpop.permute.xlu0 %5288 }
 0xa15   : > { %v10692_v8 = vpop.permute.xlu1 %5294 }
 0xa17   : > { %v10694_v49 = vpop.permute.xlu0 %5292 }
 0xa19   : > { %v10696_v46 = vpop.permute.xlu1 %5298 }
 0xa1b   : > { %v10698_v31 = vpop.permute.xlu0 %5296 }
 0xa1d   : > { %v5303_v33 = vpop.permute.xlu1 %5302 }
 0xa1e   : > { %v10703_v34 = vsel %vm1190_vm2, %v4823_v43, %v5303_v33  ;;  %v4813_v43 = vmul.f32 %v10600_v4, %v4717_v38  ;;  %v4723_v33 = vld [vmem:[#allocation5 + $0x58] sm:$0xff]  ;;  %v5448_v4 = vsel %vm1190_vm2, %v4808_v24, %v10674_v22 }
 0xa1f   : > { %v5301_v30 = vpop.permute.xlu0 %5300  ;;  %v4819_v35 = vmul.f32 %v10612_v15, %v4723_v33  ;;  %v5450_v15 = vsel %vm1190_vm2, %v4810_v51, %v10678_v13  ;;  %v5455_v13 = vsel %vm1190_vm2, %v4815_v17, %v10684_v39  ;;  %v5457_v39 = vsel %vm1190_vm2, %v4817_v27, %v10688_v16 }
 0xa20   : > { %v10706_v45 = vsel %vm1190_vm2, %v4822_v3, %v5301_v30  ;;  %v4812_v3 = vmul.f32 %v10602_v44, %v4716_v62  ;;  %v4722_v30 = vld [vmem:[#allocation5 + $0x50] sm:$0xff]  ;;  %v5453_v47 = vsel %vm1190_vm2, %v4813_v43, %v10680_v19  ;;  %v5456_v33 = vsel %vm1190_vm2, %v4816_v54, %v10690_v52 }
 0xa21   : > { %v5339_v41 = vpop.permute.xlu1 %5338  ;;  %v4818_v38 = vmul.f32 %v10614_v37, %v4722_v30  ;;  %v5459_v16 = vsel %vm1190_vm2, %v4819_v35, %v10692_v8  ;;  %v5461_v8 = vsel %vm1190_vm2, %v4821_v57, %v10696_v46 }
 0xa22   : > { %v5466_v44 = vsel %vm5464_vm9, %v5449_v12, %v5339_v41  ;;  %v5452_v53 = vsel %vm1190_vm2, %v4812_v3, %v10682_v58  ;;  %v5454_v58 = vsel %vm1190_vm2, %v4814_v2, %v10686_v5 }
 0xa23   : > { %v5337_v60 = vpop.permute.xlu0 %5336  ;;  %v5458_v52 = vsel %vm1190_vm2, %v4818_v38, %v10694_v49 }
 0xa24   : > { %v5465_v62 = vsel %vm5464_vm9, %v5448_v4, %v5337_v60 }
 0xa25   : > { %v5343_v28 = vpop.permute.xlu1 %5342 }
 0xa26   : > { %v5468_v24 = vsel %vm5464_vm9, %v5451_v14, %v5343_v28 }
 0xa27   : > { %v10708_v26 = vpop.permute.xlu0 %5340 }
 0xa28   : > { %v5467_v51 = vsel %vm5464_vm9, %v5450_v15, %v10708_v26 }
 0xa29   : > { %v10710_v18 = vpop.permute.xlu1 %5346 }
 0xa2a   : > { %v5470_v5 = vsel %vm5464_vm9, %v5453_v47, %v10710_v18 }
 0xa2b   : > { %v10712_v9 = vpop.permute.xlu0 %5344 }
 0xa2c   : > { %v5469_v2 = vsel %vm5464_vm9, %v5452_v53, %v10712_v9 }
 0xa2d   : > { %v10714_v29 = vpop.permute.xlu1 %5350 }
 0xa2e   : > { %v5472_v49 = vsel %vm5464_vm9, %v5455_v13, %v10714_v29 }
 0xa2f   : > { %v10716_v1 = vpop.permute.xlu0 %5348 }
 0xa30   : > { %v5471_v46 = vsel %vm5464_vm9, %v5454_v58, %v10716_v1 }
 0xa31   : > { %v10718_v11 = vpop.permute.xlu1 %5354 }
 0xa32   : > { %v5474_v38 = vsel %vm5464_vm9, %v5457_v39, %v10718_v11 }
 0xa33   : > { %v10720_v42 = vpop.permute.xlu0 %5352 }
 0xa35   : > { %v10722_v7 = vpop.permute.xlu1 %5358 }
 0xa36   : > { %v5476_v1 = vsel %vm5464_vm9, %v5459_v16, %v10722_v7 }
 0xa37   : > { %v10724_v21 = vpop.permute.xlu0 %5356 }
 0xa39   : > { %v10726_v10 = vpop.permute.xlu1 %5362 }
 0xa3b   : > { %v10728_v63 = vpop.permute.xlu0 %5360 }
 0xa3d   : > { %v10730_v40 = vpop.permute.xlu1 %5366 }
 0xa3e   : > { %v10852_v47 = vsel %vm5464_vm9, %v10703_v34, %v10730_v40 }
 0xa3f   : > { %v10735_v25 = vpop.permute.xlu0 %5364 }
 0xa41   : > { %v5403_v50 = vpop.permute.xlu1 %5402 }
 0xa42   : > { %v5483_v20 = vsel %vm5481_vm10, %v5466_v44, %v5403_v50  ;;  %v5460_v44 = vsel %vm1190_vm2, %v4820_v56, %v10698_v31  ;;  %v5473_v31 = vsel %vm5464_vm9, %v5456_v33, %v10720_v42  ;;  %v5478_v42 = vsel %vm5464_vm9, %v5461_v8, %v10726_v10 }
 0xa43   : > { %v5401_v59 = vpop.permute.xlu0 %5400  ;;  %v5500_v22 = vsel %vm5498_vm11, %v5483_v20, 0.0  ;;  %v5477_v7 = vsel %vm5464_vm9, %v5460_v44, %v10728_v63 }
 0xa44   : > { %v5482_v41 = vsel %vm5481_vm10, %v5465_v62, %v5401_v59  ;;  %v10764_v37 = vadd.f32 %v10749_v55, %v5500_v22 }
 0xa45   : > { %v5499_v60 = vsel %vm5498_vm11, %v5482_v41, 0.0  ;;  %v5407_v0 = vpop.permute.xlu1 %5406  ;;  %v5475_v41 = vsel %vm5464_vm9, %v5458_v52, %v10724_v21 }
 0xa46   : > { %v10773_v61 = vadd.f32 %v10749_v55, %v5499_v60  ;;  %v5554_v36 = vmul.f32 1.442695, %v10764_v37  ;;  %v5485_v48 = vsel %vm5481_vm10, %v5468_v24, %v5407_v0  ;;  %vm5537_vm2 = vcmp.gt.f32.partialorder %v10764_v37, 0.0 }
 0xa47   : > { %v5405_v19 = vpop.permute.xlu0 %5404  ;;  %v5502_v6 = vsel %vm5498_vm11, %v5485_v48, 0.0 }
 0xa48   : > { %v5552_v28 = vmul.f32 1.442695, %v10773_v61  ;;  %v5484_v43 = vsel %vm5481_vm10, %v5467_v51, %v5405_v19  ;;  %6989 = vpow2.f32 %v5554_v36  ;;  %v10789_v26 = vadd.f32 %v10749_v55, %v5502_v6 }
 0xa49   : > { %v5501_v3 = vsel %vm5498_vm11, %v5484_v43, 0.0  ;;  %v5411_v17 = vpop.permute.xlu1 %5410  ;;  %vm5536_vm12 = vcmp.gt.f32.partialorder %v10773_v61, 0.0 }
 0xa4a   : > { %6991 = vpow2.f32 %v5552_v28  ;;  %v10797_v30 = vadd.f32 %v10749_v55, %v5501_v3  ;;  %v5558_v23 = vmul.f32 1.442695, %v10789_v26  ;;  %v5487_v32 = vsel %vm5481_vm10, %v5470_v5, %v5411_v17 }
 0xa4b   : > { %v5409_v12 = vpop.permute.xlu0 %5408  ;;  %v5504_v27 = vsel %vm5498_vm11, %v5487_v32, 0.0  ;;  %v5479_v28 = vsel %vm5464_vm9, %v10706_v45, %v10735_v25  ;;  %vm5539_vm13 = vcmp.gt.f32.partialorder %v10789_v26, 0.0 }
 0xa4c   : > { %v5556_v18 = vmul.f32 1.442695, %v10797_v30  ;;  %v5486_v54 = vsel %vm5481_vm10, %v5469_v2, %v5409_v12  ;;  %6993 = vpow2.f32 %v5558_v23  ;;  %v10813_v9 = vadd.f32 %v10749_v55, %v5504_v27 }
 0xa4d   : > { %v5503_v4 = vsel %vm5498_vm11, %v5486_v54, 0.0  ;;  %v5415_v35 = vpop.permute.xlu1 %5414  ;;  %vm5538_vm14 = vcmp.gt.f32.partialorder %v10797_v30, 0.0 }
 0xa4e   : > { %6995 = vpow2.f32 %v5556_v18  ;;  %v10821_v50 = vadd.f32 %v10749_v55, %v5503_v4  ;;  %v5562_v62 = vmul.f32 1.442695, %v10813_v9  ;;  %v5489_v20 = vsel %vm5481_vm10, %v5472_v49, %v5415_v35 }
 0xa4f   : > { %v5413_v59 = vpop.permute.xlu0 %5412  ;;  %v5506_v57 = vsel %vm5498_vm11, %v5489_v20, 0.0  ;;  %vm5541_vm15 = vcmp.gt.f32.partialorder %v10813_v9, 0.0 }
 0xa50   : > { %v5560_v29 = vmul.f32 1.442695, %v10821_v50  ;;  %v5488_v56 = vsel %vm5481_vm10, %v5471_v46, %v5413_v59  ;;  %6997 = vpow2.f32 %v5562_v62  ;;  %v10837_v11 = vadd.f32 %v10749_v55, %v5506_v57 }
 0xa51   : > { %v5505_v22 = vsel %vm5498_vm11, %v5488_v56, 0.0  ;;  %v5419_v15 = vpop.permute.xlu1 %5418  ;;  %vm5540_vm0 = vcmp.gt.f32.partialorder %v10821_v50, 0.0 }
 0xa52   : > { %6999 = vpow2.f32 %v5560_v29  ;;  %v10845_v14 = vadd.f32 %v10749_v55, %v5505_v22  ;;  %v6990_v60 = vpop.eup %6989  ;;  %v5566_v53 = vmul.f32 1.442695, %v10837_v11  ;;  %v5491_v21 = vsel %vm5481_vm10, %v5474_v38, %v5419_v15 }
 0xa53   : > { %v5417_v24 = vpop.permute.xlu0 %5416  ;;  %v5935_v0 = vadd.f32 -1.0, %v6990_v60  ;;  %v5508_v51 = vsel %vm5498_vm11, %v5491_v21, 0.0  ;;  %vm5543_vm1 = vcmp.gt.f32.partialorder %v10837_v11, 0.0 }
 0xa54   : > { %v6992_v10 = vpop.eup %6991  ;;  %v5564_v13 = vmul.f32 1.442695, %v10845_v14  ;;  %7001 = vpow2.f32 %v5566_v53  ;;  %v10860_v63 = vadd.f32 %v10749_v55, %v5508_v51  ;;  %v5490_v34 = vsel %vm5481_vm10, %v5473_v31, %v5417_v24 }
 0xa55   : > { %v5934_v36 = vadd.f32 -1.0, %v6992_v10  ;;  %v5601_v40 = vsel %vm5537_vm2, %v10764_v37, %v5935_v0  ;;  %v5507_v48 = vsel %vm5498_vm11, %v5490_v34, 0.0  ;;  %v5423_v19 = vpop.permute.xlu1 %5422  ;;  %vm5542_vm3 = vcmp.gt.f32.partialorder %v10845_v14, 0.0 }
 0xa56   : > { %7003 = vpow2.f32 %v5564_v13  ;;  %v6994_v58 = vpop.eup %6993  ;;  %v5570_v43 = vmul.f32 1.442695, %v10860_v63  ;;  %v10872_v39 = vadd.f32 %v10749_v55, %v5507_v48  ;;  %v5493_v17 = vsel %vm5481_vm10, %v5476_v1, %v5423_v19 }
 0xa57   : > { %v5600_v6 = vsel %vm5536_vm12, %v10773_v61, %v5934_v36  ;;  %v5421_v37 = vpop.permute.xlu0 %5420  ;;  %v5937_v5 = vadd.f32 -1.0, %v6994_v58  ;;  %v5510_v61 = vsel %vm5498_vm11, %v5493_v17, 0.0  ;;  %vm5545_vm4 = vcmp.gt.f32.partialorder %v10860_v63, 0.0 }
 0xa58   : > { %v6996_v3 = vpop.eup %6995  ;;  %v5994_v33 = vpack.c.bf16 %v5601_v40, %v5600_v6  ;;  %v5492_v16 = vsel %vm5481_vm10, %v5475_v41, %v5421_v37  ;;  %7005 = vpow2.f32 %v5570_v43  ;;  %v5568_v45 = vmul.f32 1.442695, %v10872_v39 }
 0xa59   : > { %v5936_v2 = vadd.f32 -1.0, %v6996_v3  ;;  %v5603_v25 = vsel %vm5539_vm13, %v10789_v26, %v5937_v5  ;;  %v5509_v23 = vsel %vm5498_vm11, %v5492_v16, 0.0  ;;  %v5427_v32 = vpop.permute.xlu1 %5426  ;;  %v10885_v18 = vadd.f32 %v10749_v55, %v5510_v61 }
 0xa5a   : > { %5995 = vst [vmem:[%s7794_s16] sm:$0xff] %v5994_v33   ;;  %v6998_v12 = vpop.eup %6997  ;;  %7007 = vpow2.f32 %v5568_v45  ;;  %v10888_v27 = vadd.f32 %v10749_v55, %v5509_v23  ;;  %v5495_v44 = vsel %vm5481_vm10, %v5478_v42, %v5427_v32  ;;  %vm5544_vm5 = vcmp.gt.f32.partialorder %v10872_v39, 0.0 }
 0xa5b   : > { %v5602_v52 = vsel %vm5538_vm14, %v10797_v30, %v5936_v2  ;;  %v5425_v54 = vpop.permute.xlu0 %5424  ;;  %v5939_v4 = vadd.f32 -1.0, %v6998_v12  ;;  %v5574_v35 = vmul.f32 1.442695, %v10885_v18  ;;  %v5512_v62 = vsel %vm5498_vm11, %v5495_v44, 0.0 }
 0xa5c   : > { %v7000_v26 = vpop.eup %6999  ;;  %v5999_v8 = vpack.c.bf16 %v5603_v25, %v5602_v52  ;;  %v5494_v49 = vsel %vm5481_vm10, %v5477_v7, %v5425_v54  ;;  %v5572_v38 = vmul.f32 1.442695, %v10888_v27  ;;  %v5533_v57 = vadd.f32 %v10749_v55, %v5512_v62 }
 0xa5d   : > { %v5938_v30 = vadd.f32 -1.0, %v7000_v26  ;;  %v5605_v46 = vsel %vm5541_vm15, %v10813_v9, %v5939_v4  ;;  %v5511_v20 = vsel %vm5498_vm11, %v5494_v49, 0.0  ;;  %v5431_v59 = vpop.permute.xlu1 %5430  ;;  %7009 = vpow2.f32 %v5574_v35 }
 0xa5e   : > { %6031 = vst [vmem:[%s7794_s16 + $0x8] sm:$0xff] %v5999_v8   ;;  %v7002_v31 = vpop.eup %7001  ;;  %v5532_v56 = vadd.f32 %v10749_v55, %v5511_v20  ;;  %7011 = vpow2.f32 %v5572_v38  ;;  %v5497_v42 = vsel %vm5481_vm10, %v10852_v47, %v5431_v59  ;;  %v5578_v60 = vmul.f32 1.442695, %v5533_v57 }
 0xa5f   : > { %v5604_v29 = vsel %vm5540_vm0, %v10821_v50, %v5938_v30  ;;  %v5429_v1 = vpop.permute.xlu0 %5428  ;;  %v5941_v9 = vadd.f32 -1.0, %v7002_v31  ;;  %v5514_v53 = vsel %vm5498_vm11, %v5497_v42, 0.0  ;;  %vm5547_vm6 = vcmp.gt.f32.partialorder %v10885_v18, 0.0 }
 0xa60   : > { %v7004_v22 = vpop.eup %7003  ;;  %v6004_v41 = vpack.c.bf16 %v5605_v46, %v5604_v29  ;;  %v5576_v7 = vmul.f32 1.442695, %v5532_v56  ;;  %v5496_v21 = vsel %vm5481_vm10, %v5479_v28, %v5429_v1  ;;  %7013 = vpow2.f32 %v5578_v60 }
 0xa61   : > { %v5940_v15 = vadd.f32 -1.0, %v7004_v22  ;;  %v5607_v50 = vsel %vm5543_vm1, %v10837_v11, %v5941_v9  ;;  %v5535_v47 = vadd.f32 %v10749_v55, %v5514_v53  ;;  %v5513_v0 = vsel %vm5498_vm11, %v5496_v21, 0.0 }
 0xa62   : > { %6032 = vst [vmem:[%s7794_s16 + $0x10] sm:$0xff] %v6004_v41   ;;  %v7006_v24 = vpop.eup %7005  ;;  %7015 = vpow2.f32 %v5576_v7  ;;  %v5534_v36 = vadd.f32 %v10749_v55, %v5513_v0  ;;  %vm5546_vm7 = vcmp.gt.f32.partialorder %v10888_v27, 0.0  ;;  %vm5549_vm8 = vcmp.gt.f32.partialorder %v5533_v57, 0.0 }
 0xa63   : > { %v5606_v10 = vsel %vm5542_vm3, %v10845_v14, %v5940_v15  ;;  %v5943_v51 = vadd.f32 -1.0, %v7006_v24  ;;  %v5582_v34 = vmul.f32 1.442695, %v5535_v47  ;;  %vm5548_vm9 = vcmp.gt.f32.partialorder %v5532_v56, 0.0 }
 0xa64   : > { %v6009_v13 = vpack.c.bf16 %v5607_v50, %v5606_v10  ;;  %v7008_v11 = vpop.eup %7007  ;;  %v5580_v14 = vmul.f32 1.442695, %v5534_v36  ;;  %vm5551_vm10 = vcmp.gt.f32.partialorder %v5535_v47, 0.0  ;;  %vm5550_vm11 = vcmp.gt.f32.partialorder %v5534_v36, 0.0 }
 0xa65   : > { %v5609_v40 = vsel %vm5545_vm4, %v10860_v63, %v5943_v51  ;;  %v5942_v48 = vadd.f32 -1.0, %v7008_v11  ;;  %7017 = vpow2.f32 %v5582_v34 }
 0xa66   : > { %6033 = vst [vmem:[%s7794_s16 + $0x18] sm:$0xff] %v6009_v13   ;;  %7019 = vpow2.f32 %v5580_v14 }
 0xa67   : > { %v5608_v19 = vsel %vm5544_vm5, %v10872_v39, %v5942_v48  ;;  %v7010_v58 = vpop.eup %7009 }
 0xa68   : > { %v6014_v28 = vpack.c.bf16 %v5609_v40, %v5608_v19  ;;  %v7012_v55 = vpop.eup %7011  ;;  %v5945_v6 = vadd.f32 -1.0, %v7010_v58 }
 0xa69   : > { %v5944_v43 = vadd.f32 -1.0, %v7012_v55 }
 0xa6a   : > { %6034 = vst [vmem:[%s7794_s16 + $0x20] sm:$0xff] %v6014_v28   ;;  %v5611_v37 = vsel %vm5547_vm6, %v10885_v18, %v5945_v6  ;;  %v7014_v63 = vpop.eup %7013 }
 0xa6b   : > { %v5610_v3 = vsel %vm5546_vm7, %v10888_v27, %v5944_v43  ;;  %v5947_v5 = vadd.f32 -1.0, %v7014_v63 }
 0xa6c   : > { %v7016_v33 = vpop.eup %7015  ;;  %v6019_v39 = vpack.c.bf16 %v5611_v37, %v5610_v3 }
 0xa6d   : > { %v5946_v17 = vadd.f32 -1.0, %v7016_v33  ;;  %v5613_v16 = vsel %vm5549_vm8, %v5533_v57, %v5947_v5 }
 0xa6e   : > { %6035 = vst [vmem:[%s7794_s16 + $0x28] sm:$0xff] %v6019_v39  }
 0xa6f   : > { %v7018_v2 = vpop.eup %7017  ;;  %v5612_v45 = vsel %vm5548_vm9, %v5532_v56, %v5946_v17 }
 0xa70   : > { %v7020_v25 = vpop.eup %7019  ;;  %v6024_v61 = vpack.c.bf16 %v5613_v16, %v5612_v45  ;;  %v5949_v23 = vadd.f32 -1.0, %v7018_v2 }
 0xa71   : > { %v5948_v32 = vadd.f32 -1.0, %v7020_v25 }
 0xa72   : > { %6036 = vst [vmem:[%s7794_s16 + $0x30] sm:$0xff] %v6024_v61   ;;  %v5615_v12 = vsel %vm5551_vm10, %v5535_v47, %v5949_v23 }
 0xa73   : > { %v5614_v52 = vsel %vm5550_vm11, %v5534_v36, %v5948_v32 }
 0xa74   : > { %v6029_v18 = vpack.c.bf16 %v5615_v12, %v5614_v52 }
 0xa76   : > { %6037 = vst [vmem:[%s7794_s16 + $0x38] sm:$0xff] %v6029_v18  }
 0xa77 PF: > { %s11772_s14 = sld [smem:[#allocation25_spill]]  ;;  %s11773_s22 = sld [smem:[#allocation200_spill]] }
 0xa78   : > { %s5710_s27 = sshll.u32 %s7794_s16, 4  ;;  %s5697_s3 = scalar_lea.sflag [#allocation8], %s7765_s4  ;;  %s10935_s27 = int_to_ptr.vmem [resolvable:$true] %s5710_s27 }
 0xa79   : > { %s7167_s7 = scalar_lea.vmem %s10935_s27, 1024  ;;  %p11775_p1 = scmp.ne.s32.totalorder %s11273_s10, 0 }
 0xa7a   : > { %p7168_p11 = scmp.ne.s32.totalorder %s10935_s27, %s7167_s7  ;;  %s7353_s12 = smov [#allocation15]  }
 0xa7b   : > { %s7171_s8 = sshll.u32 %s7353_s12, 4  ;;  %s7172_s8 = int_to_ptr.vmem [resolvable:$false] %s7171_s8 }
 0xa7c   : > { %p7169_p7 = pnand %p7168_p11, %p11775_p1  ;;  %s7173_s11 = scalar_lea.vmem %s7172_s8, 2048 }
 0xa7d   : > { %s5990_s24 = sshll.u32 %s11772_s14, 10  ;;  %s11774_s1 = smov %s11773_s22 }
 0xa7e   : > { %s10932_s23 = scalar_lea.hbm %s11773_s22, %s5990_s24  ;;  %p7170_p13 = pneg %p7169_p7 }
 0xa7f   : > { %p7174_p12 = scmp.lt.s32.totalorder %s10935_s27, %s7172_s8  ;;  %p7175_p6 = scmp.lt.s32.totalorder %s7173_s11, %s7167_s7 }
 0xa81   : > { %p7176_p3 = por %p7175_p6, %p7174_p12 }
 0xa83   : > { %p7177_p10 = pnand %p7176_p3, %p7170_p13 }
 0xa85   : > { %7180 = shalt.err (!%p7177_p10)
}
 0xa86   : > { %s7181_s16 = scalar_lea.hbm %s10932_s23, 1024  ;;  %s7185_s13 = scalar_lea.hbm %s11774_s1, 2048 }
 0xa87   : > { %p7182_p2 = scmp.ne.s32.totalorder %s10932_s23, %s7181_s16  ;;  %p7186_p5 = scmp.lt.u32.totalorder %s10932_s23, %s11774_s1 }
 0xa88   : > { %p7187_p8 = scmp.lt.u32.totalorder %s7185_s13, %s7181_s16  ;;  %p7189_p11 = scmp.lt.u32.totalorder %s7181_s16, %s10932_s23 }
 0xa89   : > { %p7183_p0 = pnand %p7182_p2, %p11775_p1 }
 0xa8a   : > { %p7188_p9 = por %p7187_p8, %p7186_p5 }
 0xa8b   : > { %p7184_p4 = pneg %p7183_p0 }
 0xa8c   : > { %p7190_p7 = por %p7189_p11, %p7188_p9 }
 0xa8e   : > { %p7191_p13 = pnand %p7190_p7, %p7184_p4 }
 0xa90   : > { %7194 = shalt.err (!%p7191_p13)
}
 0xa91   : > { %s7354_s9 = smov 64   ;;  %s7355_s14 = smov 4  }
 0xa92   : > { %6417 = dma.vmem_to_hbm [thread:$0]  (%p11775_p1), %s10935_s27, 1024, %s10932_s23, %s5697_s3, %s7354_s9, %s7354_s9, %s7355_s14  }
 0xa93 PF: > { %s11776_s24 = sld [smem:[#allocation23_spill]]  ;;  %s11777_s15 = sld [smem:[#allocation31_spill]] }
 0xa94   : > { %p6445_p12 = scmp.ge.s32.totalorder %s7325_s6, 2 }
 0xa99   : > { %s5725_s21 = sand.u32 1, %s11776_s24   ;;  %p11778_p6 = scmp.ne.s32.totalorder %s11777_s15, 0 }
 0xa9a   : > { %s5726_s22 = scalar_lea.sflag [#allocation8], %s5725_s21 }
 0xa9b   : > { %p6437_p3 = pnand %p6445_p12, %p11778_p6 }
 0xa9d   : > { %7268 = dma.done.wait (!%p6437_p3), %s5726_s22, 1024  }
 0xa9e   : > { %7270 = vsyncadd (!%p6437_p3), %s5726_s22, 4294966272  ;;  %s25_s6 = sadd.s32 1, %s7325_s6   ;;  %s11780_s21 = sld [smem:[#allocation21_spill]] }
 0xa9f   : > { %p10966_p10 = scmp.ge.s32.totalorder %s25_s6, 6   ;;  %s11781_s22 = sld [smem:[#allocation22_spill]] }
 0xaa0   : > { %s11782_s23 = sld [smem:[#allocation29_spill]]  ;;  %s11783_s10 = sld [smem:[#allocation32_spill]] }
 0xaa1   : > { %s11784_s4 = sld [smem:[#allocation27_spill]]  ;;  %s11785_s3 = sld [smem:[#allocation30_spill]] }
 0xaa2   : > { %s11786_s18 = smov %s7277_s19  ;;  %s11787_s19 = smov %s7281_s20 }
 0xaa3   : > { %s11788_s20 = smov %s7714_s17  ;;  %s11789_s24 = smov %s7301_s25 }
 0xaa4   : > { %s11790_s25 = smov %s7305_s26  ;;  %s11792_s27 = smov %s7317_s29 }
 0xaa5   : > { %s11793_s28 = smov %s7321_s30  ;;  %24 = sbr.rel (!%p10966_p10) target bundleno = 19 (0x13), region = 140 }
 0xaa6   : > { %s11791_s26 = smov %s11783_s10 }
 0xaa7   : > { %s11794_s29 = smov %s11784_s4  ;;  %s11795_s30 = smov %s11785_s3 }
 0xaac   :  { %5731 = vsyncpa [#allocation7], 1 }
 0xaad   :  { %5733 = vsyncpa [#allocation7 + $0x1], 1 }
 0xaae   :  { %5734 = vsyncpa [#allocation10], 1 }
 0xaaf   :  { %5736 = vsyncpa [#allocation10 + $0x1], 1 }
 0xab0   :  { %5737 = vsyncpa [#allocation13], 1 }
 0xab1   :  { %5738 = vsyncpa [#allocation8], 1 }
 0xab2   :  { %5740 = vsyncpa [#allocation8 + $0x1], 1 }

</bundles_post_ra>
